<compile_context>
chip_gen: v7x
topology: tpu7x:2x2x1
jax: 0.10.0
libtpu: 0.0.40
codegen_flags: <defaults>
</compile_context>

<pallas_src>
import jax
import jax.numpy as jnp
from jax.experimental import pallas as pl
from jax.experimental.pallas import tpu as pltpu

H_HID = 16  # hidden width of the first Linear (fixed by the PyTorch module)


# --------------------------------------------------------------------------- kernels
def attn_kernel_lane_dense(x_ref, w1t_ref, b1_ref, w2_ref, out_ref):
    # x_ref  : (BB, T, D) bf16      w1t_ref: (16, D) bf16  (first Linear weight, transposed)
    # b1_ref : (16, 1)   f32        w2_ref : (16, 1) f32   (second Linear weight, as a column)
    # out_ref: (BB, T)   f32        -- lane-dense softmax weights
    bb, t, d = x_ref.shape

    # ---- Linear(D -> 16), hidden kept lane-dense as (16, BB*T) --------------------
    # (BB, T, D) -> (BB*T, D) is a leading-dim merge: D stays on lanes, no relayout.
    x2 = x_ref[...].reshape(bb * t, d)
    # One MXU dispatch per tile; both operands contract on their minor (D) axis (the
    # same q @ k^T pattern as flash attention).  The result keeps BB*T on lanes, so
    # the f32 hidden is dense: no 16 -> 128 lane padding and no VMEM spill.
    h = jax.lax.dot_general(
        w1t_ref[...], x2,
        dimension_numbers=(((1,), (1,)), ((), ())),
        preferred_element_type=jnp.float32)                    # (16, BB*T) f32
    h = jnp.maximum(h + b1_ref[...], 0.0)                       # bias + ReLU (VPU)

    # ---- Linear(16 -> 1): weighted reduce over the 16 sublanes --------------------
    # b2 is omitted: softmax over T is shift-invariant, so it cannot change the output.
    scores = jnp.sum(h * w2_ref[...], axis=0)                   # (BB*T,) lane-dense
    scores = scores.reshape(bb, t)                               # tiny relayout (scores only)

    # ---- numerically-stable softmax over T (lane-axis reductions) -----------------
    m = jnp.max(scores, axis=-1, keepdims=True)
    e = jnp.exp(scores - m)
    denom = jnp.sum(e, axis=-1, keepdims=True)
    out_ref[...] = e / denom          # exact divide: HBM-bound kernel, EUP/VPU slack


def attn_kernel_rowmajor_fallback(x_ref, w1_ref, b1_ref, w2_ref, out_ref):
    # Conservative fallback (previously validated layout: hidden as (BB*T, 16)).
    # Only used if the lane-dense kernel above fails to lower on the local toolchain.
    # x_ref: (BB,T,D) bf16, w1_ref: (D,16) bf16, b1_ref: (1,16) f32, w2_ref: (1,16) f32.
    bb, t, d = x_ref.shape
    hidden = w1_ref.shape[1]
    x2 = x_ref[...].reshape(bb * t, d)
    h = jnp.dot(x2, w1_ref[...], preferred_element_type=jnp.float32)   # (BB*T, 16)
    h = jnp.maximum(h + b1_ref[...], 0.0)
    h = h.reshape(bb, t, hidden)
    scores = jnp.sum(h * w2_ref[...], axis=-1)                         # (BB, T)
    m = jnp.max(scores, axis=-1, keepdims=True)
    e = jnp.exp(scores - m)
    denom = jnp.sum(e, axis=-1, keepdims=True)
    out_ref[...] = e / denom


# --------------------------------------------------------------------------- planning
def _round_up(x, m):
    return -(-x // m) * m


def _vmem_budget_bytes():
    """Per-core VMEM capacity (128 MiB v5e/v6e, 64 MiB v7x) with ~25% headroom."""
    cap = None
    try:
        info = pltpu.get_tpu_info()
        for name in ("vmem_capacity_bytes", "vmem_size_bytes", "vmem_bytes"):
            v = getattr(info, name, None)
            if v:
                cap = int(v)
                break
    except Exception:
        cap = None
    if not cap:
        cap = 64 << 20          # conservative default: v7x per-TensorCore VMEM
    cap = max(32 << 20, min(cap, 128 << 20))
    return (cap * 3) // 4        # leave headroom for compiler-internal scratch


def _plan_batch_tiling(B, T, D, vmem_budget):
    """Pick (block_b, padded_B) so that:
       * block_b is a multiple of 8 (sublane-clean output block),
       * the *padded* VMEM footprint fits the budget (the x block pads D -> 128
         lanes, so it can be 4x its real bytes; the f32 hidden is counted too),
       * real x bytes per block stay <= ~8 MiB (plenty to amortize ~0.35 us/step),
       * there are >= 2 grid steps whenever B >= 16 (v7x megacore sharding),
       * batch padding is balanced across steps (no near-empty tail tile)."""
    rT_bf16 = _round_up(T, 16)      # bf16 sublane tile
    rD_lane = _round_up(D, 128)     # lane padding of the x block
    rT_lane = _round_up(T, 128)     # lane padding of the f32 output block

    def vmem_cost(bb):
        x_buf = bb * rT_bf16 * rD_lane * 2            # one padded bf16 x buffer
        out_buf = _round_up(bb, 8) * rT_lane * 4      # one padded f32 out buffer
        h_live = H_HID * bb * T * 4                   # lane-dense f32 hidden
        return 3 * x_buf + 2 * out_buf + 2 * h_live + (1 << 20)   # weights + slack

    B8 = _round_up(max(B, 1), 8)
    bb_max = max(8, ((8 << 20) // max(1, T * D * 2)) // 8 * 8)   # ~8 MiB real bytes
    bb_max = min(bb_max, B8)
    if B8 >= 16:                                      # guarantee >= 2 steps (v7x 2 TCs)
        bb_max = min(bb_max, max(8, (B8 // 2) // 8 * 8))
    while bb_max > 8 and vmem_cost(bb_max) > vmem_budget:
        bb_max -= 8
    num_steps = max(1, -(-B8 // bb_max))
    block_b = _round_up(-(-B8 // num_steps), 8)       # balanced tiles
    return block_b, block_b * num_steps


# --------------------------------------------------------------------------- wrapper
def attn_forward(x, w1, b1, w2, b2=None, *, block_b=None, use_bf16=True):
    """x: (B, T, 2h) -> (B, T, 1) softmax-over-T attention weights.

    w1: (2h, 16), b1: (16,), w2: (16, 1), b2: (1,).
    b2 is mathematically a no-op under the softmax and is not used by the kernel.
    """
    B, T, D = x.shape
    H = w1.shape[1]
    assert H == H_HID, "the PyTorch module fixes the hidden width at 16"

    vmem_budget = _vmem_budget_bytes()
    if block_b is None:
        block_b, Bp = _plan_batch_tiling(B, T, D, vmem_budget)
    else:
        Bp = _round_up(B, block_b)

    in_dtype = jnp.bfloat16 if use_bf16 else x.dtype
    xk = x.astype(in_dtype)
    if Bp != B:
        # zero-pad batch rows: padded rows produce a harmless uniform softmax and
        # are sliced off below.
        xk = jnp.pad(xk, ((0, Bp - B), (0, 0), (0, 0)))

    b1f = b1.astype(jnp.float32)
    w2f = w2.astype(jnp.float32)

    grid = (Bp // block_b,)
    flops = 2 * Bp * T * D * H + 4 * Bp * T * H + 5 * Bp * T
    bytes_accessed = (Bp * T * D * jnp.dtype(in_dtype).itemsize
                      + D * H * jnp.dtype(in_dtype).itemsize
                      + 2 * H * 4 + Bp * T * 4)

    def run(lane_dense, buffered):
        if lane_dense:
            kern = attn_kernel_lane_dense
            wspecs = [pl.BlockSpec((H, D), lambda i: (0, 0)),   # w1^T: resident
                      pl.BlockSpec((H, 1), lambda i: (0, 0)),   # b1 column
                      pl.BlockSpec((H, 1), lambda i: (0, 0))]   # w2 column
            wops = (w1.T.astype(in_dtype), b1f.reshape(H, 1), w2f.reshape(H, 1))
        else:
            kern = attn_kernel_rowmajor_fallback
            wspecs = [pl.BlockSpec((D, H), lambda i: (0, 0)),
                      pl.BlockSpec((1, H), lambda i: (0, 0)),
                      pl.BlockSpec((1, H), lambda i: (0, 0))]
            wops = (w1.astype(in_dtype), b1f.reshape(1, H), w2f.reshape(1, H))

        x_kwargs = {"pipeline_mode": pl.Buffered(3)} if buffered else {}
        x_spec = pl.BlockSpec((block_b, T, D), lambda i: (i, 0, 0), **x_kwargs)

        out = pl.pallas_call(
            kern,
            out_shape=jax.ShapeDtypeStruct((Bp, T), jnp.float32),
            grid=grid,
            in_specs=[x_spec] + wspecs,
            out_specs=pl.BlockSpec((block_b, T), lambda i: (i, 0)),  # lane-dense output
            compiler_params=pltpu.CompilerParams(
                dimension_semantics=("parallel",),          # megacore sharding on v7x
                vmem_limit_bytes=int(vmem_budget),          # explicit, per-generation
            ),
            cost_estimate=pl.CostEstimate(
                flops=flops, transcendentals=Bp * T, bytes_accessed=bytes_accessed),
        )(xk, *wops)
        return jax.block_until_ready(out)

    # Preferred config first; fall back if an optional feature (triple buffering) or
    # the lane-dense lowering is unavailable on the local toolchain.
    last_err = None
    out2d = None
    for lane_dense, buffered in ((True, True), (True, False), (False, False)):
        try:
            out2d = run(lane_dense, buffered)
            break
        except Exception as err:   # noqa: BLE001 - try the next, more conservative config
            last_err = err
    if out2d is None:
        raise last_err

    return out2d[:B, :, None]      # free unsqueeze to (B, T, 1) outside the kernel


# --------------------------------------------------------------------------- reference
def init_params(key, h_dim):
    """Parameter shapes matching the PyTorch module (weights stored as (in, out))."""
    d_in = 2 * h_dim
    k1, k2, k3, k4 = jax.random.split(key, 4)
    bound1 = 1.0 / (d_in ** 0.5)
    w1 = jax.random.uniform(k1, (d_in, 16), jnp.float32, -bound1, bound1)
    b1 = jax.random.uniform(k2, (16,), jnp.float32, -bound1, bound1)
    bound2 = 1.0 / (16 ** 0.5)
    w2 = jax.random.uniform(k3, (16, 1), jnp.float32, -bound2, bound2)
    b2 = jax.random.uniform(k4, (1,), jnp.float32, -bound2, bound2)
    return w1, b1, w2, b2


def attn_reference(x, w1, b1, w2, b2):
    """Pure-JAX f32 reference of the PyTorch forward (includes b2)."""
    B, T, D = x.shape
    h = jnp.maximum(x.reshape(B * T, D) @ w1 + b1, 0.0)
    scores = (h @ w2 + b2).reshape(B, T)
    return jax.nn.softmax(scores, axis=1)[..., None]


if __name__ == "__main__":
    h_dim = 16            # module arg -> feature dim D = 2*h_dim = 32
    B, T = 16, 128        # small shapes; still exercises a 2-step "parallel" grid
    D = 2 * h_dim

    key = jax.random.PRNGKey(0)
    kx, kp = jax.random.split(key)
    x = jax.random.normal(kx, (B, T, D), jnp.float32)
    w1, b1, w2, b2 = init_params(kp, h_dim)

    out = attn_forward(x, w1, b1, w2, b2)
    out = jax.block_until_ready(out)

    ref = attn_reference(x, w1, b1, w2, b2)
    assert out.shape == (B, T, 1)
    # bf16 input/weight reads -> relaxed tolerance vs. the f32 reference.
    assert jnp.allclose(out, ref, atol=1e-2, rtol=5e-2)
    # softmax rows must sum to ~1 (exact divide -> tight tolerance)
    assert jnp.allclose(jnp.sum(out[..., 0], axis=1), 1.0, atol=1e-3)

    print("KERNEL_OK")
</pallas_src>

<mosaic_0001>
module attributes {stable_mosaic.version = 11 : i64} {
  func.func @attn_kernel_lane_dense(%arg0: i32, %arg1: memref<8x128x32xbf16, #tpu.memory_space<vmem>>, %arg2: memref<16x32xbf16, #tpu.memory_space<vmem>>, %arg3: memref<16x1xf32, #tpu.memory_space<vmem>>, %arg4: memref<16x1xf32, #tpu.memory_space<vmem>>, %arg5: memref<8x128xf32, #tpu.memory_space<vmem>>) attributes {dimension_semantics = [#tpu.dimension_semantics<parallel>], iteration_bounds = array<i64: 2>, scalar_prefetch = 0 : i64, scratch_operands = 0 : i64, tpu.core_type = #tpu.core_type<tc>, window_params = [{transform_indices = @transform_0, window_bounds = array<i64: 8, 128, 32>}, {pipeline_mode = #tpu.pipeline_mode<synchronous>, transform_indices = @transform_1, window_bounds = array<i64: 16, 32>}, {pipeline_mode = #tpu.pipeline_mode<synchronous>, transform_indices = @transform_2, window_bounds = array<i64: 16, 1>}, {pipeline_mode = #tpu.pipeline_mode<synchronous>, transform_indices = @transform_3, window_bounds = array<i64: 16, 1>}, {transform_indices = @transform_4, window_bounds = array<i64: 8, 128>}]} {
    %c0 = arith.constant 0 : index
    %c0_0 = arith.constant 0 : index
    %c0_1 = arith.constant 0 : index
    %0 = vector.load %arg1[%c0, %c0_0, %c0_1] : memref<8x128x32xbf16, #tpu.memory_space<vmem>>, vector<8x128x32xbf16>
    %1 = vector.shape_cast %0 : vector<8x128x32xbf16> to vector<1024x32xbf16>
    %c0_2 = arith.constant 0 : index
    %c0_3 = arith.constant 0 : index
    %2 = vector.load %arg2[%c0_2, %c0_3] : memref<16x32xbf16, #tpu.memory_space<vmem>>, vector<16x32xbf16>
    %cst = arith.constant dense<0.000000e+00> : vector<16x1024xf32>
    %3 = tpu.matmul %2, %1, %cst {dimension_numbers = #tpu.dot_dimension_numbers<[1], [1], [0], [0], [0, 0, 1, 0], [], []>} : vector<16x32xbf16>, vector<1024x32xbf16>, vector<16x1024xf32> -> vector<16x1024xf32>
    %c0_4 = arith.constant 0 : index
    %c0_5 = arith.constant 0 : index
    %4 = vector.load %arg3[%c0_4, %c0_5] : memref<16x1xf32, #tpu.memory_space<vmem>>, vector<16x1xf32>
    %5 = vector.broadcast %4 : vector<16x1xf32> to vector<16x1024xf32>
    %6 = arith.addf %3, %5 : vector<16x1024xf32>
    %cst_6 = arith.constant 0.000000e+00 : f32
    %7 = vector.broadcast %cst_6 : f32 to vector<16x1024xf32>
    %8 = arith.maximumf %6, %7 : vector<16x1024xf32>
    %c0_7 = arith.constant 0 : index
    %c0_8 = arith.constant 0 : index
    %9 = vector.load %arg4[%c0_7, %c0_8] : memref<16x1xf32, #tpu.memory_space<vmem>>, vector<16x1xf32>
    %10 = vector.broadcast %9 : vector<16x1xf32> to vector<16x1024xf32>
    %11 = arith.mulf %8, %10 : vector<16x1024xf32>
    %cst_9 = arith.constant dense<0.000000e+00> : vector<1024xf32>
    %12 = vector.multi_reduction <add>, %11, %cst_9 [0] : vector<16x1024xf32> to vector<1024xf32>
    %13 = vector.shape_cast %12 : vector<1024xf32> to vector<8x128xf32>
    %cst_10 = arith.constant dense<0xFF800000> : vector<8xf32>
    %14 = vector.multi_reduction <maximumf>, %13, %cst_10 [1] : vector<8x128xf32> to vector<8xf32>
    %15 = vector.shape_cast %14 : vector<8xf32> to vector<8x1xf32>
    %16 = vector.broadcast %15 : vector<8x1xf32> to vector<8x128xf32>
    %17 = arith.subf %13, %16 : vector<8x128xf32>
    %18 = math.exp %17 : vector<8x128xf32>
    %cst_11 = arith.constant dense<0.000000e+00> : vector<8xf32>
    %19 = vector.multi_reduction <add>, %18, %cst_11 [1] : vector<8x128xf32> to vector<8xf32>
    %20 = vector.shape_cast %19 : vector<8xf32> to vector<8x1xf32>
    %21 = vector.broadcast %20 : vector<8x1xf32> to vector<8x128xf32>
    %22 = arith.divf %18, %21 : vector<8x128xf32>
    %c0_12 = arith.constant 0 : index
    %c0_13 = arith.constant 0 : index
    %23 = vector.load %arg5[%c0_12, %c0_13] : memref<8x128xf32, #tpu.memory_space<vmem>>, vector<8x128xf32>
    tpu.vector_store %arg5[%c0_12, %c0_13], %22 {strides = array<i32>} : memref<8x128xf32, #tpu.memory_space<vmem>>, vector<8x128xf32>,
    return
  }
  func.func @transform_0(%arg0: i32) -> (i32, i32, i32) {
    %c0_i32 = arith.constant 0 : i32
    %c0_i32_0 = arith.constant 0 : i32
    %c0_i32_1 = arith.constant 0 : i32
    return %arg0, %c0_i32, %c0_i32_0 : i32, i32, i32
  }
  func.func @transform_1(%arg0: i32) -> (i32, i32) {
    %c0_i32 = arith.constant 0 : i32
    %c0_i32_0 = arith.constant 0 : i32
    %c0_i32_1 = arith.constant 0 : i32
    return %c0_i32, %c0_i32_0 : i32, i32
  }
  func.func @transform_2(%arg0: i32) -> (i32, i32) {
    %c0_i32 = arith.constant 0 : i32
    %c0_i32_0 = arith.constant 0 : i32
    %c0_i32_1 = arith.constant 0 : i32
    return %c0_i32, %c0_i32_0 : i32, i32
  }
  func.func @transform_3(%arg0: i32) -> (i32, i32) {
    %c0_i32 = arith.constant 0 : i32
    %c0_i32_0 = arith.constant 0 : i32
    %c0_i32_1 = arith.constant 0 : i32
    return %c0_i32, %c0_i32_0 : i32, i32
  }
  func.func @transform_4(%arg0: i32) -> (i32, i32) {
    %c0_i32 = arith.constant 0 : i32
    %c0_i32_0 = arith.constant 0 : i32
    return %arg0, %c0_i32 : i32, i32
  }
}

module attributes {stable_mosaic.version = 11 : i64} {
  func.func @attn_kernel_rowmajor_fallback(%arg0: i32, %arg1: memref<8x128x32xbf16, #tpu.memory_space<vmem>>, %arg2: memref<32x16xbf16, #tpu.memory_space<vmem>>, %arg3: memref<1x16xf32, #tpu.memory_space<vmem>>, %arg4: memref<1x16xf32, #tpu.memory_space<vmem>>, %arg5: memref<8x128xf32, #tpu.memory_space<vmem>>) attributes {dimension_semantics = [#tpu.dimension_semantics<parallel>], iteration_bounds = array<i64: 2>, scalar_prefetch = 0 : i64, scratch_operands = 0 : i64, tpu.core_type = #tpu.core_type<tc>, window_params = [{transform_indices = @transform_0, window_bounds = array<i64: 8, 128, 32>}, {pipeline_mode = #tpu.pipeline_mode<synchronous>, transform_indices = @transform_1, window_bounds = array<i64: 32, 16>}, {pipeline_mode = #tpu.pipeline_mode<synchronous>, transform_indices = @transform_2, window_bounds = array<i64: 1, 16>}, {pipeline_mode = #tpu.pipeline_mode<synchronous>, transform_indices = @transform_3, window_bounds = array<i64: 1, 16>}, {transform_indices = @transform_4, window_bounds = array<i64: 8, 128>}]} {
    %c0 = arith.constant 0 : index
    %c0_0 = arith.constant 0 : index
    %c0_1 = arith.constant 0 : index
    %0 = vector.load %arg1[%c0, %c0_0, %c0_1] : memref<8x128x32xbf16, #tpu.memory_space<vmem>>, vector<8x128x32xbf16>
    %1 = vector.shape_cast %0 : vector<8x128x32xbf16> to vector<1024x32xbf16>
    %c0_2 = arith.constant 0 : index
    %c0_3 = arith.constant 0 : index
    %2 = vector.load %arg2[%c0_2, %c0_3] : memref<32x16xbf16, #tpu.memory_space<vmem>>, vector<32x16xbf16>
    %cst = arith.constant dense<0.000000e+00> : vector<1024x16xf32>
    %3 = tpu.matmul %1, %2, %cst {dimension_numbers = #tpu.dot_dimension_numbers<[1], [0], [0], [1], [0, 0, 1, 1], [], []>} : vector<1024x32xbf16>, vector<32x16xbf16>, vector<1024x16xf32> -> vector<1024x16xf32>
    %c0_4 = arith.constant 0 : index
    %c0_5 = arith.constant 0 : index
    %4 = vector.load %arg3[%c0_4, %c0_5] : memref<1x16xf32, #tpu.memory_space<vmem>>, vector<1x16xf32>
    %5 = vector.broadcast %4 : vector<1x16xf32> to vector<1024x16xf32>
    %6 = arith.addf %3, %5 : vector<1024x16xf32>
    %cst_6 = arith.constant 0.000000e+00 : f32
    %7 = vector.broadcast %cst_6 : f32 to vector<1024x16xf32>
    %8 = arith.maximumf %6, %7 : vector<1024x16xf32>
    %9 = vector.shape_cast %8 : vector<1024x16xf32> to vector<8x128x16xf32>
    %c0_7 = arith.constant 0 : index
    %c0_8 = arith.constant 0 : index
    %10 = vector.load %arg4[%c0_7, %c0_8] : memref<1x16xf32, #tpu.memory_space<vmem>>, vector<1x16xf32>
    %11 = vector.shape_cast %10 : vector<1x16xf32> to vector<1x1x16xf32>
    %12 = vector.broadcast %11 : vector<1x1x16xf32> to vector<8x128x16xf32>
    %13 = arith.mulf %9, %12 : vector<8x128x16xf32>
    %cst_9 = arith.constant dense<0.000000e+00> : vector<8x128xf32>
    %14 = vector.multi_reduction <add>, %13, %cst_9 [2] : vector<8x128x16xf32> to vector<8x128xf32>
    %cst_10 = arith.constant dense<0xFF800000> : vector<8xf32>
    %15 = vector.multi_reduction <maximumf>, %14, %cst_10 [1] : vector<8x128xf32> to vector<8xf32>
    %16 = vector.shape_cast %15 : vector<8xf32> to vector<8x1xf32>
    %17 = vector.broadcast %16 : vector<8x1xf32> to vector<8x128xf32>
    %18 = arith.subf %14, %17 : vector<8x128xf32>
    %19 = math.exp %18 : vector<8x128xf32>
    %cst_11 = arith.constant dense<0.000000e+00> : vector<8xf32>
    %20 = vector.multi_reduction <add>, %19, %cst_11 [1] : vector<8x128xf32> to vector<8xf32>
    %21 = vector.shape_cast %20 : vector<8xf32> to vector<8x1xf32>
    %22 = vector.broadcast %21 : vector<8x1xf32> to vector<8x128xf32>
    %23 = arith.divf %19, %22 : vector<8x128xf32>
    %c0_12 = arith.constant 0 : index
    %c0_13 = arith.constant 0 : index
    %24 = vector.load %arg5[%c0_12, %c0_13] : memref<8x128xf32, #tpu.memory_space<vmem>>, vector<8x128xf32>
    tpu.vector_store %arg5[%c0_12, %c0_13], %23 {strides = array<i32>} : memref<8x128xf32, #tpu.memory_space<vmem>>, vector<8x128xf32>,
    return
  }
  func.func @transform_0(%arg0: i32) -> (i32, i32, i32) {
    %c0_i32 = arith.constant 0 : i32
    %c0_i32_0 = arith.constant 0 : i32
    %c0_i32_1 = arith.constant 0 : i32
    return %arg0, %c0_i32, %c0_i32_0 : i32, i32, i32
  }
  func.func @transform_1(%arg0: i32) -> (i32, i32) {
    %c0_i32 = arith.constant 0 : i32
    %c0_i32_0 = arith.constant 0 : i32
    %c0_i32_1 = arith.constant 0 : i32
    return %c0_i32, %c0_i32_0 : i32, i32
  }
  func.func @transform_2(%arg0: i32) -> (i32, i32) {
    %c0_i32 = arith.constant 0 : i32
    %c0_i32_0 = arith.constant 0 : i32
    %c0_i32_1 = arith.constant 0 : i32
    return %c0_i32, %c0_i32_0 : i32, i32
  }
  func.func @transform_3(%arg0: i32) -> (i32, i32) {
    %c0_i32 = arith.constant 0 : i32
    %c0_i32_0 = arith.constant 0 : i32
    %c0_i32_1 = arith.constant 0 : i32
    return %c0_i32, %c0_i32_0 : i32, i32
  }
  func.func @transform_4(%arg0: i32) -> (i32, i32) {
    %c0_i32 = arith.constant 0 : i32
    %c0_i32_0 = arith.constant 0 : i32
    return %arg0, %c0_i32 : i32, i32
  }
}

</mosaic_0001>

<bundles_post_ra>
// kernel: tpu_custom_call.1
= control target key start
LH: loop header
LB: loop body
LE: loop exit
PB: predicated region body
PF: predicated region fallthrough
CT: control target
= control target key end

     0   :  { %9 = vsyncpa [#allocation3], 0  ;;  %s1987_s0 = inlined_call_operand.vmem [shape: bf16[16,128,32], index: 0, kind: input, shape index: {}]   ;;  %s1988_s1 = inlined_call_operand.vmem [shape: bf16[16,32], index: 1, kind: input, shape index: {}]   ;;  %s1989_s2 = inlined_call_operand.vmem [shape: f32[16,1], index: 2, kind: input, shape index: {}]   ;;  %s1990_s3 = inlined_call_operand.vmem [shape: f32[16,1], index: 3, kind: input, shape index: {}]   ;;  %s1991_s4 = inlined_call_operand.hbm [shape: f32[16,128], index: 4, kind: output, shape index: {}]  }
   0x1   :  { %11 = vsyncpa [#allocation3 + $0x1], 0  ;;  %s1668_s15 = smov 0   ;;  %s1670_s16 = smov 0  }
   0x2   :  { %s1672_s17 = smov 0   ;;  %s1674_s18 = smov 0  }
   0x3 LB: > { %s1689_s19 = sadd.s32 4294967295, %s1638_s18   ;;  %s1278_s20 = sadd.s32 4294967294, %s1638_s18   ;;  %s1638_s18 = sphi %s1674_s18, %s1997_s18   ;;  %s1634_s17 = sphi %s1672_s17, %s1996_s17   ;;  %s1630_s16 = sphi %s1670_s16, %s1995_s16   ;;  %s1626_s15 = sphi %s1668_s15, %s1994_s15  }
   0x4   : > { %s1693_s21 = sadd.s32 1, %s1638_s18   ;;  %s113_s22 = sadd.s32 1, %s1634_s17 }
   0x5   : > { %s110_s23 = ssub.s32 %s1638_s18, %s1693_s21  ;;  %p123_p0 = scmp.ne.s32.totalorder %s1634_s17, %s1630_s16 }
   0x6   : > { %p111_p1 = scmp.eq.s32.totalorder %s110_s23, 0  ;;  %p124_p2 = scmp.eq.s32.totalorder %s1689_s19, 1 }
   0x7   : > { %p129_p3 = scmp.ne.s32.totalorder %s1630_s16, %s1626_s15  ;;  %p130_p4 = scmp.eq.s32.totalorder %s1278_s20, 1 }
   0x8   : > { %s1704_s24 = scalar_select %p111_p1, %s1634_s17, %s113_s22  }
   0x9   : > { %p1706_p5 = por %p124_p2, %p123_p0  ;;  %p1710_p6 = por %p130_p4, %p129_p3 }
   0xa   : > { %p1281_p7 = scmp.ge.s32.totalorder %s1638_s18, 1  ;;  %p167_p8 = scmp.lt.s32.totalorder %s1638_s18, 3 }
   0xc   : > { %p168_p9 = pnand %p1281_p7, %p167_p8 }
   0xd   : > { %s1283_s27 = sshll.u32 (!%p168_p9), %s1689_s19, 3  ;;  %v1720_v0 = vld [vmem:[%s1988_s1] sm:$0xff] (!%p168_p9)   ;;  %vm669_vm0 = vcmask (!%p168_p9), 261120   ;;  %v1640_v11 = vmov (!%p168_p9), 0   ;;  %v333_v60 = vld [vmem:[%s1989_s2 + $0x8] sm:$0xff] (!%p168_p9)  ;;  %s191_s22 = sand.u32 (!%p168_p9), 1, %s1630_s16  }
   0xe   : > { %171 = sbr.rel (%p168_p9) target bundleno = 727 (0x2d7), region = 36  ;;  %p195_p10 = scmp.lt.s32.totalorder (!%p168_p9), %s1283_s27, 15  ;;  %1376 = vmatprep.mubr.msk.bf16.mxu0 (!%p168_p9), %vm669_vm0, %v1720_v0  ;;  %1394 = vmatprep.mubr.msk.bf16.mxu1 (!%p168_p9), %vm669_vm0, %v1720_v0  ;;  %v332_v54 = vld [vmem:[%s1989_s2] sm:$0xff] (!%p168_p9)  ;;  %v1054_v62 = vld [vmem:[%s1990_s3 + $0x8] sm:$0xff] (!%p168_p9) }
   0xf   : > { %1505 = vset.pattern.permute.xlu0 (!%p168_p9), %v1640_v11  ;;  %1506 = vset.pattern.permute.xlu1 (!%p168_p9), %v1640_v11  ;;  %v1053_v55 = vld [vmem:[%s1990_s3] sm:$0xff] (!%p168_p9)  ;;  %s1282_s23 = sshll.u32 (!%p168_p9), %s191_s22, 3 }
  0x10   : > { %336 = vperm.xlu0 (!%p168_p9), %1505, %v332_v54   ;;  %1057 = vperm.xlu1 (!%p168_p9), %1506, %v1053_v55   ;;  %s193_s28 = scalar_lea.vmem (!%p168_p9), [#allocation2], %s1282_s23 }
  0x11   : > { %s1219_s29 = sshll.u32 (!%p168_p9), %s193_s28, 4  ;;  %s1947_s29 = int_to_ptr.vmem [resolvable:$true] %s1219_s29 }
  0x12   : > { %s1576_s8 = scalar_lea.vmem (!%p168_p9), %s1947_s29, 128 }
  0x13   : > { %p1577_p11 = scmp.ne.s32.totalorder (!%p168_p9), %s1947_s29, %s1576_s8 }
  0x14   : > { %341 = vperm.xlu0 (!%p168_p9), %1505, %v333_v60   ;;  %1062 = vperm.xlu1 (!%p168_p9), %1506, %v1054_v62  }
  0x15   : > { %s1999_s27 = smov (!%p195_p10, %s1283_s27), 15  ;;  %p1578_p12 = pnand %p1577_p11, %p1706_p5 }
  0x16   : > { %s1359_s30 = sshll.u32 %s1999_s27, 6  ;;  %s1356_s27 = sshll.u32 %s1689_s19, 7 }
  0x17   : > { %s1729_s7 = scalar_lea.vmem %s1987_s0, %s1359_s30  ;;  %s1945_s6 = scalar_lea.hbm %s1991_s4, %s1356_s27 }
  0x18   : > { %v1507_v1 = vld [vmem:[%s1729_s7 + $0x40] sm:$0xff]   ;;  %v1511_v6 = vld [vmem:[%s1729_s7 + $0x48] sm:$0xff]   ;;  %v1515_v13 = vld [vmem:[%s1729_s7 + $0x50] sm:$0xff]   ;;  %p1579_p13 = pneg %p1578_p12  ;;  %s1642_s19 = smov [#allocation2]  }
  0x19   : > { %v1508_v2 = vld [vmem:[%s1729_s7 + $0xc0] sm:$0xff]   ;;  %1432 = vmatprep.subr.msk.bf16.mxu0 %vm669_vm0, %v1507_v1  ;;  %v1512_v8 = vld [vmem:[%s1729_s7 + $0xc8] sm:$0xff]   ;;  %v1516_v15 = vld [vmem:[%s1729_s7 + $0xd0] sm:$0xff]   ;;  %s1580_s9 = sshll.u32 %s1642_s19, 4  ;;  %s1581_s9 = int_to_ptr.vmem [resolvable:$false] %s1580_s9 }
  0x1a   : > { %v1509_v3 = vld [vmem:[%s1729_s7] sm:$0xff]   ;;  %1440 = vmatprep.subr.msk.bf16.mxu1 %vm669_vm0, %v1508_v2  ;;  %v1513_v9 = vld [vmem:[%s1729_s7 + $0x8] sm:$0xff]   ;;  %v1517_v16 = vld [vmem:[%s1729_s7 + $0x10] sm:$0xff]   ;;  %s1582_s10 = scalar_lea.vmem %s1581_s9, 256  ;;  %p1583_p0 = scmp.lt.s32.totalorder %s1947_s29, %s1581_s9 }
  0x1b   : > { %v1510_v4 = vld [vmem:[%s1729_s7 + $0x80] sm:$0xff]   ;;  %v674_v5 = vsel %vm669_vm0, %v1509_v3, 0  ;;  %v1514_v10 = vld [vmem:[%s1729_s7 + $0x88] sm:$0xff]   ;;  %v677_v12 = vsel %vm669_vm0, %v1513_v9, 0  ;;  %v1518_v17 = vld [vmem:[%s1729_s7 + $0x90] sm:$0xff]   ;;  %v680_v18 = vsel %vm669_vm0, %v1517_v16, 0  ;;  %p1584_p1 = scmp.lt.s32.totalorder %s1582_s10, %s1576_s8 }
  0x1c   : > { %1361 = vmatpush3.bf16.xpose.msra.mxu0 %v674_v5  ;;  %v722_v7 = vsel %vm669_vm0, %v1510_v4, 0  ;;  %v725_v14 = vsel %vm669_vm0, %v1514_v10, 0  ;;  %v1519_v19 = vld [vmem:[%s1729_s7 + $0x58] sm:$0xff]   ;;  %v728_v20 = vsel %vm669_vm0, %v1518_v17, 0  ;;  %v1523_v25 = vld [vmem:[%s1729_s7 + $0x60] sm:$0xff]   ;;  %v1527_v31 = vld [vmem:[%s1729_s7 + $0x68] sm:$0xff]  }
  0x1d   : > { %1379 = vmatpush3.bf16.xpose.msra.mxu1 %v722_v7  ;;  %1433 = vmatprep.subr.msk.bf16.mxu0 %vm669_vm0, %v1511_v6  ;;  %v1520_v21 = vld [vmem:[%s1729_s7 + $0xd8] sm:$0xff]   ;;  %v1524_v27 = vld [vmem:[%s1729_s7 + $0xe0] sm:$0xff]   ;;  %v1528_v33 = vld [vmem:[%s1729_s7 + $0xe8] sm:$0xff]   ;;  %p1585_p2 = por %p1584_p1, %p1583_p0 }
  0x1e   : > { %1441 = vmatprep.subr.msk.bf16.mxu1 %vm669_vm0, %v1512_v8  ;;  %v1521_v22 = vld [vmem:[%s1729_s7 + $0x18] sm:$0xff]   ;;  %v1525_v28 = vld [vmem:[%s1729_s7 + $0x20] sm:$0xff]   ;;  %v1529_v34 = vld [vmem:[%s1729_s7 + $0x28] sm:$0xff]  }
  0x1f   : > { %v1522_v23 = vld [vmem:[%s1729_s7 + $0x98] sm:$0xff]   ;;  %v683_v24 = vsel %vm669_vm0, %v1521_v22, 0  ;;  %v1526_v29 = vld [vmem:[%s1729_s7 + $0xa0] sm:$0xff]   ;;  %v686_v30 = vsel %vm669_vm0, %v1525_v28, 0  ;;  %v1530_v35 = vld [vmem:[%s1729_s7 + $0xa8] sm:$0xff]   ;;  %v689_v36 = vsel %vm669_vm0, %v1529_v34, 0  ;;  %p1586_p3 = pnand %p1585_p2, %p1579_p13 }
  0x20   : > { %v731_v26 = vsel %vm669_vm0, %v1522_v23, 0  ;;  %v734_v32 = vsel %vm669_vm0, %v1526_v29, 0  ;;  %v1531_v37 = vld [vmem:[%s1729_s7 + $0x70] sm:$0xff]   ;;  %v737_v38 = vsel %vm669_vm0, %v1530_v35, 0  ;;  %v1535_v43 = vld [vmem:[%s1729_s7 + $0x78] sm:$0xff]   ;;  %v1540_v49 = vld [vmem:[%s1729_s7 + $0x140] sm:$0xff]  }
  0x21   : > { %v1532_v39 = vld [vmem:[%s1729_s7 + $0xf0] sm:$0xff]   ;;  %v1536_v45 = vld [vmem:[%s1729_s7 + $0xf8] sm:$0xff]   ;;  %v1541_v51 = vld [vmem:[%s1729_s7 + $0x1c0] sm:$0xff]  }
  0x22   : > { %v1533_v40 = vld [vmem:[%s1729_s7 + $0x30] sm:$0xff]   ;;  %v1537_v46 = vld [vmem:[%s1729_s7 + $0x38] sm:$0xff]   ;;  %v1542_v52 = vld [vmem:[%s1729_s7 + $0x100] sm:$0xff]  }
  0x23   : > { %v1534_v41 = vld [vmem:[%s1729_s7 + $0xb0] sm:$0xff]   ;;  %v692_v42 = vsel %vm669_vm0, %v1533_v40, 0  ;;  %v1538_v47 = vld [vmem:[%s1729_s7 + $0xb8] sm:$0xff]   ;;  %v695_v48 = vsel %vm669_vm0, %v1537_v46, 0  ;;  %v1543_v53 = vld [vmem:[%s1729_s7 + $0x180] sm:$0xff]   ;;  %v770_v56 = vsel %vm669_vm0, %v1542_v52, 0 }
  0x24   : > { %1363 = vmatpush3.bf16.xpose.msra.mxu0 %v677_v12  ;;  %v740_v44 = vsel %vm669_vm0, %v1534_v41, 0  ;;  %v743_v50 = vsel %vm669_vm0, %v1538_v47, 0  ;;  %v1544_v57 = vld [vmem:[%s1729_s7 + $0x148] sm:$0xff]   ;;  %v818_v58 = vsel %vm669_vm0, %v1543_v53, 0  ;;  %v1548_v2 = vld [vmem:[%s1729_s7 + $0x150] sm:$0xff]   ;;  %v1552_v8 = vld [vmem:[%s1729_s7 + $0x158] sm:$0xff]  }
  0x25   : > { %1381 = vmatpush3.bf16.xpose.msra.mxu1 %v725_v14  ;;  %1434 = vmatprep.subr.msk.bf16.mxu0 %vm669_vm0, %v1515_v13  ;;  %v1545_v59 = vld [vmem:[%s1729_s7 + $0x1c8] sm:$0xff]   ;;  %v1549_v4 = vld [vmem:[%s1729_s7 + $0x1d0] sm:$0xff]   ;;  %v1553_v10 = vld [vmem:[%s1729_s7 + $0x1d8] sm:$0xff]  }
  0x26   : > { %1442 = vmatprep.subr.msk.bf16.mxu1 %vm669_vm0, %v1516_v15  ;;  %v1546_v61 = vld [vmem:[%s1729_s7 + $0x108] sm:$0xff]   ;;  %v1550_v5 = vld [vmem:[%s1729_s7 + $0x110] sm:$0xff]   ;;  %v1554_v11 = vld [vmem:[%s1729_s7 + $0x118] sm:$0xff]  }
  0x27   : > { %v1547_v63 = vld [vmem:[%s1729_s7 + $0x188] sm:$0xff]   ;;  %v773_v1 = vsel %vm669_vm0, %v1546_v61, 0  ;;  %v1551_v6 = vld [vmem:[%s1729_s7 + $0x190] sm:$0xff]   ;;  %v776_v7 = vsel %vm669_vm0, %v1550_v5, 0  ;;  %v1555_v12 = vld [vmem:[%s1729_s7 + $0x198] sm:$0xff]   ;;  %v779_v13 = vsel %vm669_vm0, %v1554_v11, 0 }
  0x28   : > { %v821_v3 = vsel %vm669_vm0, %v1547_v63, 0  ;;  %v824_v9 = vsel %vm669_vm0, %v1551_v6, 0  ;;  %v1556_v14 = vld [vmem:[%s1729_s7 + $0x160] sm:$0xff]   ;;  %v827_v15 = vsel %vm669_vm0, %v1555_v12, 0  ;;  %v1561_v22 = vld [vmem:[%s1729_s7 + $0x1e8] sm:$0xff]   ;;  %v1565_v28 = vld [vmem:[%s1729_s7 + $0x1f0] sm:$0xff]  }
  0x29   : > { %v1557_v16 = vld [vmem:[%s1729_s7 + $0x1e0] sm:$0xff]   ;;  %v1562_v23 = vld [vmem:[%s1729_s7 + $0x128] sm:$0xff]   ;;  %v1566_v29 = vld [vmem:[%s1729_s7 + $0x130] sm:$0xff]  }
  0x2a   : > { %v1558_v17 = vld [vmem:[%s1729_s7 + $0x120] sm:$0xff]   ;;  %v1569_v34 = vld [vmem:[%s1729_s7 + $0x1f8] sm:$0xff]  }
  0x2b   : > { %v1570_v35 = vld [vmem:[%s1729_s7 + $0x138] sm:$0xff]  }
  0x2c   : > { %1365 = vmatpush3.bf16.xpose.msra.mxu0 %v680_v18  ;;  %v1559_v18 = vld [vmem:[%s1729_s7 + $0x1a0] sm:$0xff]  }
  0x2d   : > { %1383 = vmatpush3.bf16.xpose.msra.mxu1 %v728_v20  ;;  %1435 = vmatprep.subr.msk.bf16.mxu0 %vm669_vm0, %v1519_v19  ;;  %v782_v19 = vsel %vm669_vm0, %v1558_v17, 0  ;;  %v1560_v20 = vld [vmem:[%s1729_s7 + $0x168] sm:$0xff]  }
  0x2e   : > { %1443 = vmatprep.subr.msk.bf16.mxu1 %vm669_vm0, %v1520_v21  ;;  %v830_v21 = vsel %vm669_vm0, %v1559_v18, 0 }
  0x34   : > { %1367 = vmatpush3.bf16.xpose.msra.mxu0 %v683_v24  ;;  %v1563_v24 = vld [vmem:[%s1729_s7 + $0x1a8] sm:$0xff]  }
  0x35   : > { %1385 = vmatpush3.bf16.xpose.msra.mxu1 %v731_v26  ;;  %1436 = vmatprep.subr.msk.bf16.mxu0 %vm669_vm0, %v1523_v25  ;;  %v785_v25 = vsel %vm669_vm0, %v1562_v23, 0  ;;  %v1564_v26 = vld [vmem:[%s1729_s7 + $0x170] sm:$0xff]  }
  0x36   : > { %1444 = vmatprep.subr.msk.bf16.mxu1 %vm669_vm0, %v1524_v27  ;;  %v833_v27 = vsel %vm669_vm0, %v1563_v24, 0  ;;  %v1152_v24 = vlaneseq }
  0x3c   : > { %1369 = vmatpush3.bf16.xpose.msra.mxu0 %v686_v30  ;;  %v1567_v30 = vld [vmem:[%s1729_s7 + $0x1b0] sm:$0xff]  }
  0x3d   : > { %1387 = vmatpush3.bf16.xpose.msra.mxu1 %v734_v32  ;;  %1437 = vmatprep.subr.msk.bf16.mxu0 %vm669_vm0, %v1527_v31  ;;  %v788_v31 = vsel %vm669_vm0, %v1566_v29, 0  ;;  %v1568_v32 = vld [vmem:[%s1729_s7 + $0x178] sm:$0xff]  }
  0x3e   : > { %1445 = vmatprep.subr.msk.bf16.mxu1 %vm669_vm0, %v1528_v33  ;;  %v836_v33 = vsel %vm669_vm0, %v1567_v30, 0 }
  0x44   : > { %1371 = vmatpush3.bf16.xpose.msra.mxu0 %v689_v36  ;;  %v1571_v36 = vld [vmem:[%s1729_s7 + $0x1b8] sm:$0xff]   ;;  %s1206_s7 = scalar_lea.sflag [#allocation3], %s191_s22 }
  0x45   : > { %1389 = vmatpush3.bf16.xpose.msra.mxu1 %v737_v38  ;;  %1438 = vmatprep.subr.msk.bf16.mxu0 %vm669_vm0, %v1531_v37  ;;  %v791_v37 = vsel %vm669_vm0, %v1570_v35, 0  ;;  %v839_v38 = vsel %vm669_vm0, %v1571_v36, 0 }
  0x46   : > { %1446 = vmatprep.subr.msk.bf16.mxu1 %vm669_vm0, %v1532_v39 }
  0x4c   : > { %1373 = vmatpush3.bf16.xpose.msra.mxu0 %v692_v42 }
  0x4d   : > { %1391 = vmatpush3.bf16.xpose.msra.mxu1 %v740_v44  ;;  %1439 = vmatprep.subr.msk.bf16.mxu0 %vm669_vm0, %v1535_v43 }
  0x4e   : > { %1447 = vmatprep.subr.msk.bf16.mxu1 %vm669_vm0, %v1536_v45 }
  0x54   : > { %1375 = vmatpush3.bf16.xpose.msra.mxu0 %v695_v48 }
  0x55   : > { %1393 = vmatpush3.bf16.xpose.msra.mxu1 %v743_v50  ;;  %1448 = vmatprep.subr.msk.bf16.mxu0 %vm669_vm0, %v1540_v49 }
  0x56   : > { %1456 = vmatprep.subr.msk.bf16.mxu1 %vm669_vm0, %v1541_v51 }
  0x5b   : > { %1377 = vmatmul.mubr.msk.bf16.vlgmr.msra.gmra.mrb[0].mxu0 %vm669_vm0, %v1720_v0 }
  0x5c   : > { %1395 = vmatmul.mubr.msk.bf16.vlgmr.msra.gmra.mrb[0].mxu1 %vm669_vm0, %v1720_v0  ;;  %1397 = vmatpush3.bf16.xpose.msra.mxu0 %v770_v56 }
  0x5d   : > { %1415 = vmatpush3.bf16.xpose.msra.mxu1 %v818_v58  ;;  %1449 = vmatprep.subr.msk.bf16.mxu0 %vm669_vm0, %v1544_v57 }
  0x5e   : > { %1457 = vmatprep.subr.msk.bf16.mxu1 %vm669_vm0, %v1545_v59  ;;  %1412 = vmatprep.mubr.msk.bf16.mxu0 %vm669_vm0, %v1720_v0 }
  0x5f   : > { %1430 = vmatprep.mubr.msk.bf16.mxu1 %vm669_vm0, %v1720_v0 }
  0x64   : > { %1399 = vmatpush3.bf16.xpose.msra.mxu0 %v773_v1 }
  0x65   : > { %1417 = vmatpush3.bf16.xpose.msra.mxu1 %v821_v3  ;;  %1450 = vmatprep.subr.msk.bf16.mxu0 %vm669_vm0, %v1548_v2 }
  0x66   : > { %1458 = vmatprep.subr.msk.bf16.mxu1 %vm669_vm0, %v1549_v4 }
  0x6c   : > { %1401 = vmatpush3.bf16.xpose.msra.mxu0 %v776_v7 }
  0x6d   : > { %1419 = vmatpush3.bf16.xpose.msra.mxu1 %v824_v9  ;;  %1451 = vmatprep.subr.msk.bf16.mxu0 %vm669_vm0, %v1552_v8 }
  0x6e   : > { %1459 = vmatprep.subr.msk.bf16.mxu1 %vm669_vm0, %v1553_v10 }
  0x74   : > { %1403 = vmatpush3.bf16.xpose.msra.mxu0 %v779_v13 }
  0x75   : > { %1421 = vmatpush3.bf16.xpose.msra.mxu1 %v827_v15  ;;  %1452 = vmatprep.subr.msk.bf16.mxu0 %vm669_vm0, %v1556_v14 }
  0x76   : > { %1460 = vmatprep.subr.msk.bf16.mxu1 %vm669_vm0, %v1557_v16 }
  0x7c   : > { %1405 = vmatpush3.bf16.xpose.msra.mxu0 %v782_v19 }
  0x7d   : > { %1423 = vmatpush3.bf16.xpose.msra.mxu1 %v830_v21  ;;  %1453 = vmatprep.subr.msk.bf16.mxu0 %vm669_vm0, %v1560_v20 }
  0x7e   : > { %1461 = vmatprep.subr.msk.bf16.mxu1 %vm669_vm0, %v1561_v22  ;;  %v1641_v22 = vmov 1966171168  }
  0x7f   : > { %v1150_v23 = vunpack.c.l.s4 %v1641_v22 }
  0x84   : > { %1407 = vmatpush3.bf16.xpose.msra.mxu0 %v785_v25 }
  0x85   : > { %1425 = vmatpush3.bf16.xpose.msra.mxu1 %v833_v27  ;;  %1454 = vmatprep.subr.msk.bf16.mxu0 %vm669_vm0, %v1564_v26 }
  0x86   : > { %1462 = vmatprep.subr.msk.bf16.mxu1 %vm669_vm0, %v1565_v28 }
  0x8c   : > { %1409 = vmatpush3.bf16.xpose.msra.mxu0 %v788_v31 }
  0x8d   : > { %1427 = vmatpush3.bf16.xpose.msra.mxu1 %v836_v33  ;;  %1455 = vmatprep.subr.msk.bf16.mxu0 %vm669_vm0, %v1568_v32  ;;  %v1151_v33 = vunpack.c.0.s8 %v1150_v23 }
  0x8e   : > { %1463 = vmatprep.subr.msk.bf16.mxu1 %vm669_vm0, %v1569_v34  ;;  %v1153_v34 = vshrl.u32 %v1152_v24, 7 }
  0x8f   : > { %v1883_v39 = vpop.permute.xlu0 %336  ;;  %v1885_v40 = vpop.permute.xlu1 %1057 }
  0x93   : > { %v1887_v42 = vpop.permute.xlu0 %341  ;;  %v1896_v59 = vpop.permute.xlu1 %1062 }
  0x94   : > { %1411 = vmatpush3.bf16.xpose.msra.mxu0 %v791_v37 }
  0x95   : > { %1429 = vmatpush3.bf16.xpose.msra.mxu1 %v839_v38 }
  0x9b   : > { %1413 = vmatmul.mubr.msk.bf16.vlgmr.msra.gmra.mrb[4].mxu0 %vm669_vm0, %v1720_v0 }
  0x9c   : > { %1431 = vmatmul.mubr.msk.bf16.vlgmr.msra.gmra.mrb[4].mxu1 %vm669_vm0, %v1720_v0 }
 0x12e   : > { %v899_v41 = vpop.f32.mrb[0].mxu0 }
 0x12f   : > { %v900_v43 = vadd.f32 %v899_v41, %v1883_v39  ;;  %v942_v44 = vpop.f32.mrb[0].mxu1  ;;  %v901_v45 = vpop.f32.mrb[1].mxu0 }
 0x130   : > { %v943_v46 = vadd.f32 %v942_v44, %v1883_v39  ;;  %v902_v47 = vadd.f32 %v901_v45, %v1883_v39  ;;  %v944_v48 = vpop.f32.mrb[1].mxu1  ;;  %v903_v49 = vpop.f32.mrb[2].mxu0 }
 0x131   : > { %v1037_v50 = vmax.f32 %v900_v43, 0.0  ;;  %v945_v0 = vadd.f32 %v944_v48, %v1883_v39  ;;  %v904_v51 = vadd.f32 %v903_v49, %v1887_v42  ;;  %v946_v52 = vpop.f32.mrb[2].mxu1  ;;  %v905_v53 = vpop.f32.mrb[3].mxu0 }
 0x132   : > { %v1039_v54 = vmax.f32 %v943_v46, 0.0  ;;  %v1038_v55 = vmax.f32 %v902_v47, 0.0  ;;  %v947_v56 = vadd.f32 %v946_v52, %v1887_v42  ;;  %v906_v57 = vadd.f32 %v905_v53, %v1887_v42  ;;  %v948_v58 = vpop.f32.mrb[3].mxu1 }
 0x133   : > { %v1040_v60 = vmax.f32 %v945_v0, 0.0  ;;  %v1045_v61 = vmax.f32 %v904_v51, 0.0  ;;  %v949_v62 = vadd.f32 %v948_v58, %v1887_v42  ;;  %v1065_v63 = vmul.f32 %v1885_v40, %v1037_v50 }
 0x134   : > { %v1047_v1 = vmax.f32 %v947_v56, 0.0  ;;  %v1046_v2 = vmax.f32 %v906_v57, 0.0  ;;  %v1067_v3 = vmul.f32 %v1885_v40, %v1039_v54  ;;  %v1066_v6 = vmul.f32 %v1885_v40, %v1038_v55 }
 0x135   : > { %v1048_v4 = vmax.f32 %v949_v62, 0.0  ;;  %v1073_v5 = vmul.f32 %v1896_v59, %v1045_v61  ;;  %v1068_v9 = vmul.f32 %v1885_v40, %v1040_v60  ;;  %v1907_v46 = vsub.s32 %v1151_v33, %v1153_v34 }
 0x136   : > { %v1074_v7 = vmul.f32 %v1896_v59, %v1046_v2  ;;  %v1075_v8 = vmul.f32 %v1896_v59, %v1047_v1 }
 0x137   : > { %v1076_v10 = vmul.f32 %v1896_v59, %v1048_v4  ;;  %v1081_v11 = vadd.f32 %v1073_v5, %v1065_v63 }
 0x138   : > { %v1088_v12 = vadd.f32 %v1074_v7, %v1066_v6  ;;  %v1095_v13 = vadd.f32 %v1075_v8, %v1067_v3 }
 0x139   : > { %v1082_v14 = vrot.slane %v1081_v11, 4  ;;  %v1102_v15 = vadd.f32 %v1076_v10, %v1068_v9 }
 0x13a   : > { %v1089_v16 = vrot.slane %v1088_v12, 4  ;;  %v1096_v17 = vrot.slane %v1095_v13, 4 }
 0x13b   : > { %v1083_v18 = vadd.f32 %v1082_v14, %v1081_v11  ;;  %v1103_v19 = vrot.slane %v1102_v15, 4 }
 0x13c   : > { %v1090_v20 = vadd.f32 %v1089_v16, %v1088_v12  ;;  %v1097_v21 = vadd.f32 %v1096_v17, %v1095_v13 }
 0x13d   : > { %v1084_v25 = vrot.slane %v1083_v18, 2  ;;  %v1104_v26 = vadd.f32 %v1103_v19, %v1102_v15 }
 0x13e   : > { %v1091_v27 = vrot.slane %v1090_v20, 2  ;;  %v1098_v28 = vrot.slane %v1097_v21, 2 }
 0x13f   : > { %v1085_v29 = vadd.f32 %v1084_v25, %v1083_v18  ;;  %v1105_v30 = vrot.slane %v1104_v26, 2 }
 0x140   : > { %v1092_v31 = vadd.f32 %v1091_v27, %v1090_v20  ;;  %v1099_v32 = vadd.f32 %v1098_v28, %v1097_v21 }
 0x141   : > { %v1086_v35 = vrot.slane %v1085_v29, 1  ;;  %v1106_v36 = vadd.f32 %v1105_v30, %v1104_v26 }
 0x142   : > { %v1093_v37 = vrot.slane %v1092_v31, 1  ;;  %v1100_v38 = vrot.slane %v1099_v32, 1 }
 0x143   : > { %v1087_v41 = vadd.f32 %v1086_v35, %v1085_v29  ;;  %v1107_v43 = vrot.slane %v1106_v36, 1 }
 0x144   : > { %v1094_v44 = vadd.f32 %v1093_v37, %v1092_v31  ;;  %v1101_v45 = vadd.f32 %v1100_v38, %v1099_v32 }
 0x145   : > { %v1108_v47 = vadd.f32 %v1107_v43, %v1106_v36 }
 0x146   : > { %v1145_v48 = vcombine.low %v1087_v41, %v1094_v44 }
 0x147   : > { %v1146_v49 = vcombine.low %v1101_v45, %v1108_v47 }
 0x148   : > { %v1910_v50 = vrot.slane %v1145_v48, %v1907_v46 }
 0x149   : > { %v1913_v0 = vrot.slane %v1146_v49, %v1907_v46 }
 0x14b   : > { %v1177_v51 = vcombine.low %v1910_v50, %v1913_v0 }
 0x16e   : > { %v985_v52 = vpop.f32.mrb[4].mxu0 }
 0x16f   : > { %v986_v53 = vadd.f32 %v985_v52, %v1883_v39  ;;  %v1028_v54 = vpop.f32.mrb[4].mxu1  ;;  %v987_v55 = vpop.f32.mrb[5].mxu0 }
 0x170   : > { %v1029_v56 = vadd.f32 %v1028_v54, %v1883_v39  ;;  %v988_v57 = vadd.f32 %v987_v55, %v1883_v39  ;;  %v1030_v58 = vpop.f32.mrb[5].mxu1  ;;  %v989_v60 = vpop.f32.mrb[6].mxu0 }
 0x171   : > { %v1041_v61 = vmax.f32 %v986_v53, 0.0  ;;  %v1031_v62 = vadd.f32 %v1030_v58, %v1883_v39  ;;  %v990_v63 = vadd.f32 %v989_v60, %v1887_v42  ;;  %v1032_v1 = vpop.f32.mrb[6].mxu1  ;;  %v991_v2 = vpop.f32.mrb[7].mxu0 }
 0x172   : > { %v1043_v3 = vmax.f32 %v1029_v56, 0.0  ;;  %v1042_v4 = vmax.f32 %v988_v57, 0.0  ;;  %v1033_v5 = vadd.f32 %v1032_v1, %v1887_v42  ;;  %v992_v6 = vadd.f32 %v991_v2, %v1887_v42  ;;  %v1034_v7 = vpop.f32.mrb[7].mxu1 }
 0x173   : > { %v1044_v8 = vmax.f32 %v1031_v62, 0.0  ;;  %v1049_v9 = vmax.f32 %v990_v63, 0.0  ;;  %v1035_v10 = vadd.f32 %v1034_v7, %v1887_v42  ;;  %v1069_v13 = vmul.f32 %v1885_v40, %v1041_v61 }
 0x174   : > { %v1051_v11 = vmax.f32 %v1033_v5, 0.0  ;;  %v1050_v12 = vmax.f32 %v992_v6, 0.0  ;;  %v1071_v15 = vmul.f32 %v1885_v40, %v1043_v3  ;;  %v1070_v16 = vmul.f32 %v1885_v40, %v1042_v4 }
 0x175   : > { %v1077_v39 = vmul.f32 %v1896_v59, %v1049_v9  ;;  %v1052_v14 = vmax.f32 %v1035_v10, 0.0  ;;  %v1072_v19 = vmul.f32 %v1885_v40, %v1044_v8  ;;  %v1185_v57 = vrot.slane %v1177_v51, %v1907_v46 }
 0x176   : > { %v1079_v17 = vmul.f32 %v1896_v59, %v1051_v11  ;;  %v1078_v18 = vmul.f32 %v1896_v59, %v1050_v12 }
 0x177   : > { %v1109_v20 = vadd.f32 %v1077_v39, %v1069_v13  ;;  %v1080_v42 = vmul.f32 %v1896_v59, %v1052_v14 }
 0x178   : > { %v1123_v21 = vadd.f32 %v1079_v17, %v1071_v15  ;;  %v1116_v22 = vadd.f32 %v1078_v18, %v1070_v16 }
 0x179   : > { %v1110_v23 = vrot.slane %v1109_v20, 4  ;;  %v1130_v24 = vadd.f32 %v1080_v42, %v1072_v19 }
 0x17a   : > { %v1124_v25 = vrot.slane %v1123_v21, 4  ;;  %v1117_v26 = vrot.slane %v1116_v22, 4 }
 0x17b   : > { %v1111_v27 = vadd.f32 %v1110_v23, %v1109_v20  ;;  %v1131_v28 = vrot.slane %v1130_v24, 4 }
 0x17c   : > { %v1125_v29 = vadd.f32 %v1124_v25, %v1123_v21  ;;  %v1118_v30 = vadd.f32 %v1117_v26, %v1116_v22 }
 0x17d   : > { %v1112_v31 = vrot.slane %v1111_v27, 2  ;;  %v1132_v32 = vadd.f32 %v1131_v28, %v1130_v24 }
 0x17e   : > { %v1126_v33 = vrot.slane %v1125_v29, 2  ;;  %v1119_v34 = vrot.slane %v1118_v30, 2 }
 0x17f   : > { %v1113_v35 = vadd.f32 %v1112_v31, %v1111_v27  ;;  %v1133_v36 = vrot.slane %v1132_v32, 2 }
 0x180   : > { %v1127_v40 = vadd.f32 %v1126_v33, %v1125_v29  ;;  %v1120_v37 = vadd.f32 %v1119_v34, %v1118_v30 }
 0x181   : > { %v1114_v38 = vrot.slane %v1113_v35, 1  ;;  %v1134_v59 = vadd.f32 %v1133_v36, %v1132_v32 }
 0x182   : > { %v1128_v41 = vrot.slane %v1127_v40, 1  ;;  %v1121_v43 = vrot.slane %v1120_v37, 1 }
 0x183   : > { %v1115_v44 = vadd.f32 %v1114_v38, %v1113_v35  ;;  %v1135_v45 = vrot.slane %v1134_v59, 1 }
 0x184   : > { %v1129_v47 = vadd.f32 %v1128_v41, %v1127_v40  ;;  %v1122_v48 = vadd.f32 %v1121_v43, %v1120_v37 }
 0x185   : > { %v1136_v49 = vadd.f32 %v1135_v45, %v1134_v59 }
 0x186   : > { %v1147_v52 = vcombine.low %v1115_v44, %v1122_v48 }
 0x187   : > { %v1148_v53 = vcombine.low %v1129_v47, %v1136_v49 }
 0x188   : > { %v1169_v54 = vrot.slane %v1147_v52, %v1907_v46 }
 0x189   : > { %v1176_v55 = vrot.slane %v1148_v53, %v1907_v46 }
 0x18b   : > { %v1178_v56 = vcombine.low %v1169_v54, %v1176_v55 }
 0x18d   : > { %v1192_v58 = vrot.slane %v1178_v56, %v1907_v46 }
 0x18f   : > { %v1193_v60 = vcombine.low %v1185_v57, %v1192_v58 }
 0x191   : > { %1195 = vmax.xlane.f32.xlu0 %v1193_v60 }
 0x21e   : > { %v1196_v61 = vpop.xlane.xlu0 %1195 }
 0x21f   : > { %v1197_v62 = vsub.f32 %v1193_v60, %v1196_v61 }
 0x221   : > { %v1198_v63 = vmul.f32 1.442695, %v1197_v62 }
 0x223   : > { %1572 = vpow2.f32 %v1198_v63 }
 0x22d   : > { %v1573_v1 = vpop.eup %1572 }
 0x22e   : > { %1200 = vadd.xlane.f32.xlu1 %v1573_v1 }
 0x2bb   : > { %v1201_v2 = vpop.xlane.xlu1 %1200 }
 0x2bc   : > { %1574 = vrcp.f32 %v1201_v2 }
 0x2c6   : > { %v1575_v50 = vpop.eup %1574 }
 0x2c7   : > { %v1203_v0 = vmul.f32 %v1575_v50, %v1573_v1 }
 0x2c9   : > { %1204 = vst [vmem:[%s193_s28] sm:$0xff] %v1203_v0 }
 0x2ca   : > { %1589 = shalt.err (!%p1586_p3)
}
 0x2cb   : > { %s1590_s11 = scalar_lea.hbm %s1945_s6, 128  ;;  %s1594_s14 = scalar_lea.hbm %s1991_s4, 256 }
 0x2cc   : > { %p1591_p4 = scmp.ne.s32.totalorder %s1945_s6, %s1590_s11  ;;  %p1595_p9 = scmp.lt.u32.totalorder %s1945_s6, %s1991_s4 }
 0x2cd   : > { %p1596_p10 = scmp.lt.u32.totalorder %s1594_s14, %s1590_s11  ;;  %p1598_p12 = scmp.lt.u32.totalorder %s1590_s11, %s1945_s6 }
 0x2ce   : > { %p1592_p7 = pnand %p1591_p4, %p1706_p5 }
 0x2cf   : > { %p1597_p11 = por %p1596_p10, %p1595_p9 }
 0x2d0   : > { %p1593_p8 = pneg %p1592_p7 }
 0x2d1   : > { %p1599_p13 = por %p1598_p12, %p1597_p11 }
 0x2d3   : > { %p1600_p0 = pnand %p1599_p13, %p1593_p8 }
 0x2d5   : > { %1603 = shalt.err (!%p1600_p0)
}
 0x2d6   : > { %1464 = dma.vmem_to_hbm [thread:$0]  (%p1706_p5), %s1947_s29, 128, %s1945_s6, %s1206_s7  }
 0x2d7 PF: > { %p1470_p1 = scmp.ge.s32.totalorder %s1638_s18, 2  ;;  %s1231_s23 = sand.u32 1, %s1626_s15  }
 0x2d8   : > { %s1232_s27 = scalar_lea.sflag [#allocation3], %s1231_s23 }
 0x2d9   : > { %p1467_p2 = pnand %p1470_p1, %p1710_p6 }
 0x2db   : > { %1621 = dma.done.wait (!%p1467_p2), %s1232_s27, 128  }
 0x2dc   : > { %1623 = vsyncadd (!%p1467_p2), %s1232_s27, 4294967168  ;;  %p14_p3 = scmp.ge.s32.totalorder %s1693_s21, 4   ;;  %s1994_s15 = smov %s1630_s16 }
 0x2dd   : > { %s1995_s16 = smov %s1634_s17  ;;  %s1996_s17 = smov %s1704_s24 }
 0x2de   : > { %s1997_s18 = smov %s1693_s21  ;;  %16 = sbr.rel (!%p14_p3) target bundleno = 3 (0x3), region = 71 }
 0x2e5   :  { %1237 = vsyncpa [#allocation3], 1 }
 0x2e6   :  { %1239 = vsyncpa [#allocation3 + $0x1], 1 }

// kernel: tpu_custom_call.1
= control target key start
LH: loop header
LB: loop body
LE: loop exit
PB: predicated region body
PF: predicated region fallthrough
CT: control target
= control target key end

     0   :  { %9 = vsyncpa [#allocation3], 0  ;;  %s10373_s0 = inlined_call_operand.vmem [shape: bf16[16,128,32], index: 0, kind: input, shape index: {}]   ;;  %s10374_s1 = inlined_call_operand.vmem [shape: bf16[32,16], index: 1, kind: input, shape index: {}]   ;;  %s10375_s2 = inlined_call_operand.vmem [shape: f32[1,16], index: 2, kind: input, shape index: {}]   ;;  %s10376_s3 = inlined_call_operand.vmem [shape: f32[1,16], index: 3, kind: input, shape index: {}]   ;;  %s10377_s4 = inlined_call_operand.hbm [shape: f32[16,128], index: 4, kind: output, shape index: {}]  }
   0x1   :  { %11 = vsyncpa [#allocation3 + $0x1], 0  ;;  %s6670_s15 = smov 0   ;;  %s6672_s16 = smov 0  }
   0x2   :  { %s6674_s17 = smov 0   ;;  %s6676_s18 = smov 0  }
   0x3 LB: > { %s6691_s19 = sadd.s32 4294967295, %s6641_s18   ;;  %s5850_s20 = sadd.s32 4294967294, %s6641_s18   ;;  %s6641_s18 = sphi %s6676_s18, %s11434_s18   ;;  %s6637_s17 = sphi %s6674_s17, %s11433_s17   ;;  %s6633_s16 = sphi %s6672_s16, %s11432_s16   ;;  %s6629_s15 = sphi %s6670_s15, %s11431_s15  }
   0x4   : > { %s6695_s21 = sadd.s32 1, %s6641_s18   ;;  %s113_s22 = sadd.s32 1, %s6637_s17 }
   0x5   : > { %s110_s23 = ssub.s32 %s6641_s18, %s6695_s21  ;;  %p123_p0 = scmp.ne.s32.totalorder %s6637_s17, %s6633_s16 }
   0x6   : > { %p111_p1 = scmp.eq.s32.totalorder %s110_s23, 0  ;;  %p124_p2 = scmp.eq.s32.totalorder %s6691_s19, 1 }
   0x7   : > { %p129_p3 = scmp.ne.s32.totalorder %s6633_s16, %s6629_s15  ;;  %p130_p4 = scmp.eq.s32.totalorder %s5850_s20, 1 }
   0x8   : > { %s6706_s24 = scalar_select %p111_p1, %s6637_s17, %s113_s22  }
   0x9   : > { %p6708_p5 = por %p124_p2, %p123_p0  ;;  %p6712_p6 = por %p130_p4, %p129_p3 }
   0xa   : > { %p5853_p7 = scmp.ge.s32.totalorder %s6641_s18, 1  ;;  %p167_p8 = scmp.lt.s32.totalorder %s6641_s18, 3 }
   0xc   : > { %p168_p9 = pnand %p5853_p7, %p167_p8 }
   0xe   : > { %171 = sbr.rel (%p168_p9) target bundleno = 1789 (0x6fd), region = 36 }
  0x15   : > { %v6239_v0 = vld [vmem:[%s10374_s1] sm:$0xff]   ;;  %s5855_s29 = sshll.u32 %s6691_s19, 3  ;;  %v6240_v1 = vld [vmem:[%s10374_s1 + $0x8] sm:$0xff]   ;;  %vm673_vm0 = vcmask 261120   ;;  %vm1674_vm1 = vcmask 130048   ;;  %vm2198_vm2 = vcmask 130112  }
  0x16   : > { %p195_p10 = scmp.lt.s32.totalorder %s5855_s29, 15  ;;  %6061 = vmatprep.subr.bf16.mxu0 %v6239_v0  ;;  %6193 = vmatprep.subr.bf16.mxu1 %v6239_v0  ;;  %vm2205_vm3 = vcmask 195712   ;;  %vm2212_vm4 = vcmask 261312   ;;  %vm2219_vm5 = vcmask 326912   ;;  %vm10662_vm6 = vcmask 392512   ;;  %s191_s27 = sand.u32 1, %s6633_s16  }
  0x17   : > { %6062 = vmatpush3.bf16.msra.mxu0 %v6239_v0  ;;  %6195 = vmatpush3.bf16.msra.mxu1 %v6239_v0  ;;  %vm10496_vm7 = vcmask 458112   ;;  %vm10502_vm8 = vcmask 523712   ;;  %vm10508_vm9 = vcmask 589312   ;;  %vm2254_vm10 = vcmask 654912   ;;  %s5854_s28 = sshll.u32 %s191_s27, 3  ;;  %s6644_s10 = smov [#allocation2]  }
  0x18   : > { %s11436_s29 = smov (!%p195_p10, %s5855_s29), 15  ;;  %6063 = vmatprep.subr.bf16.mxu0 %v6240_v1  ;;  %6194 = vmatprep.subr.bf16.mxu1 %v6240_v1  ;;  %vm10512_vm11 = vcmask 720512   ;;  %vm10513_vm12 = vcmask 786112   ;;  %vm2275_vm13 = vcmask 851712   ;;  %vm2282_vm14 = vcmask 917312   ;;  %s193_s30 = scalar_lea.vmem [#allocation2], %s5854_s28 }
  0x19   : > { %s5994_s6 = sshll.u32 %s11436_s29, 6  ;;  %vm2289_vm15 = vcmask 982912   ;;  %s5991_s29 = sshll.u32 %s6691_s19, 7 }
  0x1a   : > { %s6728_s9 = scalar_lea.vmem %s10373_s0, %s5994_s6  ;;  %s5791_s5 = sshll.u32 %s193_s30, 4  ;;  %s10330_s5 = int_to_ptr.vmem [resolvable:$true] %s5791_s5 }
  0x1b   : > { %6064 = vmatpush3.bf16.msra.mxu0 %v6240_v1  ;;  %6196 = vmatpush3.bf16.msra.mxu1 %v6240_v1  ;;  %v6241_v2 = vld [vmem:[%s6728_s9] sm:$0xff]   ;;  %v6243_v4 = vld [vmem:[%s6728_s9 + $0x8] sm:$0xff]   ;;  %v6245_v6 = vld [vmem:[%s6728_s9 + $0x10] sm:$0xff]   ;;  %s10328_s8 = scalar_lea.hbm %s10377_s4, %s5991_s29  ;;  %s5778_s19 = scalar_lea.sflag [#allocation3], %s191_s27 }
  0x1c   : > { %v6242_v3 = vld [vmem:[%s6728_s9 + $0x100] sm:$0xff]   ;;  %6065 = vmatprep.mubr.msk.bf16.mxu0 %vm673_vm0, %v6241_v2  ;;  %v6244_v5 = vld [vmem:[%s6728_s9 + $0x108] sm:$0xff]   ;;  %v6247_v7 = vld [vmem:[%s6728_s9 + $0x110] sm:$0xff]   ;;  %s6583_s11 = sshll.u32 %s6644_s10, 4  ;;  %s6584_s11 = int_to_ptr.vmem [resolvable:$false] %s6583_s11 }
  0x1d   : > { %6129 = vmatprep.mubr.msk.bf16.mxu1 %vm673_vm0, %v6242_v3  ;;  %v6246_v8 = vld [vmem:[%s6728_s9 + $0x18] sm:$0xff]   ;;  %v6249_v10 = vld [vmem:[%s6728_s9 + $0x20] sm:$0xff]   ;;  %v6250_v12 = vld [vmem:[%s6728_s9 + $0x28] sm:$0xff]   ;;  %s6585_s12 = scalar_lea.vmem %s6584_s11, 256  ;;  %p6586_p0 = scmp.lt.s32.totalorder %s10330_s5, %s6584_s11 }
  0x1e   : > { %6066 = vmatmul.mubr.msk.bf16.vlgmr.msra.gmra.mrb[0].mxu0 %vm673_vm0, %v6243_v4  ;;  %6130 = vmatmul.mubr.msk.bf16.vlgmr.msra.gmra.mrb[0].mxu1 %vm673_vm0, %v6244_v5  ;;  %v6248_v9 = vld [vmem:[%s6728_s9 + $0x118] sm:$0xff]   ;;  %v6251_v11 = vld [vmem:[%s6728_s9 + $0x120] sm:$0xff]   ;;  %v6252_v13 = vld [vmem:[%s6728_s9 + $0x128] sm:$0xff]  }
  0x1f   : > { %6069 = vmatprep.mubr.msk.bf16.mxu0 %vm673_vm0, %v6245_v6  ;;  %6133 = vmatprep.mubr.msk.bf16.mxu1 %vm673_vm0, %v6247_v7  ;;  %v6253_v14 = vld [vmem:[%s6728_s9 + $0x30] sm:$0xff]   ;;  %v6254_v16 = vld [vmem:[%s6728_s9 + $0x38] sm:$0xff]   ;;  %v6257_v18 = vld [vmem:[%s6728_s9 + $0x40] sm:$0xff]  }
  0x20   : > { %v6255_v15 = vld [vmem:[%s6728_s9 + $0x130] sm:$0xff]   ;;  %v6256_v17 = vld [vmem:[%s6728_s9 + $0x138] sm:$0xff]   ;;  %v6259_v19 = vld [vmem:[%s6728_s9 + $0x140] sm:$0xff]  }
  0x21   : > { %v6258_v20 = vld [vmem:[%s6728_s9 + $0x48] sm:$0xff]   ;;  %v6261_v22 = vld [vmem:[%s6728_s9 + $0x50] sm:$0xff]   ;;  %v6262_v24 = vld [vmem:[%s6728_s9 + $0x58] sm:$0xff]  }
  0x22   : > { %v6260_v21 = vld [vmem:[%s6728_s9 + $0x148] sm:$0xff]   ;;  %v6263_v23 = vld [vmem:[%s6728_s9 + $0x150] sm:$0xff]   ;;  %v6264_v25 = vld [vmem:[%s6728_s9 + $0x158] sm:$0xff]  }
  0x23   : > { %v6265_v26 = vld [vmem:[%s6728_s9 + $0x60] sm:$0xff]   ;;  %v6266_v28 = vld [vmem:[%s6728_s9 + $0x68] sm:$0xff]   ;;  %v6269_v30 = vld [vmem:[%s6728_s9 + $0x70] sm:$0xff]  }
  0x24   : > { %v6267_v27 = vld [vmem:[%s6728_s9 + $0x160] sm:$0xff]   ;;  %v6268_v29 = vld [vmem:[%s6728_s9 + $0x168] sm:$0xff]   ;;  %v6271_v31 = vld [vmem:[%s6728_s9 + $0x170] sm:$0xff]  }
  0x25   : > { %v6270_v32 = vld [vmem:[%s6728_s9 + $0x78] sm:$0xff]   ;;  %v6273_v34 = vld [vmem:[%s6728_s9 + $0x80] sm:$0xff]   ;;  %v6274_v36 = vld [vmem:[%s6728_s9 + $0x88] sm:$0xff]  }
  0x26   : > { %6070 = vmatmul.mubr.msk.bf16.gmra.mrb[4].mxu0 %vm673_vm0, %v6246_v8  ;;  %6134 = vmatmul.mubr.msk.bf16.gmra.mrb[4].mxu1 %vm673_vm0, %v6248_v9  ;;  %v6272_v33 = vld [vmem:[%s6728_s9 + $0x178] sm:$0xff]   ;;  %v6275_v35 = vld [vmem:[%s6728_s9 + $0x180] sm:$0xff]   ;;  %v6276_v37 = vld [vmem:[%s6728_s9 + $0x188] sm:$0xff]  }
  0x27   : > { %6073 = vmatprep.mubr.msk.bf16.mxu0 %vm673_vm0, %v6249_v10  ;;  %6137 = vmatprep.mubr.msk.bf16.mxu1 %vm673_vm0, %v6251_v11  ;;  %v6277_v38 = vld [vmem:[%s6728_s9 + $0x90] sm:$0xff]   ;;  %v6278_v40 = vld [vmem:[%s6728_s9 + $0x98] sm:$0xff]   ;;  %v6281_v42 = vld [vmem:[%s6728_s9 + $0xa0] sm:$0xff]  }
  0x28   : > { %v6279_v39 = vld [vmem:[%s6728_s9 + $0x190] sm:$0xff]   ;;  %v6280_v41 = vld [vmem:[%s6728_s9 + $0x198] sm:$0xff]   ;;  %v6283_v43 = vld [vmem:[%s6728_s9 + $0x1a0] sm:$0xff]  }
  0x29   : > { %v6282_v44 = vld [vmem:[%s6728_s9 + $0xa8] sm:$0xff]   ;;  %v6285_v46 = vld [vmem:[%s6728_s9 + $0xb0] sm:$0xff]   ;;  %v6286_v48 = vld [vmem:[%s6728_s9 + $0xb8] sm:$0xff]  }
  0x2a   : > { %v6284_v45 = vld [vmem:[%s6728_s9 + $0x1a8] sm:$0xff]   ;;  %v6287_v47 = vld [vmem:[%s6728_s9 + $0x1b0] sm:$0xff]   ;;  %v6288_v49 = vld [vmem:[%s6728_s9 + $0x1b8] sm:$0xff]  }
  0x2b   : > { %v6289_v50 = vld [vmem:[%s6728_s9 + $0xc0] sm:$0xff]   ;;  %v6290_v52 = vld [vmem:[%s6728_s9 + $0xc8] sm:$0xff]   ;;  %v6293_v54 = vld [vmem:[%s6728_s9 + $0xd0] sm:$0xff]  }
  0x2c   : > { %v6291_v51 = vld [vmem:[%s6728_s9 + $0x1c0] sm:$0xff]   ;;  %v6292_v53 = vld [vmem:[%s6728_s9 + $0x1c8] sm:$0xff]   ;;  %v6295_v55 = vld [vmem:[%s6728_s9 + $0x1d0] sm:$0xff]  }
  0x2d   : > { %v6294_v56 = vld [vmem:[%s6728_s9 + $0xd8] sm:$0xff]   ;;  %v6297_v58 = vld [vmem:[%s6728_s9 + $0xe0] sm:$0xff]   ;;  %v6298_v60 = vld [vmem:[%s6728_s9 + $0xe8] sm:$0xff]  }
  0x2e   : > { %6074 = vmatmul.mubr.msk.bf16.gmra.mrb[8].mxu0 %vm673_vm0, %v6250_v12  ;;  %6138 = vmatmul.mubr.msk.bf16.gmra.mrb[8].mxu1 %vm673_vm0, %v6252_v13  ;;  %v6296_v57 = vld [vmem:[%s6728_s9 + $0x1d8] sm:$0xff]   ;;  %v6299_v59 = vld [vmem:[%s6728_s9 + $0x1e0] sm:$0xff]   ;;  %v6300_v61 = vld [vmem:[%s6728_s9 + $0x1e8] sm:$0xff]  }
  0x2f   : > { %6077 = vmatprep.mubr.msk.bf16.mxu0 %vm673_vm0, %v6253_v14  ;;  %6141 = vmatprep.mubr.msk.bf16.mxu1 %vm673_vm0, %v6255_v15  ;;  %v6301_v62 = vld [vmem:[%s6728_s9 + $0xf0] sm:$0xff]   ;;  %v6302_v0 = vld [vmem:[%s6728_s9 + $0xf8] sm:$0xff]   ;;  %v6861_v2 = vld [vmem:[%s10375_s2] ss:$0 sm:$0xff] }
  0x30   : > { %v6303_v63 = vld [vmem:[%s6728_s9 + $0x1f0] sm:$0xff]   ;;  %v6304_v1 = vld [vmem:[%s6728_s9 + $0x1f8] sm:$0xff]   ;;  %v6869_v11 = vld [vmem:[%s10376_s3] ss:$0 sm:$0xff]  ;;  %s6579_s9 = scalar_lea.vmem %s10330_s5, 128 }
  0x31   : > { %p6580_p11 = scmp.ne.s32.totalorder %s10330_s5, %s6579_s9  ;;  %p6587_p1 = scmp.lt.s32.totalorder %s6585_s12, %s6579_s9 }
  0x33   : > { %p6581_p12 = pnand %p6580_p11, %p6708_p5  ;;  %p6588_p2 = por %p6587_p1, %p6586_p0 }
  0x35   : > { %p6582_p13 = pneg %p6581_p12 }
  0x36   : > { %6078 = vmatmul.mubr.msk.bf16.gmra.mrb[12].mxu0 %vm673_vm0, %v6254_v16  ;;  %6142 = vmatmul.mubr.msk.bf16.gmra.mrb[12].mxu1 %vm673_vm0, %v6256_v17 }
  0x37   : > { %6081 = vmatprep.mubr.msk.bf16.mxu0 %vm673_vm0, %v6257_v18  ;;  %6145 = vmatprep.mubr.msk.bf16.mxu1 %vm673_vm0, %v6259_v19  ;;  %p6589_p3 = pnand %p6588_p2, %p6582_p13 }
  0x3e   : > { %6082 = vmatmul.mubr.msk.bf16.gmra.mrb[16].mxu0 %vm673_vm0, %v6258_v20  ;;  %6146 = vmatmul.mubr.msk.bf16.gmra.mrb[16].mxu1 %vm673_vm0, %v6260_v21 }
  0x3f   : > { %6085 = vmatprep.mubr.msk.bf16.mxu0 %vm673_vm0, %v6261_v22  ;;  %6149 = vmatprep.mubr.msk.bf16.mxu1 %vm673_vm0, %v6263_v23 }
  0x46   : > { %6086 = vmatmul.mubr.msk.bf16.gmra.mrb[20].mxu0 %vm673_vm0, %v6262_v24  ;;  %6150 = vmatmul.mubr.msk.bf16.gmra.mrb[20].mxu1 %vm673_vm0, %v6264_v25 }
  0x47   : > { %6089 = vmatprep.mubr.msk.bf16.mxu0 %vm673_vm0, %v6265_v26  ;;  %6153 = vmatprep.mubr.msk.bf16.mxu1 %vm673_vm0, %v6267_v27 }
  0x4e   : > { %6090 = vmatmul.mubr.msk.bf16.gmra.mrb[24].mxu0 %vm673_vm0, %v6266_v28  ;;  %6154 = vmatmul.mubr.msk.bf16.gmra.mrb[24].mxu1 %vm673_vm0, %v6268_v29 }
  0x4f   : > { %6093 = vmatprep.mubr.msk.bf16.mxu0 %vm673_vm0, %v6269_v30  ;;  %6157 = vmatprep.mubr.msk.bf16.mxu1 %vm673_vm0, %v6271_v31 }
  0x56   : > { %6094 = vmatmul.mubr.msk.bf16.gmra.mrb[28].mxu0 %vm673_vm0, %v6270_v32  ;;  %6158 = vmatmul.mubr.msk.bf16.gmra.mrb[28].mxu1 %vm673_vm0, %v6272_v33 }
  0x57   : > { %6097 = vmatprep.mubr.msk.bf16.mxu0 %vm673_vm0, %v6273_v34  ;;  %6161 = vmatprep.mubr.msk.bf16.mxu1 %vm673_vm0, %v6275_v35 }
  0x5e   : > { %6098 = vmatmul.mubr.msk.bf16.gmra.mrb[32].mxu0 %vm673_vm0, %v6274_v36  ;;  %6162 = vmatmul.mubr.msk.bf16.gmra.mrb[32].mxu1 %vm673_vm0, %v6276_v37 }
  0x5f   : > { %6101 = vmatprep.mubr.msk.bf16.mxu0 %vm673_vm0, %v6277_v38  ;;  %6165 = vmatprep.mubr.msk.bf16.mxu1 %vm673_vm0, %v6279_v39 }
  0x66   : > { %6102 = vmatmul.mubr.msk.bf16.gmra.mrb[36].mxu0 %vm673_vm0, %v6278_v40  ;;  %6166 = vmatmul.mubr.msk.bf16.gmra.mrb[36].mxu1 %vm673_vm0, %v6280_v41 }
  0x67   : > { %6105 = vmatprep.mubr.msk.bf16.mxu0 %vm673_vm0, %v6281_v42  ;;  %6169 = vmatprep.mubr.msk.bf16.mxu1 %vm673_vm0, %v6283_v43 }
  0x6e   : > { %6106 = vmatmul.mubr.msk.bf16.gmra.mrb[40].mxu0 %vm673_vm0, %v6282_v44  ;;  %6170 = vmatmul.mubr.msk.bf16.gmra.mrb[40].mxu1 %vm673_vm0, %v6284_v45 }
  0x6f   : > { %6109 = vmatprep.mubr.msk.bf16.mxu0 %vm673_vm0, %v6285_v46  ;;  %6173 = vmatprep.mubr.msk.bf16.mxu1 %vm673_vm0, %v6287_v47 }
  0x76   : > { %6110 = vmatmul.mubr.msk.bf16.gmra.mrb[44].mxu0 %vm673_vm0, %v6286_v48  ;;  %6174 = vmatmul.mubr.msk.bf16.gmra.mrb[44].mxu1 %vm673_vm0, %v6288_v49 }
  0x77   : > { %6113 = vmatprep.mubr.msk.bf16.mxu0 %vm673_vm0, %v6289_v50  ;;  %6177 = vmatprep.mubr.msk.bf16.mxu1 %vm673_vm0, %v6291_v51 }
  0x7e   : > { %6114 = vmatmul.mubr.msk.bf16.gmra.mrb[48].mxu0 %vm673_vm0, %v6290_v52  ;;  %6178 = vmatmul.mubr.msk.bf16.gmra.mrb[48].mxu1 %vm673_vm0, %v6292_v53 }
  0x7f   : > { %6117 = vmatprep.mubr.msk.bf16.mxu0 %vm673_vm0, %v6293_v54  ;;  %6181 = vmatprep.mubr.msk.bf16.mxu1 %vm673_vm0, %v6295_v55 }
  0x86   : > { %6118 = vmatmul.mubr.msk.bf16.gmra.mrb[52].mxu0 %vm673_vm0, %v6294_v56  ;;  %6182 = vmatmul.mubr.msk.bf16.gmra.mrb[52].mxu1 %vm673_vm0, %v6296_v57 }
  0x87   : > { %6121 = vmatprep.mubr.msk.bf16.mxu0 %vm673_vm0, %v6297_v58  ;;  %6185 = vmatprep.mubr.msk.bf16.mxu1 %vm673_vm0, %v6299_v59 }
  0x8e   : > { %6122 = vmatmul.mubr.msk.bf16.gmra.mrb[56].mxu0 %vm673_vm0, %v6298_v60  ;;  %6186 = vmatmul.mubr.msk.bf16.gmra.mrb[56].mxu1 %vm673_vm0, %v6300_v61 }
  0x8f   : > { %6125 = vmatprep.mubr.msk.bf16.mxu0 %vm673_vm0, %v6301_v62  ;;  %6189 = vmatprep.mubr.msk.bf16.mxu1 %vm673_vm0, %v6303_v63 }
  0x96   : > { %6126 = vmatmul.mubr.msk.bf16.gmra.mrb[60].mxu0 %vm673_vm0, %v6302_v0  ;;  %6190 = vmatmul.mubr.msk.bf16.gmra.mrb[60].mxu1 %vm673_vm0, %v6304_v1  ;;  %vm2296_vm0 = vcmask 1048512  }
  0xf1   : > { %v6067_v3 = vpop.f32.mrb[0].mxu0  ;;  %v6131_v5 = vpop.f32.mrb[0].mxu1 }
  0xf2   : > { %v909_v4 = vadd.f32 %v6067_v3, %v6861_v2  ;;  %v900_v6 = vpop.f32.mrb[1].mxu0  ;;  %v1165_v7 = vadd.f32 %v6131_v5, %v6861_v2  ;;  %v1156_v9 = vpop.f32.mrb[1].mxu1 }
  0xf3   : > { %v901_v8 = vadd.f32 %v6861_v2, %v900_v6  ;;  %v6068_v10 = vpop.f32.mrb[2].mxu0  ;;  %v6132_v14 = vpop.f32.mrb[2].mxu1  ;;  %v1157_v18 = vadd.f32 %v6861_v2, %v1156_v9 }
  0xf4   : > { %v1413_v12 = vmax.f32 %v909_v4, 0.0  ;;  %v912_v13 = vadd.f32 %v6068_v10, %v6861_v2  ;;  %v903_v15 = vpop.f32.mrb[3].mxu0  ;;  %v1477_v16 = vmax.f32 %v1165_v7, 0.0  ;;  %v1168_v19 = vadd.f32 %v6132_v14, %v6861_v2  ;;  %v1159_v20 = vpop.f32.mrb[3].mxu1 }
  0xf5   : > { %v1411_v17 = vmax.f32 %v901_v8, 0.0  ;;  %v1160_v25 = vadd.f32 %v6861_v2, %v1159_v20  ;;  %v1475_v28 = vmax.f32 %v1157_v18, 0.0  ;;  %v904_v29 = vadd.f32 %v6861_v2, %v903_v15 }
  0xf6   : > { %v1414_v21 = vmax.f32 %v912_v13, 0.0  ;;  %v1548_v22 = vmul.f32 %v6869_v11, %v1413_v12  ;;  %v1612_v23 = vmul.f32 %v6869_v11, %v1477_v16  ;;  %v1478_v24 = vmax.f32 %v1168_v19, 0.0 }
  0xf7   : > { %v1546_v32 = vmul.f32 %v6869_v11, %v1411_v17  ;;  %v1476_v38 = vmax.f32 %v1160_v25, 0.0  ;;  %v1412_v44 = vmax.f32 %v904_v29, 0.0  ;;  %v1610_v46 = vmul.f32 %v6869_v11, %v1475_v28 }
  0xf8   : > { %v1681_v26 = vsel %vm1674_vm1, %v1548_v22, 0.0  ;;  %v1549_v27 = vmul.f32 %v6869_v11, %v1414_v21  ;;  %v1873_v30 = vsel %vm1674_vm1, %v1612_v23, 0.0  ;;  %v1613_v42 = vmul.f32 %v6869_v11, %v1478_v24 }
  0xf9   : > { %1682 = vadd.xlane.f32.xlu1 %v1681_v26  ;;  %v6071_v31 = vpop.f32.mrb[4].mxu0  ;;  %1874 = vadd.xlane.f32.xlu0 %v1873_v30  ;;  %v6135_v34 = vpop.f32.mrb[4].mxu1  ;;  %v1675_v45 = vsel %vm1674_vm1, %v1546_v32, 0.0  ;;  %v1611_v53 = vmul.f32 %v6869_v11, %v1476_v38  ;;  %v1867_v54 = vsel %vm1674_vm1, %v1610_v46, 0.0  ;;  %v1547_v55 = vmul.f32 %v6869_v11, %v1412_v44 }
  0xfa   : > { %v916_v33 = vpop.f32.mrb[5].mxu0  ;;  %v925_v35 = vadd.f32 %v6071_v31, %v6861_v2  ;;  %v1172_v37 = vpop.f32.mrb[5].mxu1  ;;  %v1684_v39 = vsel %vm1674_vm1, %v1549_v27, 0.0  ;;  %v1181_v51 = vadd.f32 %v6135_v34, %v6861_v2  ;;  %v1876_v52 = vsel %vm1674_vm1, %v1613_v42, 0.0 }
  0xfb   : > { %v6072_v36 = vpop.f32.mrb[6].mxu0  ;;  %v6136_v43 = vpop.f32.mrb[6].mxu1  ;;  %v1870_v3 = vsel %vm1674_vm1, %v1611_v53, 0.0  ;;  %v917_v6 = vadd.f32 %v6861_v2, %v916_v33  ;;  %v1678_v7 = vsel %vm1674_vm1, %v1547_v55, 0.0  ;;  %v1173_v17 = vadd.f32 %v6861_v2, %v1172_v37 }
  0xfc   : > { %v928_v40 = vadd.f32 %v6072_v36, %v6861_v2  ;;  %v919_v41 = vpop.f32.mrb[7].mxu0  ;;  %v1175_v47 = vpop.f32.mrb[7].mxu1  ;;  %v1184_v49 = vadd.f32 %v6136_v43, %v6861_v2  ;;  %v1417_v50 = vmax.f32 %v925_v35, 0.0  ;;  %v1481_v61 = vmax.f32 %v1181_v51, 0.0 }
  0xfd   : > { %1685 = vadd.xlane.f32.xlu1 %v1684_v39  ;;  %1676 = vadd.xlane.f32.xlu0 %v1675_v45  ;;  %v920_v1 = vadd.f32 %v6861_v2, %v919_v41  ;;  %v1176_v15 = vadd.f32 %v6861_v2, %v1175_v47  ;;  %v1415_v16 = vmax.f32 %v917_v6, 0.0  ;;  %v1479_v31 = vmax.f32 %v1173_v17, 0.0 }
  0xfe   : > { %v1418_v48 = vmax.f32 %v928_v40, 0.0  ;;  %v1482_v57 = vmax.f32 %v1184_v49, 0.0  ;;  %v1552_v62 = vmul.f32 %v6869_v11, %v1417_v50  ;;  %v1616_v13 = vmul.f32 %v6869_v11, %v1481_v61 }
  0xff   : > { %v1416_v14 = vmax.f32 %v920_v1, 0.0  ;;  %v1480_v27 = vmax.f32 %v1176_v15, 0.0  ;;  %v1550_v32 = vmul.f32 %v6869_v11, %v1415_v16  ;;  %v1614_v41 = vmul.f32 %v6869_v11, %v1479_v31 }
 0x100   : > { %v1553_v58 = vmul.f32 %v6869_v11, %v1418_v48  ;;  %v1617_v10 = vmul.f32 %v6869_v11, %v1482_v57  ;;  %v1693_v12 = vsel %vm1674_vm1, %v1552_v62, 0.0  ;;  %v1885_v24 = vsel %vm1674_vm1, %v1616_v13, 0.0 }
 0x101   : > { %1877 = vadd.xlane.f32.xlu1 %v1876_v52  ;;  %v6075_v56 = vpop.f32.mrb[8].mxu0  ;;  %1868 = vadd.xlane.f32.xlu0 %v1867_v54  ;;  %v6139_v60 = vpop.f32.mrb[8].mxu1  ;;  %v1551_v28 = vmul.f32 %v6869_v11, %v1416_v14  ;;  %v1615_v39 = vmul.f32 %v6869_v11, %v1480_v27  ;;  %v1687_v40 = vsel %vm1674_vm1, %v1550_v32, 0.0 }
 0x102   : > { %v6895_v59 = vpop.f32.mrb[9].mxu0  ;;  %v6898_v0 = vpop.f32.mrb[9].mxu1  ;;  %v1696_v9 = vsel %vm1674_vm1, %v1553_v58, 0.0  ;;  %v1888_v19 = vsel %vm1674_vm1, %v1617_v10, 0.0  ;;  %v941_v23 = vadd.f32 %v6075_v56, %v6861_v2  ;;  %v1197_v37 = vadd.f32 %v6139_v60, %v6861_v2 }
 0x103   : > { %v6076_v63 = vpop.f32.mrb[10].mxu0  ;;  %v6140_v5 = vpop.f32.mrb[10].mxu1  ;;  %v1690_v38 = vsel %vm1674_vm1, %v1551_v28, 0.0  ;;  %v1882_v52 = vsel %vm1674_vm1, %v1615_v39, 0.0  ;;  %v933_v55 = vadd.f32 %v6861_v2, %v6895_v59  ;;  %v1879_v56 = vsel %vm1674_vm1, %v1614_v41, 0.0 }
 0x104   : > { %v935_v4 = vpop.f32.mrb[11].mxu0  ;;  %v6904_v8 = vpop.f32.mrb[11].mxu1  ;;  %v944_v20 = vadd.f32 %v6076_v63, %v6861_v2  ;;  %v1200_v35 = vadd.f32 %v6140_v5, %v6861_v2  ;;  %v1421_v36 = vmax.f32 %v941_v23, 0.0  ;;  %v1485_v47 = vmax.f32 %v1197_v37, 0.0 }
 0x105   : > { %1871 = vadd.xlane.f32.xlu1 %v1870_v3  ;;  %1679 = vadd.xlane.f32.xlu0 %v1678_v7  ;;  %v936_v51 = vadd.f32 %v6861_v2, %v935_v4  ;;  %v1192_v1 = vadd.f32 %v6861_v2, %v6904_v8  ;;  %v1419_v3 = vmax.f32 %v933_v55, 0.0  ;;  %v1189_v59 = vadd.f32 %v6861_v2, %v6898_v0 }
 0x106   : > { %v1422_v34 = vmax.f32 %v944_v20, 0.0  ;;  %v1486_v43 = vmax.f32 %v1200_v35, 0.0  ;;  %v1556_v48 = vmul.f32 %v6869_v11, %v1421_v36  ;;  %v1620_v62 = vmul.f32 %v6869_v11, %v1485_v47 }
 0x107   : > { %v1420_v63 = vmax.f32 %v936_v51, 0.0  ;;  %v1484_v0 = vmax.f32 %v1192_v1, 0.0  ;;  %v1483_v17 = vmax.f32 %v1189_v59, 0.0 }
 0x108   : > { %v1557_v44 = vmul.f32 %v6869_v11, %v1422_v34  ;;  %v1621_v60 = vmul.f32 %v6869_v11, %v1486_v43  ;;  %v1705_v61 = vsel %vm1674_vm1, %v1556_v48, 0.0  ;;  %v1897_v8 = vsel %vm1674_vm1, %v1620_v62, 0.0 }
 0x109   : > { %1697 = vadd.xlane.f32.xlu1 %v1696_v9  ;;  %v6079_v18 = vpop.f32.mrb[12].mxu0  ;;  %1694 = vadd.xlane.f32.xlu0 %v1693_v12  ;;  %v6916_v22 = vpop.f32.mrb[12].mxu1  ;;  %v1555_v14 = vmul.f32 %v6869_v11, %v1420_v63  ;;  %v1619_v28 = vmul.f32 %v6869_v11, %v1484_v0  ;;  %v1618_v32 = vmul.f32 %v6869_v11, %v1483_v17 }
 0x10a   : > { %v6914_v21 = vpop.f32.mrb[13].mxu0  ;;  %v6920_v26 = vpop.f32.mrb[13].mxu1  ;;  %v1708_v58 = vsel %vm1674_vm1, %v1557_v44, 0.0  ;;  %v1900_v5 = vsel %vm1674_vm1, %v1621_v60, 0.0  ;;  %v957_v10 = vadd.f32 %v6079_v18, %v6861_v2 }
 0x10b   : > { %v6080_v25 = vpop.f32.mrb[14].mxu0  ;;  %v6925_v30 = vpop.f32.mrb[14].mxu1  ;;  %v1702_v27 = vsel %vm1674_vm1, %v1555_v14, 0.0  ;;  %v1894_v43 = vsel %vm1674_vm1, %v1619_v28, 0.0  ;;  %v949_v48 = vadd.f32 %v6861_v2, %v6914_v21  ;;  %v1891_v51 = vsel %vm1674_vm1, %v1618_v32, 0.0 }
 0x10c   : > { %v6923_v29 = vpop.f32.mrb[15].mxu0  ;;  %v6928_v33 = vpop.f32.mrb[15].mxu1  ;;  %v960_v6 = vadd.f32 %v6080_v25, %v6861_v2  ;;  %v1216_v23 = vadd.f32 %v6925_v30, %v6861_v2  ;;  %v1213_v25 = vadd.f32 %v6916_v22, %v6861_v2  ;;  %v1205_v21 = vadd.f32 %v6861_v2, %v6920_v26 }
 0x10d   : > { %1889 = vadd.xlane.f32.xlu1 %v1888_v19  ;;  %1886 = vadd.xlane.f32.xlu0 %v1885_v24  ;;  %v1554_v19 = vmul.f32 %v6869_v11, %v1419_v3  ;;  %v1425_v24 = vmax.f32 %v957_v10, 0.0  ;;  %v952_v41 = vadd.f32 %v6861_v2, %v6923_v29  ;;  %v1423_v62 = vmax.f32 %v949_v48, 0.0 }
 0x10e   : > { %v1426_v18 = vmax.f32 %v960_v6, 0.0  ;;  %v1490_v35 = vmax.f32 %v1216_v23, 0.0  ;;  %v1489_v22 = vmax.f32 %v1213_v25, 0.0 }
 0x10f   : > { %v1699_v31 = vsel %vm1674_vm1, %v1554_v19, 0.0  ;;  %v1424_v60 = vmax.f32 %v952_v41, 0.0  ;;  %v1558_v19 = vmul.f32 %v6869_v11, %v1423_v62 }
 0x110   : > { %v1561_v36 = vmul.f32 %v6869_v11, %v1426_v18 }
 0x111   : > { %1691 = vadd.xlane.f32.xlu1 %v1690_v38  ;;  %v6936_v42 = vpop.f32.mrb[16].mxu0  ;;  %1688 = vadd.xlane.f32.xlu0 %v1687_v40  ;;  %v6941_v46 = vpop.f32.mrb[16].mxu1  ;;  %v1560_v38 = vmul.f32 %v6869_v11, %v1425_v24  ;;  %v1559_v0 = vmul.f32 %v6869_v11, %v1424_v60 }
 0x112   : > { %v6939_v45 = vpop.f32.mrb[17].mxu0  ;;  %v6946_v50 = vpop.f32.mrb[17].mxu1  ;;  %v1720_v55 = vsel %vm1674_vm1, %v1561_v36, 0.0  ;;  %v1229_v25 = vadd.f32 %v6941_v46, %v6861_v2 }
 0x113   : > { %v6944_v49 = vpop.f32.mrb[18].mxu0  ;;  %v6952_v54 = vpop.f32.mrb[18].mxu1  ;;  %v1717_v29 = vsel %vm1674_vm1, %v1560_v38, 0.0 }
 0x114   : > { %v6950_v53 = vpop.f32.mrb[19].mxu0  ;;  %v6957_v57 = vpop.f32.mrb[19].mxu1  ;;  %v976_v3 = vadd.f32 %v6944_v49, %v6861_v2  ;;  %v1487_v49 = vmax.f32 %v1205_v21, 0.0  ;;  %v1232_v23 = vadd.f32 %v6952_v54, %v6861_v2  ;;  %v1493_v46 = vmax.f32 %v1229_v25, 0.0 }
 0x115   : > { %1883 = vadd.xlane.f32.xlu1 %v1882_v52  ;;  %1880 = vadd.xlane.f32.xlu0 %v1879_v56  ;;  %v1625_v56 = vmul.f32 %v6869_v11, %v1490_v35 }
 0x116   : > { %v1622_v32 = vmul.f32 %v6869_v11, %v1487_v49  ;;  %v1494_v36 = vmax.f32 %v1232_v23, 0.0 }
 0x117   : > { %v1912_v1 = vsel %vm1674_vm1, %v1625_v56, 0.0 }
 0x118   : > { %v1903_v60 = vsel %vm1674_vm1, %v1622_v32, 0.0  ;;  %v1629_v21 = vmul.f32 %v6869_v11, %v1494_v36 }
 0x119   : > { %1709 = vadd.xlane.f32.xlu1 %v1708_v58  ;;  %v6967_v4 = vpop.f32.mrb[20].mxu0  ;;  %1706 = vadd.xlane.f32.xlu0 %v1705_v61  ;;  %v6973_v9 = vpop.f32.mrb[20].mxu1  ;;  %v1624_v58 = vmul.f32 %v6869_v11, %v1489_v22  ;;  %v1208_v61 = vadd.f32 %v6861_v2, %v6928_v33  ;;  %v973_v33 = vadd.f32 %v6936_v42, %v6861_v2  ;;  %v1430_v42 = vmax.f32 %v976_v3, 0.0 }
 0x11a   : > { %v6971_v7 = vpop.f32.mrb[21].mxu0  ;;  %v6979_v13 = vpop.f32.mrb[21].mxu1 }
 0x11b   : > { %v6977_v12 = vpop.f32.mrb[22].mxu0  ;;  %v6984_v16 = vpop.f32.mrb[22].mxu1  ;;  %v1909_v6 = vsel %vm1674_vm1, %v1624_v58, 0.0  ;;  %v1429_v24 = vmax.f32 %v973_v33, 0.0  ;;  %v1565_v22 = vmul.f32 %v6869_v11, %v1430_v42  ;;  %v965_v58 = vadd.f32 %v6861_v2, %v6939_v45 }
 0x11c   : > { %v6982_v15 = vpop.f32.mrb[23].mxu0  ;;  %v6987_v20 = vpop.f32.mrb[23].mxu1  ;;  %v1224_v33 = vadd.f32 %v6861_v2, %v6957_v57  ;;  %v1221_v45 = vadd.f32 %v6861_v2, %v6946_v50  ;;  %v992_v49 = vadd.f32 %v6977_v12, %v6861_v2  ;;  %v989_v57 = vadd.f32 %v6967_v4, %v6861_v2 }
 0x11d   : > { %1901 = vadd.xlane.f32.xlu1 %v1900_v5  ;;  %1898 = vadd.xlane.f32.xlu0 %v1897_v8  ;;  %v1488_v8 = vmax.f32 %v1208_v61, 0.0  ;;  %v1564_v41 = vmul.f32 %v6869_v11, %v1429_v24  ;;  %v1732_v62 = vsel %vm1674_vm1, %v1565_v22, 0.0  ;;  %v1248_v22 = vadd.f32 %v6984_v16, %v6861_v2 }
 0x11e   : > { %v1492_v25 = vmax.f32 %v1224_v33, 0.0  ;;  %v1491_v12 = vmax.f32 %v1221_v45, 0.0  ;;  %v1434_v4 = vmax.f32 %v992_v49, 0.0  ;;  %v984_v45 = vadd.f32 %v6861_v2, %v6982_v15 }
 0x11f   : > { %v1623_v28 = vmul.f32 %v6869_v11, %v1488_v8 }
 0x121   : > { %1703 = vadd.xlane.f32.xlu1 %v1702_v27  ;;  %v6997_v34 = vpop.f32.mrb[24].mxu0  ;;  %1700 = vadd.xlane.f32.xlu0 %v1699_v31  ;;  %v7002_v37 = vpop.f32.mrb[24].mxu1  ;;  %v1714_v27 = vsel %vm1674_vm1, %v1559_v0, 0.0  ;;  %v1711_v31 = vsel %vm1674_vm1, %v1558_v19, 0.0  ;;  %v1924_v0 = vsel %vm1674_vm1, %v1629_v21, 0.0  ;;  %v1498_v21 = vmax.f32 %v1248_v22, 0.0 }
 0x122   : > { %v7000_v30 = vpop.f32.mrb[25].mxu0  ;;  %v7007_v40 = vpop.f32.mrb[25].mxu1  ;;  %v1432_v22 = vmax.f32 %v984_v45, 0.0 }
 0x123   : > { %v7005_v39 = vpop.f32.mrb[26].mxu0  ;;  %v7014_v47 = vpop.f32.mrb[26].mxu1 }
 0x124   : > { %v7012_v44 = vpop.f32.mrb[27].mxu0  ;;  %v7019_v52 = vpop.f32.mrb[27].mxu1  ;;  %v1567_v45 = vmul.f32 %v6869_v11, %v1432_v22 }
 0x125   : > { %1895 = vadd.xlane.f32.xlu1 %v1894_v43  ;;  %1892 = vadd.xlane.f32.xlu0 %v1891_v51  ;;  %v968_v51 = vadd.f32 %v6861_v2, %v6950_v53  ;;  %v1729_v53 = vsel %vm1674_vm1, %v1564_v41, 0.0  ;;  %v1245_v41 = vadd.f32 %v6973_v9, %v6861_v2 }
 0x126   : > { %v1738_v22 = vsel %vm1674_vm1, %v1567_v45, 0.0 }
 0x127   : > { %v1428_v3 = vmax.f32 %v968_v51, 0.0  ;;  %v1497_v9 = vmax.f32 %v1245_v41, 0.0 }
 0x129   : > { %1721 = vadd.xlane.f32.xlu1 %v1720_v55  ;;  %v7029_v63 = vpop.f32.mrb[28].mxu0  ;;  %1718 = vadd.xlane.f32.xlu0 %v1717_v29  ;;  %v7036_v5 = vpop.f32.mrb[28].mxu1  ;;  %v1906_v55 = vsel %vm1674_vm1, %v1623_v28, 0.0 }
 0x12a   : > { %v7034_v59 = vpop.f32.mrb[29].mxu0  ;;  %v7043_v26 = vpop.f32.mrb[29].mxu1 }
 0x12b   : > { %v7041_v10 = vpop.f32.mrb[30].mxu0  ;;  %v7048_v17 = vpop.f32.mrb[30].mxu1 }
 0x12c   : > { %v7046_v14 = vpop.f32.mrb[31].mxu0  ;;  %v7051_v18 = vpop.f32.mrb[31].mxu1 }
 0x12d   : > { %1913 = vadd.xlane.f32.xlu1 %v1912_v1  ;;  %1910 = vadd.xlane.f32.xlu0 %v1909_v6  ;;  %v1628_v1 = vmul.f32 %v6869_v11, %v1493_v46  ;;  %v1427_v6 = vmax.f32 %v965_v58, 0.0  ;;  %v1433_v46 = vmax.f32 %v989_v57, 0.0 }
 0x12f   : > { %v1921_v23 = vsel %vm1674_vm1, %v1628_v1, 0.0  ;;  %v1562_v32 = vmul.f32 %v6869_v11, %v1427_v6 }
 0x131   : > { %1715 = vadd.xlane.f32.xlu1 %v1714_v27  ;;  %v7061_v35 = vpop.f32.mrb[32].mxu0  ;;  %1712 = vadd.xlane.f32.xlu0 %v1711_v31  ;;  %v7066_v38 = vpop.f32.mrb[32].mxu1  ;;  %v1563_v27 = vmul.f32 %v6869_v11, %v1428_v3  ;;  %v1723_v58 = vsel %vm1674_vm1, %v1562_v32, 0.0  ;;  %v1568_v3 = vmul.f32 %v6869_v11, %v1433_v46  ;;  %v1633_v32 = vmul.f32 %v6869_v11, %v1498_v21 }
 0x132   : > { %v7064_v54 = vpop.f32.mrb[33].mxu0  ;;  %v7071_v48 = vpop.f32.mrb[33].mxu1  ;;  %v1240_v46 = vadd.f32 %v6861_v2, %v6987_v20  ;;  %v1005_v20 = vadd.f32 %v6997_v34, %v6861_v2 }
 0x133   : > { %v7069_v43 = vpop.f32.mrb[34].mxu0  ;;  %v7078_v29 = vpop.f32.mrb[34].mxu1  ;;  %v1726_v51 = vsel %vm1674_vm1, %v1563_v27, 0.0  ;;  %v1741_v15 = vsel %vm1674_vm1, %v1568_v3, 0.0 }
 0x134   : > { %v7076_v56 = vpop.f32.mrb[35].mxu0  ;;  %v7083_v61 = vpop.f32.mrb[35].mxu1  ;;  %v1496_v3 = vmax.f32 %v1240_v46, 0.0 }
 0x135   : > { %1907 = vadd.xlane.f32.xlu1 %v1906_v55  ;;  %1904 = vadd.xlane.f32.xlu0 %v1903_v60  ;;  %v1627_v55 = vmul.f32 %v6869_v11, %v1492_v25  ;;  %v1626_v60 = vmul.f32 %v6869_v11, %v1491_v12 }
 0x136   : > { %v1631_v46 = vmul.f32 %v6869_v11, %v1496_v3 }
 0x137   : > { %v1915_v25 = vsel %vm1674_vm1, %v1626_v60, 0.0 }
 0x139   : > { %1733 = vadd.xlane.f32.xlu1 %v1732_v62  ;;  %v7093_v8 = vpop.f32.mrb[36].mxu0  ;;  %1730 = vadd.xlane.f32.xlu0 %v1729_v53  ;;  %v7100_v42 = vpop.f32.mrb[36].mxu1  ;;  %v1569_v53 = vmul.f32 %v6869_v11, %v1434_v4  ;;  %v1632_v4 = vmul.f32 %v6869_v11, %v1497_v9 }
 0x13a   : > { %v7098_v19 = vpop.f32.mrb[37].mxu0  ;;  %v7107_v50 = vpop.f32.mrb[37].mxu1 }
 0x13b   : > { %v7105_v24 = vpop.f32.mrb[38].mxu0  ;;  %v7112_v31 = vpop.f32.mrb[38].mxu1  ;;  %v1744_v12 = vsel %vm1674_vm1, %v1569_v53, 0.0  ;;  %v1933_v53 = vsel %vm1674_vm1, %v1632_v4, 0.0  ;;  %v1261_v4 = vadd.f32 %v7002_v37, %v6861_v2 }
 0x13c   : > { %v7110_v28 = vpop.f32.mrb[39].mxu0  ;;  %v7115_v36 = vpop.f32.mrb[39].mxu1 }
 0x13d   : > { %1925 = vadd.xlane.f32.xlu1 %v1924_v0  ;;  %1922 = vadd.xlane.f32.xlu0 %v1921_v23  ;;  %v1918_v0 = vsel %vm1674_vm1, %v1627_v55, 0.0  ;;  %v981_v23 = vadd.f32 %v6861_v2, %v6971_v7  ;;  %v1237_v7 = vadd.f32 %v6861_v2, %v6979_v13  ;;  %v1936_v55 = vsel %vm1674_vm1, %v1633_v32, 0.0 }
 0x13e   : > { %v1264_v32 = vadd.f32 %v7014_v47, %v6861_v2  ;;  %v1501_v37 = vmax.f32 %v1261_v4, 0.0 }
 0x13f   : > { %v1431_v41 = vmax.f32 %v981_v23, 0.0 }
 0x141   : > { %1727 = vadd.xlane.f32.xlu1 %v1726_v51  ;;  %v7125_v62 = vpop.f32.mrb[40].mxu0  ;;  %1724 = vadd.xlane.f32.xlu0 %v1723_v58  ;;  %v7130_v1 = vpop.f32.mrb[40].mxu1  ;;  %v1008_v58 = vadd.f32 %v7005_v39, %v6861_v2  ;;  %v1495_v39 = vmax.f32 %v1237_v7, 0.0 }
 0x142   : > { %v7128_v16 = vpop.f32.mrb[41].mxu0  ;;  %v7135_v6 = vpop.f32.mrb[41].mxu1 }
 0x143   : > { %v7133_v33 = vpop.f32.mrb[42].mxu0  ;;  %v7142_v57 = vpop.f32.mrb[42].mxu1  ;;  %v1438_v34 = vmax.f32 %v1008_v58, 0.0  ;;  %v1502_v58 = vmax.f32 %v1264_v32, 0.0 }
 0x144   : > { %v7140_v49 = vpop.f32.mrb[43].mxu0  ;;  %v7147_v27 = vpop.f32.mrb[43].mxu1 }
 0x145   : > { %1919 = vadd.xlane.f32.xlu1 %v1918_v0  ;;  %1916 = vadd.xlane.f32.xlu0 %v1915_v25  ;;  %v1566_v25 = vmul.f32 %v6869_v11, %v1431_v41  ;;  %v1630_v41 = vmul.f32 %v6869_v11, %v1495_v39  ;;  %v1000_v39 = vadd.f32 %v6861_v2, %v7012_v44 }
 0x147   : > { %v1735_v7 = vsel %vm1674_vm1, %v1566_v25, 0.0  ;;  %v1930_v25 = vsel %vm1674_vm1, %v1631_v46, 0.0  ;;  %v1927_v4 = vsel %vm1674_vm1, %v1630_v41, 0.0  ;;  %v1636_v46 = vmul.f32 %v6869_v11, %v1501_v37 }
 0x149   : > { %1745 = vadd.xlane.f32.xlu1 %v1744_v12  ;;  %v7157_v51 = vpop.f32.mrb[44].mxu0  ;;  %1742 = vadd.xlane.f32.xlu0 %v1741_v15  ;;  %v7164_v21 = vpop.f32.mrb[44].mxu1  ;;  %v1437_v15 = vmax.f32 %v1005_v20, 0.0 }
 0x14a   : > { %v7162_v60 = vpop.f32.mrb[45].mxu0  ;;  %v7171_v13 = vpop.f32.mrb[45].mxu1 }
 0x14b   : > { %v7169_v9 = vpop.f32.mrb[46].mxu0  ;;  %10665 = vst [vmem:[#allocation5_spill] sm:$0xff] %v7171_v13  ;;  %v7176_v23 = vpop.f32.mrb[46].mxu1  ;;  %v1572_v45 = vmul.f32 %v6869_v11, %v1437_v15 }
 0x14c   : > { %v7174_v0 = vpop.f32.mrb[47].mxu0  ;;  %v7179_v12 = vpop.f32.mrb[47].mxu1 }
 0x14d   : > { %1937 = vadd.xlane.f32.xlu1 %v1936_v55  ;;  %1934 = vadd.xlane.f32.xlu0 %v1933_v53  ;;  %v1573_v53 = vmul.f32 %v6869_v11, %v1438_v34  ;;  %v997_v34 = vadd.f32 %v6861_v2, %v7000_v30  ;;  %v1753_v44 = vsel %vm1674_vm1, %v1572_v45, 0.0  ;;  %v1253_v30 = vadd.f32 %v6861_v2, %v7007_v40 }
 0x151   : > { %1739 = vadd.xlane.f32.xlu1 %v1738_v22  ;;  %v7189_v55 = vpop.f32.mrb[48].mxu0  ;;  %1736 = vadd.xlane.f32.xlu0 %v1735_v7  ;;  %v7194_v20 = vpop.f32.mrb[48].mxu1  ;;  %v1756_v7 = vsel %vm1674_vm1, %v1573_v53, 0.0 }
 0x152   : > { %v7192_v47 = vpop.f32.mrb[49].mxu0  ;;  %10667 = vst [vmem:[#allocation7_spill] sm:$0xff] %v7194_v20  ;;  %v7199_v3 = vpop.f32.mrb[49].mxu1  ;;  %v1435_v20 = vmax.f32 %v997_v34, 0.0 }
 0x153   : > { %10666 = vst [vmem:[#allocation6_spill] sm:$0xff] %v7192_v47  ;;  %v7197_v13 = vpop.f32.mrb[50].mxu0  ;;  %10668 = vst [vmem:[#allocation8_spill] sm:$0xff] %v7199_v3  ;;  %v7206_v32 = vpop.f32.mrb[50].mxu1  ;;  %v1637_v3 = vmul.f32 %v6869_v11, %v1502_v58  ;;  %v1436_v47 = vmax.f32 %v1000_v39, 0.0  ;;  %v1024_v58 = vadd.f32 %v7041_v10, %v6861_v2  ;;  %v1945_v39 = vsel %vm1674_vm1, %v1636_v46, 0.0 }
 0x154   : > { %v7204_v22 = vpop.f32.mrb[51].mxu0  ;;  %v7211_v15 = vpop.f32.mrb[51].mxu1  ;;  %v1499_v10 = vmax.f32 %v1253_v30, 0.0  ;;  %v1280_v46 = vadd.f32 %v7048_v17, %v6861_v2 }
 0x155   : > { %10669 = vst [vmem:[#allocation9_spill] sm:$0xff] %v7204_v22  ;;  %1931 = vadd.xlane.f32.xlu1 %v1930_v25  ;;  %1928 = vadd.xlane.f32.xlu0 %v1927_v4  ;;  %v1256_v22 = vadd.f32 %v6861_v2, %v7019_v52  ;;  %v1948_v53 = vsel %vm1674_vm1, %v1637_v3, 0.0  ;;  %v1021_v52 = vadd.f32 %v7029_v63, %v6861_v2  ;;  %v1442_v63 = vmax.f32 %v1024_v58, 0.0 }
 0x156   : > { %v1571_v4 = vmul.f32 %v6869_v11, %v1436_v47  ;;  %v1506_v58 = vmax.f32 %v1280_v46, 0.0 }
 0x157   : > { %v1500_v34 = vmax.f32 %v1256_v22, 0.0  ;;  %v1277_v22 = vadd.f32 %v7036_v5, %v6861_v2 }
 0x158   : > { %v1750_v47 = vsel %vm1674_vm1, %v1571_v4, 0.0 }
 0x159   : > { %1757 = vadd.xlane.f32.xlu1 %v1756_v7  ;;  %v7221_v41 = vpop.f32.mrb[52].mxu0  ;;  %1754 = vadd.xlane.f32.xlu0 %v1753_v44  ;;  %v7228_v37 = vpop.f32.mrb[52].mxu1  ;;  %v1570_v44 = vmul.f32 %v6869_v11, %v1435_v20  ;;  %v1634_v20 = vmul.f32 %v6869_v11, %v1499_v10  ;;  %v1505_v5 = vmax.f32 %v1277_v22, 0.0  ;;  %v1016_v10 = vadd.f32 %v6861_v2, %v7046_v14 }
 0x15a   : > { %v7226_v45 = vpop.f32.mrb[53].mxu0  ;;  %10671 = vst [vmem:[#allocation11_spill] sm:$0xff] %v7228_v37  ;;  %v7235_v40 = vpop.f32.mrb[53].mxu1  ;;  %v1441_v37 = vmax.f32 %v1021_v52, 0.0 }
 0x15b   : > { %10670 = vst [vmem:[#allocation10_spill] sm:$0xff] %v7226_v45  ;;  %v7233_v25 = vpop.f32.mrb[54].mxu0  ;;  %10672 = vst [vmem:[#allocation12_spill] sm:$0xff] %v7235_v40  ;;  %v7240_v7 = vpop.f32.mrb[54].mxu1  ;;  %v1635_v40 = vmul.f32 %v6869_v11, %v1500_v34  ;;  %v1747_v30 = vsel %vm1674_vm1, %v1570_v44, 0.0  ;;  %v1939_v22 = vsel %vm1674_vm1, %v1634_v20, 0.0 }
 0x15c   : > { %v7238_v3 = vpop.f32.mrb[55].mxu0  ;;  %v7243_v45 = vpop.f32.mrb[55].mxu1  ;;  %v1576_v4 = vmul.f32 %v6869_v11, %v1441_v37 }
 0x15d   : > { %1949 = vadd.xlane.f32.xlu1 %v1948_v53  ;;  %10673 = vst [vmem:[#allocation13_spill] sm:$0xff] %v7243_v45  ;;  %1946 = vadd.xlane.f32.xlu0 %v1945_v39  ;;  %v1577_v39 = vmul.f32 %v6869_v11, %v1442_v63  ;;  %v1942_v44 = vsel %vm1674_vm1, %v1635_v40, 0.0  ;;  %v1013_v63 = vadd.f32 %v6861_v2, %v7034_v59 }
 0x15e   : > { %v1765_v14 = vsel %vm1674_vm1, %v1576_v4, 0.0  ;;  %v1640_v40 = vmul.f32 %v6869_v11, %v1505_v5  ;;  %v1269_v59 = vadd.f32 %v6861_v2, %v7043_v26 }
 0x161   : > { %1751 = vadd.xlane.f32.xlu1 %v1750_v47  ;;  %v7253_v53 = vpop.f32.mrb[56].mxu0  ;;  %1748 = vadd.xlane.f32.xlu0 %v1747_v30  ;;  %v7258_v52 = vpop.f32.mrb[56].mxu1  ;;  %v1768_v30 = vsel %vm1674_vm1, %v1577_v39, 0.0 }
 0x162   : > { %v7256_v17 = vpop.f32.mrb[57].mxu0  ;;  %10675 = vst [vmem:[#allocation15_spill] sm:$0xff] %v7258_v52  ;;  %v7263_v34 = vpop.f32.mrb[57].mxu1  ;;  %v1439_v52 = vmax.f32 %v1013_v63, 0.0 }
 0x163   : > { %10674 = vst [vmem:[#allocation14_spill] sm:$0xff] %v7256_v17  ;;  %v7261_v45 = vpop.f32.mrb[58].mxu0  ;;  %10676 = vst [vmem:[#allocation16_spill] sm:$0xff] %v7263_v34  ;;  %v7270_v46 = vpop.f32.mrb[58].mxu1  ;;  %v1641_v34 = vmul.f32 %v6869_v11, %v1506_v58  ;;  %v1440_v17 = vmax.f32 %v1016_v10, 0.0  ;;  %v1040_v58 = vadd.f32 %v7069_v43, %v6861_v2  ;;  %v1957_v10 = vsel %vm1674_vm1, %v1640_v40, 0.0 }
 0x164   : > { %v7268_v47 = vpop.f32.mrb[59].mxu0  ;;  %v7275_v37 = vpop.f32.mrb[59].mxu1  ;;  %v1503_v43 = vmax.f32 %v1269_v59, 0.0  ;;  %v1296_v40 = vadd.f32 %v7078_v29, %v6861_v2 }
 0x165   : > { %10677 = vst [vmem:[#allocation17_spill] sm:$0xff] %v7268_v47  ;;  %1943 = vadd.xlane.f32.xlu1 %v1942_v44  ;;  %1940 = vadd.xlane.f32.xlu0 %v1939_v22  ;;  %v1272_v47 = vadd.f32 %v6861_v2, %v7051_v18  ;;  %v1960_v39 = vsel %vm1674_vm1, %v1641_v34, 0.0  ;;  %v1037_v18 = vadd.f32 %v7061_v35, %v6861_v2  ;;  %v1446_v35 = vmax.f32 %v1040_v58, 0.0 }
 0x166   : > { %v1575_v22 = vmul.f32 %v6869_v11, %v1440_v17 }
 0x167   : > { %v1504_v63 = vmax.f32 %v1272_v47, 0.0  ;;  %v1293_v47 = vadd.f32 %v7066_v38, %v6861_v2  ;;  %v1581_v58 = vmul.f32 %v6869_v11, %v1446_v35 }
 0x168   : > { %v1762_v17 = vsel %vm1674_vm1, %v1575_v22, 0.0 }
 0x169   : > { %1769 = vadd.xlane.f32.xlu1 %v1768_v30  ;;  %v7285_v20 = vpop.f32.mrb[60].mxu0  ;;  %1766 = vadd.xlane.f32.xlu0 %v1765_v14  ;;  %v7292_v5 = vpop.f32.mrb[60].mxu1  ;;  %v1574_v14 = vmul.f32 %v6869_v11, %v1439_v52  ;;  %v1638_v52 = vmul.f32 %v6869_v11, %v1503_v43  ;;  %v1780_v43 = vsel %vm1674_vm1, %v1581_v58, 0.0 }
 0x16a   : > { %v7290_v4 = vpop.f32.mrb[61].mxu0  ;;  %10679 = vst [vmem:[#allocation19_spill] sm:$0xff] %v7292_v5  ;;  %v7299_v26 = vpop.f32.mrb[61].mxu1  ;;  %v1445_v5 = vmax.f32 %v1037_v18, 0.0  ;;  %v1032_v18 = vadd.f32 %v6861_v2, %v7076_v56  ;;  %v1288_v56 = vadd.f32 %v6861_v2, %v7083_v61 }
 0x16b   : > { %10678 = vst [vmem:[#allocation18_spill] sm:$0xff] %v7290_v4  ;;  %v7297_v44 = vpop.f32.mrb[62].mxu0  ;;  %10680 = vst [vmem:[#allocation20_spill] sm:$0xff] %v7299_v26  ;;  %v7304_v30 = vpop.f32.mrb[62].mxu1  ;;  %v1639_v26 = vmul.f32 %v6869_v11, %v1504_v63  ;;  %v1759_v59 = vsel %vm1674_vm1, %v1574_v14, 0.0  ;;  %v1029_v63 = vadd.f32 %v6861_v2, %v7064_v54  ;;  %v1951_v22 = vsel %vm1674_vm1, %v1638_v52, 0.0 }
 0x16c   : > { %v7302_v34 = vpop.f32.mrb[63].mxu0  ;;  %v7307_v4 = vpop.f32.mrb[63].mxu1  ;;  %v1580_v29 = vmul.f32 %v6869_v11, %v1445_v5  ;;  %v1285_v54 = vadd.f32 %v6861_v2, %v7071_v48 }
 0x16d   : > { %1961 = vadd.xlane.f32.xlu1 %v1960_v39  ;;  %1958 = vadd.xlane.f32.xlu0 %v1957_v10  ;;  %v1510_v39 = vmax.f32 %v1296_v40, 0.0  ;;  %v1509_v10 = vmax.f32 %v1293_v47, 0.0  ;;  %v1954_v38 = vsel %vm1674_vm1, %v1639_v26, 0.0  ;;  %v1444_v40 = vmax.f32 %v1032_v18, 0.0 }
 0x16e   : > { %v1777_v35 = vsel %vm1674_vm1, %v1580_v29, 0.0  ;;  %v1443_v26 = vmax.f32 %v1029_v63, 0.0  ;;  %v1507_v61 = vmax.f32 %v1285_v54, 0.0  ;;  %v1312_v29 = vadd.f32 %v7112_v31, %v6861_v2 }
 0x16f   : > { %v1645_v14 = vmul.f32 %v6869_v11, %v1510_v39  ;;  %v1644_v5 = vmul.f32 %v6869_v11, %v1509_v10  ;;  %v1508_v39 = vmax.f32 %v1288_v56, 0.0  ;;  %v1579_v58 = vmul.f32 %v6869_v11, %v1444_v40 }
 0x170   : > { %v1578_v10 = vmul.f32 %v6869_v11, %v1443_v26  ;;  %v1045_v40 = vadd.f32 %v6861_v2, %v7098_v19  ;;  %v1304_v19 = vadd.f32 %v6861_v2, %v7115_v36 }
 0x171   : > { %1763 = vadd.xlane.f32.xlu1 %v1762_v17  ;;  %1760 = vadd.xlane.f32.xlu0 %v1759_v59  ;;  %v1972_v47 = vsel %vm1674_vm1, %v1645_v14, 0.0  ;;  %v1056_v17 = vadd.f32 %v7105_v24, %v6861_v2  ;;  %v1053_v59 = vadd.f32 %v7093_v8, %v6861_v2  ;;  %v1969_v52 = vsel %vm1674_vm1, %v1644_v5, 0.0 }
 0x172   : > { %v1309_v24 = vadd.f32 %v7100_v42, %v6861_v2  ;;  %v1774_v8 = vsel %vm1674_vm1, %v1579_v58, 0.0  ;;  %v1771_v63 = vsel %vm1674_vm1, %v1578_v10, 0.0  ;;  %v1048_v5 = vadd.f32 %v6861_v2, %v7110_v28  ;;  %v7370_v58 = vld [vmem:[%s10375_s2] ss:$0 sm:$0xff] }
 0x173   : > { %v1450_v48 = vmax.f32 %v1056_v17, 0.0  ;;  %v1449_v18 = vmax.f32 %v1053_v59, 0.0  ;;  %v1069_v2 = vadd.f32 %v7370_v58, %v7125_v62  ;;  %v1328_v62 = vadd.f32 %v7370_v58, %v7142_v57 }
 0x175   : > { %1955 = vadd.xlane.f32.xlu1 %v1954_v38  ;;  %1952 = vadd.xlane.f32.xlu0 %v1951_v22  ;;  %v1643_v38 = vmul.f32 %v6869_v11, %v1508_v39  ;;  %v1642_v22 = vmul.f32 %v6869_v11, %v1507_v61  ;;  %v1585_v14 = vmul.f32 %v6869_v11, %v1450_v48  ;;  %v1447_v39 = vmax.f32 %v1045_v40, 0.0 }
 0x176   : > { %v1584_v31 = vmul.f32 %v6869_v11, %v1449_v18  ;;  %v1301_v61 = vadd.f32 %v7370_v58, %v7107_v50  ;;  %v1512_v18 = vmax.f32 %v1304_v19, 0.0  ;;  %v7387_v50 = vld [vmem:[%s10376_s3] ss:$0 sm:$0xff] }
 0x177   : > { %v1966_v42 = vsel %vm1674_vm1, %v1643_v38, 0.0  ;;  %v1963_v56 = vsel %vm1674_vm1, %v1642_v22, 0.0  ;;  %v1792_v54 = vsel %vm1674_vm1, %v1585_v14, 0.0  ;;  %v1582_v38 = vmul.f32 %v7387_v50, %v1447_v39 }
 0x178   : > { %v1789_v59 = vsel %vm1674_vm1, %v1584_v31, 0.0  ;;  %v1453_v22 = vmax.f32 %v1069_v2, 0.0  ;;  %v1325_v14 = vadd.f32 %v7370_v58, %v7130_v1  ;;  %v1647_v31 = vmul.f32 %v7387_v50, %v1512_v18 }
 0x179   : > { %1781 = vadd.xlane.f32.xlu1 %v1780_v43  ;;  %1778 = vadd.xlane.f32.xlu0 %v1777_v35  ;;  %v1514_v43 = vmax.f32 %v1312_v29, 0.0  ;;  %v1513_v35 = vmax.f32 %v1309_v24, 0.0 }
 0x17a   : > { %v1588_v1 = vmul.f32 %v7387_v50, %v1453_v22  ;;  %v1085_v22 = vadd.f32 %v7370_v58, %v7157_v51  ;;  %v1341_v51 = vadd.f32 %v7370_v58, %v7164_v21 }
 0x17b   : > { %v1648_v28 = vmul.f32 %v6869_v11, %v1513_v35 }
 0x17c   : > { %v1801_v2 = vsel %vm1674_vm1, %v1588_v1, 0.0 }
 0x17d   : > { %1973 = vadd.xlane.f32.xlu1 %v1972_v47  ;;  %1970 = vadd.xlane.f32.xlu0 %v1969_v52  ;;  %v1649_v47 = vmul.f32 %v6869_v11, %v1514_v43  ;;  %v1448_v52 = vmax.f32 %v1048_v5, 0.0  ;;  %v1072_v11 = vadd.f32 %v7370_v58, %v7133_v33  ;;  %v1981_v36 = vsel %vm1674_vm1, %v1648_v28, 0.0 }
 0x17e   : > { %v1783_v5 = vsel %vm1674_vm1, %v1582_v38, 0.0  ;;  %v1978_v28 = vsel %vm1674_vm1, %v1647_v31, 0.0 }
 0x17f   : > { %v1984_v48 = vsel %vm1674_vm1, %v1649_v47, 0.0  ;;  %v1583_v24 = vmul.f32 %v7387_v50, %v1448_v52  ;;  %v1061_v52 = vadd.f32 %v7370_v58, %v7128_v16  ;;  %v1320_v16 = vadd.f32 %v7370_v58, %v7147_v27 }
 0x181   : > { %1775 = vadd.xlane.f32.xlu1 %v1774_v8  ;;  %1772 = vadd.xlane.f32.xlu0 %v1771_v63  ;;  %v1511_v8 = vmax.f32 %v1301_v61, 0.0  ;;  %v1454_v63 = vmax.f32 %v1072_v11, 0.0  ;;  %v1786_v35 = vsel %vm1674_vm1, %v1583_v24, 0.0  ;;  %v1451_v18 = vmax.f32 %v1061_v52, 0.0 }
 0x182   : > { %v1317_v24 = vadd.f32 %v7370_v58, %v7135_v6 }
 0x183   : > { %v1589_v57 = vmul.f32 %v7387_v50, %v1454_v63  ;;  %v1088_v63 = vadd.f32 %v7370_v58, %v7169_v9  ;;  %v1586_v31 = vmul.f32 %v7387_v50, %v1451_v18  ;;  %v1344_v9 = vadd.f32 %v7370_v58, %v7176_v23 }
 0x184   : > { %v1515_v6 = vmax.f32 %v1317_v24, 0.0 }
 0x185   : > { %1967 = vadd.xlane.f32.xlu1 %v1966_v42  ;;  %1964 = vadd.xlane.f32.xlu0 %v1963_v56  ;;  %v1646_v42 = vmul.f32 %v7387_v50, %v1511_v8  ;;  %v1518_v56 = vmax.f32 %v1328_v62, 0.0  ;;  %v1804_v61 = vsel %vm1674_vm1, %v1589_v57, 0.0 }
 0x186   : > { %v7357_v26 = vpop.xlane.xlu1 %1682  ;;  %v7361_v17 = vpop.xlane.xlu0 %1874 }
 0x187   : > { %10681 = vst [vmem:[#allocation21_spill] sm:$0xff] %v7357_v26  ;;  %10682 = vst [vmem:[#allocation22_spill] sm:$0xff] %v7361_v17  ;;  %v1975_v19 = vsel %vm1674_vm1, %v1646_v42, 0.0  ;;  %v1458_v42 = vmax.f32 %v1088_v63, 0.0 }
 0x189   : > { %1793 = vadd.xlane.f32.xlu1 %v1792_v54  ;;  %1790 = vadd.xlane.f32.xlu0 %v1789_v59  ;;  %v1517_v54 = vmax.f32 %v1325_v14, 0.0  ;;  %v1064_v59 = vadd.f32 %v7370_v58, %v7140_v49  ;;  %v1516_v14 = vmax.f32 %v1320_v16, 0.0  ;;  %v1593_v23 = vmul.f32 %v7387_v50, %v1458_v42 }
 0x18a   : > { %v7374_v10 = vpop.xlane.xlu1 %1685  ;;  %v7379_v29 = vpop.xlane.xlu0 %1676 }
 0x18b   : > { %10683 = vst [vmem:[#allocation23_spill] sm:$0xff] %v7374_v10  ;;  %10684 = vst [vmem:[#allocation24_spill] sm:$0xff] %v7379_v29  ;;  %v1652_v49 = vmul.f32 %v7387_v50, %v1517_v54  ;;  %v1651_v1 = vmul.f32 %v7387_v50, %v1516_v14  ;;  %v1816_v24 = vsel %vm1674_vm1, %v1593_v23, 0.0 }
 0x18d   : > { %1985 = vadd.xlane.f32.xlu1 %v1984_v48  ;;  %1982 = vadd.xlane.f32.xlu0 %v1981_v36  ;;  %v1653_v48 = vmul.f32 %v7387_v50, %v1518_v56  ;;  %v1452_v36 = vmax.f32 %v1064_v59, 0.0  ;;  %v1993_v27 = vsel %vm1674_vm1, %v1652_v49, 0.0  ;;  %v1457_v56 = vmax.f32 %v1085_v22, 0.0 }
 0x18e   : > { %v7391_v33 = vpop.xlane.xlu1 %1877  ;;  %v7395_v43 = vpop.xlane.xlu0 %1868  ;;  %v1795_v59 = vsel %vm1674_vm1, %v1586_v31, 0.0  ;;  %v1990_v49 = vsel %vm1674_vm1, %v1651_v1, 0.0 }
 0x18f   : > { %10685 = vst [vmem:[#allocation25_spill] sm:$0xff] %v7391_v33  ;;  %10686 = vst [vmem:[#allocation26_spill] sm:$0xff] %v7395_v43  ;;  %v1996_v38 = vsel %vm1674_vm1, %v1653_v48, 0.0  ;;  %v1592_v21 = vmul.f32 %v7387_v50, %v1457_v56 }
 0x191   : > { %1787 = vadd.xlane.f32.xlu1 %v1786_v35  ;;  %1784 = vadd.xlane.f32.xlu0 %v1783_v5  ;;  %v1587_v35 = vmul.f32 %v7387_v50, %v1452_v36  ;;  %v1077_v36 = vadd.f32 %v7370_v58, %v7162_v60  ;;  %v1813_v22 = vsel %vm1674_vm1, %v1592_v21, 0.0  ;;  %v1336_v60 = vadd.f32 %v7370_v58, %v7179_v12 }
 0x192   : > { %v7403_v40 = vpop.xlane.xlu1 %1871  ;;  %v7406_v47 = vpop.xlane.xlu0 %1679 }
 0x193   : > { %10687 = vst [vmem:[#allocation27_spill] sm:$0xff] %v7403_v40  ;;  %10688 = vst [vmem:[#allocation28_spill] sm:$0xff] %v7406_v47  ;;  %v1798_v54 = vsel %vm1674_vm1, %v1587_v35, 0.0  ;;  %v1455_v14 = vmax.f32 %v1077_v36, 0.0  ;;  %v10698_v35 = vld [vmem:[#allocation5_spill] sm:$0xff] }
 0x195   : > { %1979 = vadd.xlane.f32.xlu1 %v1978_v28  ;;  %1976 = vadd.xlane.f32.xlu0 %v1975_v19  ;;  %v1650_v28 = vmul.f32 %v7387_v50, %v1515_v6  ;;  %v1522_v19 = vmax.f32 %v1344_v9, 0.0  ;;  %v1333_v6 = vadd.f32 %v7370_v58, %v10698_v35  ;;  %v1104_v9 = vadd.f32 %v7370_v58, %v7197_v13 }
 0x196   : > { %v7415_v39 = vpop.xlane.xlu1 %1697  ;;  %v7419_v11 = vpop.xlane.xlu0 %1694  ;;  %v1360_v13 = vadd.f32 %v7370_v58, %v7206_v32 }
 0x197   : > { %10689 = vst [vmem:[#allocation29_spill] sm:$0xff] %v7415_v39  ;;  %10690 = vst [vmem:[#allocation30_spill] sm:$0xff] %v7419_v11  ;;  %v1987_v16 = vsel %vm1674_vm1, %v1650_v28, 0.0  ;;  %v1590_v28 = vmul.f32 %v7387_v50, %v1455_v14  ;;  %v1462_v23 = vmax.f32 %v1104_v9, 0.0  ;;  %v10706_v14 = vld [vmem:[#allocation9_spill] sm:$0xff] }
 0x198   : > { %v1096_v35 = vadd.f32 %v7370_v58, %v10706_v14 }
 0x199   : > { %1805 = vadd.xlane.f32.xlu1 %v1804_v61  ;;  %1802 = vadd.xlane.f32.xlu0 %v1801_v2  ;;  %v1521_v61 = vmax.f32 %v1341_v51, 0.0  ;;  %v1080_v2 = vadd.f32 %v7370_v58, %v7174_v0  ;;  %v1101_v51 = vadd.f32 %v7370_v58, %v7189_v55  ;;  %v10703_v55 = vld [vmem:[#allocation7_spill] sm:$0xff]  ;;  %v1597_v32 = vmul.f32 %v7387_v50, %v1462_v23 }
 0x19a   : > { %v7427_v8 = vpop.xlane.xlu1 %1889  ;;  %v7432_v62 = vpop.xlane.xlu0 %1886 }
 0x19b   : > { %10691 = vst [vmem:[#allocation31_spill] sm:$0xff] %v7427_v8  ;;  %10692 = vst [vmem:[#allocation32_spill] sm:$0xff] %v7432_v62  ;;  %v1656_v0 = vmul.f32 %v7387_v50, %v1521_v61  ;;  %v1461_v61 = vmax.f32 %v1101_v51, 0.0 }
 0x19d   : > { %1997 = vadd.xlane.f32.xlu1 %v1996_v38  ;;  %1994 = vadd.xlane.f32.xlu0 %v1993_v27  ;;  %v1657_v38 = vmul.f32 %v7387_v50, %v1522_v19  ;;  %v1456_v27 = vmax.f32 %v1080_v2, 0.0  ;;  %v2005_v12 = vsel %vm1674_vm1, %v1656_v0, 0.0  ;;  %v1357_v2 = vadd.f32 %v7370_v58, %v10703_v55 }
 0x19e   : > { %v7439_v5 = vpop.xlane.xlu1 %1691  ;;  %v7443_v57 = vpop.xlane.xlu0 %1688 }
 0x19f   : > { %10693 = vst [vmem:[#allocation33_spill] sm:$0xff] %v7439_v5  ;;  %10694 = vst [vmem:[#allocation34_spill] sm:$0xff] %v7443_v57  ;;  %v2008_v42 = vsel %vm1674_vm1, %v1657_v38, 0.0  ;;  %v1591_v1 = vmul.f32 %v7387_v50, %v1456_v27  ;;  %v1525_v0 = vmax.f32 %v1357_v2, 0.0  ;;  %v10709_v2 = vld [vmem:[#allocation8_spill] sm:$0xff] }
 0x1a1   : > { %1799 = vadd.xlane.f32.xlu1 %v1798_v54  ;;  %1796 = vadd.xlane.f32.xlu0 %v1795_v59  ;;  %v1520_v54 = vmax.f32 %v1336_v60, 0.0  ;;  %v1519_v59 = vmax.f32 %v1333_v6, 0.0  ;;  %v1596_v60 = vmul.f32 %v7387_v50, %v1461_v61  ;;  %v1352_v61 = vadd.f32 %v7370_v58, %v7211_v15 }
 0x1a2   : > { %v7451_v52 = vpop.xlane.xlu1 %1883  ;;  %v7454_v48 = vpop.xlane.xlu0 %1880 }
 0x1a3   : > { %10695 = vst [vmem:[#allocation35_spill] sm:$0xff] %v7451_v52  ;;  %10696 = vst [vmem:[#allocation36_spill] sm:$0xff] %v7454_v48  ;;  %v1655_v36 = vmul.f32 %v7387_v50, %v1520_v54  ;;  %v1825_v23 = vsel %vm1674_vm1, %v1596_v60, 0.0  ;;  %v1524_v60 = vmax.f32 %v1352_v61, 0.0 }
 0x1a5   : > { %1991 = vadd.xlane.f32.xlu1 %v1990_v49  ;;  %1988 = vadd.xlane.f32.xlu0 %v1987_v16  ;;  %v1810_v49 = vsel %vm1674_vm1, %v1591_v1, 0.0  ;;  %v1807_v16 = vsel %vm1674_vm1, %v1590_v28, 0.0  ;;  %v2002_v6 = vsel %vm1674_vm1, %v1655_v36, 0.0  ;;  %v1828_v1 = vsel %vm1674_vm1, %v1597_v32, 0.0 }
 0x1a6   : > { %v7463_v18 = vpop.xlane.xlu1 %1709  ;;  %v7467_v63 = vpop.xlane.xlu0 %1706  ;;  %v1117_v32 = vadd.f32 %v7370_v58, %v7221_v41  ;;  %v10713_v41 = vld [vmem:[#allocation11_spill] sm:$0xff] }
 0x1a7   : > { %10697 = vst [vmem:[#allocation37_spill] sm:$0xff] %v7463_v18 }
 0x1a9   : > { %1817 = vadd.xlane.f32.xlu1 %v1816_v24  ;;  %1814 = vadd.xlane.f32.xlu0 %v1813_v22  ;;  %v1654_v24 = vmul.f32 %v7387_v50, %v1519_v59  ;;  %v1526_v22 = vmax.f32 %v1360_v13, 0.0  ;;  %v1660_v59 = vmul.f32 %v7387_v50, %v1525_v0  ;;  %v1460_v13 = vmax.f32 %v1096_v35, 0.0 }
 0x1aa   : > { %v7475_v31 = vpop.xlane.xlu1 %1901  ;;  %v7480_v56 = vpop.xlane.xlu0 %1898 }
 0x1ab   : > { %10699 = vst [vmem:[#allocation5_spill] sm:$0xff] %v7475_v31  ;;  %10700 = vst [vmem:[#allocation38_spill] sm:$0xff] %v7480_v56  ;;  %v1999_v51 = vsel %vm1674_vm1, %v1654_v24, 0.0  ;;  %v1120_v24 = vadd.f32 %v7370_v58, %v7233_v25  ;;  %v2017_v15 = vsel %vm1674_vm1, %v1660_v59, 0.0  ;;  %v1595_v0 = vmul.f32 %v7387_v50, %v1460_v13 }
 0x1ac   : > { %v1376_v25 = vadd.f32 %v7370_v58, %v7240_v7 }
 0x1ad   : > { %2009 = vadd.xlane.f32.xlu1 %v2008_v42  ;;  %2006 = vadd.xlane.f32.xlu0 %v2005_v12  ;;  %v10707_v42 = vld [vmem:[#allocation6_spill] sm:$0xff]  ;;  %v1661_v12 = vmul.f32 %v7387_v50, %v1526_v22  ;;  %v1822_v59 = vsel %vm1674_vm1, %v1595_v0, 0.0 }
 0x1ae   : > { %v7487_v19 = vpop.xlane.xlu1 %1703  ;;  %v7491_v21 = vpop.xlane.xlu0 %1700  ;;  %v1093_v9 = vadd.f32 %v7370_v58, %v10707_v42  ;;  %v1466_v42 = vmax.f32 %v1120_v24, 0.0  ;;  %v1530_v7 = vmax.f32 %v1376_v25, 0.0  ;;  %v1112_v24 = vadd.f32 %v7370_v58, %v7238_v3 }
 0x1af   : > { %10701 = vst [vmem:[#allocation39_spill] sm:$0xff] %v7487_v19  ;;  %10702 = vst [vmem:[#allocation40_spill] sm:$0xff] %v7491_v21 }
 0x1b0   : > { %v1459_v55 = vmax.f32 %v1093_v9, 0.0  ;;  %v1465_v9 = vmax.f32 %v1117_v32, 0.0  ;;  %v1601_v61 = vmul.f32 %v7387_v50, %v1466_v42 }
 0x1b1   : > { %1811 = vadd.xlane.f32.xlu1 %v1810_v49  ;;  %1808 = vadd.xlane.f32.xlu0 %v1807_v16  ;;  %v1349_v49 = vadd.f32 %v7370_v58, %v10709_v2  ;;  %v2020_v16 = vsel %vm1674_vm1, %v1661_v12, 0.0  ;;  %v1373_v12 = vadd.f32 %v7370_v58, %v10713_v41  ;;  %v1464_v41 = vmax.f32 %v1112_v24, 0.0 }
 0x1b2   : > { %v7499_v38 = vpop.xlane.xlu1 %1895  ;;  %v7502_v27 = vpop.xlane.xlu0 %1892  ;;  %v1594_v14 = vmul.f32 %v7387_v50, %v1459_v55  ;;  %v1600_v2 = vmul.f32 %v7387_v50, %v1465_v9  ;;  %v1840_v42 = vsel %vm1674_vm1, %v1601_v61, 0.0 }
 0x1b3   : > { %10704 = vst [vmem:[#allocation7_spill] sm:$0xff] %v7499_v38  ;;  %10705 = vst [vmem:[#allocation41_spill] sm:$0xff] %v7502_v27  ;;  %v1523_v35 = vmax.f32 %v1349_v49, 0.0  ;;  %v1529_v49 = vmax.f32 %v1373_v12, 0.0  ;;  %v10719_v12 = vld [vmem:[#allocation13_spill] sm:$0xff] }
 0x1b4   : > { %v1819_v13 = vsel %vm1674_vm1, %v1594_v14, 0.0  ;;  %v1665_v14 = vmul.f32 %v7387_v50, %v1530_v7  ;;  %v1837_v3 = vsel %vm1674_vm1, %v1600_v2, 0.0  ;;  %v1133_v2 = vadd.f32 %v7370_v58, %v7253_v53  ;;  %v10725_v53 = vld [vmem:[#allocation15_spill] sm:$0xff] }
 0x1b5   : > { %2003 = vadd.xlane.f32.xlu1 %v2002_v6  ;;  %2000 = vadd.xlane.f32.xlu0 %v1999_v51  ;;  %v1664_v25 = vmul.f32 %v7387_v50, %v1529_v49  ;;  %v1136_v49 = vadd.f32 %v7370_v58, %v7261_v45  ;;  %v1392_v45 = vadd.f32 %v7370_v58, %v7270_v46 }
 0x1b6   : > { %v7512_v54 = vpop.xlane.xlu1 %1721  ;;  %v7516_v28 = vpop.xlane.xlu0 %1718  ;;  %v2032_v61 = vsel %vm1674_vm1, %v1665_v14, 0.0 }
 0x1b7   : > { %10708 = vst [vmem:[#allocation9_spill] sm:$0xff] %v7512_v54  ;;  %v2029_v24 = vsel %vm1674_vm1, %v1664_v25, 0.0  ;;  %v1470_v14 = vmax.f32 %v1136_v49, 0.0  ;;  %v1389_v25 = vadd.f32 %v7370_v58, %v10725_v53  ;;  %v1534_v46 = vmax.f32 %v1392_v45, 0.0  ;;  %v10728_v53 = vld [vmem:[#allocation17_spill] sm:$0xff] }
 0x1b9   : > { %1829 = vadd.xlane.f32.xlu1 %v1828_v1  ;;  %1826 = vadd.xlane.f32.xlu0 %v1825_v23  ;;  %v1659_v1 = vmul.f32 %v7387_v50, %v1524_v60  ;;  %v1658_v23 = vmul.f32 %v7387_v50, %v1523_v35 }
 0x1ba   : > { %v7523_v36 = vpop.xlane.xlu1 %1913  ;;  %v7528_v22 = vpop.xlane.xlu0 %1910 }
 0x1bb   : > { %10710 = vst [vmem:[#allocation6_spill] sm:$0xff] %v7523_v36  ;;  %10711 = vst [vmem:[#allocation8_spill] sm:$0xff] %v7528_v22  ;;  %v2014_v32 = vsel %vm1674_vm1, %v1659_v1, 0.0  ;;  %v2011_v60 = vsel %vm1674_vm1, %v1658_v23, 0.0  ;;  %v1368_v1 = vadd.f32 %v7370_v58, %v10719_v12  ;;  %v1469_v12 = vmax.f32 %v1133_v2, 0.0  ;;  %v10731_v22 = vld [vmem:[#allocation16_spill] sm:$0xff] }
 0x1bd   : > { %2021 = vadd.xlane.f32.xlu1 %v2020_v16  ;;  %2018 = vadd.xlane.f32.xlu0 %v2017_v15  ;;  %v10716_v15 = vld [vmem:[#allocation10_spill] sm:$0xff]  ;;  %v1604_v2 = vmul.f32 %v7387_v50, %v1469_v12 }
 0x1be   : > { %v7535_v6 = vpop.xlane.xlu1 %1715  ;;  %v7539_v51 = vpop.xlane.xlu0 %1712  ;;  %v1109_v0 = vadd.f32 %v7370_v58, %v10716_v15  ;;  %v1599_v15 = vmul.f32 %v7387_v50, %v1464_v41 }
 0x1bf   : > { %10712 = vst [vmem:[#allocation42_spill] sm:$0xff] %v7535_v6 }
 0x1c1   : > { %1823 = vadd.xlane.f32.xlu1 %v1822_v59  ;;  %1820 = vadd.xlane.f32.xlu0 %v1819_v13  ;;  %v1463_v59 = vmax.f32 %v1109_v0, 0.0  ;;  %v10720_v13 = vld [vmem:[#allocation12_spill] sm:$0xff]  ;;  %v1528_v0 = vmax.f32 %v1368_v1, 0.0  ;;  %v1834_v1 = vsel %vm1674_vm1, %v1599_v15, 0.0 }
 0x1c2   : > { %v7548_v55 = vpop.xlane.xlu1 %1907  ;;  %v7551_v16 = vpop.xlane.xlu0 %1904  ;;  %v1365_v23 = vadd.f32 %v7370_v58, %v10720_v13 }
 0x1c3   : > { %10714 = vst [vmem:[#allocation11_spill] sm:$0xff] %v7548_v55  ;;  %10715 = vst [vmem:[#allocation43_spill] sm:$0xff] %v7551_v16  ;;  %v1663_v41 = vmul.f32 %v7387_v50, %v1528_v0  ;;  %v1128_v0 = vadd.f32 %v7370_v58, %v10728_v53  ;;  %v1849_v53 = vsel %vm1674_vm1, %v1604_v2, 0.0  ;;  %v1149_v2 = vadd.f32 %v7370_v58, %v7285_v20  ;;  %v10736_v20 = vld [vmem:[#allocation19_spill] sm:$0xff] }
 0x1c5   : > { %2015 = vadd.xlane.f32.xlu1 %v2014_v32  ;;  %2012 = vadd.xlane.f32.xlu0 %v2011_v60  ;;  %v1598_v60 = vmul.f32 %v7387_v50, %v1463_v59  ;;  %v2026_v15 = vsel %vm1674_vm1, %v1663_v41, 0.0  ;;  %v1468_v41 = vmax.f32 %v1128_v0, 0.0 }
 0x1c6   : > { %v7560_v35 = vpop.xlane.xlu1 %1733  ;;  %v7564_v9 = vpop.xlane.xlu0 %1730 }
 0x1c7   : > { %10717 = vst [vmem:[#allocation10_spill] sm:$0xff] %v7560_v35  ;;  %10718 = vst [vmem:[#allocation44_spill] sm:$0xff] %v7564_v9  ;;  %v1603_v0 = vmul.f32 %v7387_v50, %v1468_v41 }
 0x1c9   : > { %1841 = vadd.xlane.f32.xlu1 %v1840_v42  ;;  %1838 = vadd.xlane.f32.xlu0 %v1837_v3  ;;  %v1527_v42 = vmax.f32 %v1365_v23, 0.0  ;;  %v1831_v23 = vsel %vm1674_vm1, %v1598_v60, 0.0 }
 0x1ca   : > { %v7571_v7 = vpop.xlane.xlu1 %1925  ;;  %v7576_v32 = vpop.xlane.xlu0 %1922 }
 0x1cb   : > { %10721 = vst [vmem:[#allocation13_spill] sm:$0xff] %v7571_v7  ;;  %10722 = vst [vmem:[#allocation12_spill] sm:$0xff] %v7576_v32  ;;  %v1662_v59 = vmul.f32 %v7387_v50, %v1527_v42  ;;  %v10729_v42 = vld [vmem:[#allocation14_spill] sm:$0xff] }
 0x1cd   : > { %2033 = vadd.xlane.f32.xlu1 %v2032_v61  ;;  %2030 = vadd.xlane.f32.xlu0 %v2029_v24  ;;  %v1605_v61 = vmul.f32 %v7387_v50, %v1470_v14  ;;  %v1533_v24 = vmax.f32 %v1389_v25, 0.0  ;;  %v2023_v60 = vsel %vm1674_vm1, %v1662_v59, 0.0  ;;  %v1669_v14 = vmul.f32 %v7387_v50, %v1534_v46 }
 0x1ce   : > { %v7583_v3 = vpop.xlane.xlu1 %1727  ;;  %v7587_v13 = vpop.xlane.xlu0 %1724  ;;  %v1381_v59 = vadd.f32 %v7370_v58, %v10731_v22 }
 0x1cf   : > { %10723 = vst [vmem:[#allocation45_spill] sm:$0xff] %v7583_v3  ;;  %10724 = vst [vmem:[#allocation46_spill] sm:$0xff] %v7587_v13  ;;  %v1852_v12 = vsel %vm1674_vm1, %v1605_v61, 0.0  ;;  %v1668_v25 = vmul.f32 %v7387_v50, %v1533_v24  ;;  %v2044_v61 = vsel %vm1674_vm1, %v1669_v14, 0.0  ;;  %v1152_v24 = vadd.f32 %v7370_v58, %v7297_v44 }
 0x1d0   : > { %v1408_v44 = vadd.f32 %v7370_v58, %v7304_v30 }
 0x1d1   : > { %1835 = vadd.xlane.f32.xlu1 %v1834_v1  ;;  %1832 = vadd.xlane.f32.xlu0 %v1831_v23  ;;  %v1125_v1 = vadd.f32 %v7370_v58, %v10729_v42  ;;  %v1384_v42 = vadd.f32 %v7370_v58, %v7275_v37  ;;  %v2041_v37 = vsel %vm1674_vm1, %v1668_v25, 0.0  ;;  %v1474_v14 = vmax.f32 %v1152_v24, 0.0 }
 0x1d2   : > { %v7596_v49 = vpop.xlane.xlu1 %1919  ;;  %v7599_v36 = vpop.xlane.xlu0 %1916  ;;  %v1405_v25 = vadd.f32 %v7370_v58, %v10736_v20  ;;  %v1538_v30 = vmax.f32 %v1408_v44, 0.0 }
 0x1d3   : > { %10726 = vst [vmem:[#allocation15_spill] sm:$0xff] %v7596_v49  ;;  %10727 = vst [vmem:[#allocation47_spill] sm:$0xff] %v7599_v36 }
 0x1d5   : > { %2027 = vadd.xlane.f32.xlu1 %v2026_v15  ;;  %2024 = vadd.xlane.f32.xlu0 %v2023_v60  ;;  %v1467_v15 = vmax.f32 %v1125_v1, 0.0  ;;  %v1532_v1 = vmax.f32 %v1384_v42, 0.0  ;;  %v1846_v42 = vsel %vm1674_vm1, %v1603_v0, 0.0 }
 0x1d6   : > { %v7608_v45 = vpop.xlane.xlu1 %1745  ;;  %v7612_v23 = vpop.xlane.xlu0 %1742 }
 0x1d7   : > { %10730 = vst [vmem:[#allocation17_spill] sm:$0xff] %v7608_v45  ;;  %v1602_v22 = vmul.f32 %v7387_v50, %v1467_v15  ;;  %v1667_v41 = vmul.f32 %v7387_v50, %v1532_v1  ;;  %v1144_v1 = vadd.f32 %v7370_v58, %v7302_v34 }
 0x1d9   : > { %1853 = vadd.xlane.f32.xlu1 %v1852_v12  ;;  %1850 = vadd.xlane.f32.xlu0 %v1849_v53  ;;  %v1531_v12 = vmax.f32 %v1381_v59, 0.0  ;;  %v1843_v59 = vsel %vm1674_vm1, %v1602_v22, 0.0  ;;  %v2038_v0 = vsel %vm1674_vm1, %v1667_v41, 0.0  ;;  %v1472_v41 = vmax.f32 %v1144_v1, 0.0 }
 0x1da   : > { %v7619_v46 = vpop.xlane.xlu1 %1937  ;;  %v7624_v60 = vpop.xlane.xlu0 %1934 }
 0x1db   : > { %10732 = vst [vmem:[#allocation14_spill] sm:$0xff] %v7619_v46  ;;  %10733 = vst [vmem:[#allocation16_spill] sm:$0xff] %v7624_v60  ;;  %v1473_v46 = vmax.f32 %v1149_v2, 0.0  ;;  %v1666_v15 = vmul.f32 %v7387_v50, %v1531_v12  ;;  %v10739_v12 = vld [vmem:[#allocation18_spill] sm:$0xff] }
 0x1dc   : > { %v1141_v20 = vadd.f32 %v7370_v58, %v10739_v12  ;;  %v10742_v12 = vld [vmem:[#allocation20_spill] sm:$0xff] }
 0x1dd   : > { %2045 = vadd.xlane.f32.xlu1 %v2044_v61  ;;  %2042 = vadd.xlane.f32.xlu0 %v2041_v37  ;;  %v1609_v61 = vmul.f32 %v7387_v50, %v1474_v14  ;;  %v1608_v2 = vmul.f32 %v7387_v50, %v1473_v46  ;;  %v1537_v37 = vmax.f32 %v1405_v25, 0.0  ;;  %v2035_v22 = vsel %vm1674_vm1, %v1666_v15, 0.0 }
 0x1de   : > { %v7631_v53 = vpop.xlane.xlu1 %1739  ;;  %v7635_v60 = vpop.xlane.xlu0 %1736  ;;  %v1673_v14 = vmul.f32 %v7387_v50, %v1538_v30  ;;  %v1397_v15 = vadd.f32 %v7370_v58, %v10742_v12 }
 0x1df   : > { %10734 = vst [vmem:[#allocation48_spill] sm:$0xff] %v7631_v53  ;;  %10735 = vst [vmem:[#allocation49_spill] sm:$0xff] %v7635_v60  ;;  %v1864_v46 = vsel %vm1674_vm1, %v1609_v61, 0.0  ;;  %v1672_v25 = vmul.f32 %v7387_v50, %v1537_v37  ;;  %v1861_v34 = vsel %vm1674_vm1, %v1608_v2, 0.0  ;;  %v1607_v2 = vmul.f32 %v7387_v50, %v1472_v41 }
 0x1e0   : > { %v2056_v61 = vsel %vm1674_vm1, %v1673_v14, 0.0 }
 0x1e1   : > { %1847 = vadd.xlane.f32.xlu1 %v1846_v42  ;;  %1844 = vadd.xlane.f32.xlu0 %v1843_v59  ;;  %v1400_v59 = vadd.f32 %v7370_v58, %v7307_v4  ;;  %v2053_v37 = vsel %vm1674_vm1, %v1672_v25, 0.0  ;;  %v1535_v4 = vmax.f32 %v1397_v15, 0.0  ;;  %v1858_v14 = vsel %vm1674_vm1, %v1607_v2, 0.0 }
 0x1e2   : > { %v7644_v24 = vpop.xlane.xlu1 %1931  ;;  %v7647_v54 = vpop.xlane.xlu0 %1928 }
 0x1e3   : > { %10737 = vst [vmem:[#allocation19_spill] sm:$0xff] %v7644_v24  ;;  %10738 = vst [vmem:[#allocation50_spill] sm:$0xff] %v7647_v54  ;;  %v1536_v1 = vmax.f32 %v1400_v59, 0.0 }
 0x1e5   : > { %2039 = vadd.xlane.f32.xlu1 %v2038_v0  ;;  %2036 = vadd.xlane.f32.xlu0 %v2035_v22  ;;  %v1471_v0 = vmax.f32 %v1141_v20, 0.0 }
 0x1e6   : > { %v7656_v44 = vpop.xlane.xlu1 %1757  ;;  %v7660_v42 = vpop.xlane.xlu0 %1754 }
 0x1e7   : > { %10740 = vst [vmem:[#allocation18_spill] sm:$0xff] %v7656_v44  ;;  %10741 = vst [vmem:[#allocation51_spill] sm:$0xff] %v7660_v42  ;;  %v1606_v44 = vmul.f32 %v7387_v50, %v1471_v0 }
 0x1e9   : > { %1865 = vadd.xlane.f32.xlu1 %v1864_v46  ;;  %1862 = vadd.xlane.f32.xlu0 %v1861_v34  ;;  %v1671_v46 = vmul.f32 %v7387_v50, %v1536_v1  ;;  %v1670_v34 = vmul.f32 %v7387_v50, %v1535_v4  ;;  %v1855_v25 = vsel %vm1674_vm1, %v1606_v44, 0.0 }
 0x1ea   : > { %v7667_v30 = vpop.xlane.xlu1 %1949  ;;  %v7670_v22 = vpop.xlane.xlu0 %1946 }
 0x1eb   : > { %10743 = vst [vmem:[#allocation20_spill] sm:$0xff] %v7667_v30  ;;  %10744 = vst [vmem:[#allocation52_spill] sm:$0xff] %v7670_v22  ;;  %v2050_v0 = vsel %vm1674_vm1, %v1671_v46, 0.0  ;;  %v2047_v12 = vsel %vm1674_vm1, %v1670_v34, 0.0  ;;  %vm10507_vm1 = vcmask 1041409  }
 0x1ed   : > { %2057 = vadd.xlane.f32.xlu1 %v2056_v61  ;;  %2054 = vadd.xlane.f32.xlu0 %v2053_v37 }
 0x1ee   : > { %v7675_v20 = vpop.xlane.xlu1 %1751  ;;  %v7677_v58 = vpop.xlane.xlu0 %1748 }
 0x1ef   : > { %10745 = vst [vmem:[#allocation53_spill] sm:$0xff] %v7675_v20  ;;  %10746 = vst [vmem:[#allocation54_spill] sm:$0xff] %v7677_v58 }
 0x1f1   : > { %1859 = vadd.xlane.f32.xlu1 %v1858_v14  ;;  %1856 = vadd.xlane.f32.xlu0 %v1855_v25 }
 0x1f2   : > { %v7683_v41 = vpop.xlane.xlu1 %1943  ;;  %v7685_v59 = vpop.xlane.xlu0 %1940 }
 0x1f3   : > { %10747 = vst [vmem:[#allocation55_spill] sm:$0xff] %v7683_v41  ;;  %10748 = vst [vmem:[#allocation56_spill] sm:$0xff] %v7685_v59 }
 0x1f5   : > { %2051 = vadd.xlane.f32.xlu1 %v2050_v0  ;;  %2048 = vadd.xlane.f32.xlu0 %v2047_v12 }
 0x1f6   : > { %v7689_v15 = vpop.xlane.xlu1 %1769  ;;  %v7691_v61 = vpop.xlane.xlu0 %1766 }
 0x1f7   : > { %10749 = vst [vmem:[#allocation57_spill] sm:$0xff] %v7689_v15  ;;  %10750 = vst [vmem:[#allocation58_spill] sm:$0xff] %v7691_v61 }
 0x1fa   : > { %v7693_v37 = vpop.xlane.xlu1 %1961  ;;  %v7695_v50 = vpop.xlane.xlu0 %1958 }
 0x1fb   : > { %10751 = vst [vmem:[#allocation59_spill] sm:$0xff] %v7693_v37  ;;  %10752 = vst [vmem:[#allocation60_spill] sm:$0xff] %v7695_v50 }
 0x1fe   : > { %v7697_v44 = vpop.xlane.xlu1 %1763  ;;  %v7699_v2 = vpop.xlane.xlu0 %1760 }
 0x1ff   : > { %10753 = vst [vmem:[#allocation61_spill] sm:$0xff] %v7697_v44  ;;  %10754 = vst [vmem:[#allocation62_spill] sm:$0xff] %v7699_v2 }
 0x202   : > { %v7701_v1 = vpop.xlane.xlu1 %1955  ;;  %v7703_v4 = vpop.xlane.xlu0 %1952 }
 0x203   : > { %10755 = vst [vmem:[#allocation63_spill] sm:$0xff] %v7701_v1  ;;  %10756 = vst [vmem:[#allocation64_spill] sm:$0xff] %v7703_v4 }
 0x206   : > { %v7705_v46 = vpop.xlane.xlu1 %1781  ;;  %v7707_v14 = vpop.xlane.xlu0 %1778 }
 0x207   : > { %10757 = vst [vmem:[#allocation65_spill] sm:$0xff] %v7705_v46  ;;  %10758 = vst [vmem:[#allocation66_spill] sm:$0xff] %v7707_v14 }
 0x20a   : > { %v7709_v34 = vpop.xlane.xlu1 %1973  ;;  %v7711_v25 = vpop.xlane.xlu0 %1970 }
 0x20b   : > { %10759 = vst [vmem:[#allocation67_spill] sm:$0xff] %v7709_v34  ;;  %10760 = vst [vmem:[#allocation68_spill] sm:$0xff] %v7711_v25  ;;  %v2187_v25 = vlaneseq }
 0x20e   : > { %v7713_v0 = vpop.xlane.xlu1 %1775  ;;  %v7715_v12 = vpop.xlane.xlu0 %1772 }
 0x20f   : > { %10761 = vst [vmem:[#allocation69_spill] sm:$0xff] %v7713_v0  ;;  %10762 = vst [vmem:[#allocation70_spill] sm:$0xff] %v7715_v12 }
 0x212   : > { %v7717_v50 = vpop.xlane.xlu1 %1967  ;;  %v7719_v37 = vpop.xlane.xlu0 %1964 }
 0x213   : > { %10763 = vst [vmem:[#allocation71_spill] sm:$0xff] %v7717_v50  ;;  %10764 = vst [vmem:[#allocation72_spill] sm:$0xff] %v7719_v37 }
 0x216   : > { %v7721_v61 = vpop.xlane.xlu1 %1793  ;;  %v7723_v1 = vpop.xlane.xlu0 %1790 }
 0x217   : > { %10765 = vst [vmem:[#allocation73_spill] sm:$0xff] %v7721_v61  ;;  %10766 = vst [vmem:[#allocation74_spill] sm:$0xff] %v7723_v1 }
 0x21a   : > { %v7725_v4 = vpop.xlane.xlu1 %1985  ;;  %v7727_v15 = vpop.xlane.xlu0 %1982 }
 0x21b   : > { %10767 = vst [vmem:[#allocation75_spill] sm:$0xff] %v7725_v4  ;;  %10768 = vst [vmem:[#allocation76_spill] sm:$0xff] %v7727_v15  ;;  %v7745_v4 = vand.u32 127, %v2187_v25 }
 0x21d   : > { %v2193_v59 = vadd.s32 4294967288, %v7745_v4  ;;  %v2221_v46 = vadd.s32 4294967256, %v7745_v4 }
 0x21e   : > { %v7729_v44 = vpop.xlane.xlu1 %1787  ;;  %v7731_v2 = vpop.xlane.xlu0 %1784 }
 0x21f   : > { %10769 = vst [vmem:[#allocation77_spill] sm:$0xff] %v7729_v44  ;;  %10770 = vst [vmem:[#allocation78_spill] sm:$0xff] %v7731_v2 }
 0x222   : > { %v7733_v22 = vpop.xlane.xlu1 %1979  ;;  %v7735_v34 = vpop.xlane.xlu0 %1976 }
 0x223   : > { %10771 = vst [vmem:[#allocation79_spill] sm:$0xff] %v7733_v22  ;;  %10772 = vst [vmem:[#allocation80_spill] sm:$0xff] %v7735_v34  ;;  %v7752_v22 = vshrl.u32 %v2187_v25, 7  ;;  %v2207_v25 = vadd.s32 4294967272, %v7745_v4 }
 0x225   : > { %10779 = vst [vmem:[#allocation87_spill] sm:$0xff] %v7752_v22 }
 0x226   : > { %v7737_v41 = vpop.xlane.xlu1 %1805  ;;  %v7739_v30 = vpop.xlane.xlu0 %1802 }
 0x227   : > { %10773 = vst [vmem:[#allocation81_spill] sm:$0xff] %v7737_v41  ;;  %10774 = vst [vmem:[#allocation82_spill] sm:$0xff] %v7739_v30  ;;  %v7757_v41 = vsub.s32 %v2193_v59, %v7752_v22 }
 0x229   : > { %10781 = vst [vmem:[#allocation89_spill] sm:$0xff] %v7757_v41  ;;  %v2542_v2 = vrot.slane %v7403_v40, %v7757_v41  ;;  %v2228_v40 = vadd.s32 4294967248, %v7745_v4 }
 0x22a   : > { %v7741_v61 = vpop.xlane.xlu1 %1997  ;;  %v7743_v1 = vpop.xlane.xlu0 %1994 }
 0x22b   : > { %10775 = vst [vmem:[#allocation83_spill] sm:$0xff] %v7741_v61  ;;  %10776 = vst [vmem:[#allocation84_spill] sm:$0xff] %v7743_v1  ;;  %v2200_v61 = vadd.s32 4294967280, %v7745_v4  ;;  %v7764_v1 = vsub.s32 %v7745_v4, %v7752_v22 }
 0x22d   : > { %10783 = vst [vmem:[#allocation91_spill] sm:$0xff] %v7764_v1  ;;  %v7775_v59 = vsub.s32 %v2200_v61, %v7752_v22  ;;  %v2538_v50 = vrot.slane %v7395_v43, %v7764_v1 }
 0x22e   : > { %v7747_v15 = vpop.xlane.xlu1 %1799  ;;  %v7750_v44 = vpop.xlane.xlu0 %1796 }
 0x22f   : > { %10777 = vst [vmem:[#allocation85_spill] sm:$0xff] %v7747_v15  ;;  %10778 = vst [vmem:[#allocation86_spill] sm:$0xff] %v7750_v44  ;;  %v2214_v15 = vadd.s32 4294967264, %v7745_v4 }
 0x230   : > { %10786 = vst [vmem:[#allocation94_spill] sm:$0xff] %v7775_v59 }
 0x232   : > { %v7754_v34 = vpop.xlane.xlu1 %1991  ;;  %v7759_v30 = vpop.xlane.xlu0 %1988 }
 0x233   : > { %10780 = vst [vmem:[#allocation88_spill] sm:$0xff] %v7754_v34  ;;  %10782 = vst [vmem:[#allocation90_spill] sm:$0xff] %v7759_v30  ;;  %v2197_v34 = vrot.slane %v7406_v47, %v7757_v41  ;;  %v2192_v30 = vrot.slane %v7379_v29, %v7764_v1  ;;  %v7788_v47 = vsub.s32 %v2207_v25, %v7752_v22 }
 0x234   : > { %v2204_v29 = vrot.slane %v7357_v26, %v7775_v59  ;;  %v2547_v26 = vrot.slane %v7361_v17, %v7775_v59 }
 0x235   : > { %10789 = vst [vmem:[#allocation97_spill] sm:$0xff] %v7788_v47  ;;  %v2199_v61 = vsel %vm2198_vm2, %v2197_v34, %v2192_v30  ;;  %v2211_v43 = vrot.slane %v7374_v10, %v7788_v47  ;;  %v7824_v10 = vsub.s32 %v2228_v40, %v7752_v22 }
 0x236   : > { %v7767_v42 = vpop.xlane.xlu1 %1817  ;;  %v7772_v44 = vpop.xlane.xlu0 %1814  ;;  %v2206_v25 = vsel %vm2205_vm3, %v2204_v29, %v2199_v61 }
 0x237   : > { %10784 = vst [vmem:[#allocation92_spill] sm:$0xff] %v7767_v42  ;;  %10785 = vst [vmem:[#allocation93_spill] sm:$0xff] %v7772_v44  ;;  %v7783_v42 = vsub.s32 %v2214_v15, %v7752_v22  ;;  %v7799_v15 = vsub.s32 %v2221_v46, %v7752_v22  ;;  %v2235_v46 = vadd.s32 4294967240, %v7745_v4  ;;  %v2213_v61 = vsel %vm2212_vm4, %v2211_v43, %v2206_v25 }
 0x238   : > { %10794 = vst [vmem:[#allocation102_spill] sm:$0xff] %v7824_v10 }
 0x239   : > { %10787 = vst [vmem:[#allocation95_spill] sm:$0xff] %v7783_v42  ;;  %10791 = vst [vmem:[#allocation99_spill] sm:$0xff] %v7799_v15  ;;  %v2218_v30 = vrot.slane %v7443_v57, %v7783_v42  ;;  %v2557_v17 = vrot.slane %v7454_v48, %v7783_v42  ;;  %v2552_v57 = vrot.slane %v7391_v33, %v7788_v47 }
 0x23a   : > { %v7785_v37 = vpop.xlane.xlu1 %2009  ;;  %v7791_v44 = vpop.xlane.xlu0 %2006  ;;  %v2562_v43 = vrot.slane %v7451_v52, %v7799_v15  ;;  %v7839_v40 = vsub.s32 %v2235_v46, %v7752_v22  ;;  %v2301_v52 = vrot.slane %v7587_v13, %v7764_v1 }
 0x23b   : > { %10788 = vst [vmem:[#allocation96_spill] sm:$0xff] %v7785_v37  ;;  %10790 = vst [vmem:[#allocation98_spill] sm:$0xff] %v7791_v44  ;;  %v2543_v37 = vsel %vm2198_vm2, %v2542_v2, %v2538_v50  ;;  %v2242_v50 = vadd.s32 4294967232, %v7745_v4  ;;  %v2225_v2 = vrot.slane %v7439_v5, %v7799_v15  ;;  %v2256_v5 = vadd.s32 4294967216, %v7745_v4 }
 0x23c   : > { %v2548_v29 = vsel %vm2205_vm3, %v2547_v26, %v2543_v37  ;;  %v2249_v26 = vadd.s32 4294967224, %v7745_v4  ;;  %10797 = vst [vmem:[#allocation105_spill] sm:$0xff] %v7839_v40 }
 0x23d   : > { %v2553_v25 = vsel %vm2212_vm4, %v2552_v57, %v2548_v29  ;;  %v7836_v48 = vsub.s32 %v2242_v50, %v7752_v22  ;;  %v2263_v57 = vadd.s32 4294967208, %v7745_v4 }
 0x23e   : > { %v7805_v34 = vpop.xlane.xlu1 %1811  ;;  %v7811_v44 = vpop.xlane.xlu0 %1808  ;;  %v7850_v50 = vsub.s32 %v2249_v26, %v7752_v22  ;;  %v2305_v26 = vrot.slane %v7583_v3, %v7757_v41 }
 0x23f   : > { %10792 = vst [vmem:[#allocation100_spill] sm:$0xff] %v7805_v34  ;;  %10793 = vst [vmem:[#allocation101_spill] sm:$0xff] %v7811_v44  ;;  %v2220_v34 = vsel %vm2219_vm5, %v2218_v30, %v2213_v61  ;;  %v2558_v30 = vsel %vm2219_vm5, %v2557_v17, %v2553_v25  ;;  %v2232_v61 = vrot.slane %v7419_v11, %v7824_v10 }
 0x240   : > { %10796 = vst [vmem:[#allocation104_spill] sm:$0xff] %v7836_v48  ;;  %v2227_v33 = vsel %vm10662_vm6, %v2225_v2, %v2220_v34  ;;  %10799 = vst [vmem:[#allocation107_spill] sm:$0xff] %v7850_v50  ;;  %v2563_v34 = vsel %vm10662_vm6, %v2562_v43, %v2558_v30  ;;  %v2246_v29 = vrot.slane %v7491_v21, %v7836_v48 }
 0x241   : > { %v2234_v17 = vsel %vm10496_vm7, %v2232_v61, %v2227_v33  ;;  %v2239_v2 = vrot.slane %v7415_v39, %v7839_v40  ;;  %v2567_v25 = vrot.slane %v7432_v62, %v7824_v10  ;;  %v7867_v43 = vsub.s32 %v2256_v5, %v7752_v22 }
 0x242   : > { %v7827_v44 = vpop.xlane.xlu1 %2003  ;;  %v7830_v37 = vpop.xlane.xlu0 %2000  ;;  %v2270_v33 = vadd.s32 4294967200, %v7745_v4  ;;  %v2253_v61 = vrot.slane %v7487_v19, %v7850_v50  ;;  %v2577_v3 = vrot.slane %v7502_v27, %v7836_v48  ;;  %v2572_v5 = vrot.slane %v7427_v8, %v7839_v40 }
 0x243   : > { %10795 = vst [vmem:[#allocation103_spill] sm:$0xff] %v7827_v44  ;;  %10801 = vst [vmem:[#allocation109_spill] sm:$0xff] %v7867_v43  ;;  %v2241_v21 = vsel %vm10502_vm8, %v2239_v2, %v2234_v17  ;;  %v2568_v62 = vsel %vm10496_vm7, %v2567_v25, %v2563_v34  ;;  %v7884_v13 = vsub.s32 %v2263_v57, %v7752_v22  ;;  %v2291_v19 = vadd.s32 4294967176, %v7745_v4 }
 0x244   : > { %v2248_v11 = vsel %vm10508_vm9, %v2246_v29, %v2241_v21  ;;  %v2277_v17 = vadd.s32 4294967192, %v7745_v4  ;;  %v2306_v34 = vsel %vm2198_vm2, %v2305_v26, %v2301_v52  ;;  %v2573_v2 = vsel %vm10502_vm8, %v2572_v5, %v2568_v62 }
 0x245   : > { %v7891_v25 = vsub.s32 %v2270_v33, %v7752_v22  ;;  %v2310_v8 = vrot.slane %v7564_v9, %v7775_v59  ;;  %v2260_v21 = vrot.slane %v7467_v63, %v7867_v43  ;;  %v2255_v57 = vsel %vm2254_vm10, %v2253_v61, %v2248_v11 }
 0x246   : > { %v7846_v44 = vpop.xlane.xlu1 %1829  ;;  %v7852_v46 = vpop.xlane.xlu0 %1826  ;;  %v2582_v29 = vrot.slane %v7499_v38, %v7850_v50  ;;  %v2578_v52 = vsel %vm10508_vm9, %v2577_v3, %v2573_v2  ;;  %v2621_v33 = vrot.slane %v7596_v49, %v7757_v41  ;;  %v2617_v5 = vrot.slane %v7599_v36, %v7764_v1 }
 0x247   : > { %10798 = vst [vmem:[#allocation106_spill] sm:$0xff] %v7846_v44  ;;  %10800 = vst [vmem:[#allocation108_spill] sm:$0xff] %v7852_v46  ;;  %v2311_v26 = vsel %vm2205_vm3, %v2310_v8, %v2306_v34  ;;  %v2320_v9 = vrot.slane %v7635_v60, %v7783_v42  ;;  %v2284_v11 = vadd.s32 4294967184, %v7745_v4  ;;  %v7914_v61 = vsub.s32 %v2277_v17, %v7752_v22 }
 0x248   : > { %v2315_v3 = vrot.slane %v7560_v35, %v7788_v47  ;;  %v2262_v2 = vsel %vm10512_vm11, %v2260_v21, %v2255_v57  ;;  %v2274_v8 = vrot.slane %v7539_v51, %v7891_v25  ;;  %v2267_v49 = vrot.slane %v7463_v18, %v7884_v13 }
 0x249   : > { %v2583_v4 = vsel %vm2254_vm10, %v2582_v29, %v2578_v52  ;;  %v2325_v17 = vrot.slane %v7631_v53, %v7799_v15  ;;  %v2587_v21 = vrot.slane %v7480_v56, %v7867_v43  ;;  %v7934_v57 = vsub.s32 %v2291_v19, %v7752_v22  ;;  %v10821_v53 = vld [vmem:[#allocation51_spill] sm:$0xff] }
 0x24a   : > { %v7870_v30 = vpop.xlane.xlu1 %2021  ;;  %v7878_v39 = vpop.xlane.xlu0 %2018  ;;  %v2316_v38 = vsel %vm2212_vm4, %v2315_v3, %v2311_v26  ;;  %v2622_v35 = vsel %vm2198_vm2, %v2621_v33, %v2617_v5  ;;  %v7939_v18 = vsub.s32 %v2284_v11, %v7752_v22  ;;  %v2281_v29 = vrot.slane %v7535_v6, %v7914_v61 }
 0x24b   : > { %10802 = vst [vmem:[#allocation110_spill] sm:$0xff] %v7870_v30  ;;  %10803 = vst [vmem:[#allocation111_spill] sm:$0xff] %v7878_v39  ;;  %v2321_v60 = vsel %vm2219_vm5, %v2320_v9, %v2316_v38  ;;  %v2269_v52 = vsel %vm10513_vm12, %v2267_v49, %v2262_v2  ;;  %v2626_v26 = vrot.slane %v7576_v32, %v7775_v59 }
 0x24c   : > { %10808 = vst [vmem:[#allocation116_spill] sm:$0xff] %v7934_v57  ;;  %v2592_v3 = vrot.slane %v7475_v31, %v7884_v13  ;;  %v2276_v19 = vsel %vm2275_vm13, %v2274_v8, %v2269_v52  ;;  %v2588_v33 = vsel %vm10512_vm11, %v2587_v21, %v2583_v4  ;;  %v2597_v9 = vrot.slane %v7551_v16, %v7891_v25 }
 0x24d   : > { %v2627_v5 = vsel %vm2205_vm3, %v2626_v26, %v2622_v35  ;;  %v2326_v49 = vsel %vm10662_vm6, %v2325_v17, %v2321_v60  ;;  %v2636_v11 = vrot.slane %v7647_v54, %v7783_v42  ;;  %v2631_v31 = vrot.slane %v7571_v7, %v7788_v47 }
 0x24e   : > { %v7895_v27 = vpop.xlane.xlu1 %1823  ;;  %v7903_v62 = vpop.xlane.xlu0 %1820  ;;  %v2330_v8 = vrot.slane %v7612_v23, %v7824_v10  ;;  %v2384_v4 = vrot.slane %v7713_v0, %v7757_v41  ;;  %v2380_v21 = vrot.slane %v7715_v12, %v7764_v1  ;;  %v2283_v35 = vsel %vm2282_vm14, %v2281_v29, %v2276_v19 }
 0x24f   : > { %10804 = vst [vmem:[#allocation112_spill] sm:$0xff] %v7895_v27  ;;  %10805 = vst [vmem:[#allocation113_spill] sm:$0xff] %v7903_v62  ;;  %v2602_v60 = vrot.slane %v7548_v55, %v7914_v61  ;;  %v2593_v17 = vsel %vm10513_vm12, %v2592_v3, %v2588_v33  ;;  %v2641_v52 = vrot.slane %v7644_v24, %v7799_v15 }
 0x250   : > { %v2632_v26 = vsel %vm2212_vm4, %v2631_v31, %v2627_v5  ;;  %v2331_v7 = vsel %vm10496_vm7, %v2330_v8, %v2326_v49  ;;  %v2340_v54 = vrot.slane %v7677_v58, %v7836_v48  ;;  %v2288_v29 = vrot.slane %v7516_v28, %v7939_v18  ;;  %v10811_v31 = vld [vmem:[#allocation9_spill] sm:$0xff]  ;;  %v10812_v8 = vld [vmem:[#allocation8_spill] sm:$0xff] }
 0x251   : > { %v2598_v19 = vsel %vm2275_vm13, %v2597_v9, %v2593_v17  ;;  %v2335_v3 = vrot.slane %v7608_v45, %v7839_v40  ;;  %v2637_v33 = vsel %vm2219_vm5, %v2636_v11, %v2632_v26  ;;  %v2295_v5 = vrot.slane %v10811_v31, %v7934_v57 }
 0x252   : > { %v7921_v34 = vpop.xlane.xlu1 %2015  ;;  %v7929_v36 = vpop.xlane.xlu0 %2012  ;;  %v2385_v49 = vsel %vm2198_vm2, %v2384_v4, %v2380_v21  ;;  %v2607_v55 = vrot.slane %v10812_v8, %v7939_v18  ;;  %v2290_v16 = vsel %vm2289_vm15, %v2288_v29, %v2283_v35  ;;  %v2389_v17 = vrot.slane %v7707_v14, %v7775_v59  ;;  %v10813_v35 = vld [vmem:[#allocation71_spill] sm:$0xff]  ;;  %v10815_v8 = vld [vmem:[#allocation78_spill] sm:$0xff] }
 0x253   : > { %10806 = vst [vmem:[#allocation114_spill] sm:$0xff] %v7921_v34  ;;  %10807 = vst [vmem:[#allocation115_spill] sm:$0xff] %v7929_v36  ;;  %v2336_v9 = vsel %vm10502_vm8, %v2335_v3, %v2331_v7  ;;  %v2603_v11 = vsel %vm2282_vm14, %v2602_v60, %v2598_v19  ;;  %v2642_v26 = vsel %vm10662_vm6, %v2641_v52, %v2637_v33  ;;  %v10814_v7 = vld [vmem:[#allocation72_spill] sm:$0xff]  ;;  %v10817_v52 = vld [vmem:[#allocation6_spill] sm:$0xff] }
 0x254   : > { %v2345_v56 = vrot.slane %v7675_v20, %v7850_v50  ;;  %v2341_v0 = vsel %vm10508_vm9, %v2340_v54, %v2336_v9  ;;  %v2390_v21 = vsel %vm2205_vm3, %v2389_v17, %v2385_v49  ;;  %v2700_v29 = vrot.slane %v10813_v35, %v7757_v41  ;;  %v10818_v54 = vld [vmem:[#allocation16_spill] sm:$0xff]  ;;  %v10819_v20 = vld [vmem:[#allocation65_spill] sm:$0xff] }
 0x255   : > { %v2696_v3 = vrot.slane %v10814_v7, %v7764_v1  ;;  %v2399_v60 = vrot.slane %v10815_v8, %v7783_v42  ;;  %v2612_v33 = vrot.slane %v10817_v52, %v7934_v57  ;;  %v2646_v9 = vrot.slane %v10818_v54, %v7824_v10  ;;  %v10820_v7 = vld [vmem:[#allocation14_spill] sm:$0xff]  ;;  %v10822_v54 = vld [vmem:[#allocation77_spill] sm:$0xff] }
 0x256   : > { %v7950_v38 = vpop.xlane.xlu1 %1841  ;;  %v7958_v2 = vpop.xlane.xlu0 %1838  ;;  %v2394_v49 = vrot.slane %v10819_v20, %v7788_v47  ;;  %v8020_v17 = vsel %vm2296_vm0, %v2295_v5, %v2290_v16  ;;  %v2608_v35 = vsel %vm2289_vm15, %v2607_v55, %v2603_v11  ;;  %v2651_v45 = vrot.slane %v10820_v7, %v7839_v40 }
 0x257   : > { %v2350_v8 = vrot.slane %v10821_v53, %v7867_v43  ;;  %v2346_v14 = vsel %vm2254_vm10, %v2345_v56, %v2341_v0  ;;  %v2647_v52 = vsel %vm10496_vm7, %v2646_v9, %v2642_v26  ;;  %v2404_v12 = vrot.slane %v10822_v54, %v7799_v15  ;;  %v10825_v0 = vld [vmem:[#allocation18_spill] sm:$0xff]  ;;  %v10826_v9 = vld [vmem:[#allocation56_spill] sm:$0xff] }
 0x258   : > { %v2395_v20 = vsel %vm2212_vm4, %v2394_v49, %v2390_v21  ;;  %v2701_v16 = vsel %vm2198_vm2, %v2700_v29, %v2696_v3  ;;  %v2463_v5 = vrot.slane %v7895_v27, %v7757_v41  ;;  %v2459_v11 = vrot.slane %v7903_v62, %v7764_v1  ;;  %v10827_v49 = vld [vmem:[#allocation68_spill] sm:$0xff]  ;;  %v10832_v3 = vld [vmem:[#allocation74_spill] sm:$0xff] }
 0x259   : > { %v2400_v55 = vsel %vm2219_vm5, %v2399_v60, %v2395_v20  ;;  %v2355_v26 = vrot.slane %v10825_v0, %v7884_v13  ;;  %v2656_v21 = vrot.slane %v10826_v9, %v7836_v48  ;;  %v2705_v7 = vrot.slane %v10827_v49, %v7775_v59  ;;  %v10828_v20 = vld [vmem:[#allocation20_spill] sm:$0xff]  ;;  %v10829_v60 = vld [vmem:[#allocation55_spill] sm:$0xff] }
 0x25a   : > { %v7978_v32 = vpop.xlane.xlu1 %2033  ;;  %v7986_v24 = vpop.xlane.xlu0 %2030  ;;  %v8049_v29 = vsel %vm2296_vm0, %v2612_v33, %v2608_v35  ;;  %v2661_v27 = vrot.slane %v10829_v60, %v7850_v50  ;;  %v2652_v54 = vsel %vm10502_vm8, %v2651_v45, %v2647_v52  ;;  %v2351_v62 = vsel %vm10512_vm11, %v2350_v8, %v2346_v14  ;;  %v10830_v0 = vld [vmem:[#allocation67_spill] sm:$0xff]  ;;  %v10831_v35 = vld [vmem:[#allocation80_spill] sm:$0xff] }
 0x25b   : > { %10809 = vst [vmem:[#allocation117_spill] sm:$0xff] %v7978_v32  ;;  %10810 = vst [vmem:[#allocation118_spill] sm:$0xff] %v7986_v24  ;;  %v2710_v6 = vrot.slane %v10830_v0, %v7788_v47  ;;  %v2706_v9 = vsel %vm2205_vm3, %v2705_v7, %v2701_v16  ;;  %v2405_v49 = vsel %vm10662_vm6, %v2404_v12, %v2400_v55  ;;  %v10833_v12 = vld [vmem:[#allocation52_spill] sm:$0xff] }
 0x25c   : > { %v2715_v33 = vrot.slane %v10831_v35, %v7783_v42  ;;  %v2409_v58 = vrot.slane %v10832_v3, %v7824_v10  ;;  %v2464_v60 = vsel %vm2198_vm2, %v2463_v5, %v2459_v11  ;;  %v2779_v45 = vrot.slane %v7921_v34, %v7757_v41  ;;  %v10834_v5 = vld [vmem:[#allocation79_spill] sm:$0xff] }
 0x25d   : > { %v2775_v14 = vrot.slane %v7929_v36, %v7764_v1  ;;  %v2666_v7 = vrot.slane %v10833_v12, %v7867_v43  ;;  %v2657_v52 = vsel %vm10508_vm9, %v2656_v21, %v2652_v54  ;;  %v2356_v16 = vsel %vm10513_vm12, %v2355_v26, %v2351_v62  ;;  %v10835_v1 = vld [vmem:[#allocation86_spill] sm:$0xff]  ;;  %v10836_v36 = vld [vmem:[#allocation73_spill] sm:$0xff] }
 0x25e   : > { %v8002_v4 = vpop.xlane.xlu1 %1835  ;;  %v8011_v19 = vpop.xlane.xlu0 %1832  ;;  %v2468_v55 = vrot.slane %v7852_v46, %v7775_v59  ;;  %v2720_v11 = vrot.slane %v10834_v5, %v7799_v15  ;;  %v2711_v41 = vsel %vm2212_vm4, %v2710_v6, %v2706_v9  ;;  %v2410_v34 = vsel %vm10496_vm7, %v2409_v58, %v2405_v49  ;;  %v10837_v6 = vld [vmem:[#allocation62_spill] sm:$0xff] }
 0x25f   : > { %10816 = vst [vmem:[#allocation119_spill] sm:$0xff] %v8011_v19  ;;  %v2419_v0 = vrot.slane %v10835_v1, %v7836_v48  ;;  %v2414_v35 = vrot.slane %v10836_v36, %v7839_v40  ;;  %v2716_v54 = vsel %vm2219_vm5, %v2715_v33, %v2711_v41  ;;  %v2478_v26 = vrot.slane %v8011_v19, %v7783_v42  ;;  %v10839_v41 = vld [vmem:[#allocation61_spill] sm:$0xff] }
 0x260   : > { %v2469_v62 = vsel %vm2205_vm3, %v2468_v55, %v2464_v60  ;;  %v2662_v5 = vsel %vm2254_vm10, %v2661_v27, %v2657_v52  ;;  %v2360_v58 = vrot.slane %v10837_v6, %v7891_v25  ;;  %v2473_v9 = vrot.slane %v7846_v44, %v7788_v47  ;;  %v10840_v33 = vld [vmem:[#allocation85_spill] sm:$0xff]  ;;  %v10841_v44 = vld [vmem:[#allocation76_spill] sm:$0xff] }
 0x261   : > { %v2780_v49 = vsel %vm2198_vm2, %v2779_v45, %v2775_v14  ;;  %v2365_v60 = vrot.slane %v10839_v41, %v7914_v61  ;;  %v2424_v55 = vrot.slane %v10840_v33, %v7850_v50  ;;  %v2415_v36 = vsel %vm10502_vm8, %v2414_v35, %v2410_v34 }
 0x262   : > { %v8032_v31 = vpop.xlane.xlu1 %2027  ;;  %v8040_v56 = vpop.xlane.xlu0 %2024  ;;  %v2784_v27 = vrot.slane %v7878_v39, %v7775_v59  ;;  %v2721_v52 = vsel %vm10662_vm6, %v2720_v11, %v2716_v54  ;;  %v2420_v19 = vsel %vm10508_vm9, %v2419_v0, %v2415_v36  ;;  %v2483_v45 = vrot.slane %v8002_v4, %v7799_v15  ;;  %v10842_v11 = vld [vmem:[#allocation57_spill] sm:$0xff]  ;;  %v10843_v0 = vld [vmem:[#allocation58_spill] sm:$0xff] }
 0x263   : > { %10823 = vst [vmem:[#allocation120_spill] sm:$0xff] %v8032_v31  ;;  %10824 = vst [vmem:[#allocation121_spill] sm:$0xff] %v8040_v56  ;;  %v2474_v14 = vsel %vm2212_vm4, %v2473_v9, %v2469_v62  ;;  %v2725_v46 = vrot.slane %v10841_v44, %v7824_v10  ;;  %v2794_v34 = vrot.slane %v8040_v56, %v7783_v42  ;;  %v10845_v42 = vld [vmem:[#allocation90_spill] sm:$0xff] }
 0x264   : > { %v2785_v41 = vsel %vm2205_vm3, %v2784_v27, %v2780_v49  ;;  %v2479_v33 = vsel %vm2219_vm5, %v2478_v26, %v2474_v14  ;;  %v2375_v36 = vrot.slane %v10842_v11, %v7934_v57  ;;  %v2370_v54 = vrot.slane %v10843_v0, %v7939_v18  ;;  %v10844_v26 = vld [vmem:[#allocation75_spill] sm:$0xff]  ;;  %v10846_v39 = vld [vmem:[#allocation82_spill] sm:$0xff] }
 0x265   : > { %v2361_v62 = vsel %vm2275_vm13, %v2360_v58, %v2356_v16  ;;  %v2789_v9 = vrot.slane %v7870_v30, %v7788_v47  ;;  %v2730_v49 = vrot.slane %v10844_v26, %v7839_v40  ;;  %v2425_v27 = vsel %vm2254_vm10, %v2424_v55, %v2420_v19 }
 0x266   : > { %v8063_v53 = vpop.xlane.xlu1 %1853  ;;  %v8072_v8 = vpop.xlane.xlu0 %1850  ;;  %v2726_v14 = vsel %vm10496_vm7, %v2725_v46, %v2721_v52  ;;  %v2735_v56 = vrot.slane %v10845_v42, %v7836_v48  ;;  %v2429_v44 = vrot.slane %v10846_v39, %v7867_v43  ;;  %v2484_v16 = vsel %vm10662_vm6, %v2483_v45, %v2479_v33  ;;  %v10848_v52 = vld [vmem:[#allocation88_spill] sm:$0xff] }
 0x267   : > { %v2799_v58 = vrot.slane %v8032_v31, %v7799_v15  ;;  %v2790_v47 = vsel %vm2212_vm4, %v2789_v9, %v2785_v41  ;;  %v2366_v30 = vsel %vm2282_vm14, %v2365_v60, %v2361_v62  ;;  %v2667_v26 = vsel %vm10512_vm11, %v2666_v7, %v2662_v5  ;;  %v10849_v41 = vld [vmem:[#allocation101_spill] sm:$0xff]  ;;  %v10855_v42 = vld [vmem:[#allocation84_spill] sm:$0xff] }
 0x268   : > { %v2488_v46 = vrot.slane %v7958_v2, %v7824_v10  ;;  %v2795_v19 = vsel %vm2219_vm5, %v2794_v34, %v2790_v47  ;;  %v2740_v33 = vrot.slane %v10848_v52, %v7850_v50  ;;  %v2731_v45 = vsel %vm10502_vm8, %v2730_v49, %v2726_v14  ;;  %v10851_v7 = vld [vmem:[#allocation81_spill] sm:$0xff]  ;;  %v10853_v52 = vld [vmem:[#allocation64_spill] sm:$0xff] }
 0x269   : > { %v2430_v15 = vsel %vm10512_vm11, %v2429_v44, %v2425_v27  ;;  %v2439_v60 = vrot.slane %v10849_v41, %v7891_v25  ;;  %v2434_v5 = vrot.slane %v10851_v7, %v7884_v13  ;;  %v2736_v47 = vsel %vm10508_vm9, %v2735_v56, %v2731_v45 }
 0x26a   : > { %v8092_v21 = vpop.xlane.xlu1 %2045  ;;  %v8100_v12 = vpop.xlane.xlu0 %2042  ;;  %v2489_v34 = vsel %vm10496_vm7, %v2488_v46, %v2484_v16  ;;  %v2371_v31 = vsel %vm2289_vm15, %v2370_v54, %v2366_v30  ;;  %v10852_v44 = vrot.slane %v10828_v20, %v7884_v13  ;;  %v2493_v27 = vrot.slane %v7950_v38, %v7839_v40  ;;  %v10854_v16 = vld [vmem:[#allocation100_spill] sm:$0xff] }
 0x26b   : > { %10838 = vst [vmem:[#allocation74_spill] sm:$0xff] %v8100_v12  ;;  %v2800_v14 = vsel %vm10662_vm6, %v2799_v58, %v2795_v19  ;;  %v2676_v56 = vrot.slane %v10853_v52, %v7891_v25  ;;  %v2444_v46 = vrot.slane %v10854_v16, %v7914_v61  ;;  %v2435_v45 = vsel %vm10513_vm12, %v2434_v5, %v2430_v15 }
 0x26c   : > { %v2672_v49 = vsel %vm10513_vm12, %v10852_v44, %v2667_v26  ;;  %v2804_v30 = vrot.slane %v7986_v24, %v7824_v10  ;;  %v2741_v26 = vsel %vm2254_vm10, %v2740_v33, %v2736_v47  ;;  %v2440_v44 = vsel %vm2275_vm13, %v2439_v60, %v2435_v45  ;;  %v10856_v33 = vld [vmem:[#allocation59_spill] sm:$0xff]  ;;  %v10857_v47 = vld [vmem:[#allocation60_spill] sm:$0xff] }
 0x26d   : > { %v2494_v19 = vsel %vm10502_vm8, %v2493_v27, %v2489_v34  ;;  %v2745_v52 = vrot.slane %v10855_v42, %v7867_v43  ;;  %v2691_v60 = vrot.slane %v10856_v33, %v7934_v57  ;;  %v2686_v45 = vrot.slane %v10857_v47, %v7939_v18  ;;  %v10858_v34 = vld [vmem:[#allocation63_spill] sm:$0xff] }
 0x26e   : > { %v8120_v35 = vpop.xlane.xlu1 %1847  ;;  %v8129_v59 = vpop.xlane.xlu0 %1844  ;;  %v2805_v5 = vsel %vm10496_vm7, %v2804_v30, %v2800_v14  ;;  %v2681_v27 = vrot.slane %v10858_v34, %v7914_v61  ;;  %v2809_v24 = vrot.slane %v7978_v32, %v7839_v40  ;;  %v2376_v42 = vsel %vm2296_vm0, %v2375_v36, %v2371_v31  ;;  %v10859_v36 = vld [vmem:[#allocation83_spill] sm:$0xff] }
 0x26f   : > { %v2498_v9 = vrot.slane %v8129_v59, %v7836_v48  ;;  %v2503_v58 = vrot.slane %v8120_v35, %v7850_v50  ;;  %v2445_v14 = vsel %vm2282_vm14, %v2444_v46, %v2440_v44  ;;  %v2746_v30 = vsel %vm10512_vm11, %v2745_v52, %v2741_v26  ;;  %v10860_v52 = vld [vmem:[#allocation93_spill] sm:$0xff] }
 0x270   : > { %vm2853_vm7 = vcmask 1042434   ;;  %v2810_v40 = vsel %vm10502_vm8, %v2809_v24, %v2805_v5  ;;  %v2508_v46 = vrot.slane %v8072_v8, %v7867_v43  ;;  %v2852_v24 = vsel %vm10507_vm1, %v2376_v42, %v8020_v17 }
 0x271   : > { %v2499_v15 = vsel %vm10508_vm9, %v2498_v9, %v2494_v19  ;;  %v2677_v9 = vsel %vm2275_vm13, %v2676_v56, %v2672_v49  ;;  %v2750_v49 = vrot.slane %v10859_v36, %v7884_v13  ;;  %v2449_v56 = vrot.slane %v10860_v52, %v7939_v18 }
 0x272   : > { %v8148_v55 = vpop.xlane.xlu1 %2039  ;;  %v8156_v62 = vpop.xlane.xlu0 %2036  ;;  %v2682_v44 = vsel %vm2282_vm14, %v2681_v27, %v2677_v9  ;;  %vm2855_vm8 = vcmask 1043459   ;;  %v2513_v27 = vrot.slane %v8063_v53, %v7884_v13  ;;  %vm10661_vm1 = vcmask 1044484  }
 0x273   : > { %10847 = vst [vmem:[#allocation86_spill] sm:$0xff] %v8148_v55  ;;  %10850 = vst [vmem:[#allocation62_spill] sm:$0xff] %v8156_v62  ;;  %v2814_v10 = vrot.slane %v8156_v62, %v7836_v48  ;;  %v2755_v48 = vrot.slane %v7830_v37, %v7891_v25  ;;  %v2504_v62 = vsel %vm2254_vm10, %v2503_v58, %v2499_v15  ;;  %v10861_v58 = vld [vmem:[#allocation92_spill] sm:$0xff] }
 0x274   : > { %v2819_v33 = vrot.slane %v8148_v55, %v7850_v50  ;;  %v2454_v15 = vrot.slane %v10861_v58, %v7934_v57  ;;  %v2450_v5 = vsel %vm2289_vm15, %v2449_v56, %v2445_v14  ;;  %v10862_v50 = vld [vmem:[#allocation103_spill] sm:$0xff]  ;;  %v2751_v32 = vsel %vm10513_vm12, %v2750_v49, %v2746_v30 }
 0x275   : > { %v2815_v26 = vsel %vm10508_vm9, %v2814_v10, %v2810_v40  ;;  %v2760_v55 = vrot.slane %v10862_v50, %v7914_v61  ;;  %v2509_v10 = vsel %vm10512_vm11, %v2508_v46, %v2504_v62  ;;  %v2756_v40 = vsel %vm2275_vm13, %v2755_v48, %v2751_v32  ;;  %v10863_v48 = vld [vmem:[#allocation98_spill] sm:$0xff] }
 0x276   : > { %v8179_v54 = vpop.xlane.xlu1 %1865  ;;  %v8186_v20 = vpop.xlane.xlu0 %1862  ;;  %v2820_v9 = vsel %vm2254_vm10, %v2819_v33, %v2815_v26  ;;  %v2824_v14 = vrot.slane %v8100_v12, %v7867_v43  ;;  %vm10660_vm9 = vcmask 1045509   ;;  %v2765_v32 = vrot.slane %v10863_v48, %v7939_v18 }
 0x277   : > { %v2455_v62 = vsel %vm2296_vm0, %v2454_v15, %v2450_v5  ;;  %v2514_v33 = vsel %vm10513_vm12, %v2513_v27, %v2509_v10  ;;  %v2687_v49 = vsel %vm2289_vm15, %v2686_v45, %v2682_v44  ;;  %v2761_v56 = vsel %vm2282_vm14, %v2760_v55, %v2756_v40 }
 0x278   : > { %v2528_v46 = vrot.slane %v8186_v20, %v7939_v18  ;;  %v2825_v50 = vsel %vm10512_vm11, %v2824_v14, %v2820_v9  ;;  %v2829_v12 = vrot.slane %v8092_v21, %v7884_v13  ;;  %v2533_v15 = vrot.slane %v8179_v54, %v7934_v57 }
 0x279   : > { %v2692_v40 = vsel %vm2296_vm0, %v2691_v60, %v2687_v49  ;;  %vm10659_vm11 = vcmask 1046534   ;;  %v2766_v14 = vsel %vm2289_vm15, %v2765_v32, %v2761_v56 }
 0x27a   : > { %v8206_v19 = vpop.xlane.xlu1 %2057  ;;  %v8214_v31 = vpop.xlane.xlu0 %2054  ;;  %v2830_v27 = vsel %vm10513_vm12, %v2829_v12, %v2825_v50  ;;  %vm10658_vm12 = vcmask 1047559  }
 0x27b   : > { %v2849_v60 = vrot.slane %v8206_v19, %v7934_v57 }
 0x27e   : > { %v8232_v36 = vpop.xlane.xlu1 %1859  ;;  %v8241_v17 = vpop.xlane.xlu0 %1856 }
 0x27f   : > { %v2523_v42 = vrot.slane %v8232_v36, %v7914_v61  ;;  %v2518_v30 = vrot.slane %v8241_v17, %v7891_v25 }
 0x281   : > { %v2519_v26 = vsel %vm2275_vm13, %v2518_v30, %v2514_v33  ;;  %v10864_v30 = vld [vmem:[#allocation96_spill] sm:$0xff] }
 0x282   : > { %v8256_v43 = vpop.xlane.xlu1 %2051  ;;  %v2524_v5 = vsel %vm2282_vm14, %v2523_v42, %v2519_v26  ;;  %v8266_v45 = vpop.xlane.xlu0 %2048  ;;  %v2854_v42 = vsel %vm2853_vm7, %v2455_v62, %v2852_v24  ;;  %v2770_v33 = vrot.slane %v10864_v30, %v7934_v57 }
 0x283   : > { %v2839_v55 = vrot.slane %v8256_v43, %v7914_v61  ;;  %v2529_v44 = vsel %vm2289_vm15, %v2528_v46, %v2524_v5  ;;  %v2834_v10 = vrot.slane %v8266_v45, %v7891_v25  ;;  %v2844_v46 = vrot.slane %v8214_v31, %v7939_v18 }
 0x284   : > { %v2534_v9 = vsel %vm2296_vm0, %v2533_v15, %v2529_v44  ;;  %v2771_v24 = vsel %vm2296_vm0, %v2770_v33, %v2766_v14  ;;  %v6643_v44 = vmov 0   ;;  %v10867_v33 = vld [vmem:[#allocation21_spill] sm:$0xff] }
 0x285   : > { %v2835_v26 = vsel %vm2275_vm13, %v2834_v10, %v2830_v27  ;;  %v2856_v5 = vsel %vm2855_vm8, %v2534_v9, %v2854_v42  ;;  %6238 = vset.pattern.permute.xlu0 %v6643_v44  ;;  %6237 = vset.pattern.permute.xlu1 %v6643_v44  ;;  %v10866_v9 = vld [vmem:[#allocation24_spill] sm:$0xff]  ;;  %v10869_v44 = vld [vmem:[#allocation34_spill] sm:$0xff] }
 0x286   : > { %v2840_v50 = vsel %vm2282_vm14, %v2839_v55, %v2835_v26  ;;  %v2858_v12 = vsel %vm10661_vm1, %v8049_v29, %v2856_v5  ;;  %v10515_v55 = vsub.s32 0, %v7752_v22 }
 0x287   : > { %v2845_v32 = vsel %vm2289_vm15, %v2844_v46, %v2840_v50  ;;  %v2860_v62 = vsel %vm10660_vm9, %v2692_v40, %v2858_v12  ;;  %v10865_v40 = vld [vmem:[#allocation28_spill] sm:$0xff]  ;;  %vm11153_vm9 = vcmask 589312  }
 0x288   : > { %v2850_v49 = vsel %vm2296_vm0, %v2849_v60, %v2845_v32  ;;  %v2862_v56 = vsel %vm10659_vm11, %v2771_v24, %v2860_v62  ;;  %v10514_v60 = vsub.s32 1, %v7752_v22  ;;  %v10868_v32 = vld [vmem:[#allocation23_spill] sm:$0xff]  ;;  %vm11152_vm11 = vcmask 523712  }
 0x289   : > { %v2864_v15 = vsel %vm10658_vm12, %v2850_v49, %v2862_v56  ;;  %vm11150_vm12 = vcmask 458112  }
 0x28a   : > { %2866 = vmax.xlane.f32.xlu0 %v2864_v15  ;;  %vm11154_vm1 = vmmov %vm11150_vm12 }
 0x317   : > { %v8294_v29 = vpop.xlane.xlu0 %2866 }
 0x318   : > { %v8299_v10 = vrot.slane %v8294_v29, %v10515_v55  ;;  %v10519_v55 = vsub.s32 2, %v7752_v22 }
 0x31a   : > { %v2910_v27 = vsub.f32 %v10865_v40, %v8299_v10  ;;  %v2909_v14 = vsub.f32 %v10866_v9, %v8299_v10  ;;  %v2919_v42 = vsub.f32 %v7467_v63, %v8299_v10  ;;  %v2911_v46 = vsub.f32 %v10867_v33, %v8299_v10 }
 0x31b   : > { %v2921_v12 = vsub.f32 %v7539_v51, %v8299_v10  ;;  %v2912_v62 = vsub.f32 %v10868_v32, %v8299_v10  ;;  %v8317_v63 = vrot.slane %v8294_v29, %v10514_v60  ;;  %v2923_v56 = vsub.f32 %v7516_v28, %v8299_v10 }
 0x31c   : > { %v3039_v26 = vmul.f32 1.442695, %v2910_v27  ;;  %v3037_v5 = vmul.f32 1.442695, %v2909_v14  ;;  %v3057_v50 = vmul.f32 1.442695, %v2919_v42  ;;  %v2913_v51 = vsub.f32 %v10869_v44, %v8299_v10 }
 0x31d   : > { %v3041_v24 = vmul.f32 1.442695, %v2911_v46  ;;  %v3061_v49 = vmul.f32 1.442695, %v2921_v12  ;;  %v3043_v15 = vmul.f32 1.442695, %v2912_v62 }
 0x31e   : > { %6305 = vpow2.f32 %v3039_v26  ;;  %v3065_v40 = vmul.f32 1.442695, %v2923_v56  ;;  %v10870_v27 = vld [vmem:[#allocation46_spill] sm:$0xff]  ;;  %v3045_v14 = vmul.f32 1.442695, %v2913_v51  ;;  %v10871_v42 = vld [vmem:[#allocation33_spill] sm:$0xff] }
 0x31f   : > { %6307 = vpow2.f32 %v3037_v5  ;;  %v2925_v9 = vsub.f32 %v10870_v27, %v8317_v63  ;;  %v2914_v33 = vsub.f32 %v10871_v42, %v8299_v10  ;;  %v10874_v5 = vld [vmem:[#allocation44_spill] sm:$0xff] }
 0x320   : > { %6309 = vpow2.f32 %v3057_v50  ;;  %v2927_v50 = vsub.f32 %v10874_v5, %v8317_v63  ;;  %v10882_v5 = vld [vmem:[#allocation40_spill] sm:$0xff] }
 0x321   : > { %6311 = vpow2.f32 %v3041_v24  ;;  %v3069_v28 = vmul.f32 1.442695, %v2925_v9  ;;  %v3047_v12 = vmul.f32 1.442695, %v2914_v33  ;;  %v10875_v24 = vld [vmem:[#allocation30_spill] sm:$0xff]  ;;  %v2931_v33 = vsub.f32 %v7612_v23, %v8317_v63 }
 0x322   : > { %6313 = vpow2.f32 %v3061_v49  ;;  %v2915_v32 = vsub.f32 %v10875_v24, %v8299_v10  ;;  %v3073_v56 = vmul.f32 1.442695, %v2927_v50  ;;  %v2917_v50 = vsub.f32 %v10882_v5, %v8299_v10 }
 0x323   : > { %6315 = vpow2.f32 %v3043_v15  ;;  %v10878_v15 = vld [vmem:[#allocation49_spill] sm:$0xff] }
 0x324   : > { %6317 = vpow2.f32 %v3065_v40  ;;  %v2929_v44 = vsub.f32 %v10878_v15, %v8317_v63  ;;  %v3049_v51 = vmul.f32 1.442695, %v2915_v32  ;;  %v10879_v40 = vld [vmem:[#allocation29_spill] sm:$0xff]  ;;  %v3081_v32 = vmul.f32 1.442695, %v2931_v33 }
 0x325   : > { %6319 = vpow2.f32 %v3045_v14  ;;  %v2916_v27 = vsub.f32 %v10879_v40, %v8299_v10  ;;  %v3053_v23 = vmul.f32 1.442695, %v2917_v50 }
 0x326   : > { %6321 = vpow2.f32 %v3069_v28  ;;  %v3077_v42 = vmul.f32 1.442695, %v2929_v44  ;;  %v10886_v44 = vld [vmem:[#allocation39_spill] sm:$0xff] }
 0x327   : > { %6323 = vpow2.f32 %v3047_v12  ;;  %v3051_v28 = vmul.f32 1.442695, %v2916_v27 }
 0x328   : > { %v8327_v46 = vpop.eup %6305  ;;  %6325 = vpow2.f32 %v3073_v56  ;;  %v10885_v56 = vld [vmem:[#allocation54_spill] sm:$0xff] }
 0x329   : > { %10872 = vst [vmem:[#allocation57_spill] sm:$0xff] %v8327_v46  ;;  %v8329_v26 = vpop.eup %6307  ;;  %3425 = vperm.xlu0 %6238, %v8327_v46   ;;  %6327 = vpow2.f32 %v3049_v51  ;;  %v2933_v15 = vsub.f32 %v10885_v56, %v8317_v63  ;;  %v2918_v51 = vsub.f32 %v10886_v44, %v8299_v10 }
 0x32a   : > { %10873 = vst [vmem:[#allocation58_spill] sm:$0xff] %v8329_v26  ;;  %3422 = vperm.xlu1 %6237, %v8329_v26   ;;  %v8337_v62 = vpop.eup %6309  ;;  %6329 = vpow2.f32 %v3077_v42  ;;  %v10889_v42 = vld [vmem:[#allocation51_spill] sm:$0xff] }
 0x32b   : > { %10876 = vst [vmem:[#allocation82_spill] sm:$0xff] %v8337_v62  ;;  %v8339_v49 = vpop.eup %6311  ;;  %6331 = vpow2.f32 %v3051_v28  ;;  %v3085_v5 = vmul.f32 1.442695, %v2933_v15  ;;  %v2935_v33 = vsub.f32 %v10889_v42, %v8317_v63  ;;  %v3055_v56 = vmul.f32 1.442695, %v2918_v51  ;;  %v10890_v28 = vld [vmem:[#allocation37_spill] sm:$0xff] }
 0x32c   : > { %10877 = vst [vmem:[#allocation101_spill] sm:$0xff] %v8339_v49  ;;  %v8347_v9 = vpop.eup %6313  ;;  %6333 = vpow2.f32 %v3081_v32  ;;  %v2920_v50 = vsub.f32 %v10890_v28, %v8299_v10  ;;  %v2937_v15 = vsub.f32 %v10837_v6, %v8317_v63  ;;  %v10893_v51 = vld [vmem:[#allocation42_spill] sm:$0xff] }
 0x32d   : > { %3452 = vperm.xlu0 %6238, %v8337_v62   ;;  %10880 = vst [vmem:[#allocation81_spill] sm:$0xff] %v8347_v9  ;;  %v8349_v14 = vpop.eup %6315  ;;  %6335 = vpow2.f32 %v3053_v23  ;;  %v3089_v32 = vmul.f32 1.442695, %v2935_v33  ;;  %v2922_v42 = vsub.f32 %v10893_v51, %v8299_v10  ;;  %v8396_v62 = vrot.slane %v8294_v29, %v10519_v55 }
 0x32e   : > { %3428 = vperm.xlu1 %6237, %v8339_v49   ;;  %10881 = vst [vmem:[#allocation100_spill] sm:$0xff] %v8349_v14  ;;  %v8357_v12 = vpop.eup %6317  ;;  %6337 = vpow2.f32 %v3085_v5  ;;  %v3059_v23 = vmul.f32 1.442695, %v2920_v50  ;;  %v3093_v6 = vmul.f32 1.442695, %v2937_v15  ;;  %v2939_v5 = vsub.f32 %v10843_v0, %v8317_v63 }
 0x32f   : > { %10883 = vst [vmem:[#allocation60_spill] sm:$0xff] %v8357_v12  ;;  %v8359_v24 = vpop.eup %6319  ;;  %6339 = vpow2.f32 %v3055_v56  ;;  %v3063_v33 = vmul.f32 1.442695, %v2922_v42  ;;  %v10896_v56 = vld [vmem:[#allocation9_spill] sm:$0xff] }
 0x330   : > { %10884 = vst [vmem:[#allocation63_spill] sm:$0xff] %v8359_v24  ;;  %v8367_v40 = vpop.eup %6321  ;;  %6341 = vpow2.f32 %v3089_v32  ;;  %v2924_v50 = vsub.f32 %v10896_v56, %v8299_v10  ;;  %v3097_v55 = vmul.f32 1.442695, %v2939_v5  ;;  %v10899_v32 = vld [vmem:[#allocation70_spill] sm:$0xff] }
 0x331   : > { %3458 = vperm.xlu0 %6238, %v8347_v9   ;;  %10887 = vst [vmem:[#allocation93_spill] sm:$0xff] %v8367_v40  ;;  %v8369_v27 = vpop.eup %6323  ;;  %6343 = vpow2.f32 %v3059_v23  ;;  %v2941_v15 = vsub.f32 %v10899_v32, %v8396_v62  ;;  %v10900_v23 = vld [vmem:[#allocation45_spill] sm:$0xff] }
 0x332   : > { %3431 = vperm.xlu1 %6237, %v8349_v14   ;;  %10888 = vst [vmem:[#allocation92_spill] sm:$0xff] %v8369_v27  ;;  %v8377_v60 = vpop.eup %6325  ;;  %6345 = vpow2.f32 %v3093_v6  ;;  %v3067_v0 = vmul.f32 1.442695, %v2924_v50  ;;  %v2926_v42 = vsub.f32 %v10900_v23, %v8317_v63  ;;  %v10903_v6 = vld [vmem:[#allocation66_spill] sm:$0xff] }
 0x333   : > { %10891 = vst [vmem:[#allocation98_spill] sm:$0xff] %v8377_v60  ;;  %v8379_v44 = vpop.eup %6327  ;;  %6347 = vpow2.f32 %v3063_v33  ;;  %v3101_v56 = vmul.f32 1.442695, %v2941_v15  ;;  %v2943_v5 = vsub.f32 %v10903_v6, %v8396_v62  ;;  %v10904_v33 = vld [vmem:[#allocation10_spill] sm:$0xff] }
 0x334   : > { %10892 = vst [vmem:[#allocation96_spill] sm:$0xff] %v8379_v44  ;;  %v8388_v28 = vpop.eup %6329  ;;  %6349 = vpow2.f32 %v3097_v55  ;;  %v3071_v32 = vmul.f32 1.442695, %v2926_v42  ;;  %v2928_v50 = vsub.f32 %v10904_v33, %v8317_v63  ;;  %v10907_v55 = vld [vmem:[#allocation78_spill] sm:$0xff] }
 0x335   : > { %3464 = vperm.xlu0 %6238, %v8357_v12   ;;  %10894 = vst [vmem:[#allocation28_spill] sm:$0xff] %v8388_v28  ;;  %v8390_v9 = vpop.eup %6331  ;;  %6351 = vpow2.f32 %v3067_v0  ;;  %v2945_v15 = vsub.f32 %v10907_v55, %v8396_v62  ;;  %v10908_v0 = vld [vmem:[#allocation48_spill] sm:$0xff] }
 0x336   : > { %3434 = vperm.xlu1 %6237, %v8359_v24   ;;  %10895 = vst [vmem:[#allocation24_spill] sm:$0xff] %v8390_v9  ;;  %v8403_v51 = vpop.eup %6333  ;;  %6353 = vpow2.f32 %v3101_v56  ;;  %v3075_v6 = vmul.f32 1.442695, %v2928_v50  ;;  %v2930_v42 = vsub.f32 %v10908_v0, %v8317_v63  ;;  %v2947_v56 = vsub.f32 %v10832_v3, %v8396_v62 }
 0x337   : > { %10897 = vst [vmem:[#allocation21_spill] sm:$0xff] %v8403_v51  ;;  %6355 = vpow2.f32 %v3071_v32  ;;  %v10911_v32 = vld [vmem:[#allocation17_spill] sm:$0xff] }
 0x338   : > { %v2932_v50 = vsub.f32 %v10911_v32, %v8317_v63 }
 0x339   : > { %3470 = vperm.xlu0 %6238, %v8367_v40  }
 0x33a   : > { %3437 = vperm.xlu1 %6237, %v8369_v27   ;;  %v3083_v3 = vmul.f32 1.442695, %v2932_v50 }
 0x33d   : > { %3476 = vperm.xlu0 %6238, %v8377_v60  }
 0x33e   : > { %3440 = vperm.xlu1 %6237, %v8379_v44   ;;  %v8405_v44 = vpop.eup %6335 }
 0x33f   : > { %10898 = vst [vmem:[#allocation23_spill] sm:$0xff] %v8405_v44 }
 0x341   : > { %3482 = vperm.xlu0 %6238, %v8388_v28  }
 0x342   : > { %3443 = vperm.xlu1 %6237, %v8390_v9   ;;  %v8413_v9 = vpop.eup %6337 }
 0x343   : > { %10901 = vst [vmem:[#allocation34_spill] sm:$0xff] %v8413_v9  ;;  %v8415_v10 = vpop.eup %6339 }
 0x344   : > { %10902 = vst [vmem:[#allocation46_spill] sm:$0xff] %v8415_v10  ;;  %v8423_v27 = vpop.eup %6341 }
 0x345   : > { %3488 = vperm.xlu0 %6238, %v8403_v51   ;;  %10905 = vst [vmem:[#allocation33_spill] sm:$0xff] %v8423_v27  ;;  %v8425_v23 = vpop.eup %6343 }
 0x346   : > { %3446 = vperm.xlu1 %6237, %v8405_v44   ;;  %10906 = vst [vmem:[#allocation44_spill] sm:$0xff] %v8425_v23 }
 0x349   : > { %3494 = vperm.xlu0 %6238, %v8413_v9   ;;  %v8433_v9 = vpop.eup %6345 }
 0x34a   : > { %3449 = vperm.xlu1 %6237, %v8415_v10   ;;  %v3105_v10 = vmul.f32 1.442695, %v2943_v5  ;;  %10909 = vst [vmem:[#allocation30_spill] sm:$0xff] %v8433_v9  ;;  %v8435_v33 = vpop.eup %6347  ;;  %v3079_v5 = vmul.f32 1.442695, %v2930_v42 }
 0x34b   : > { %10910 = vst [vmem:[#allocation49_spill] sm:$0xff] %v8435_v33  ;;  %v8443_v55 = vpop.eup %6349 }
 0x34c   : > { %6357 = vpow2.f32 %v3105_v10  ;;  %10912 = vst [vmem:[#allocation29_spill] sm:$0xff] %v8443_v55  ;;  %v8445_v0 = vpop.eup %6351  ;;  %v2949_v10 = vsub.f32 %v10835_v1, %v8396_v62 }
 0x34d   : > { %3500 = vperm.xlu0 %6238, %v8423_v27   ;;  %6359 = vpow2.f32 %v3075_v6  ;;  %10913 = vst [vmem:[#allocation40_spill] sm:$0xff] %v8445_v0  ;;  %v8453_v42 = vpop.eup %6353 }
 0x34e   : > { %3455 = vperm.xlu1 %6237, %v8425_v23   ;;  %v3109_v23 = vmul.f32 1.442695, %v2945_v15  ;;  %v10914_v15 = vld [vmem:[#allocation53_spill] sm:$0xff]  ;;  %10915 = vst [vmem:[#allocation54_spill] sm:$0xff] %v8453_v42  ;;  %v8455_v32 = vpop.eup %6355 }
 0x34f   : > { %v2934_v6 = vsub.f32 %v10914_v15, %v8317_v63  ;;  %10916 = vst [vmem:[#allocation39_spill] sm:$0xff] %v8455_v32 }
 0x350   : > { %6361 = vpow2.f32 %v3109_v23  ;;  %v2951_v23 = vsub.f32 %v10846_v39, %v8396_v62  ;;  %v2953_v39 = vsub.f32 %v10849_v41, %v8396_v62 }
 0x351   : > { %3506 = vperm.xlu0 %6238, %v8433_v9   ;;  %6363 = vpow2.f32 %v3079_v5  ;;  %v3087_v1 = vmul.f32 1.442695, %v2934_v6 }
 0x352   : > { %3461 = vperm.xlu1 %6237, %v8435_v33   ;;  %v3113_v33 = vmul.f32 1.442695, %v2947_v56  ;;  %v10917_v56 = vld [vmem:[#allocation18_spill] sm:$0xff]  ;;  %v3125_v41 = vmul.f32 1.442695, %v2953_v39 }
 0x353   : > { %v2936_v5 = vsub.f32 %v10917_v56, %v8317_v63 }
 0x354   : > { %6365 = vpow2.f32 %v3113_v33  ;;  %v3121_v33 = vmul.f32 1.442695, %v2951_v23 }
 0x355   : > { %3512 = vperm.xlu0 %6238, %v8443_v55   ;;  %6367 = vpow2.f32 %v3083_v3  ;;  %v10920_v3 = vld [vmem:[#allocation61_spill] sm:$0xff] }
 0x356   : > { %3467 = vperm.xlu1 %6237, %v8445_v0   ;;  %v3117_v0 = vmul.f32 1.442695, %v2949_v10  ;;  %v8463_v50 = vpop.eup %6357  ;;  %v3091_v10 = vmul.f32 1.442695, %v2936_v5  ;;  %v2938_v6 = vsub.f32 %v10920_v3, %v8317_v63 }
 0x357   : > { %10918 = vst [vmem:[#allocation51_spill] sm:$0xff] %v8463_v50  ;;  %v8465_v15 = vpop.eup %6359 }
 0x358   : > { %10919 = vst [vmem:[#allocation37_spill] sm:$0xff] %v8465_v15  ;;  %6369 = vpow2.f32 %v3117_v0  ;;  %v2955_v0 = vsub.f32 %v10860_v52, %v8396_v62  ;;  %v3095_v23 = vmul.f32 1.442695, %v2938_v6 }
 0x359   : > { %3518 = vperm.xlu0 %6238, %v8453_v42   ;;  %v10530_v42 = vsub.s32 3, %v7752_v22  ;;  %6371 = vpow2.f32 %v3087_v1  ;;  %v2940_v1 = vsub.f32 %v10842_v11, %v8317_v63 }
 0x35a   : > { %3473 = vperm.xlu1 %6237, %v8455_v32   ;;  %v8474_v56 = vpop.eup %6361  ;;  %6373 = vpow2.f32 %v3121_v33  ;;  %v10925_v33 = vld [vmem:[#allocation113_spill] sm:$0xff] }
 0x35b   : > { %10921 = vst [vmem:[#allocation42_spill] sm:$0xff] %v8474_v56  ;;  %v8476_v32 = vpop.eup %6363  ;;  %6375 = vpow2.f32 %v3091_v10  ;;  %v3099_v52 = vmul.f32 1.442695, %v2940_v1  ;;  %v10926_v10 = vld [vmem:[#allocation69_spill] sm:$0xff] }
 0x35c   : > { %10922 = vst [vmem:[#allocation9_spill] sm:$0xff] %v8476_v32  ;;  %6377 = vpow2.f32 %v3125_v41  ;;  %v2942_v6 = vsub.f32 %v10926_v10, %v8396_v62  ;;  %v10929_v41 = vld [vmem:[#allocation108_spill] sm:$0xff] }
 0x35d   : > { %3524 = vperm.xlu0 %6238, %v8463_v50   ;;  %6379 = vpow2.f32 %v3095_v23  ;;  %v10930_v23 = vld [vmem:[#allocation65_spill] sm:$0xff] }
 0x35e   : > { %3479 = vperm.xlu1 %6237, %v8465_v15   ;;  %v8482_v15 = vrot.slane %v8294_v29, %v10530_v42  ;;  %v8489_v5 = vpop.eup %6365  ;;  %v3129_v42 = vmul.f32 1.442695, %v2955_v0  ;;  %v2944_v1 = vsub.f32 %v10930_v23, %v8396_v62 }
 0x35f   : > { %10923 = vst [vmem:[#allocation70_spill] sm:$0xff] %v8489_v5  ;;  %v8491_v3 = vpop.eup %6367 }
 0x360   : > { %10924 = vst [vmem:[#allocation45_spill] sm:$0xff] %v8491_v3  ;;  %v2957_v39 = vsub.f32 %v10925_v33, %v8482_v15  ;;  %6381 = vpow2.f32 %v3129_v42  ;;  %v2959_v0 = vsub.f32 %v10929_v41, %v8482_v15  ;;  %v3103_v33 = vmul.f32 1.442695, %v2942_v6  ;;  %v10933_v42 = vld [vmem:[#allocation119_spill] sm:$0xff] }
 0x361   : > { %3530 = vperm.xlu0 %6238, %v8474_v56   ;;  %6383 = vpow2.f32 %v3099_v52  ;;  %v3107_v41 = vmul.f32 1.442695, %v2944_v1  ;;  %v10934_v52 = vld [vmem:[#allocation77_spill] sm:$0xff] }
 0x362   : > { %3485 = vperm.xlu1 %6237, %v8476_v32   ;;  %v8499_v32 = vpop.eup %6369  ;;  %v3133_v63 = vmul.f32 1.442695, %v2957_v39  ;;  %v2961_v39 = vsub.f32 %v10933_v42, %v8482_v15  ;;  %v2946_v6 = vsub.f32 %v10934_v52, %v8396_v62 }
 0x363   : > { %10927 = vst [vmem:[#allocation66_spill] sm:$0xff] %v8499_v32  ;;  %v8501_v11 = vpop.eup %6371 }
 0x364   : > { %10928 = vst [vmem:[#allocation10_spill] sm:$0xff] %v8501_v11  ;;  %6385 = vpow2.f32 %v3133_v63  ;;  %v2963_v63 = vsub.f32 %v7958_v2, %v8482_v15 }
 0x365   : > { %3536 = vperm.xlu0 %6238, %v8489_v5   ;;  %6387 = vpow2.f32 %v3103_v33  ;;  %v10937_v33 = vld [vmem:[#allocation73_spill] sm:$0xff] }
 0x366   : > { %3491 = vperm.xlu1 %6237, %v8491_v3   ;;  %v8509_v3 = vpop.eup %6373  ;;  %v2948_v1 = vsub.f32 %v10937_v33, %v8396_v62 }
 0x367   : > { %10931 = vst [vmem:[#allocation78_spill] sm:$0xff] %v8509_v3  ;;  %v8511_v10 = vpop.eup %6375 }
 0x368   : > { %10932 = vst [vmem:[#allocation48_spill] sm:$0xff] %v8511_v10  ;;  %v3115_v2 = vmul.f32 1.442695, %v2948_v1 }
 0x369   : > { %3542 = vperm.xlu0 %6238, %v8499_v32   ;;  %v8519_v32 = vpop.eup %6377 }
 0x36a   : > { %3497 = vperm.xlu1 %6237, %v8501_v11   ;;  %v3137_v11 = vmul.f32 1.442695, %v2959_v0  ;;  %10935 = vst [vmem:[#allocation17_spill] sm:$0xff] %v8519_v32  ;;  %v8521_v23 = vpop.eup %6379  ;;  %v3111_v0 = vmul.f32 1.442695, %v2946_v6 }
 0x36b   : > { %10936 = vst [vmem:[#allocation53_spill] sm:$0xff] %v8521_v23  ;;  %v8529_v42 = vpop.eup %6381 }
 0x36c   : > { %6389 = vpow2.f32 %v3137_v11  ;;  %10938 = vst [vmem:[#allocation18_spill] sm:$0xff] %v8529_v42  ;;  %v8531_v52 = vpop.eup %6383  ;;  %v2965_v11 = vsub.f32 %v8129_v59, %v8482_v15 }
 0x36d   : > { %3548 = vperm.xlu0 %6238, %v8509_v3   ;;  %6391 = vpow2.f32 %v3107_v41  ;;  %10939 = vst [vmem:[#allocation61_spill] sm:$0xff] %v8531_v52 }
 0x36e   : > { %3503 = vperm.xlu1 %6237, %v8511_v10   ;;  %v3141_v10 = vmul.f32 1.442695, %v2961_v39  ;;  %v10940_v39 = vld [vmem:[#allocation85_spill] sm:$0xff]  ;;  %v8539_v6 = vpop.eup %6385 }
 0x36f   : > { %v2950_v41 = vsub.f32 %v10940_v39, %v8396_v62  ;;  %10941 = vst [vmem:[#allocation113_spill] sm:$0xff] %v8539_v6  ;;  %v8541_v33 = vpop.eup %6387  ;;  %v10539_v39 = vsub.s32 4, %v7752_v22 }
 0x370   : > { %6393 = vpow2.f32 %v3141_v10  ;;  %10942 = vst [vmem:[#allocation69_spill] sm:$0xff] %v8541_v33  ;;  %v2967_v10 = vsub.f32 %v8072_v8, %v8482_v15  ;;  %v2969_v8 = vsub.f32 %v8241_v17, %v8482_v15 }
 0x371   : > { %3554 = vperm.xlu0 %6238, %v8519_v32   ;;  %6395 = vpow2.f32 %v3111_v0  ;;  %v3119_v59 = vmul.f32 1.442695, %v2950_v41 }
 0x372   : > { %3509 = vperm.xlu1 %6237, %v8521_v23   ;;  %v3145_v23 = vmul.f32 1.442695, %v2963_v63  ;;  %v2952_v63 = vsub.f32 %v10851_v7, %v8396_v62  ;;  %v2954_v7 = vsub.f32 %v10854_v16, %v8396_v62  ;;  %v3157_v17 = vmul.f32 1.442695, %v2969_v8 }
 0x374   : > { %6397 = vpow2.f32 %v3145_v23  ;;  %v3153_v23 = vmul.f32 1.442695, %v2967_v10  ;;  %v3127_v16 = vmul.f32 1.442695, %v2954_v7  ;;  %v2956_v10 = vsub.f32 %v10861_v58, %v8396_v62 }
 0x375   : > { %3560 = vperm.xlu0 %6238, %v8529_v42   ;;  %6399 = vpow2.f32 %v3115_v2 }
 0x376   : > { %3515 = vperm.xlu1 %6237, %v8531_v52   ;;  %v3149_v52 = vmul.f32 1.442695, %v2965_v11  ;;  %v8549_v0 = vpop.eup %6389  ;;  %v3123_v11 = vmul.f32 1.442695, %v2952_v63 }
 0x377   : > { %10943 = vst [vmem:[#allocation108_spill] sm:$0xff] %v8549_v0  ;;  %v8551_v1 = vpop.eup %6391 }
 0x378   : > { %10944 = vst [vmem:[#allocation65_spill] sm:$0xff] %v8551_v1  ;;  %6401 = vpow2.f32 %v3149_v52  ;;  %v2971_v52 = vsub.f32 %v8186_v20, %v8482_v15  ;;  %v3131_v20 = vmul.f32 1.442695, %v2956_v10 }
 0x379   : > { %3566 = vperm.xlu0 %6238, %v8539_v6   ;;  %6403 = vpow2.f32 %v3119_v59 }
 0x37a   : > { %3521 = vperm.xlu1 %6237, %v8541_v33   ;;  %v8560_v2 = vpop.eup %6393  ;;  %6405 = vpow2.f32 %v3153_v23  ;;  %v10949_v23 = vld [vmem:[#allocation26_spill] sm:$0xff] }
 0x37b   : > { %10945 = vst [vmem:[#allocation119_spill] sm:$0xff] %v8560_v2  ;;  %v8562_v41 = vpop.eup %6395  ;;  %6407 = vpow2.f32 %v3123_v11  ;;  %v10950_v11 = vld [vmem:[#allocation112_spill] sm:$0xff] }
 0x37c   : > { %10946 = vst [vmem:[#allocation77_spill] sm:$0xff] %v8562_v41  ;;  %6409 = vpow2.f32 %v3157_v17  ;;  %v2958_v7 = vsub.f32 %v10950_v11, %v8482_v15  ;;  %v10953_v17 = vld [vmem:[#allocation22_spill] sm:$0xff] }
 0x37d   : > { %3572 = vperm.xlu0 %6238, %v8549_v0   ;;  %6411 = vpow2.f32 %v3127_v16  ;;  %v10954_v16 = vld [vmem:[#allocation106_spill] sm:$0xff] }
 0x37e   : > { %3527 = vperm.xlu1 %6237, %v8551_v1   ;;  %v8568_v1 = vrot.slane %v8294_v29, %v10539_v39  ;;  %v8575_v59 = vpop.eup %6397  ;;  %v3161_v39 = vmul.f32 1.442695, %v2971_v52  ;;  %v2960_v10 = vsub.f32 %v10954_v16, %v8482_v15 }
 0x37f   : > { %10947 = vst [vmem:[#allocation73_spill] sm:$0xff] %v8575_v59  ;;  %v8577_v63 = vpop.eup %6399 }
 0x380   : > { %10948 = vst [vmem:[#allocation85_spill] sm:$0xff] %v8577_v63  ;;  %v2973_v8 = vsub.f32 %v10949_v23, %v8568_v1  ;;  %6413 = vpow2.f32 %v3161_v39  ;;  %v2975_v52 = vsub.f32 %v10953_v17, %v8568_v1  ;;  %v3135_v23 = vmul.f32 1.442695, %v2958_v7  ;;  %v10957_v39 = vld [vmem:[#allocation36_spill] sm:$0xff] }
 0x381   : > { %3578 = vperm.xlu0 %6238, %v8560_v2   ;;  %6415 = vpow2.f32 %v3131_v20  ;;  %v3139_v17 = vmul.f32 1.442695, %v2960_v10  ;;  %v2962_v20 = vsub.f32 %v8002_v4, %v8482_v15 }
 0x382   : > { %3533 = vperm.xlu1 %6237, %v8562_v41   ;;  %v8585_v41 = vpop.eup %6401  ;;  %v3165_v62 = vmul.f32 1.442695, %v2973_v8  ;;  %v2977_v8 = vsub.f32 %v10957_v39, %v8568_v1 }
 0x383   : > { %10951 = vst [vmem:[#allocation26_spill] sm:$0xff] %v8585_v41  ;;  %v8587_v58 = vpop.eup %6403  ;;  %v3143_v39 = vmul.f32 1.442695, %v2962_v20 }
 0x384   : > { %10952 = vst [vmem:[#allocation112_spill] sm:$0xff] %v8587_v58  ;;  %6417 = vpow2.f32 %v3165_v62  ;;  %v10960_v62 = vld [vmem:[#allocation32_spill] sm:$0xff] }
 0x385   : > { %3584 = vperm.xlu0 %6238, %v8575_v59   ;;  %6419 = vpow2.f32 %v3135_v23  ;;  %v2964_v23 = vsub.f32 %v7950_v38, %v8482_v15 }
 0x386   : > { %3539 = vperm.xlu1 %6237, %v8577_v63   ;;  %v8595_v63 = vpop.eup %6405 }
 0x387   : > { %10955 = vst [vmem:[#allocation22_spill] sm:$0xff] %v8595_v63  ;;  %v8597_v11 = vpop.eup %6407 }
 0x388   : > { %10956 = vst [vmem:[#allocation106_spill] sm:$0xff] %v8597_v11  ;;  %v8605_v7 = vpop.eup %6409 }
 0x389   : > { %3590 = vperm.xlu0 %6238, %v8585_v41   ;;  %10958 = vst [vmem:[#allocation36_spill] sm:$0xff] %v8605_v7  ;;  %v8607_v16 = vpop.eup %6411 }
 0x38a   : > { %3545 = vperm.xlu1 %6237, %v8587_v58   ;;  %v3169_v58 = vmul.f32 1.442695, %v2975_v52  ;;  %10959 = vst [vmem:[#allocation122_spill] sm:$0xff] %v8607_v16  ;;  %v2979_v52 = vsub.f32 %v10960_v62, %v8568_v1  ;;  %v8615_v10 = vpop.eup %6413  ;;  %v3147_v62 = vmul.f32 1.442695, %v2964_v23 }
 0x38b   : > { %10961 = vst [vmem:[#allocation32_spill] sm:$0xff] %v8615_v10  ;;  %v8617_v4 = vpop.eup %6415 }
 0x38c   : > { %6421 = vpow2.f32 %v3169_v58  ;;  %10962 = vst [vmem:[#allocation123_spill] sm:$0xff] %v8617_v4  ;;  %v10963_v58 = vld [vmem:[#allocation41_spill] sm:$0xff] }
 0x38d   : > { %3596 = vperm.xlu0 %6238, %v8595_v63   ;;  %6423 = vpow2.f32 %v3139_v17  ;;  %v2966_v17 = vsub.f32 %v8120_v35, %v8482_v15 }
 0x38e   : > { %3551 = vperm.xlu1 %6237, %v8597_v11   ;;  %v3173_v11 = vmul.f32 1.442695, %v2977_v8  ;;  %v2981_v8 = vsub.f32 %v10963_v58, %v8568_v1  ;;  %v8625_v20 = vpop.eup %6417 }
 0x38f   : > { %10964 = vst [vmem:[#allocation41_spill] sm:$0xff] %v8625_v20  ;;  %v8627_v38 = vpop.eup %6419  ;;  %v3151_v58 = vmul.f32 1.442695, %v2966_v17 }
 0x390   : > { %6425 = vpow2.f32 %v3173_v11  ;;  %10965 = vst [vmem:[#allocation124_spill] sm:$0xff] %v8627_v38  ;;  %v10966_v11 = vld [vmem:[#allocation38_spill] sm:$0xff] }
 0x391   : > { %3602 = vperm.xlu0 %6238, %v8605_v7   ;;  %6427 = vpow2.f32 %v3143_v39  ;;  %v2968_v39 = vsub.f32 %v8063_v53, %v8482_v15  ;;  %v2970_v53 = vsub.f32 %v8232_v36, %v8482_v15 }
 0x392   : > { %3557 = vperm.xlu1 %6237, %v8607_v16   ;;  %v3177_v16 = vmul.f32 1.442695, %v2979_v52  ;;  %v2983_v52 = vsub.f32 %v10966_v11, %v8568_v1 }
 0x393   : > { %v3159_v36 = vmul.f32 1.442695, %v2970_v53 }
 0x394   : > { %6429 = vpow2.f32 %v3177_v16  ;;  %v3185_v16 = vmul.f32 1.442695, %v2983_v52  ;;  %v10972_v52 = vld [vmem:[#allocation8_spill] sm:$0xff] }
 0x395   : > { %3608 = vperm.xlu0 %6238, %v8615_v10   ;;  %6431 = vpow2.f32 %v3147_v62  ;;  %v3155_v62 = vmul.f32 1.442695, %v2968_v39  ;;  %v2972_v39 = vsub.f32 %v8179_v54, %v8482_v15 }
 0x396   : > { %3563 = vperm.xlu1 %6237, %v8617_v4   ;;  %v3181_v4 = vmul.f32 1.442695, %v2981_v8  ;;  %v8635_v23 = vpop.eup %6421  ;;  %v10969_v8 = vld [vmem:[#allocation43_spill] sm:$0xff] }
 0x397   : > { %10967 = vst [vmem:[#allocation38_spill] sm:$0xff] %v8635_v23  ;;  %v8637_v35 = vpop.eup %6423  ;;  %v2985_v11 = vsub.f32 %v10969_v8, %v8568_v1 }
 0x398   : > { %10968 = vst [vmem:[#allocation125_spill] sm:$0xff] %v8637_v35  ;;  %6433 = vpow2.f32 %v3181_v4 }
 0x399   : > { %3614 = vperm.xlu0 %6238, %v8625_v20   ;;  %v10550_v20 = vsub.s32 5, %v7752_v22  ;;  %6435 = vpow2.f32 %v3151_v58  ;;  %v3189_v4 = vmul.f32 1.442695, %v2985_v11  ;;  %v2987_v58 = vsub.f32 %v10972_v52, %v8568_v1 }
 0x39a   : > { %3569 = vperm.xlu1 %6237, %v8627_v38   ;;  %v8646_v17 = vpop.eup %6425  ;;  %6437 = vpow2.f32 %v3185_v16  ;;  %v10975_v16 = vld [vmem:[#allocation47_spill] sm:$0xff]  ;;  %v3163_v52 = vmul.f32 1.442695, %v2972_v39 }
 0x39b   : > { %10970 = vst [vmem:[#allocation43_spill] sm:$0xff] %v8646_v17  ;;  %v8648_v38 = vpop.eup %6427  ;;  %6439 = vpow2.f32 %v3155_v62  ;;  %v10976_v62 = vld [vmem:[#allocation27_spill] sm:$0xff] }
 0x39c   : > { %10971 = vst [vmem:[#allocation126_spill] sm:$0xff] %v8648_v38  ;;  %6441 = vpow2.f32 %v3189_v4  ;;  %v2974_v53 = vsub.f32 %v10976_v62, %v8568_v1 }
 0x39d   : > { %3620 = vperm.xlu0 %6238, %v8635_v23   ;;  %6443 = vpow2.f32 %v3159_v36 }
 0x39e   : > { %3575 = vperm.xlu1 %6237, %v8637_v35   ;;  %v8654_v35 = vrot.slane %v8294_v29, %v10550_v20  ;;  %v8661_v8 = vpop.eup %6429  ;;  %v3193_v20 = vmul.f32 1.442695, %v2987_v58  ;;  %v10979_v58 = vld [vmem:[#allocation12_spill] sm:$0xff]  ;;  %v3167_v39 = vmul.f32 1.442695, %v2974_v53 }
 0x39f   : > { %10973 = vst [vmem:[#allocation8_spill] sm:$0xff] %v8661_v8 }
 0x3a0   : > { %v2989_v11 = vsub.f32 %v10975_v16, %v8654_v35  ;;  %6445 = vpow2.f32 %v3193_v20  ;;  %v2991_v36 = vsub.f32 %v10979_v58, %v8654_v35  ;;  %v10980_v16 = vld [vmem:[#allocation25_spill] sm:$0xff]  ;;  %v10984_v58 = vld [vmem:[#allocation35_spill] sm:$0xff] }
 0x3a1   : > { %3626 = vperm.xlu0 %6238, %v8646_v17   ;;  %v8663_v17 = vpop.eup %6431  ;;  %6447 = vpow2.f32 %v3163_v52  ;;  %v2976_v62 = vsub.f32 %v10980_v16, %v8568_v1  ;;  %v2978_v16 = vsub.f32 %v10984_v58, %v8568_v1 }
 0x3a2   : > { %3581 = vperm.xlu1 %6237, %v8648_v38   ;;  %10974 = vst [vmem:[#allocation127_spill] sm:$0xff] %v8663_v17  ;;  %v8671_v38 = vpop.eup %6433  ;;  %v3197_v4 = vmul.f32 1.442695, %v2989_v11  ;;  %v3201_v20 = vmul.f32 1.442695, %v2991_v36  ;;  %v10983_v11 = vld [vmem:[#allocation50_spill] sm:$0xff] }
 0x3a3   : > { %10977 = vst [vmem:[#allocation47_spill] sm:$0xff] %v8671_v38  ;;  %v8675_v15 = vpop.eup %6435  ;;  %v2993_v52 = vsub.f32 %v10983_v11, %v8654_v35  ;;  %v3171_v53 = vmul.f32 1.442695, %v2976_v62  ;;  %v10987_v36 = vld [vmem:[#allocation16_spill] sm:$0xff]  ;;  %v3175_v62 = vmul.f32 1.442695, %v2978_v16 }
 0x3a4   : > { %10978 = vst [vmem:[#allocation27_spill] sm:$0xff] %v8675_v15  ;;  %6449 = vpow2.f32 %v3197_v4  ;;  %v10988_v11 = vld [vmem:[#allocation31_spill] sm:$0xff] }
 0x3a5   : > { %3632 = vperm.xlu0 %6238, %v8661_v8   ;;  %6451 = vpow2.f32 %v3167_v39  ;;  %v3205_v4 = vmul.f32 1.442695, %v2993_v52  ;;  %v2995_v39 = vsub.f32 %v10987_v36, %v8654_v35  ;;  %v2980_v58 = vsub.f32 %v10988_v11, %v8568_v1  ;;  %v10992_v52 = vld [vmem:[#allocation56_spill] sm:$0xff]  ;;  %v10993_v36 = vld [vmem:[#allocation7_spill] sm:$0xff] }
 0x3a6   : > { %3587 = vperm.xlu1 %6237, %v8663_v17   ;;  %v8685_v17 = vpop.eup %6437  ;;  %6453 = vpow2.f32 %v3201_v20  ;;  %v2982_v11 = vsub.f32 %v10993_v36, %v8568_v1 }
 0x3a7   : > { %10981 = vst [vmem:[#allocation12_spill] sm:$0xff] %v8685_v17  ;;  %v8689_v10 = vpop.eup %6439  ;;  %6455 = vpow2.f32 %v3171_v53  ;;  %v3209_v20 = vmul.f32 1.442695, %v2995_v39  ;;  %v2997_v53 = vsub.f32 %v10992_v52, %v8654_v35  ;;  %v3179_v16 = vmul.f32 1.442695, %v2980_v58  ;;  %v10996_v39 = vld [vmem:[#allocation52_spill] sm:$0xff] }
 0x3a8   : > { %v8673_v54 = vpop.permute.xlu0 %3425  ;;  %10982 = vst [vmem:[#allocation25_spill] sm:$0xff] %v8689_v10  ;;  %6457 = vpow2.f32 %v3205_v4  ;;  %v3183_v58 = vmul.f32 1.442695, %v2982_v11  ;;  %v10997_v52 = vld [vmem:[#allocation5_spill] sm:$0xff] }
 0x3a9   : > { %v8677_v23 = vpop.permute.xlu1 %3422  ;;  %3638 = vperm.xlu0 %6238, %v8671_v38   ;;  %6459 = vpow2.f32 %v3175_v62  ;;  %v3213_v4 = vmul.f32 1.442695, %v2997_v53  ;;  %v2999_v62 = vsub.f32 %v10996_v39, %v8654_v35  ;;  %v2984_v36 = vsub.f32 %v10997_v52, %v8568_v1  ;;  %v11001_v52 = vld [vmem:[#allocation11_spill] sm:$0xff] }
 0x3aa   : > { %3593 = vperm.xlu1 %6237, %v8675_v15   ;;  %v8699_v15 = vpop.eup %6441  ;;  %6461 = vpow2.f32 %v3209_v20  ;;  %v10581_v20 = vsub.s32 6, %v7752_v22 }
 0x3ab   : > { %10985 = vst [vmem:[#allocation50_spill] sm:$0xff] %v8699_v15  ;;  %v8703_v63 = vpop.eup %6443  ;;  %6463 = vpow2.f32 %v3179_v16  ;;  %v3217_v53 = vmul.f32 1.442695, %v2999_v62  ;;  %v11000_v16 = vld [vmem:[#allocation64_spill] sm:$0xff]  ;;  %v3187_v39 = vmul.f32 1.442695, %v2984_v36 }
 0x3ac   : > { %v8687_v8 = vpop.permute.xlu0 %3452  ;;  %10986 = vst [vmem:[#allocation35_spill] sm:$0xff] %v8703_v63  ;;  %6465 = vpow2.f32 %v3213_v4  ;;  %v3001_v11 = vsub.f32 %v11000_v16, %v8654_v35  ;;  %v8768_v4 = vrot.slane %v8294_v29, %v10581_v20  ;;  %v11004_v16 = vld [vmem:[#allocation6_spill] sm:$0xff] }
 0x3ad   : > { %v8691_v7 = vpop.permute.xlu1 %3428  ;;  %3644 = vperm.xlu0 %6238, %v8685_v17   ;;  %6467 = vpow2.f32 %v3183_v58  ;;  %v3003_v58 = vsub.f32 %v10857_v47, %v8654_v35  ;;  %v11007_v47 = vld [vmem:[#allocation72_spill] sm:$0xff] }
 0x3ae   : > { %3599 = vperm.xlu1 %6237, %v8689_v10   ;;  %v8713_v10 = vpop.eup %6445  ;;  %6469 = vpow2.f32 %v3217_v53  ;;  %v3221_v62 = vmul.f32 1.442695, %v3001_v11 }
 0x3af   : > { %10989 = vst [vmem:[#allocation16_spill] sm:$0xff] %v8713_v10  ;;  %v8717_v41 = vpop.eup %6447  ;;  %6471 = vpow2.f32 %v3187_v39  ;;  %v3225_v53 = vmul.f32 1.442695, %v3003_v58  ;;  %v11011_v58 = vld [vmem:[#allocation68_spill] sm:$0xff] }
 0x3b0   : > { %v8701_v38 = vpop.permute.xlu0 %3458  ;;  %10991 = vst [vmem:[#allocation128_spill] sm:$0xff] %v8717_v41  ;;  %6473 = vpow2.f32 %v3221_v62 }
 0x3b1   : > { %v8705_v33 = vpop.permute.xlu1 %3431  ;;  %3650 = vperm.xlu0 %6238, %v8699_v15  }
 0x3b2   : > { %3605 = vperm.xlu1 %6237, %v8703_v63   ;;  %v8727_v63 = vpop.eup %6449 }
 0x3b3   : > { %10994 = vst [vmem:[#allocation56_spill] sm:$0xff] %v8727_v63  ;;  %v8731_v2 = vpop.eup %6451 }
 0x3b4   : > { %v8715_v17 = vpop.permute.xlu0 %3464  ;;  %10995 = vst [vmem:[#allocation7_spill] sm:$0xff] %v8731_v2 }
 0x3b5   : > { %10990 = vst [vmem:[#allocation31_spill] sm:$0xff] %v8715_v17  ;;  %v8719_v59 = vpop.permute.xlu1 %3434  ;;  %3656 = vperm.xlu0 %6238, %v8713_v10  }
 0x3b6   : > { %3611 = vperm.xlu1 %6237, %v8717_v41   ;;  %v8741_v41 = vpop.eup %6453 }
 0x3b7   : > { %10998 = vst [vmem:[#allocation52_spill] sm:$0xff] %v8741_v41  ;;  %v8745_v6 = vpop.eup %6455 }
 0x3b8   : > { %v8729_v15 = vpop.permute.xlu0 %3470  ;;  %10999 = vst [vmem:[#allocation5_spill] sm:$0xff] %v8745_v6 }
 0x3b9   : > { %v8733_v0 = vpop.permute.xlu1 %3437  ;;  %3662 = vperm.xlu0 %6238, %v8727_v63   ;;  %v8756_v63 = vpop.eup %6457 }
 0x3ba   : > { %3617 = vperm.xlu1 %6237, %v8731_v2   ;;  %v2986_v2 = vsub.f32 %v11001_v52, %v8568_v1  ;;  %11002 = vst [vmem:[#allocation64_spill] sm:$0xff] %v8756_v63  ;;  %v8760_v3 = vpop.eup %6459  ;;  %v2988_v52 = vsub.f32 %v11004_v16, %v8568_v1  ;;  %v11008_v1 = vld [vmem:[#allocation15_spill] sm:$0xff] }
 0x3bb   : > { %11003 = vst [vmem:[#allocation11_spill] sm:$0xff] %v8760_v3  ;;  %v2990_v39 = vsub.f32 %v11008_v1, %v8654_v35 }
 0x3bc   : > { %v8743_v10 = vpop.permute.xlu0 %3476  ;;  %v3191_v36 = vmul.f32 1.442695, %v2986_v2  ;;  %v3005_v2 = vsub.f32 %v11007_v47, %v8768_v4  ;;  %v3195_v11 = vmul.f32 1.442695, %v2988_v52  ;;  %v11012_v47 = vld [vmem:[#allocation13_spill] sm:$0xff] }
 0x3bd   : > { %v8747_v42 = vpop.permute.xlu1 %3440  ;;  %3668 = vperm.xlu0 %6238, %v8741_v41   ;;  %v3199_v52 = vmul.f32 1.442695, %v2990_v39  ;;  %v2992_v1 = vsub.f32 %v11012_v47, %v8654_v35 }
 0x3be   : > { %3623 = vperm.xlu1 %6237, %v8745_v6   ;;  %v8775_v6 = vpop.eup %6461  ;;  %6475 = vpow2.f32 %v3191_v36  ;;  %v3229_v62 = vmul.f32 1.442695, %v3005_v2  ;;  %v3007_v36 = vsub.f32 %v11011_v58, %v8768_v4  ;;  %v11015_v2 = vld [vmem:[#allocation80_spill] sm:$0xff]  ;;  %v11016_v58 = vld [vmem:[#allocation19_spill] sm:$0xff] }
 0x3bf   : > { %11005 = vst [vmem:[#allocation6_spill] sm:$0xff] %v8775_v6  ;;  %v8779_v5 = vpop.eup %6463  ;;  %6477 = vpow2.f32 %v3225_v53  ;;  %v3203_v39 = vmul.f32 1.442695, %v2992_v1  ;;  %v2994_v47 = vsub.f32 %v11016_v58, %v8654_v35 }
 0x3c0   : > { %v8758_v32 = vpop.permute.xlu0 %3482  ;;  %11006 = vst [vmem:[#allocation129_spill] sm:$0xff] %v8779_v5  ;;  %v8789_v16 = vpop.eup %6465  ;;  %6479 = vpow2.f32 %v3195_v11  ;;  %v3233_v53 = vmul.f32 1.442695, %v3007_v36  ;;  %v3009_v11 = vsub.f32 %v11015_v2, %v8768_v4  ;;  %v11020_v36 = vld [vmem:[#allocation76_spill] sm:$0xff]  ;;  %v11021_v2 = vld [vmem:[#allocation14_spill] sm:$0xff] }
 0x3c1   : > { %v8762_v41 = vpop.permute.xlu1 %3443  ;;  %3674 = vperm.xlu0 %6238, %v8756_v63   ;;  %11009 = vst [vmem:[#allocation72_spill] sm:$0xff] %v8789_v16  ;;  %v8793_v56 = vpop.eup %6467  ;;  %6481 = vpow2.f32 %v3229_v62  ;;  %v3207_v1 = vmul.f32 1.442695, %v2994_v47  ;;  %v2996_v58 = vsub.f32 %v11021_v2, %v8654_v35 }
 0x3c2   : > { %3629 = vperm.xlu1 %6237, %v8760_v3   ;;  %11010 = vst [vmem:[#allocation15_spill] sm:$0xff] %v8793_v56  ;;  %6483 = vpow2.f32 %v3199_v52  ;;  %v3237_v62 = vmul.f32 1.442695, %v3009_v11  ;;  %v3011_v52 = vsub.f32 %v11020_v36, %v8768_v4  ;;  %v11026_v11 = vld [vmem:[#allocation90_spill] sm:$0xff]  ;;  %v11027_v36 = vld [vmem:[#allocation55_spill] sm:$0xff] }
 0x3c3   : > { %6485 = vpow2.f32 %v3233_v53  ;;  %v3211_v47 = vmul.f32 1.442695, %v2996_v58  ;;  %v2998_v2 = vsub.f32 %v11027_v36, %v8654_v35 }
 0x3c4   : > { %v8777_v63 = vpop.permute.xlu0 %3488  ;;  %6487 = vpow2.f32 %v3203_v39  ;;  %v3241_v53 = vmul.f32 1.442695, %v3011_v52  ;;  %v3013_v39 = vsub.f32 %v11026_v11, %v8768_v4  ;;  %v11030_v52 = vld [vmem:[#allocation84_spill] sm:$0xff] }
 0x3c5   : > { %v8781_v20 = vpop.permute.xlu1 %3446  ;;  %3680 = vperm.xlu0 %6238, %v8775_v6   ;;  %6489 = vpow2.f32 %v3237_v62  ;;  %v3215_v58 = vmul.f32 1.442695, %v2998_v2  ;;  %v11031_v11 = vld [vmem:[#allocation20_spill] sm:$0xff] }
 0x3c6   : > { %3635 = vperm.xlu1 %6237, %v8779_v5   ;;  %v8803_v5 = vpop.eup %6469  ;;  %6491 = vpow2.f32 %v3207_v1  ;;  %v3245_v62 = vmul.f32 1.442695, %v3013_v39  ;;  %v3015_v1 = vsub.f32 %v11030_v52, %v8768_v4  ;;  %v3000_v36 = vsub.f32 %v11031_v11, %v8654_v35 }
 0x3c7   : > { %11013 = vst [vmem:[#allocation68_spill] sm:$0xff] %v8803_v5  ;;  %v8807_v55 = vpop.eup %6471  ;;  %6493 = vpow2.f32 %v3241_v53  ;;  %v10611_v53 = vsub.s32 7, %v7752_v22  ;;  %v3002_v52 = vsub.f32 %v10858_v34, %v8654_v35  ;;  %v3019_v34 = vsub.f32 %v10863_v48, %v8768_v4  ;;  %v11039_v48 = vld [vmem:[#allocation115_spill] sm:$0xff] }
 0x3c8   : > { %v8791_v3 = vpop.permute.xlu0 %3494  ;;  %11014 = vst [vmem:[#allocation13_spill] sm:$0xff] %v8807_v55  ;;  %6495 = vpow2.f32 %v3211_v47  ;;  %v3249_v39 = vmul.f32 1.442695, %v3015_v1  ;;  %v3017_v47 = vsub.f32 %v7830_v37, %v8768_v4  ;;  %v3219_v2 = vmul.f32 1.442695, %v3000_v36 }
 0x3c9   : > { %v8795_v50 = vpop.permute.xlu1 %3449  ;;  %3686 = vperm.xlu0 %6238, %v8789_v16   ;;  %6497 = vpow2.f32 %v3245_v62  ;;  %v8886_v62 = vrot.slane %v8294_v29, %v10611_v53  ;;  %v3223_v1 = vmul.f32 1.442695, %v3002_v52 }
 0x3ca   : > { %3641 = vperm.xlu1 %6237, %v8793_v56   ;;  %v8817_v56 = vpop.eup %6473  ;;  %6499 = vpow2.f32 %v3215_v58  ;;  %v3253_v37 = vmul.f32 1.442695, %v3017_v47  ;;  %v11036_v58 = vld [vmem:[#allocation59_spill] sm:$0xff] }
 0x3cb   : > { %11017 = vst [vmem:[#allocation80_spill] sm:$0xff] %v8817_v56  ;;  %v8821_v27 = vpop.eup %6475  ;;  %6501 = vpow2.f32 %v3249_v39  ;;  %v3004_v36 = vsub.f32 %v11036_v58, %v8654_v35  ;;  %v3257_v39 = vmul.f32 1.442695, %v3019_v34  ;;  %v3021_v47 = vsub.f32 %v11039_v48, %v8886_v62  ;;  %v11040_v35 = vld [vmem:[#allocation71_spill] sm:$0xff] }
 0x3cc   : > { %v8805_v6 = vpop.permute.xlu0 %3500  ;;  %11019 = vst [vmem:[#allocation130_spill] sm:$0xff] %v8821_v27  ;;  %6503 = vpow2.f32 %v3219_v2  ;;  %v3006_v52 = vsub.f32 %v11040_v35, %v8768_v4  ;;  %v11043_v34 = vld [vmem:[#allocation111_spill] sm:$0xff] }
 0x3cd   : > { %v8809_v9 = vpop.permute.xlu1 %3455  ;;  %3692 = vperm.xlu0 %6238, %v8803_v5   ;;  %6505 = vpow2.f32 %v3253_v37  ;;  %v3227_v2 = vmul.f32 1.442695, %v3004_v36  ;;  %v3261_v37 = vmul.f32 1.442695, %v3021_v47  ;;  %v11044_v48 = vld [vmem:[#allocation67_spill] sm:$0xff]  ;;  %v11047_v47 = vld [vmem:[#allocation121_spill] sm:$0xff] }
 0x3ce   : > { %3647 = vperm.xlu1 %6237, %v8807_v55   ;;  %v8831_v55 = vpop.eup %6477  ;;  %6507 = vpow2.f32 %v3223_v1  ;;  %v3023_v1 = vsub.f32 %v11043_v34, %v8886_v62  ;;  %v3231_v36 = vmul.f32 1.442695, %v3006_v52  ;;  %v3008_v35 = vsub.f32 %v11044_v48, %v8768_v4  ;;  %v11048_v34 = vld [vmem:[#allocation79_spill] sm:$0xff] }
 0x3cf   : > { %11022 = vst [vmem:[#allocation76_spill] sm:$0xff] %v8831_v55  ;;  %v8835_v24 = vpop.eup %6479  ;;  %6509 = vpow2.f32 %v3257_v39  ;;  %v3010_v48 = vsub.f32 %v11048_v34, %v8768_v4 }
 0x3d0   : > { %v8819_v16 = vpop.permute.xlu0 %3506  ;;  %11024 = vst [vmem:[#allocation131_spill] sm:$0xff] %v8835_v24  ;;  %6511 = vpow2.f32 %v3227_v2  ;;  %v3265_v39 = vmul.f32 1.442695, %v3023_v1  ;;  %v3025_v2 = vsub.f32 %v11047_v47, %v8886_v62  ;;  %v3235_v52 = vmul.f32 1.442695, %v3008_v35  ;;  %v11052_v1 = vld [vmem:[#allocation118_spill] sm:$0xff] }
 0x3d1   : > { %11018 = vst [vmem:[#allocation19_spill] sm:$0xff] %v8819_v16  ;;  %v8823_v51 = vpop.permute.xlu1 %3461  ;;  %3698 = vperm.xlu0 %6238, %v8817_v56   ;;  %v3239_v35 = vmul.f32 1.442695, %v3010_v48  ;;  %v11053_v47 = vld [vmem:[#allocation75_spill] sm:$0xff] }
 0x3d2   : > { %3653 = vperm.xlu1 %6237, %v8821_v27   ;;  %v8845_v27 = vpop.eup %6481  ;;  %6513 = vpow2.f32 %v3261_v37  ;;  %v3269_v37 = vmul.f32 1.442695, %v3025_v2  ;;  %v3012_v34 = vsub.f32 %v11053_v47, %v8768_v4  ;;  %v11058_v2 = vld [vmem:[#allocation62_spill] sm:$0xff] }
 0x3d3   : > { %11028 = vst [vmem:[#allocation90_spill] sm:$0xff] %v8845_v27  ;;  %v8849_v14 = vpop.eup %6483  ;;  %6515 = vpow2.f32 %v3231_v36  ;;  %v3027_v36 = vsub.f32 %v11052_v1, %v8886_v62  ;;  %v11059_v1 = vld [vmem:[#allocation88_spill] sm:$0xff] }
 0x3d4   : > { %v8833_v5 = vpop.permute.xlu0 %3512  ;;  %11029 = vst [vmem:[#allocation55_spill] sm:$0xff] %v8849_v14  ;;  %v3243_v48 = vmul.f32 1.442695, %v3012_v34  ;;  %v3014_v47 = vsub.f32 %v11059_v1, %v8768_v4 }
 0x3d5   : > { %11023 = vst [vmem:[#allocation14_spill] sm:$0xff] %v8833_v5  ;;  %v8837_v28 = vpop.permute.xlu1 %3467  ;;  %3704 = vperm.xlu0 %6238, %v8831_v55  }
 0x3d6   : > { %11025 = vst [vmem:[#allocation132_spill] sm:$0xff] %v8837_v28  ;;  %3659 = vperm.xlu1 %6237, %v8835_v24   ;;  %v8859_v24 = vpop.eup %6485  ;;  %6517 = vpow2.f32 %v3265_v39  ;;  %v3273_v39 = vmul.f32 1.442695, %v3027_v36  ;;  %v11062_v36 = vld [vmem:[#allocation74_spill] sm:$0xff]  ;;  %v3247_v34 = vmul.f32 1.442695, %v3014_v47 }
 0x3d7   : > { %11032 = vst [vmem:[#allocation84_spill] sm:$0xff] %v8859_v24  ;;  %v8863_v49 = vpop.eup %6487  ;;  %6519 = vpow2.f32 %v3235_v52  ;;  %v3029_v52 = vsub.f32 %v11058_v2, %v8886_v62  ;;  %v11063_v2 = vld [vmem:[#allocation83_spill] sm:$0xff] }
 0x3d8   : > { %v8847_v56 = vpop.permute.xlu0 %3518  ;;  %11033 = vst [vmem:[#allocation20_spill] sm:$0xff] %v8863_v49  ;;  %v8874_v11 = vpop.eup %6489  ;;  %6521 = vpow2.f32 %v3269_v37  ;;  %v3016_v1 = vsub.f32 %v11063_v2, %v8768_v4  ;;  %v11066_v47 = vld [vmem:[#allocation103_spill] sm:$0xff] }
 0x3d9   : > { %v8851_v60 = vpop.permute.xlu1 %3473  ;;  %3710 = vperm.xlu0 %6238, %v8845_v27   ;;  %11034 = vst [vmem:[#allocation133_spill] sm:$0xff] %v8874_v11  ;;  %v8878_v27 = vpop.eup %6491  ;;  %6523 = vpow2.f32 %v3239_v35  ;;  %v3277_v37 = vmul.f32 1.442695, %v3029_v52  ;;  %v3031_v35 = vsub.f32 %v11062_v36, %v8886_v62  ;;  %v3033_v52 = vsub.f32 %v8266_v45, %v8886_v62 }
 0x3da   : > { %3665 = vperm.xlu1 %6237, %v8849_v14   ;;  %11035 = vst [vmem:[#allocation134_spill] sm:$0xff] %v8878_v27  ;;  %v3018_v36 = vsub.f32 %v11066_v47, %v8768_v4  ;;  %v3035_v45 = vsub.f32 %v8214_v31, %v8886_v62 }
 0x3dc   : > { %v8861_v55 = vpop.permute.xlu0 %3524 }
 0x3dd   : > { %v8865_v40 = vpop.permute.xlu1 %3479  ;;  %3716 = vperm.xlu0 %6238, %v8859_v24  }
 0x3de   : > { %3671 = vperm.xlu1 %6237, %v8863_v49   ;;  %v8893_v49 = vpop.eup %6493  ;;  %6525 = vpow2.f32 %v3273_v39  ;;  %v3281_v39 = vmul.f32 1.442695, %v3031_v35  ;;  %v3255_v35 = vmul.f32 1.442695, %v3018_v36 }
 0x3df   : > { %11037 = vst [vmem:[#allocation59_spill] sm:$0xff] %v8893_v49  ;;  %v8897_v46 = vpop.eup %6495  ;;  %6527 = vpow2.f32 %v3243_v48  ;;  %v3251_v48 = vmul.f32 1.442695, %v3016_v1 }
 0x3e0   : > { %v8876_v14 = vpop.permute.xlu0 %3530  ;;  %11038 = vst [vmem:[#allocation135_spill] sm:$0xff] %v8897_v46  ;;  %v8907_v58 = vpop.eup %6497  ;;  %6529 = vpow2.f32 %v3277_v37  ;;  %v3285_v37 = vmul.f32 1.442695, %v3033_v52  ;;  %v11072_v52 = vld [vmem:[#allocation114_spill] sm:$0xff] }
 0x3e1   : > { %v8880_v24 = vpop.permute.xlu1 %3485  ;;  %3722 = vperm.xlu0 %6238, %v8874_v11   ;;  %11041 = vst [vmem:[#allocation115_spill] sm:$0xff] %v8907_v58 }
 0x3e2   : > { %3677 = vperm.xlu1 %6237, %v8878_v27   ;;  %v8911_v27 = vpop.eup %6499  ;;  %6531 = vpow2.f32 %v3247_v34  ;;  %v3020_v34 = vsub.f32 %v10864_v30, %v8768_v4 }
 0x3e3   : > { %11042 = vst [vmem:[#allocation71_spill] sm:$0xff] %v8911_v27 }
 0x3e4   : > { %v8895_v11 = vpop.permute.xlu0 %3536  ;;  %v3259_v31 = vmul.f32 1.442695, %v3020_v34 }
 0x3e5   : > { %v8899_v29 = vpop.permute.xlu1 %3491  ;;  %3728 = vperm.xlu0 %6238, %v8893_v49  }
 0x3e6   : > { %3683 = vperm.xlu1 %6237, %v8897_v46   ;;  %v8921_v46 = vpop.eup %6501  ;;  %6533 = vpow2.f32 %v3281_v39  ;;  %v3289_v39 = vmul.f32 1.442695, %v3035_v45  ;;  %v11076_v45 = vld [vmem:[#allocation110_spill] sm:$0xff] }
 0x3e7   : > { %11045 = vst [vmem:[#allocation111_spill] sm:$0xff] %v8921_v46  ;;  %v8925_v26 = vpop.eup %6503  ;;  %6535 = vpow2.f32 %v3251_v48  ;;  %v3022_v48 = vsub.f32 %v11072_v52, %v8886_v62 }
 0x3e8   : > { %v8909_v53 = vpop.permute.xlu0 %3542  ;;  %11046 = vst [vmem:[#allocation67_spill] sm:$0xff] %v8925_v26 }
 0x3e9   : > { %v8913_v12 = vpop.permute.xlu1 %3497  ;;  %3734 = vperm.xlu0 %6238, %v8907_v58  }
 0x3ea   : > { %3689 = vperm.xlu1 %6237, %v8911_v27   ;;  %v8935_v27 = vpop.eup %6505  ;;  %6537 = vpow2.f32 %v3285_v37  ;;  %v3263_v37 = vmul.f32 1.442695, %v3022_v48 }
 0x3eb   : > { %11049 = vst [vmem:[#allocation121_spill] sm:$0xff] %v8935_v27  ;;  %v8939_v22 = vpop.eup %6507  ;;  %6539 = vpow2.f32 %v3255_v35  ;;  %v3024_v35 = vsub.f32 %v11076_v45, %v8886_v62 }
 0x3ec   : > { %v8923_v49 = vpop.permute.xlu0 %3548  ;;  %11051 = vst [vmem:[#allocation136_spill] sm:$0xff] %v8939_v22 }
 0x3ed   : > { %v8927_v44 = vpop.permute.xlu1 %3503  ;;  %3740 = vperm.xlu0 %6238, %v8921_v46  }
 0x3ee   : > { %3695 = vperm.xlu1 %6237, %v8925_v26   ;;  %v8949_v26 = vpop.eup %6509  ;;  %6541 = vpow2.f32 %v3289_v39  ;;  %v11080_v39 = vld [vmem:[#allocation120_spill] sm:$0xff] }
 0x3ef   : > { %11054 = vst [vmem:[#allocation118_spill] sm:$0xff] %v8949_v26 }
 0x3f0   : > { %v8937_v58 = vpop.permute.xlu0 %3554 }
 0x3f1   : > { %11050 = vst [vmem:[#allocation79_spill] sm:$0xff] %v8937_v58  ;;  %v8941_v5 = vpop.permute.xlu1 %3509  ;;  %3746 = vperm.xlu0 %6238, %v8935_v27   ;;  %v8953_v58 = vpop.eup %6511  ;;  %6543 = vpow2.f32 %v3259_v31  ;;  %v3026_v31 = vsub.f32 %v11080_v39, %v8886_v62 }
 0x3f2   : > { %3701 = vperm.xlu1 %6237, %v8939_v22   ;;  %11056 = vst [vmem:[#allocation137_spill] sm:$0xff] %v8953_v58  ;;  %v8963_v27 = vpop.eup %6513  ;;  %6545 = vpow2.f32 %v3263_v37  ;;  %v11085_v37 = vld [vmem:[#allocation117_spill] sm:$0xff] }
 0x3f3   : > { %11060 = vst [vmem:[#allocation62_spill] sm:$0xff] %v8963_v27 }
 0x3f4   : > { %v8951_v46 = vpop.permute.xlu0 %3560 }
 0x3f5   : > { %11055 = vst [vmem:[#allocation75_spill] sm:$0xff] %v8951_v46  ;;  %v8955_v28 = vpop.permute.xlu1 %3515  ;;  %3752 = vperm.xlu0 %6238, %v8949_v26   ;;  %v8967_v46 = vpop.eup %6515 }
 0x3f6   : > { %11057 = vst [vmem:[#allocation138_spill] sm:$0xff] %v8955_v28  ;;  %3707 = vperm.xlu1 %6237, %v8953_v58   ;;  %11061 = vst [vmem:[#allocation88_spill] sm:$0xff] %v8967_v46  ;;  %v8977_v26 = vpop.eup %6517 }
 0x3f7   : > { %11064 = vst [vmem:[#allocation74_spill] sm:$0xff] %v8977_v26  ;;  %v8981_v57 = vpop.eup %6519 }
 0x3f8   : > { %v8965_v22 = vpop.permute.xlu0 %3566  ;;  %11065 = vst [vmem:[#allocation83_spill] sm:$0xff] %v8981_v57  ;;  %v8991_v2 = vpop.eup %6521 }
 0x3f9   : > { %v8969_v28 = vpop.permute.xlu1 %3521  ;;  %3758 = vperm.xlu0 %6238, %v8963_v27   ;;  %11067 = vst [vmem:[#allocation103_spill] sm:$0xff] %v8991_v2 }
 0x3fa   : > { %3713 = vperm.xlu1 %6237, %v8967_v46   ;;  %v8995_v46 = vpop.eup %6523 }
 0x3fb   : > { %11068 = vst [vmem:[#allocation139_spill] sm:$0xff] %v8995_v46  ;;  %v9005_v1 = vpop.eup %6525 }
 0x3fc   : > { %v8979_v58 = vpop.permute.xlu0 %3572  ;;  %11069 = vst [vmem:[#allocation140_spill] sm:$0xff] %v9005_v1 }
 0x3fd   : > { %v8983_v16 = vpop.permute.xlu1 %3527  ;;  %3764 = vperm.xlu0 %6238, %v8977_v26   ;;  %v9009_v26 = vpop.eup %6527 }
 0x3fe   : > { %3719 = vperm.xlu1 %6237, %v8981_v57   ;;  %11071 = vst [vmem:[#allocation142_spill] sm:$0xff] %v9009_v26  ;;  %v9017_v30 = vpop.eup %6529 }
 0x3ff   : > { %11073 = vst [vmem:[#allocation114_spill] sm:$0xff] %v9017_v30  ;;  %v9021_v36 = vpop.eup %6531 }
 0x400   : > { %v8993_v27 = vpop.permute.xlu0 %3578  ;;  %11075 = vst [vmem:[#allocation144_spill] sm:$0xff] %v9021_v36  ;;  %v9029_v34 = vpop.eup %6533 }
 0x401   : > { %v8997_v17 = vpop.permute.xlu1 %3533  ;;  %3770 = vperm.xlu0 %6238, %v8991_v2   ;;  %11077 = vst [vmem:[#allocation110_spill] sm:$0xff] %v9029_v34 }
 0x402   : > { %3725 = vperm.xlu1 %6237, %v8995_v46  }
 0x404   : > { %v9007_v47 = vpop.permute.xlu0 %3584 }
 0x405   : > { %11070 = vst [vmem:[#allocation141_spill] sm:$0xff] %v9007_v47  ;;  %v9011_v57 = vpop.permute.xlu1 %3539  ;;  %3776 = vperm.xlu0 %6238, %v9005_v1   ;;  %v9033_v1 = vpop.eup %6535 }
 0x406   : > { %3731 = vperm.xlu1 %6237, %v9009_v26   ;;  %11079 = vst [vmem:[#allocation146_spill] sm:$0xff] %v9033_v1  ;;  %v9041_v48 = vpop.eup %6537 }
 0x407   : > { %11081 = vst [vmem:[#allocation120_spill] sm:$0xff] %v9041_v48 }
 0x408   : > { %v9019_v4 = vpop.permute.xlu0 %3590 }
 0x409   : > { %11074 = vst [vmem:[#allocation143_spill] sm:$0xff] %v9019_v4  ;;  %v9023_v2 = vpop.permute.xlu1 %3545  ;;  %3782 = vperm.xlu0 %6238, %v9017_v30   ;;  %v3267_v30 = vmul.f32 1.442695, %v3024_v35  ;;  %v3028_v35 = vsub.f32 %v11085_v37, %v8886_v62 }
 0x40a   : > { %3737 = vperm.xlu1 %6237, %v9021_v36   ;;  %v9045_v36 = vpop.eup %6539 }
 0x40b   : > { %11083 = vst [vmem:[#allocation148_spill] sm:$0xff] %v9045_v36  ;;  %6547 = vpow2.f32 %v3267_v30  ;;  %v11090_v30 = vld [vmem:[#allocation86_spill] sm:$0xff] }
 0x40c   : > { %v9031_v52 = vpop.permute.xlu0 %3596 }
 0x40d   : > { %11078 = vst [vmem:[#allocation145_spill] sm:$0xff] %v9031_v52  ;;  %v9035_v26 = vpop.permute.xlu1 %3551  ;;  %3788 = vperm.xlu0 %6238, %v9029_v34   ;;  %v3271_v34 = vmul.f32 1.442695, %v3026_v31  ;;  %v3030_v31 = vsub.f32 %v11090_v30, %v8886_v62 }
 0x40e   : > { %3743 = vperm.xlu1 %6237, %v9033_v1   ;;  %v9053_v1 = vpop.eup %6541 }
 0x40f   : > { %11086 = vst [vmem:[#allocation117_spill] sm:$0xff] %v9053_v1  ;;  %v9057_v52 = vpop.eup %6543  ;;  %6549 = vpow2.f32 %v3271_v34 }
 0x410   : > { %v9043_v45 = vpop.permute.xlu0 %3602  ;;  %11088 = vst [vmem:[#allocation151_spill] sm:$0xff] %v9057_v52  ;;  %v9067_v37 = vpop.eup %6545 }
 0x411   : > { %11082 = vst [vmem:[#allocation147_spill] sm:$0xff] %v9043_v45  ;;  %v9047_v46 = vpop.permute.xlu1 %3557  ;;  %3794 = vperm.xlu0 %6238, %v9041_v48   ;;  %v3275_v48 = vmul.f32 1.442695, %v3028_v35  ;;  %11092 = vst [vmem:[#allocation153_spill] sm:$0xff] %v9067_v37 }
 0x412   : > { %11084 = vst [vmem:[#allocation149_spill] sm:$0xff] %v9047_v46  ;;  %3749 = vperm.xlu1 %6237, %v9045_v36   ;;  %v11145_v46 = vld [vmem:[#allocation95_spill] sm:$0xff] }
 0x413   : > { %6551 = vpow2.f32 %v3275_v48 }
 0x414   : > { %v9055_v39 = vpop.permute.xlu0 %3608 }
 0x415   : > { %11087 = vst [vmem:[#allocation150_spill] sm:$0xff] %v9055_v39  ;;  %v9059_v45 = vpop.permute.xlu1 %3563  ;;  %3800 = vperm.xlu0 %6238, %v9053_v1   ;;  %v3279_v39 = vmul.f32 1.442695, %v3030_v31  ;;  %v3032_v1 = vsub.f32 %v8092_v21, %v8886_v62  ;;  %v9076_v34 = vpop.eup %6547 }
 0x416   : > { %11089 = vst [vmem:[#allocation152_spill] sm:$0xff] %v9059_v45  ;;  %3755 = vperm.xlu1 %6237, %v9057_v52   ;;  %11094 = vst [vmem:[#allocation155_spill] sm:$0xff] %v9076_v34  ;;  %v3034_v52 = vsub.f32 %v8256_v43, %v8886_v62 }
 0x417   : > { %6553 = vpow2.f32 %v3279_v39  ;;  %v3283_v30 = vmul.f32 1.442695, %v3032_v1 }
 0x418   : > { %v9065_v36 = vpop.permute.xlu0 %3614  ;;  %v3287_v21 = vmul.f32 1.442695, %v3034_v52 }
 0x419   : > { %11091 = vst [vmem:[#allocation86_spill] sm:$0xff] %v9065_v36  ;;  %v9069_v4 = vpop.permute.xlu1 %3569  ;;  %v9085_v48 = vpop.eup %6549  ;;  %6555 = vpow2.f32 %v3283_v30 }
 0x41a   : > { %3761 = vperm.xlu1 %6237, %v9067_v37   ;;  %11096 = vst [vmem:[#allocation157_spill] sm:$0xff] %v9085_v48  ;;  %v3036_v37 = vsub.f32 %v8206_v19, %v8886_v62  ;;  %6557 = vpow2.f32 %v3287_v21 }
 0x41c   : > { %v9074_v45 = vpop.permute.xlu0 %3620  ;;  %v3291_v43 = vmul.f32 1.442695, %v3036_v37 }
 0x41d   : > { %11093 = vst [vmem:[#allocation154_spill] sm:$0xff] %v9074_v45  ;;  %v9078_v35 = vpop.permute.xlu1 %3575  ;;  %v9094_v39 = vpop.eup %6551 }
 0x41e   : > { %3767 = vperm.xlu1 %6237, %v9076_v34   ;;  %11098 = vst [vmem:[#allocation159_spill] sm:$0xff] %v9094_v39  ;;  %6559 = vpow2.f32 %v3291_v43 }
 0x420   : > { %v9083_v36 = vpop.permute.xlu0 %3626 }
 0x421   : > { %11095 = vst [vmem:[#allocation156_spill] sm:$0xff] %v9083_v36  ;;  %v9087_v31 = vpop.permute.xlu1 %3581  ;;  %v9101_v36 = vpop.eup %6553 }
 0x422   : > { %3773 = vperm.xlu1 %6237, %v9085_v48   ;;  %11100 = vst [vmem:[#allocation161_spill] sm:$0xff] %v9101_v36 }
 0x423   : > { %v9108_v62 = vpop.eup %6555 }
 0x424   : > { %v9092_v45 = vpop.permute.xlu0 %3632  ;;  %11103 = vst [vmem:[#allocation164_spill] sm:$0xff] %v9108_v62  ;;  %v9115_v37 = vpop.eup %6557 }
 0x425   : > { %11097 = vst [vmem:[#allocation158_spill] sm:$0xff] %v9092_v45  ;;  %v9096_v1 = vpop.permute.xlu1 %3587  ;;  %11106 = vst [vmem:[#allocation167_spill] sm:$0xff] %v9115_v37 }
 0x426   : > { %3779 = vperm.xlu1 %6237, %v9094_v39  }
 0x428   : > { %v9099_v34 = vpop.permute.xlu0 %3638 }
 0x429   : > { %11099 = vst [vmem:[#allocation160_spill] sm:$0xff] %v9099_v34  ;;  %v9103_v48 = vpop.permute.xlu1 %3593 }
 0x42a   : > { %11101 = vst [vmem:[#allocation162_spill] sm:$0xff] %v9103_v48  ;;  %3785 = vperm.xlu1 %6237, %v9101_v36   ;;  %v9122_v36 = vpop.eup %6559 }
 0x42b   : > { %11109 = vst [vmem:[#allocation170_spill] sm:$0xff] %v9122_v36 }
 0x42c   : > { %v9106_v19 = vpop.permute.xlu0 %3644 }
 0x42d   : > { %11102 = vst [vmem:[#allocation163_spill] sm:$0xff] %v9106_v19  ;;  %v9110_v52 = vpop.permute.xlu1 %3599 }
 0x42e   : > { %11104 = vst [vmem:[#allocation165_spill] sm:$0xff] %v9110_v52  ;;  %3791 = vperm.xlu1 %6237, %v9108_v62  }
 0x430   : > { %v9113_v30 = vpop.permute.xlu0 %3650 }
 0x431   : > { %11105 = vst [vmem:[#allocation166_spill] sm:$0xff] %v9113_v30  ;;  %v9117_v21 = vpop.permute.xlu1 %3605 }
 0x432   : > { %11107 = vst [vmem:[#allocation168_spill] sm:$0xff] %v9117_v21  ;;  %3797 = vperm.xlu1 %6237, %v9115_v37  }
 0x434   : > { %v9120_v39 = vpop.permute.xlu0 %3656 }
 0x435   : > { %11108 = vst [vmem:[#allocation169_spill] sm:$0xff] %v9120_v39  ;;  %v9124_v43 = vpop.permute.xlu1 %3611 }
 0x436   : > { %11110 = vst [vmem:[#allocation171_spill] sm:$0xff] %v9124_v43  ;;  %3803 = vperm.xlu1 %6237, %v9122_v36  }
 0x438   : > { %v9127_v19 = vpop.permute.xlu0 %3662 }
 0x439   : > { %11111 = vst [vmem:[#allocation172_spill] sm:$0xff] %v9127_v19  ;;  %v9129_v34 = vpop.permute.xlu1 %3617 }
 0x43a   : > { %11112 = vst [vmem:[#allocation173_spill] sm:$0xff] %v9129_v34 }
 0x43c   : > { %v9131_v62 = vpop.permute.xlu0 %3668 }
 0x43d   : > { %11113 = vst [vmem:[#allocation174_spill] sm:$0xff] %v9131_v62  ;;  %v9133_v30 = vpop.permute.xlu1 %3623 }
 0x43e   : > { %11114 = vst [vmem:[#allocation175_spill] sm:$0xff] %v9133_v30 }
 0x440   : > { %v9135_v45 = vpop.permute.xlu0 %3674 }
 0x441   : > { %11115 = vst [vmem:[#allocation176_spill] sm:$0xff] %v9135_v45  ;;  %v9137_v21 = vpop.permute.xlu1 %3629 }
 0x442   : > { %11116 = vst [vmem:[#allocation177_spill] sm:$0xff] %v9137_v21 }
 0x444   : > { %v9139_v37 = vpop.permute.xlu0 %3680 }
 0x445   : > { %11117 = vst [vmem:[#allocation178_spill] sm:$0xff] %v9139_v37  ;;  %v9141_v39 = vpop.permute.xlu1 %3635 }
 0x446   : > { %11118 = vst [vmem:[#allocation179_spill] sm:$0xff] %v9141_v39 }
 0x448   : > { %v9143_v52 = vpop.permute.xlu0 %3686 }
 0x449   : > { %11119 = vst [vmem:[#allocation180_spill] sm:$0xff] %v9143_v52  ;;  %v9145_v43 = vpop.permute.xlu1 %3641 }
 0x44a   : > { %11120 = vst [vmem:[#allocation181_spill] sm:$0xff] %v9145_v43 }
 0x44c   : > { %v9147_v36 = vpop.permute.xlu0 %3692 }
 0x44d   : > { %11121 = vst [vmem:[#allocation182_spill] sm:$0xff] %v9147_v36  ;;  %v9149_v19 = vpop.permute.xlu1 %3647 }
 0x44e   : > { %11122 = vst [vmem:[#allocation183_spill] sm:$0xff] %v9149_v19 }
 0x450   : > { %v9151_v34 = vpop.permute.xlu0 %3698 }
 0x451   : > { %11123 = vst [vmem:[#allocation184_spill] sm:$0xff] %v9151_v34  ;;  %v9153_v62 = vpop.permute.xlu1 %3653 }
 0x452   : > { %11124 = vst [vmem:[#allocation185_spill] sm:$0xff] %v9153_v62 }
 0x454   : > { %v9155_v30 = vpop.permute.xlu0 %3704 }
 0x455   : > { %11125 = vst [vmem:[#allocation186_spill] sm:$0xff] %v9155_v30  ;;  %v9157_v45 = vpop.permute.xlu1 %3659 }
 0x456   : > { %11126 = vst [vmem:[#allocation187_spill] sm:$0xff] %v9157_v45 }
 0x458   : > { %v9159_v21 = vpop.permute.xlu0 %3710 }
 0x459   : > { %11127 = vst [vmem:[#allocation188_spill] sm:$0xff] %v9159_v21  ;;  %v9161_v37 = vpop.permute.xlu1 %3665 }
 0x45a   : > { %11128 = vst [vmem:[#allocation189_spill] sm:$0xff] %v9161_v37  ;;  %v11139_v37 = vld [vmem:[#allocation89_spill] sm:$0xff] }
 0x45c   : > { %v9165_v52 = vpop.permute.xlu0 %3716 }
 0x45d   : > { %v9163_v39 = vpop.permute.xlu1 %3671  ;;  %11130 = vst [vmem:[#allocation191_spill] sm:$0xff] %v9165_v52  ;;  %v11140_v52 = vld [vmem:[#allocation91_spill] sm:$0xff] }
 0x45e   : > { %11129 = vst [vmem:[#allocation190_spill] sm:$0xff] %v9163_v39  ;;  %v3891_v39 = vrot.slane %v8851_v60, %v11139_v37  ;;  %v11143_v60 = vld [vmem:[#allocation97_spill] sm:$0xff] }
 0x45f   : > { %v3901_v48 = vrot.slane %v8865_v40, %v11143_v60 }
 0x460   : > { %v9169_v36 = vpop.permute.xlu0 %3722 }
 0x461   : > { %v9167_v43 = vpop.permute.xlu1 %3677  ;;  %11132 = vst [vmem:[#allocation193_spill] sm:$0xff] %v9169_v36  ;;  %v3808_v36 = vrot.slane %v8677_v23, %v11140_v52  ;;  %v3822_v23 = vrot.slane %v8705_v33, %v11143_v60  ;;  %v3980_v33 = vrot.slane %v8983_v16, %v11143_v60  ;;  %v3906_v16 = vrot.slane %v8758_v32, %v11145_v46 }
 0x462   : > { %11131 = vst [vmem:[#allocation192_spill] sm:$0xff] %v9167_v43  ;;  %v3812_v43 = vrot.slane %v8673_v54, %v11139_v37 }
 0x464   : > { %v9175_v62 = vpop.permute.xlu0 %3728 }
 0x465   : > { %v9171_v19 = vpop.permute.xlu1 %3683  ;;  %11135 = vst [vmem:[#allocation196_spill] sm:$0xff] %v9175_v62 }
 0x466   : > { %11133 = vst [vmem:[#allocation194_spill] sm:$0xff] %v9171_v19  ;;  %v11141_v19 = vld [vmem:[#allocation94_spill] sm:$0xff] }
 0x467   : > { %v3817_v62 = vrot.slane %v8691_v7, %v11141_v19  ;;  %v3966_v7 = vrot.slane %v8847_v56, %v11140_v52  ;;  %v3975_v56 = vrot.slane %v8861_v55, %v11141_v19 }
 0x468   : > { %v9179_v45 = vpop.permute.xlu0 %3734 }
 0x469   : > { %v9173_v34 = vpop.permute.xlu1 %3689  ;;  %11137 = vst [vmem:[#allocation198_spill] sm:$0xff] %v9179_v45 }
 0x46a   : > { %11134 = vst [vmem:[#allocation195_spill] sm:$0xff] %v9173_v34  ;;  %v3887_v34 = vrot.slane %v8729_v15, %v11140_v52  ;;  %v3896_v15 = vrot.slane %v8743_v10, %v11141_v19  ;;  %v11146_v10 = vld [vmem:[#allocation99_spill] sm:$0xff] }
 0x46b   : > { %v3832_v47 = vrot.slane %v8733_v0, %v11146_v10 }
 0x46c   : > { %v9200_v54 = vpop.permute.xlu0 %3740 }
 0x46d   : > { %v9177_v30 = vpop.permute.xlu1 %3695  ;;  %11144 = vst [vmem:[#allocation91_spill] sm:$0xff] %v9200_v54 }
 0x46e   : > { %11136 = vst [vmem:[#allocation197_spill] sm:$0xff] %v9177_v30  ;;  %v3970_v30 = vrot.slane %v8969_v28, %v11139_v37  ;;  %v3813_v28 = vsel %vm2198_vm2, %v3812_v43, %v3808_v36 }
 0x471   : > { %v9181_v21 = vpop.permute.xlu1 %3701 }
 0x472   : > { %11138 = vst [vmem:[#allocation199_spill] sm:$0xff] %v9181_v21  ;;  %v3892_v21 = vsel %vm2198_vm2, %v3891_v39, %v3887_v34  ;;  %v3818_v34 = vsel %vm2205_vm3, %v3817_v62, %v3813_v28  ;;  %v3971_v39 = vsel %vm2198_vm2, %v3970_v30, %v3966_v7  ;;  %v9234_v7 = vpop.permute.xlu0 %3746 }
 0x473   : > { %v3897_v40 = vsel %vm2205_vm3, %v3896_v15, %v3892_v21  ;;  %v3823_v62 = vsel %vm2212_vm4, %v3822_v23, %v3818_v34  ;;  %v11147_v21 = vld [vmem:[#allocation102_spill] sm:$0xff]  ;;  %v11148_v15 = vld [vmem:[#allocation105_spill] sm:$0xff]  ;;  %v3976_v55 = vsel %vm2205_vm3, %v3975_v56, %v3971_v39 }
 0x474   : > { %v3902_v36 = vsel %vm2212_vm4, %v3901_v48, %v3897_v40  ;;  %v3837_v30 = vrot.slane %v8747_v42, %v11147_v21  ;;  %v3842_v0 = vrot.slane %v8762_v41, %v11148_v15  ;;  %v11149_v48 = vld [vmem:[#allocation104_spill] sm:$0xff]  ;;  %v3981_v28 = vsel %vm2212_vm4, %v3980_v33, %v3976_v55  ;;  %v11151_v33 = vld [vmem:[#allocation107_spill] sm:$0xff] }
 0x475   : > { %v9195_v45 = vpop.permute.xlu1 %3707  ;;  %v3907_v23 = vsel %vm2219_vm5, %v3906_v16, %v3902_v36  ;;  %v3990_v42 = vrot.slane %v8997_v17, %v11146_v10  ;;  %v3985_v41 = vrot.slane %v8876_v14, %v11145_v46  ;;  %v3921_v40 = vrot.slane %v8899_v29, %v11148_v15 }
 0x476   : > { %11142 = vst [vmem:[#allocation89_spill] sm:$0xff] %v9195_v45  ;;  %v3827_v45 = vrot.slane %v8719_v59, %v11145_v46  ;;  %v3911_v59 = vrot.slane %v8880_v24, %v11146_v10  ;;  %v3847_v24 = vrot.slane %v8781_v20, %v11149_v48  ;;  %v3916_v39 = vrot.slane %v8777_v63, %v11147_v21 }
 0x477   : > { %v3852_v17 = vrot.slane %v8795_v50, %v11151_v33  ;;  %v4049_v14 = vrot.slane %v9069_v4, %v11139_v37  ;;  %v3995_v50 = vrot.slane %v8895_v11, %v11147_v21  ;;  %v3931_v16 = vrot.slane %v8913_v12, %v11151_v33 }
 0x478   : > { %v3828_v43 = vsel %vm2219_vm5, %v3827_v45, %v3823_v62  ;;  %v3912_v34 = vsel %vm10662_vm6, %v3911_v59, %v3907_v23  ;;  %v4000_v62 = vrot.slane %v9011_v57, %v11148_v15  ;;  %v4045_v4 = vrot.slane %v8965_v22, %v11140_v52 }
 0x479   : > { %v9216_v54 = vpop.permute.xlu1 %3713  ;;  %v3833_v45 = vsel %vm10662_vm6, %v3832_v47, %v3828_v43  ;;  %v3986_v47 = vsel %vm2219_vm5, %v3985_v41, %v3981_v28  ;;  %v3917_v59 = vsel %vm11154_vm1, %v3916_v39, %v3912_v34  ;;  %v9273_v43 = vpop.permute.xlu0 %3752  ;;  %v3862_v55 = vrot.slane %v8809_v9, %v7884_v13 }
 0x47a   : > { %v3838_v20 = vsel %vm11150_vm12, %v3837_v30, %v3833_v45  ;;  %v3991_v29 = vsel %vm10662_vm6, %v3990_v42, %v3986_v47  ;;  %v3922_v30 = vsel %vm11152_vm11, %v3921_v40, %v3917_v59  ;;  %v4050_v12 = vsel %vm2198_vm2, %v4049_v14, %v4045_v4 }
 0x47b   : > { %v3843_v56 = vsel %vm11152_vm11, %v3842_v0, %v3838_v20  ;;  %v3926_v0 = vrot.slane %v8791_v3, %v11149_v48  ;;  %v4059_v22 = vrot.slane %v9078_v35, %v11143_v60  ;;  %vm11157_vm12 = vcmask 589312  }
 0x47c   : > { %v3848_v36 = vsel %vm11153_vm9, %v3847_v24, %v3843_v56  ;;  %v11155_v24 = vld [vmem:[#allocation109_spill] sm:$0xff]  ;;  %vm11156_vm9 = vmmov %vm11154_vm1  ;;  %v4054_v3 = vrot.slane %v8979_v58, %v11141_v19  ;;  %v4010_v9 = vrot.slane %v9023_v2, %v11151_v33  ;;  %v4005_v41 = vrot.slane %v8909_v53, %v11149_v48 }
 0x47d   : > { %v9242_v32 = vpop.permute.xlu1 %3719  ;;  %v3853_v57 = vsel %vm2254_vm10, %v3852_v17, %v3848_v36  ;;  %v3857_v11 = vrot.slane %v8687_v8, %v11155_v24  ;;  %v3996_v23 = vsel %vm11156_vm9, %v3995_v50, %v3991_v29  ;;  %v3927_v28 = vsel %vm11157_vm12, %v3926_v0, %v3922_v30  ;;  %vm11158_vm1 = vmmov %vm11152_vm11  ;;  %v9312_v56 = vpop.permute.xlu0 %3758  ;;  %v11163_v29 = vld [vmem:[#allocation31_spill] sm:$0xff] }
 0x47e   : > { %v4001_v42 = vsel %vm11158_vm1, %v4000_v62, %v3996_v23  ;;  %vm11159_vm11 = vcmask 720512   ;;  %v3932_v34 = vsel %vm2254_vm10, %v3931_v16, %v3927_v28  ;;  %v3941_v35 = vrot.slane %v8927_v44, %v7884_v13  ;;  %v11168_v23 = vld [vmem:[#allocation149_spill] sm:$0xff]  ;;  %v11169_v28 = vld [vmem:[#allocation116_spill] sm:$0xff] }
 0x47f   : > { %v3858_v8 = vsel %vm11159_vm11, %v3857_v11, %v3853_v57  ;;  %v3867_v58 = vrot.slane %v8701_v38, %v7891_v25  ;;  %v3936_v40 = vrot.slane %v8805_v6, %v11155_v24  ;;  %vm11160_vm9 = vcmask 786112   ;;  %vm11161_vm1 = vmmov %vm11159_vm11  ;;  %v11166_v57 = vld [vmem:[#allocation141_spill] sm:$0xff] }
 0x480   : > { %v3863_v2 = vsel %vm11160_vm9, %v3862_v55, %v3858_v8  ;;  %v4055_v20 = vsel %vm2205_vm3, %v4054_v3, %v4050_v12  ;;  %v3872_v39 = vrot.slane %v8823_v51, %v7914_v61  ;;  %v4006_v53 = vsel %vm11157_vm12, %v4005_v41, %v4001_v42  ;;  %vm11162_vm11 = vmmov %vm11160_vm9  ;;  %v11170_v3 = vld [vmem:[#allocation132_spill] sm:$0xff]  ;;  %v11172_v41 = vld [vmem:[#allocation138_spill] sm:$0xff] }
 0x481   : > { %v9264_v63 = vpop.permute.xlu1 %3725  ;;  %v4060_v17 = vsel %vm2212_vm4, %v4059_v22, %v4055_v20  ;;  %v4069_v44 = vrot.slane %v9087_v31, %v11146_v10  ;;  %v3937_v38 = vsel %vm11161_vm1, %v3936_v40, %v3932_v34  ;;  %v4064_v6 = vrot.slane %v8993_v27, %v11145_v46  ;;  %v11164_v27 = vld [vmem:[#allocation19_spill] sm:$0xff]  ;;  %vm11165_vm9 = vmmov %vm11161_vm1 }
 0x482   : > { %v4011_v47 = vsel %vm2254_vm10, %v4010_v9, %v4006_v53  ;;  %v4020_v14 = vrot.slane %v9035_v26, %v7884_v13  ;;  %v4015_v36 = vrot.slane %v8923_v49, %v11155_v24  ;;  %v3942_v59 = vsel %vm11162_vm11, %v3941_v35, %v3937_v38  ;;  %vm11167_vm12 = vmmov %vm11162_vm11  ;;  %v11171_v9 = vld [vmem:[#allocation79_spill] sm:$0xff]  ;;  %v9353_v35 = vpop.permute.xlu0 %3764 }
 0x483   : > { %v3951_v31 = vrot.slane %v8941_v5, %v7914_v61  ;;  %v3877_v62 = vrot.slane %v11163_v29, %v7939_v18  ;;  %v3946_v50 = vrot.slane %v11164_v27, %v7891_v25  ;;  %v3868_v30 = vsel %vm2275_vm13, %v3867_v58, %v3863_v2  ;;  %v11173_v58 = vld [vmem:[#allocation14_spill] sm:$0xff] }
 0x484   : > { %v4065_v26 = vsel %vm2219_vm5, %v4064_v6, %v4060_v17  ;;  %v3873_v16 = vsel %vm2282_vm14, %v3872_v39, %v3868_v30  ;;  %v4016_v4 = vsel %vm11165_vm9, %v4015_v36, %v4011_v47  ;;  %v4079_v0 = vrot.slane %v9096_v1, %v11148_v15  ;;  %v11176_v17 = vld [vmem:[#allocation162_spill] sm:$0xff]  ;;  %v11177_v6 = vld [vmem:[#allocation143_spill] sm:$0xff]  ;;  %v11178_v36 = vld [vmem:[#allocation152_spill] sm:$0xff] }
 0x485   : > { %v9292_v45 = vpop.permute.xlu1 %3731  ;;  %v4070_v49 = vsel %vm10662_vm6, %v4069_v44, %v4065_v26  ;;  %v3947_v5 = vsel %vm2275_vm13, %v3946_v50, %v3942_v59  ;;  %v4074_v55 = vrot.slane %v11166_v57, %v11147_v21  ;;  %v4021_v11 = vsel %vm11167_vm12, %v4020_v14, %v4016_v4  ;;  %v11180_v30 = vld [vmem:[#allocation145_spill] sm:$0xff] }
 0x486   : > { %v4030_v12 = vrot.slane %v11168_v23, %v7914_v61  ;;  %v3882_v42 = vrot.slane %v11170_v3, %v11169_v28  ;;  %v4025_v8 = vrot.slane %v11171_v9, %v7891_v25  ;;  %v3952_v1 = vsel %vm2282_vm14, %v3951_v31, %v3947_v5  ;;  %v11184_v57 = vld [vmem:[#allocation173_spill] sm:$0xff] }
 0x487   : > { %v3961_v34 = vrot.slane %v11172_v41, %v11169_v28  ;;  %v3956_v40 = vrot.slane %v11173_v58, %v7939_v18  ;;  %vm11174_vm1 = vcmask 458112   ;;  %v3878_v20 = vsel %vm2289_vm15, %v3877_v62, %v3873_v16  ;;  %v11179_v62 = vld [vmem:[#allocation75_spill] sm:$0xff]  ;;  %v11187_v41 = vld [vmem:[#allocation86_spill] sm:$0xff] }
 0x488   : > { %v4075_v2 = vsel %vm11174_vm1, %v4074_v55, %v4070_v49  ;;  %v4026_v39 = vsel %vm2275_vm13, %v4025_v8, %v4021_v11  ;;  %vm11175_vm11 = vcmask 523712   ;;  %v4089_v44 = vrot.slane %v11176_v17, %v11151_v33  ;;  %v11181_v16 = vld [vmem:[#allocation147_spill] sm:$0xff]  ;;  %v11182_v49 = vld [vmem:[#allocation150_spill] sm:$0xff]  ;;  %v9394_v8 = vpop.permute.xlu0 %3770 }
 0x489   : > { %v9320_v51 = vpop.permute.xlu1 %3737  ;;  %v4080_v53 = vsel %vm11175_vm11, %v4079_v0, %v4075_v2  ;;  %v3957_v38 = vsel %vm2289_vm15, %v3956_v40, %v3952_v1  ;;  %v4084_v47 = vrot.slane %v11177_v6, %v11149_v48  ;;  %v4031_v14 = vsel %vm2282_vm14, %v4030_v12, %v4026_v39  ;;  %v11185_v12 = vld [vmem:[#allocation165_spill] sm:$0xff]  ;;  %v11188_v58 = vld [vmem:[#allocation154_spill] sm:$0xff]  ;;  %v11189_v39 = vld [vmem:[#allocation156_spill] sm:$0xff] }
 0x48a   : > { %v4040_v59 = vrot.slane %v11178_v36, %v11169_v28  ;;  %v9372_v29 = vsel %vm2296_vm0, %v3882_v42, %v3878_v20  ;;  %v4035_v27 = vrot.slane %v11179_v62, %v7939_v18  ;;  %v9377_v50 = vsel %vm2296_vm0, %v3961_v34, %v3957_v38  ;;  %v11186_v42 = vld [vmem:[#allocation189_spill] sm:$0xff]  ;;  %v11190_v17 = vld [vmem:[#allocation158_spill] sm:$0xff]  ;;  %v11191_v38 = vld [vmem:[#allocation160_spill] sm:$0xff] }
 0x48b   : > { %v4094_v26 = vrot.slane %v11180_v30, %v11155_v24  ;;  %v4104_v4 = vrot.slane %v11181_v16, %v7891_v25  ;;  %v4114_v0 = vrot.slane %v11182_v49, %v7939_v18  ;;  %vm11183_vm9 = vcmask 589312   ;;  %v11196_v16 = vld [vmem:[#allocation163_spill] sm:$0xff] }
 0x48c   : > { %v4085_v5 = vsel %vm11183_vm9, %v4084_v47, %v4080_v53  ;;  %v4128_v55 = vrot.slane %v11184_v57, %v11139_v37  ;;  %v4036_v11 = vsel %vm2289_vm15, %v4035_v27, %v4031_v14  ;;  %v4099_v3 = vrot.slane %v11185_v12, %v7884_v13  ;;  %v11192_v47 = vld [vmem:[#allocation172_spill] sm:$0xff]  ;;  %v11198_v12 = vld [vmem:[#allocation190_spill] sm:$0xff] }
 0x48d   : > { %v9344_v22 = vpop.permute.xlu1 %3743  ;;  %v4090_v23 = vsel %vm2254_vm10, %v4089_v44, %v4085_v5  ;;  %v4207_v9 = vrot.slane %v11186_v42, %v11139_v37  ;;  %v9397_v1 = vsel %vm2296_vm0, %v4040_v59, %v4036_v11  ;;  %v4124_v34 = vrot.slane %v11187_v41, %v11140_v52  ;;  %v11195_v27 = vld [vmem:[#allocation188_spill] sm:$0xff] }
 0x48e   : > { %v4133_v40 = vrot.slane %v11188_v58, %v11141_v19  ;;  %v4286_v2 = vrot.slane %v9216_v54, %v11139_v37  ;;  %v4143_v53 = vrot.slane %v11189_v39, %v11145_v46  ;;  %v4153_v44 = vrot.slane %v11190_v17, %v11147_v21  ;;  %v11194_v54 = vld [vmem:[#allocation175_spill] sm:$0xff] }
 0x48f   : > { %v4163_v6 = vrot.slane %v11191_v38, %v11149_v48  ;;  %v4203_v14 = vrot.slane %v11192_v47, %v11140_v52  ;;  %vm11193_vm12 = vcmask 720512   ;;  %v4129_v59 = vsel %vm2198_vm2, %v4128_v55, %v4124_v34  ;;  %v11200_v55 = vld [vmem:[#allocation174_spill] sm:$0xff]  ;;  %v11224_v38 = vld [vmem:[#allocation197_spill] sm:$0xff] }
 0x490   : > { %v4095_v36 = vsel %vm11193_vm12, %v4094_v26, %v4090_v23  ;;  %v4138_v62 = vrot.slane %v11194_v54, %v11143_v60  ;;  %v4282_v30 = vrot.slane %v11195_v27, %v11140_v52  ;;  %v4173_v5 = vrot.slane %v11196_v16, %v11155_v24  ;;  %v11199_v26 = vld [vmem:[#allocation166_spill] sm:$0xff]  ;;  %v11235_v16 = vld [vmem:[#allocation199_spill] sm:$0xff] }
 0x491   : > { %v9369_v31 = vpop.permute.xlu1 %3749  ;;  %vm11197_vm1 = vcmask 786112   ;;  %v4208_v11 = vsel %vm2198_vm2, %v4207_v9, %v4203_v14  ;;  %v4217_v42 = vrot.slane %v11198_v12, %v11143_v60  ;;  %v4183_v23 = vrot.slane %v11199_v26, %v7891_v25  ;;  %v3777_v14 = vpop.permute.xlu0 %3776  ;;  %v11241_v26 = vld [vmem:[#allocation89_spill] sm:$0xff] }
 0x492   : > { %v4100_v57 = vsel %vm11197_vm1, %v4099_v3, %v4095_v36  ;;  %v4212_v41 = vrot.slane %v11200_v55, %v11141_v19  ;;  %v4287_v34 = vsel %vm2198_vm2, %v4286_v2, %v4282_v30  ;;  %v4296_v58 = vrot.slane %v9242_v32, %v11143_v60  ;;  %v11201_v3 = vld [vmem:[#allocation191_spill] sm:$0xff]  ;;  %v11202_v2 = vld [vmem:[#allocation177_spill] sm:$0xff] }
 0x493   : > { %v4134_v17 = vsel %vm2205_vm3, %v4133_v40, %v4129_v59  ;;  %v4291_v9 = vrot.slane %v11201_v3, %v11141_v19  ;;  %v4361_v47 = vrot.slane %v9312_v56, %v11140_v52  ;;  %v4105_v54 = vsel %vm2275_vm13, %v4104_v4, %v4100_v57  ;;  %v11203_v59 = vld [vmem:[#allocation192_spill] sm:$0xff] }
 0x494   : > { %v4139_v27 = vsel %vm2212_vm4, %v4138_v62, %v4134_v17  ;;  %v4148_v30 = vrot.slane %v11202_v2, %v11146_v10  ;;  %v4213_v32 = vsel %vm2205_vm3, %v4212_v41, %v4208_v11  ;;  %v4227_v12 = vrot.slane %v11203_v59, %v11146_v10  ;;  %v11208_v59 = vld [vmem:[#allocation194_spill] sm:$0xff] }
 0x495   : > { %v9405_v20 = vpop.permute.xlu1 %3755  ;;  %v4218_v40 = vsel %vm2212_vm4, %v4217_v42, %v4213_v32  ;;  %v4292_v55 = vsel %vm2205_vm3, %v4291_v9, %v4287_v34  ;;  %v4370_v4 = vrot.slane %v9353_v35, %v11141_v19  ;;  %v4306_v57 = vrot.slane %v9264_v63, %v11146_v10  ;;  %v11205_v42 = vld [vmem:[#allocation168_spill] sm:$0xff]  ;;  %v11206_v34 = vld [vmem:[#allocation193_spill] sm:$0xff]  ;;  %v11207_v35 = vld [vmem:[#allocation179_spill] sm:$0xff] }
 0x496   : > { %v4297_v62 = vsel %vm2212_vm4, %v4296_v58, %v4292_v55  ;;  %v4109_v41 = vrot.slane %v11205_v42, %v7914_v61  ;;  %v4144_v17 = vsel %vm2219_vm5, %v4143_v53, %v4139_v27  ;;  %v4301_v9 = vrot.slane %v11206_v34, %v11145_v46  ;;  %v3783_v27 = vpop.permute.xlu0 %3782 }
 0x497   : > { %v4158_v2 = vrot.slane %v11207_v35, %v11148_v15  ;;  %v4237_v55 = vrot.slane %v11208_v59, %v11148_v15  ;;  %v4380_v42 = vrot.slane %v9394_v8, %v11145_v46  ;;  %vm11210_vm11 = vcmask 458112  }
 0x498   : > { %v4302_v53 = vsel %vm2219_vm5, %v4301_v9, %v4297_v62  ;;  %v11211_v62 = vld [vmem:[#allocation196_spill] sm:$0xff]  ;;  %vm11212_vm9 = vcmask 523712   ;;  %vm11214_vm12 = vmmov %vm11210_vm11 }
 0x499   : > { %v3762_v39 = vpop.permute.xlu1 %3761  ;;  %vm11215_vm1 = vmmov %vm11212_vm9 }
 0x49a   : > { %v4365_v36 = vrot.slane %v3762_v39, %v11139_v37  ;;  %v11204_v39 = vld [vmem:[#allocation176_spill] sm:$0xff] }
 0x49b   : > { %v4222_v3 = vrot.slane %v11204_v39, %v11145_v46 }
 0x49c   : > { %v4366_v56 = vsel %vm2198_vm2, %v4365_v36, %v4361_v47  ;;  %v4149_v36 = vsel %vm10662_vm6, %v4148_v30, %v4144_v17  ;;  %v4311_v17 = vrot.slane %v11211_v62, %v11147_v21 }
 0x49d   : > { %v3768_v11 = vpop.permute.xlu1 %3767  ;;  %v4223_v58 = vsel %vm2219_vm5, %v4222_v3, %v4218_v40  ;;  %v4371_v63 = vsel %vm2205_vm3, %v4370_v4, %v4366_v56  ;;  %v4307_v40 = vsel %vm10662_vm6, %v4306_v57, %v4302_v53  ;;  %v4316_v56 = vrot.slane %v9292_v45, %v11148_v15 }
 0x49e   : > { %v4375_v47 = vrot.slane %v3768_v11, %v11143_v60  ;;  %v4228_v32 = vsel %vm10662_vm6, %v4227_v12, %v4223_v58  ;;  %v11209_v11 = vld [vmem:[#allocation178_spill] sm:$0xff]  ;;  %v4110_v3 = vsel %vm2282_vm14, %v4109_v41, %v4105_v54  ;;  %v4154_v4 = vsel %vm11210_vm11, %v4153_v44, %v4149_v36  ;;  %v11216_v54 = vld [vmem:[#allocation195_spill] sm:$0xff]  ;;  %v11217_v58 = vld [vmem:[#allocation180_spill] sm:$0xff] }
 0x49f   : > { %v4232_v30 = vrot.slane %v11209_v11, %v11147_v21  ;;  %v4159_v9 = vsel %vm11212_vm9, %v4158_v2, %v4154_v4  ;;  %v4247_v41 = vrot.slane %v11216_v54, %v11151_v33  ;;  %v4312_v44 = vsel %vm11210_vm11, %v4311_v17, %v4307_v40  ;;  %vm11218_vm9 = vmmov %vm11215_vm1  ;;  %v3789_v40 = vpop.permute.xlu0 %3788 }
 0x4a0   : > { %v4376_v39 = vsel %vm2212_vm4, %v4375_v47, %v4371_v63  ;;  %v11213_v47 = vld [vmem:[#allocation181_spill] sm:$0xff]  ;;  %v4242_v63 = vrot.slane %v11217_v58, %v11149_v48  ;;  %v4390_v2 = vrot.slane %v3777_v14, %v11147_v21  ;;  %v4317_v59 = vsel %vm11218_vm9, %v4316_v56, %v4312_v44 }
 0x4a1   : > { %v3774_v12 = vpop.permute.xlu1 %3773  ;;  %v4168_v8 = vrot.slane %v11213_v47, %v11151_v33  ;;  %v4233_v57 = vsel %vm11214_vm12, %v4232_v30, %v4228_v32  ;;  %v4381_v35 = vsel %vm2219_vm5, %v4380_v42, %v4376_v39  ;;  %v4326_v32 = vrot.slane %v9320_v51, %v11151_v33  ;;  %v11221_v30 = vld [vmem:[#allocation198_spill] sm:$0xff] }
 0x4a2   : > { %v4385_v34 = vrot.slane %v3774_v12, %v11146_v10  ;;  %v4238_v45 = vsel %vm11215_vm1, %v4237_v55, %v4233_v57  ;;  %v11219_v55 = vld [vmem:[#allocation169_spill] sm:$0xff]  ;;  %vm11220_vm12 = vcmask 589312   ;;  %v4321_v42 = vrot.slane %v11221_v30, %v11149_v48  ;;  %v11222_v12 = vld [vmem:[#allocation183_spill] sm:$0xff]  ;;  %v11227_v47 = vld [vmem:[#allocation182_spill] sm:$0xff] }
 0x4a3   : > { %v4193_v39 = vrot.slane %v11219_v55, %v7939_v18  ;;  %v4164_v11 = vsel %vm11220_vm12, %v4163_v6, %v4159_v9  ;;  %v4178_v51 = vrot.slane %v11222_v12, %v7884_v13  ;;  %vm11223_vm1 = vmmov %vm11220_vm12  ;;  %v4257_v6 = vrot.slane %v11224_v38, %v7884_v13  ;;  %v11236_v55 = vld [vmem:[#allocation184_spill] sm:$0xff]  ;;  %v11238_v12 = vld [vmem:[#allocation171_spill] sm:$0xff] }
 0x4a4   : > { %v4386_v36 = vsel %vm10662_vm6, %v4385_v34, %v4381_v35  ;;  %v4169_v56 = vsel %vm2254_vm10, %v4168_v8, %v4164_v11  ;;  %v4243_v4 = vsel %vm11223_vm1, %v4242_v63, %v4238_v45  ;;  %vm11225_vm9 = vmmov %vm11223_vm1  ;;  %vm11226_vm12 = vcmask 523712   ;;  %v11239_v38 = vld [vmem:[#allocation187_spill] sm:$0xff] }
 0x4a5   : > { %v3780_v53 = vpop.permute.xlu1 %3779  ;;  %v4391_v62 = vsel %vm11210_vm11, %v4390_v2, %v4386_v36  ;;  %v4248_v17 = vsel %vm2254_vm10, %v4247_v41, %v4243_v4  ;;  %v4322_v34 = vsel %vm11225_vm9, %v4321_v42, %v4317_v59  ;;  %v4252_v57 = vrot.slane %v11227_v47, %v11155_v24  ;;  %v11229_v36 = vld [vmem:[#allocation91_spill] sm:$0xff] }
 0x4a6   : > { %v4395_v14 = vrot.slane %v3780_v53, %v11148_v15  ;;  %v4400_v8 = vrot.slane %v3783_v27, %v11149_v48  ;;  %v4327_v35 = vsel %vm2254_vm10, %v4326_v32, %v4322_v34  ;;  %v4336_v45 = vrot.slane %v9344_v22, %v7884_v13  ;;  %v11231_v22 = vld [vmem:[#allocation185_spill] sm:$0xff]  ;;  %v3795_v32 = vpop.permute.xlu0 %3794 }
 0x4a7   : > { %v4115_v41 = vsel %vm2289_vm15, %v4114_v0, %v4110_v3  ;;  %vm11228_vm1 = vcmask 720512   ;;  %v4331_v58 = vrot.slane %v11229_v36, %v11155_v24  ;;  %vm11230_vm11 = vcmask 786112  }
 0x4a8   : > { %v4396_v9 = vsel %vm11226_vm12, %v4395_v14, %v4391_v62  ;;  %v4174_v44 = vsel %vm11228_vm1, %v4173_v5, %v4169_v56  ;;  %v4188_v2 = vrot.slane %v11231_v22, %v7914_v61  ;;  %vm11232_vm9 = vmmov %vm11228_vm1  ;;  %vm11233_vm12 = vcmask 589312  }
 0x4a9   : > { %v3786_v54 = vpop.permute.xlu1 %3785  ;;  %v4179_v63 = vsel %vm11230_vm11, %v4178_v51, %v4174_v44  ;;  %v4253_v59 = vsel %vm11232_vm9, %v4252_v57, %v4248_v17  ;;  %v4401_v49 = vsel %vm11233_vm12, %v4400_v8, %v4396_v9  ;;  %vm11234_vm6 = vmmov %vm11230_vm11  ;;  %v4267_v3 = vrot.slane %v11235_v16, %v7914_v61  ;;  %v11243_v57 = vld [vmem:[#allocation186_spill] sm:$0xff] }
 0x4aa   : > { %v4405_v27 = vrot.slane %v3786_v54, %v11151_v33  ;;  %v4258_v0 = vsel %vm11234_vm6, %v4257_v6, %v4253_v59  ;;  %v4332_v5 = vsel %vm11228_vm1, %v4331_v58, %v4327_v35  ;;  %v4262_v11 = vrot.slane %v11236_v55, %v7891_v25  ;;  %vm11237_vm11 = vmmov %vm11234_vm6 }
 0x4ab   : > { %v4410_v30 = vrot.slane %v3789_v40, %v11155_v24  ;;  %v4337_v42 = vsel %vm11237_vm11, %v4336_v45, %v4332_v5  ;;  %v4346_v14 = vrot.slane %v9369_v31, %v7914_v61  ;;  %v4119_v51 = vrot.slane %v11238_v12, %v11169_v28  ;;  %vm11240_vm6 = vmmov %vm11228_vm1 }
 0x4ac   : > { %v4406_v53 = vsel %vm2254_vm10, %v4405_v27, %v4401_v49  ;;  %v4184_v4 = vsel %vm2275_vm13, %v4183_v23, %v4179_v63  ;;  %v4341_v62 = vrot.slane %v9234_v7, %v7891_v25  ;;  %v4198_v6 = vrot.slane %v11239_v38, %v11169_v28  ;;  %vm11242_vm9 = vmmov %vm11237_vm11  ;;  %v3801_v63 = vpop.permute.xlu0 %3800  ;;  %v11253_v38 = vld [vmem:[#allocation58_spill] sm:$0xff] }
 0x4ad   : > { %v3792_v56 = vpop.permute.xlu1 %3791  ;;  %v4189_v40 = vsel %vm2282_vm14, %v4188_v2, %v4184_v4  ;;  %v4263_v31 = vsel %vm2275_vm13, %v4262_v11, %v4258_v0  ;;  %v4411_v34 = vsel %vm11240_vm6, %v4410_v30, %v4406_v53  ;;  %v4277_v47 = vrot.slane %v11241_v26, %v11169_v28 }
 0x4ae   : > { %v4415_v17 = vrot.slane %v3792_v56, %v7884_v13  ;;  %v4268_v9 = vsel %vm2282_vm14, %v4267_v3, %v4263_v31  ;;  %v4342_v23 = vsel %vm2275_vm13, %v4341_v62, %v4337_v42  ;;  %v4272_v8 = vrot.slane %v11243_v57, %v7939_v18  ;;  %v11254_v31 = vld [vmem:[#allocation60_spill] sm:$0xff]  ;;  %v11257_v57 = vld [vmem:[#allocation101_spill] sm:$0xff] }
 0x4af   : > { %v4420_v35 = vrot.slane %v3795_v32, %v7891_v25  ;;  %v4347_v45 = vsel %vm2282_vm14, %v4346_v14, %v4342_v23  ;;  %v4356_v54 = vrot.slane %v9405_v20, %v11169_v28  ;;  %v4120_v36 = vsel %vm2296_vm0, %v4119_v51, %v4115_v41  ;;  %v11249_v14 = vld [vmem:[#allocation87_spill] sm:$0xff]  ;;  %v11256_v23 = vld [vmem:[#allocation93_spill] sm:$0xff] }
 0x4b0   : > { %v4416_v7 = vsel %vm11242_vm9, %v4415_v17, %v4411_v34  ;;  %v4194_v58 = vsel %vm2289_vm15, %v4193_v39, %v4189_v40  ;;  %v4351_v27 = vrot.slane %v9273_v43, %v7939_v18  ;;  %vm11244_vm12 = vcmask 1041409   ;;  %v11252_v17 = vld [vmem:[#allocation23_spill] sm:$0xff] }
 0x4b1   : > { %v3798_v44 = vpop.permute.xlu1 %3797  ;;  %v4437_v2 = vsel %vm11244_vm12, %v9377_v50, %v9372_v29  ;;  %v4199_v59 = vsel %vm2296_vm0, %v4198_v6, %v4194_v58  ;;  %v4273_v49 = vsel %vm2289_vm15, %v4272_v8, %v4268_v9  ;;  %v4421_v20 = vsel %vm2275_vm13, %v4420_v35, %v4416_v7  ;;  %v11255_v9 = vld [vmem:[#allocation57_spill] sm:$0xff]  ;;  %v11258_v35 = vld [vmem:[#allocation98_spill] sm:$0xff] }
 0x4b2   : > { %v4425_v22 = vrot.slane %v3798_v44, %v7914_v61  ;;  %v4438_v41 = vsel %vm2853_vm7, %v9397_v1, %v4437_v2  ;;  %v4278_v39 = vsel %vm2296_vm0, %v4277_v47, %v4273_v49  ;;  %v4352_v0 = vsel %vm2289_vm15, %v4351_v27, %v4347_v45  ;;  %v11261_v27 = vld [vmem:[#allocation63_spill] sm:$0xff] }
 0x4b3   : > { %v4439_v16 = vsel %vm2855_vm8, %v4120_v36, %v4438_v41  ;;  %v4430_v3 = vrot.slane %v3801_v63, %v7939_v18  ;;  %v4357_v50 = vsel %vm2296_vm0, %v4356_v54, %v4352_v0  ;;  %vm11245_vm1 = vcmask 1044484   ;;  %v11259_v54 = vld [vmem:[#allocation100_spill] sm:$0xff] }
 0x4b4   : > { %v4426_v43 = vsel %vm2282_vm14, %v4425_v22, %v4421_v20  ;;  %v4440_v32 = vsel %vm11245_vm1, %v4199_v59, %v4439_v16  ;;  %vm11246_vm11 = vcmask 1045509   ;;  %vm11247_vm6 = vcmask 1046534   ;;  %v11260_v36 = vld [vmem:[#allocation28_spill] sm:$0xff]  ;;  %v11262_v22 = vld [vmem:[#allocation21_spill] sm:$0xff] }
 0x4b5   : > { %v3804_v29 = vpop.permute.xlu1 %3803  ;;  %v4431_v53 = vsel %vm2289_vm15, %v4430_v3, %v4426_v43  ;;  %v4441_v1 = vsel %vm11246_vm11, %v4278_v39, %v4440_v32  ;;  %vm11248_vm9 = vcmask 1047559   ;;  %v11250_v56 = vsub.s32 0, %v11249_v14  ;;  %v11263_v59 = vld [vmem:[#allocation92_spill] sm:$0xff]  ;;  %v11265_v39 = vld [vmem:[#allocation34_spill] sm:$0xff]  ;;  %v11267_v3 = vld [vmem:[#allocation33_spill] sm:$0xff] }
 0x4b6   : > { %v4435_v5 = vrot.slane %v3804_v29, %v11169_v28  ;;  %v4442_v11 = vsel %vm11247_vm6, %v4357_v50, %v4441_v1  ;;  %v11251_v51 = vsub.s32 1, %v11249_v14  ;;  %v11264_v20 = vsub.s32 2, %v11249_v14  ;;  %v11266_v0 = vld [vmem:[#allocation96_spill] sm:$0xff]  ;;  %v11269_v32 = vld [vmem:[#allocation30_spill] sm:$0xff] }
 0x4b7   : > { %v11268_v50 = vld [vmem:[#allocation24_spill] sm:$0xff]  ;;  %v11270_v1 = vld [vmem:[#allocation46_spill] sm:$0xff]  ;;  %vm11356_vm12 = vcmask 392512   ;;  %vm11359_vm1 = vcmask 458112   ;;  %vm11360_vm11 = vcmask 523712   ;;  %vm11363_vm6 = vcmask 589312  }
 0x4b8   : > { %v4436_v55 = vsel %vm2296_vm0, %v4435_v5, %v4431_v53 }
 0x4b9   : > { %v4443_v30 = vsel %vm11248_vm9, %v4436_v55, %v4442_v11  ;;  %v11271_v11 = vld [vmem:[#allocation29_spill] sm:$0xff]  ;;  %vm11366_vm9 = vcmask 720512  }
 0x4ba   : > { %4445 = vadd.xlane.f32.xlu0 %v4443_v30 }
 0x547   : > { %v9604_v42 = vpop.xlane.xlu0 %4445 }
 0x548   : > { %v4451_v12 = vrot.slane %v9604_v42, %v11250_v56  ;;  %v4455_v4 = vrot.slane %v9604_v42, %v11251_v51  ;;  %v4459_v41 = vrot.slane %v9604_v42, %v11264_v20  ;;  %v11272_v56 = vld [vmem:[#allocation82_spill] sm:$0xff]  ;;  %v11286_v20 = vld [vmem:[#allocation17_spill] sm:$0xff] }
 0x54a   : > { %6561 = vrcp.f32 %v4451_v12 }
 0x54b   : > { %6563 = vrcp.f32 %v4455_v4  ;;  %v11273_v4 = vld [vmem:[#allocation54_spill] sm:$0xff] }
 0x54c   : > { %6565 = vrcp.f32 %v4459_v41 }
 0x554   : > { %v6562_v62 = vpop.eup %6561 }
 0x555   : > { %v4497_v40 = vmul.f32 %v6562_v62, %v11252_v17  ;;  %v4489_v6 = vmul.f32 %v6562_v62, %v11253_v38  ;;  %v4503_v34 = vmul.f32 %v6562_v62, %v11254_v31  ;;  %v4490_v26 = vmul.f32 %v6562_v62, %v11255_v9  ;;  %v9616_v47 = vpop.eup %6563 }
 0x556   : > { %v4506_v7 = vmul.f32 %v9616_v47, %v11256_v23  ;;  %v4491_v8 = vmul.f32 %v6562_v62, %v11257_v57  ;;  %v4508_v45 = vmul.f32 %v9616_v47, %v11258_v35  ;;  %v4492_v44 = vmul.f32 %v6562_v62, %v11259_v54  ;;  %v9645_v51 = vpop.eup %6565 }
 0x557   : > { %4777 = vperm.xlu0 %6238, %v4497_v40   ;;  %4753 = vperm.xlu1 %6237, %v4489_v6   ;;  %v4510_v58 = vmul.f32 %v9616_v47, %v11260_v36  ;;  %v4493_v63 = vmul.f32 %v6562_v62, %v11261_v27  ;;  %v4512_v2 = vmul.f32 %v9616_v47, %v11262_v22  ;;  %v11274_v40 = vld [vmem:[#allocation44_spill] sm:$0xff]  ;;  %v11275_v6 = vld [vmem:[#allocation51_spill] sm:$0xff] }
 0x558   : > { %v4494_v49 = vmul.f32 %v6562_v62, %v11263_v59  ;;  %v4514_v43 = vmul.f32 %v9616_v47, %v11265_v39  ;;  %v4495_v16 = vmul.f32 %v6562_v62, %v11266_v0  ;;  %v4516_v29 = vmul.f32 %v9616_v47, %v11267_v3  ;;  %v11287_v39 = vld [vmem:[#allocation9_spill] sm:$0xff]  ;;  %v11288_v0 = vld [vmem:[#allocation18_spill] sm:$0xff] }
 0x559   : > { %v4496_v5 = vmul.f32 %v6562_v62, %v11268_v50  ;;  %v4518_v53 = vmul.f32 %v9616_v47, %v11269_v32  ;;  %v4498_v55 = vmul.f32 %v6562_v62, %v11270_v1  ;;  %v4520_v30 = vmul.f32 %v9616_v47, %v11271_v11  ;;  %v11289_v3 = vld [vmem:[#allocation45_spill] sm:$0xff] }
 0x55a   : > { %v4499_v12 = vmul.f32 %v6562_v62, %v11272_v56  ;;  %v4523_v17 = vmul.f32 %v9645_v51, %v11273_v4  ;;  %v4500_v38 = vmul.f32 %v6562_v62, %v11274_v40  ;;  %v4525_v31 = vmul.f32 %v9645_v51, %v11275_v6 }
 0x55b   : > { %4795 = vperm.xlu0 %6238, %v4503_v34   ;;  %4756 = vperm.xlu1 %6237, %v4490_v26   ;;  %v11276_v34 = vld [vmem:[#allocation81_spill] sm:$0xff]  ;;  %v11277_v26 = vld [vmem:[#allocation42_spill] sm:$0xff]  ;;  %v4535_v41 = vmul.f32 %v9645_v51, %v11286_v20 }
 0x55c   : > { %v4501_v9 = vmul.f32 %v6562_v62, %v11276_v34  ;;  %v4527_v23 = vmul.f32 %v9645_v51, %v11277_v26 }
 0x55f   : > { %4801 = vperm.xlu0 %6238, %v4506_v7   ;;  %4759 = vperm.xlu1 %6237, %v4491_v8   ;;  %v11278_v7 = vld [vmem:[#allocation49_spill] sm:$0xff]  ;;  %v11279_v8 = vld [vmem:[#allocation70_spill] sm:$0xff] }
 0x560   : > { %v4502_v57 = vmul.f32 %v6562_v62, %v11278_v7  ;;  %v4529_v35 = vmul.f32 %v9645_v51, %v11279_v8 }
 0x563   : > { %4807 = vperm.xlu0 %6238, %v4508_v45   ;;  %4762 = vperm.xlu1 %6237, %v4492_v44   ;;  %v11280_v45 = vld [vmem:[#allocation40_spill] sm:$0xff]  ;;  %v11281_v44 = vsub.s32 3, %v11249_v14 }
 0x564   : > { %v4504_v54 = vmul.f32 %v6562_v62, %v11280_v45 }
 0x565   : > { %v4463_v36 = vrot.slane %v9604_v42, %v11281_v44  ;;  %v11303_v44 = vld [vmem:[#allocation36_spill] sm:$0xff] }
 0x567   : > { %4813 = vperm.xlu0 %6238, %v4510_v58   ;;  %4765 = vperm.xlu1 %6237, %v4493_v63   ;;  %v11282_v58 = vld [vmem:[#allocation66_spill] sm:$0xff]  ;;  %v11283_v63 = vld [vmem:[#allocation39_spill] sm:$0xff]  ;;  %6567 = vrcp.f32 %v4463_v36 }
 0x568   : > { %v4531_v27 = vmul.f32 %v9645_v51, %v11282_v58  ;;  %v4507_v22 = vmul.f32 %v9616_v47, %v11283_v63  ;;  %v11304_v58 = vld [vmem:[#allocation77_spill] sm:$0xff]  ;;  %v11305_v63 = vld [vmem:[#allocation32_spill] sm:$0xff] }
 0x56b   : > { %4819 = vperm.xlu0 %6238, %v4512_v2   ;;  %4768 = vperm.xlu1 %6237, %v4494_v49   ;;  %v11284_v2 = vld [vmem:[#allocation78_spill] sm:$0xff]  ;;  %v11285_v49 = vld [vmem:[#allocation37_spill] sm:$0xff] }
 0x56c   : > { %v4533_v59 = vmul.f32 %v9645_v51, %v11284_v2  ;;  %v4509_v62 = vmul.f32 %v9616_v47, %v11285_v49  ;;  %v11306_v2 = vld [vmem:[#allocation85_spill] sm:$0xff] }
 0x56f   : > { %4825 = vperm.xlu0 %6238, %v4514_v43   ;;  %4771 = vperm.xlu1 %6237, %v4495_v16   ;;  %v4511_v43 = vmul.f32 %v9616_v47, %v11287_v39  ;;  %v4537_v16 = vmul.f32 %v9645_v51, %v11288_v0 }
 0x571   : > { %v9678_v50 = vpop.eup %6567 }
 0x572   : > { %v4552_v36 = vmul.f32 %v9678_v50, %v11303_v44 }
 0x573   : > { %4831 = vperm.xlu0 %6238, %v4516_v29   ;;  %4774 = vperm.xlu1 %6237, %v4496_v5   ;;  %v4513_v29 = vmul.f32 %v9616_v47, %v11289_v3  ;;  %v11290_v5 = vld [vmem:[#allocation113_spill] sm:$0xff] }
 0x574   : > { %v4540_v32 = vmul.f32 %v9678_v50, %v11290_v5 }
 0x577   : > { %4837 = vperm.xlu0 %6238, %v4518_v53   ;;  %4780 = vperm.xlu1 %6237, %v4498_v55   ;;  %v11291_v53 = vld [vmem:[#allocation10_spill] sm:$0xff]  ;;  %v11292_v55 = vld [vmem:[#allocation108_spill] sm:$0xff] }
 0x578   : > { %v4515_v1 = vmul.f32 %v9616_v47, %v11291_v53  ;;  %v4542_v11 = vmul.f32 %v9678_v50, %v11292_v55 }
 0x57b   : > { %4843 = vperm.xlu0 %6238, %v4520_v30   ;;  %4783 = vperm.xlu1 %6237, %v4499_v12   ;;  %v11293_v30 = vld [vmem:[#allocation48_spill] sm:$0xff]  ;;  %v11294_v12 = vld [vmem:[#allocation119_spill] sm:$0xff] }
 0x57c   : > { %v4517_v56 = vmul.f32 %v9616_v47, %v11293_v30  ;;  %v4544_v4 = vmul.f32 %v9678_v50, %v11294_v12 }
 0x57f   : > { %4849 = vperm.xlu0 %6238, %v4523_v17   ;;  %4786 = vperm.xlu1 %6237, %v4500_v38   ;;  %v11295_v17 = vld [vmem:[#allocation53_spill] sm:$0xff] }
 0x580   : > { %v4519_v40 = vmul.f32 %v9616_v47, %v11295_v17  ;;  %v11296_v38 = vld [vmem:[#allocation73_spill] sm:$0xff] }
 0x581   : > { %v4546_v6 = vmul.f32 %v9678_v50, %v11296_v38 }
 0x583   : > { %4855 = vperm.xlu0 %6238, %v4525_v31   ;;  %4789 = vperm.xlu1 %6237, %v4501_v9   ;;  %v11297_v31 = vld [vmem:[#allocation61_spill] sm:$0xff]  ;;  %v11298_v9 = vsub.s32 4, %v11249_v14 }
 0x584   : > { %v4521_v34 = vmul.f32 %v9616_v47, %v11297_v31 }
 0x585   : > { %v4467_v26 = vrot.slane %v9604_v42, %v11298_v9  ;;  %v11320_v9 = vld [vmem:[#allocation50_spill] sm:$0xff] }
 0x587   : > { %4861 = vperm.xlu0 %6238, %v4527_v23   ;;  %4792 = vperm.xlu1 %6237, %v4502_v57   ;;  %v11299_v23 = vld [vmem:[#allocation26_spill] sm:$0xff]  ;;  %v11300_v57 = vld [vmem:[#allocation69_spill] sm:$0xff]  ;;  %6569 = vrcp.f32 %v4467_v26 }
 0x588   : > { %v4548_v7 = vmul.f32 %v9678_v50, %v11299_v23  ;;  %v4524_v8 = vmul.f32 %v9645_v51, %v11300_v57  ;;  %v11321_v23 = vld [vmem:[#allocation126_spill] sm:$0xff] }
 0x58b   : > { %4867 = vperm.xlu0 %6238, %v4529_v35   ;;  %4798 = vperm.xlu1 %6237, %v4504_v54   ;;  %v11301_v35 = vld [vmem:[#allocation22_spill] sm:$0xff]  ;;  %v11302_v54 = vld [vmem:[#allocation65_spill] sm:$0xff] }
 0x58c   : > { %v4550_v45 = vmul.f32 %v9678_v50, %v11301_v35  ;;  %v4526_v47 = vmul.f32 %v9645_v51, %v11302_v54  ;;  %v11322_v35 = vld [vmem:[#allocation16_spill] sm:$0xff]  ;;  %v11323_v54 = vld [vmem:[#allocation127_spill] sm:$0xff] }
 0x58f   : > { %4873 = vperm.xlu0 %6238, %v4531_v27   ;;  %4804 = vperm.xlu1 %6237, %v4507_v22   ;;  %v4528_v27 = vmul.f32 %v9645_v51, %v11304_v58  ;;  %v4554_v22 = vmul.f32 %v9678_v50, %v11305_v63 }
 0x591   : > { %v9715_v49 = vpop.eup %6569 }
 0x592   : > { %v4569_v26 = vmul.f32 %v9715_v49, %v11320_v9 }
 0x593   : > { %4879 = vperm.xlu0 %6238, %v4533_v59   ;;  %4810 = vperm.xlu1 %6237, %v4509_v62   ;;  %v4530_v59 = vmul.f32 %v9645_v51, %v11306_v2  ;;  %v11307_v62 = vld [vmem:[#allocation41_spill] sm:$0xff] }
 0x594   : > { %v4557_v20 = vmul.f32 %v9715_v49, %v11307_v62 }
 0x597   : > { %4885 = vperm.xlu0 %6238, %v4535_v41   ;;  %4816 = vperm.xlu1 %6237, %v4511_v43   ;;  %v11308_v41 = vld [vmem:[#allocation112_spill] sm:$0xff]  ;;  %v11309_v43 = vld [vmem:[#allocation38_spill] sm:$0xff] }
 0x598   : > { %v4532_v39 = vmul.f32 %v9645_v51, %v11308_v41  ;;  %v4559_v0 = vmul.f32 %v9715_v49, %v11309_v43 }
 0x59b   : > { %4891 = vperm.xlu0 %6238, %v4537_v16   ;;  %4822 = vperm.xlu1 %6237, %v4513_v29   ;;  %v11310_v16 = vld [vmem:[#allocation106_spill] sm:$0xff]  ;;  %v11311_v29 = vld [vmem:[#allocation43_spill] sm:$0xff] }
 0x59c   : > { %v4534_v3 = vmul.f32 %v9645_v51, %v11310_v16  ;;  %v4561_v5 = vmul.f32 %v9715_v49, %v11311_v29 }
 0x59f   : > { %4897 = vperm.xlu0 %6238, %v4540_v32   ;;  %4828 = vperm.xlu1 %6237, %v4515_v1   ;;  %v11312_v32 = vld [vmem:[#allocation122_spill] sm:$0xff]  ;;  %v11313_v1 = vld [vmem:[#allocation8_spill] sm:$0xff] }
 0x5a0   : > { %v4536_v53 = vmul.f32 %v9645_v51, %v11312_v32  ;;  %v4563_v55 = vmul.f32 %v9715_v49, %v11313_v1 }
 0x5a3   : > { %4903 = vperm.xlu0 %6238, %v4542_v11   ;;  %4834 = vperm.xlu1 %6237, %v4517_v56   ;;  %v11314_v11 = vld [vmem:[#allocation123_spill] sm:$0xff]  ;;  %v11315_v56 = vsub.s32 5, %v11249_v14 }
 0x5a4   : > { %v4538_v30 = vmul.f32 %v9645_v51, %v11314_v11 }
 0x5a5   : > { %v4471_v12 = vrot.slane %v9604_v42, %v11315_v56 }
 0x5a7   : > { %4909 = vperm.xlu0 %6238, %v4544_v4   ;;  %4840 = vperm.xlu1 %6237, %v4519_v40   ;;  %v11316_v4 = vld [vmem:[#allocation47_spill] sm:$0xff]  ;;  %v11317_v40 = vld [vmem:[#allocation124_spill] sm:$0xff]  ;;  %6571 = vrcp.f32 %v4471_v12 }
 0x5a8   : > { %v4565_v17 = vmul.f32 %v9715_v49, %v11316_v4  ;;  %v4541_v38 = vmul.f32 %v9678_v50, %v11317_v40 }
 0x5ab   : > { %4915 = vperm.xlu0 %6238, %v4546_v6   ;;  %4846 = vperm.xlu1 %6237, %v4521_v34   ;;  %v11318_v6 = vld [vmem:[#allocation12_spill] sm:$0xff]  ;;  %v11319_v34 = vld [vmem:[#allocation125_spill] sm:$0xff] }
 0x5ac   : > { %v4567_v31 = vmul.f32 %v9715_v49, %v11318_v6  ;;  %v4543_v51 = vmul.f32 %v9678_v50, %v11319_v34 }
 0x5af   : > { %4921 = vperm.xlu0 %6238, %v4548_v7   ;;  %4852 = vperm.xlu1 %6237, %v4524_v8   ;;  %v4545_v7 = vmul.f32 %v9678_v50, %v11321_v23  ;;  %v11336_v23 = vld [vmem:[#allocation5_spill] sm:$0xff] }
 0x5b1   : > { %v9756_v44 = vpop.eup %6571 }
 0x5b3   : > { %4927 = vperm.xlu0 %6238, %v4550_v45   ;;  %4858 = vperm.xlu1 %6237, %v4526_v47   ;;  %v4571_v45 = vmul.f32 %v9715_v49, %v11322_v35  ;;  %v4547_v47 = vmul.f32 %v9678_v50, %v11323_v54  ;;  %v11337_v54 = vld [vmem:[#allocation80_spill] sm:$0xff] }
 0x5b7   : > { %4933 = vperm.xlu0 %6238, %v4552_v36   ;;  %4864 = vperm.xlu1 %6237, %v4528_v27   ;;  %v11324_v27 = vld [vmem:[#allocation56_spill] sm:$0xff] }
 0x5b8   : > { %v4574_v63 = vmul.f32 %v9756_v44, %v11324_v27  ;;  %v11338_v27 = vld [vmem:[#allocation11_spill] sm:$0xff] }
 0x5bb   : > { %4939 = vperm.xlu0 %6238, %v4554_v22   ;;  %4870 = vperm.xlu1 %6237, %v4530_v59   ;;  %v11325_v22 = vld [vmem:[#allocation27_spill] sm:$0xff] }
 0x5bc   : > { %v4549_v2 = vmul.f32 %v9678_v50, %v11325_v22 }
 0x5bf   : > { %4945 = vperm.xlu0 %6238, %v4557_v20   ;;  %4876 = vperm.xlu1 %6237, %v4532_v39   ;;  %v11326_v20 = vld [vmem:[#allocation52_spill] sm:$0xff]  ;;  %v11327_v39 = vld [vmem:[#allocation25_spill] sm:$0xff] }
 0x5c0   : > { %v4576_v41 = vmul.f32 %v9756_v44, %v11326_v20  ;;  %v4551_v43 = vmul.f32 %v9678_v50, %v11327_v39  ;;  %v11339_v20 = vld [vmem:[#allocation76_spill] sm:$0xff]  ;;  %v11340_v39 = vld [vmem:[#allocation129_spill] sm:$0xff] }
 0x5c3   : > { %4951 = vperm.xlu0 %6238, %v4559_v0   ;;  %4882 = vperm.xlu1 %6237, %v4534_v3   ;;  %v11328_v3 = vld [vmem:[#allocation64_spill] sm:$0xff] }
 0x5c4   : > { %v4578_v29 = vmul.f32 %v9756_v44, %v11328_v3 }
 0x5c7   : > { %4957 = vperm.xlu0 %6238, %v4561_v5   ;;  %4888 = vperm.xlu1 %6237, %v4536_v53   ;;  %v11329_v5 = vld [vmem:[#allocation35_spill] sm:$0xff] }
 0x5c8   : > { %v4553_v32 = vmul.f32 %v9678_v50, %v11329_v5 }
 0x5cb   : > { %4963 = vperm.xlu0 %6238, %v4563_v55   ;;  %4894 = vperm.xlu1 %6237, %v4538_v30   ;;  %v11330_v55 = vld [vmem:[#allocation6_spill] sm:$0xff]  ;;  %v11331_v30 = vld [vmem:[#allocation128_spill] sm:$0xff] }
 0x5cc   : > { %v4580_v11 = vmul.f32 %v9756_v44, %v11330_v55  ;;  %v4555_v56 = vmul.f32 %v9678_v50, %v11331_v30  ;;  %v11335_v50 = vld [vmem:[#allocation68_spill] sm:$0xff] }
 0x5cf   : > { %4969 = vperm.xlu0 %6238, %v4565_v17   ;;  %4900 = vperm.xlu1 %6237, %v4541_v38   ;;  %v11332_v17 = vsub.s32 6, %v11249_v14  ;;  %v11333_v38 = vld [vmem:[#allocation72_spill] sm:$0xff] }
 0x5d0   : > { %v4582_v6 = vmul.f32 %v9756_v44, %v11333_v38 }
 0x5d1   : > { %v4475_v40 = vrot.slane %v9604_v42, %v11332_v17 }
 0x5d3   : > { %4975 = vperm.xlu0 %6238, %v4567_v31   ;;  %4906 = vperm.xlu1 %6237, %v4543_v51   ;;  %v11334_v31 = vld [vmem:[#allocation7_spill] sm:$0xff]  ;;  %6573 = vrcp.f32 %v4475_v40  ;;  %v11343_v40 = vld [vmem:[#allocation84_spill] sm:$0xff] }
 0x5d4   : > { %v4558_v34 = vmul.f32 %v9715_v49, %v11334_v31 }
 0x5d6   : > { %v9748_v57 = vpop.permute.xlu0 %4777  ;;  %v9750_v8 = vpop.permute.xlu1 %4753 }
 0x5d7   : > { %4981 = vperm.xlu0 %6238, %v4569_v26   ;;  %4912 = vperm.xlu1 %6237, %v4545_v7   ;;  %v4584_v26 = vmul.f32 %v9756_v44, %v11335_v50  ;;  %v4560_v7 = vmul.f32 %v9715_v49, %v11336_v23 }
 0x5da   : > { %v9758_v36 = vpop.permute.xlu0 %4795  ;;  %v9760_v58 = vpop.permute.xlu1 %4756 }
 0x5db   : > { %4987 = vperm.xlu0 %6238, %v4571_v45   ;;  %4918 = vperm.xlu1 %6237, %v4547_v47   ;;  %v4586_v47 = vmul.f32 %v9756_v44, %v11337_v54 }
 0x5dd   : > { %v9825_v3 = vpop.eup %6573 }
 0x5de   : > { %v9766_v59 = vpop.permute.xlu0 %4801  ;;  %v9768_v62 = vpop.permute.xlu1 %4759  ;;  %v4593_v38 = vmul.f32 %v9825_v3, %v11343_v40 }
 0x5df   : > { %4993 = vperm.xlu0 %6238, %v4574_v63   ;;  %4924 = vperm.xlu1 %6237, %v4549_v2   ;;  %v4562_v63 = vmul.f32 %v9715_v49, %v11338_v27 }
 0x5e2   : > { %v9774_v0 = vpop.permute.xlu0 %4807  ;;  %v9776_v16 = vpop.permute.xlu1 %4762 }
 0x5e3   : > { %4999 = vperm.xlu0 %6238, %v4576_v41   ;;  %4930 = vperm.xlu1 %6237, %v4551_v43   ;;  %v4588_v41 = vmul.f32 %v9756_v44, %v11339_v20  ;;  %v4564_v43 = vmul.f32 %v9715_v49, %v11340_v39 }
 0x5e6   : > { %v9782_v53 = vpop.permute.xlu0 %4813  ;;  %v9784_v1 = vpop.permute.xlu1 %4765 }
 0x5e7   : > { %5005 = vperm.xlu0 %6238, %v4578_v29   ;;  %4936 = vperm.xlu1 %6237, %v4553_v32   ;;  %v11341_v32 = vld [vmem:[#allocation90_spill] sm:$0xff] }
 0x5e8   : > { %v4591_v55 = vmul.f32 %v9825_v3, %v11341_v32 }
 0x5ea   : > { %v9790_v12 = vpop.permute.xlu0 %4819  ;;  %v9792_v4 = vpop.permute.xlu1 %4768 }
 0x5eb   : > { %5011 = vperm.xlu0 %6238, %v4580_v11   ;;  %4942 = vperm.xlu1 %6237, %v4555_v56   ;;  %v11342_v11 = vld [vmem:[#allocation15_spill] sm:$0xff] }
 0x5ec   : > { %v4566_v30 = vmul.f32 %v9715_v49, %v11342_v11 }
 0x5ee   : > { %v9801_v51 = vpop.permute.xlu0 %4825  ;;  %v9803_v9 = vpop.permute.xlu1 %4771 }
 0x5ef   : > { %5017 = vperm.xlu0 %6238, %v4582_v6   ;;  %4948 = vperm.xlu1 %6237, %v4558_v34   ;;  %v11344_v6 = vld [vmem:[#allocation13_spill] sm:$0xff] }
 0x5f0   : > { %v4568_v31 = vmul.f32 %v9715_v49, %v11344_v6 }
 0x5f2   : > { %v9809_v35 = vpop.permute.xlu0 %4831  ;;  %v9811_v45 = vpop.permute.xlu1 %4774 }
 0x5f3   : > { %5023 = vperm.xlu0 %6238, %v4584_v26   ;;  %4954 = vperm.xlu1 %6237, %v4560_v7   ;;  %v11345_v26 = vsub.s32 7, %v11249_v14  ;;  %v11346_v7 = vld [vmem:[#allocation133_spill] sm:$0xff] }
 0x5f4   : > { %v4595_v54 = vmul.f32 %v9825_v3, %v11346_v7 }
 0x5f5   : > { %v4479_v23 = vrot.slane %v9604_v42, %v11345_v26 }
 0x5f6   : > { %v9817_v22 = vpop.permute.xlu0 %4837  ;;  %v9819_v2 = vpop.permute.xlu1 %4780 }
 0x5f7   : > { %5029 = vperm.xlu0 %6238, %v4586_v47   ;;  %4960 = vperm.xlu1 %6237, %v4562_v63   ;;  %v11347_v47 = vld [vmem:[#allocation130_spill] sm:$0xff]  ;;  %6575 = vrcp.f32 %v4479_v23  ;;  %v11352_v23 = vld [vmem:[#allocation111_spill] sm:$0xff] }
 0x5f8   : > { %v4570_v27 = vmul.f32 %v9715_v49, %v11347_v47  ;;  %v4601_v7 = vmul.f32 %v9825_v3, %v11352_v23 }
 0x5fa   : > { %v9827_v29 = vpop.permute.xlu0 %4843  ;;  %v9829_v5 = vpop.permute.xlu1 %4783 }
 0x5fb   : > { %5035 = vperm.xlu0 %6238, %v4588_v41   ;;  %4966 = vperm.xlu1 %6237, %v4564_v43   ;;  %v11348_v41 = vld [vmem:[#allocation59_spill] sm:$0xff] }
 0x5fc   : > { %v4597_v39 = vmul.f32 %v9825_v3, %v11348_v41  ;;  %v11349_v43 = vld [vmem:[#allocation131_spill] sm:$0xff]  ;;  %v5227_v41 = vrot.slane %v9774_v0, %v11141_v19  ;;  %v5237_v0 = vrot.slane %v9782_v53, %v11145_v46  ;;  %v5247_v53 = vrot.slane %v9790_v12, %v11147_v21 }
 0x5fd   : > { %v4572_v14 = vmul.f32 %v9715_v49, %v11349_v43  ;;  %v5257_v12 = vrot.slane %v9801_v51, %v11149_v48  ;;  %v5267_v51 = vrot.slane %v9809_v35, %v11155_v24  ;;  %v5277_v35 = vrot.slane %v9817_v22, %v7891_v25 }
 0x5fe   : > { %v9835_v56 = vpop.permute.xlu0 %4849  ;;  %v9837_v17 = vpop.permute.xlu1 %4786  ;;  %v5287_v22 = vrot.slane %v9827_v29, %v7939_v18 }
 0x5ff   : > { %5041 = vperm.xlu0 %6238, %v4591_v55   ;;  %4972 = vperm.xlu1 %6237, %v4566_v30   ;;  %v11350_v55 = vld [vmem:[#allocation115_spill] sm:$0xff] }
 0x600   : > { %v4599_v11 = vmul.f32 %v9825_v3, %v11350_v55  ;;  %v11351_v30 = vld [vmem:[#allocation55_spill] sm:$0xff] }
 0x601   : > { %v4575_v40 = vmul.f32 %v9756_v44, %v11351_v30 }
 0x602   : > { %v9843_v34 = vpop.permute.xlu0 %4855  ;;  %v9845_v50 = vpop.permute.xlu1 %4789 }
 0x603   : > { %5047 = vperm.xlu0 %6238, %v4593_v38   ;;  %4978 = vperm.xlu1 %6237, %v4568_v31   ;;  %v5218_v31 = vrot.slane %v9766_v59, %v11140_v52 }
 0x606   : > { %v9854_v63 = vpop.permute.xlu0 %4861  ;;  %v9856_v20 = vpop.permute.xlu1 %4792 }
 0x607   : > { %5053 = vperm.xlu0 %6238, %v4595_v54   ;;  %4984 = vperm.xlu1 %6237, %v4570_v27   ;;  %v11353_v54 = vld [vmem:[#allocation20_spill] sm:$0xff]  ;;  %v9880_v27 = vpop.eup %6575 }
 0x608   : > { %v4577_v47 = vmul.f32 %v9756_v44, %v11353_v54  ;;  %v11357_v54 = vld [vmem:[#allocation155_spill] sm:$0xff] }
 0x60a   : > { %v9862_v42 = vpop.permute.xlu0 %4867  ;;  %v9864_v32 = vpop.permute.xlu1 %4798 }
 0x60b   : > { %5059 = vperm.xlu0 %6238, %v4597_v39   ;;  %4990 = vperm.xlu1 %6237, %v4572_v14  }
 0x60e   : > { %v9870_v38 = vpop.permute.xlu0 %4873  ;;  %v4805_v6 = vpop.permute.xlu1 %4804 }
 0x60f   : > { %v5222_v49 = vrot.slane %v4805_v6, %v11139_v37  ;;  %5065 = vperm.xlu0 %6238, %v4599_v11   ;;  %4996 = vperm.xlu1 %6237, %v4575_v40   ;;  %v11354_v11 = vld [vmem:[#allocation153_spill] sm:$0xff]  ;;  %v11355_v40 = vld [vmem:[#allocation134_spill] sm:$0xff] }
 0x610   : > { %v4609_v30 = vmul.f32 %v9880_v27, %v11354_v11  ;;  %v4579_v6 = vmul.f32 %v9756_v44, %v11355_v40  ;;  %v11361_v40 = vld [vmem:[#allocation157_spill] sm:$0xff] }
 0x611   : > { %v5223_v26 = vsel %vm2198_vm2, %v5222_v49, %v5218_v31 }
 0x612   : > { %v9884_v39 = vpop.permute.xlu0 %4879  ;;  %v4811_v59 = vpop.permute.xlu1 %4810  ;;  %v5228_v14 = vsel %vm2205_vm3, %v5227_v41, %v5223_v26  ;;  %v11358_v41 = vld [vmem:[#allocation135_spill] sm:$0xff] }
 0x613   : > { %v5232_v43 = vrot.slane %v4811_v59, %v11143_v60  ;;  %5071 = vperm.xlu0 %6238, %v4601_v7   ;;  %5002 = vperm.xlu1 %6237, %v4577_v47   ;;  %v4611_v47 = vmul.f32 %v9880_v27, %v11357_v54  ;;  %v4581_v59 = vmul.f32 %v9756_v44, %v11358_v41  ;;  %v11364_v41 = vld [vmem:[#allocation159_spill] sm:$0xff] }
 0x615   : > { %v5233_v55 = vsel %vm2212_vm4, %v5232_v43, %v5228_v14 }
 0x616   : > { %v9895_v31 = vpop.permute.xlu0 %4885  ;;  %v4817_v49 = vpop.permute.xlu1 %4816  ;;  %v5238_v26 = vsel %vm2219_vm5, %v5237_v0, %v5233_v55  ;;  %v11362_v0 = vld [vmem:[#allocation71_spill] sm:$0xff] }
 0x617   : > { %v5242_v23 = vrot.slane %v4817_v49, %v11146_v10  ;;  %5092 = vperm.xlu0 %6238, %v4609_v30   ;;  %5008 = vperm.xlu1 %6237, %v4579_v6   ;;  %v4613_v6 = vmul.f32 %v9880_v27, %v11361_v40  ;;  %v4583_v49 = vmul.f32 %v9756_v44, %v11362_v0  ;;  %v11368_v0 = vld [vmem:[#allocation161_spill] sm:$0xff] }
 0x619   : > { %v5243_v7 = vsel %vm11356_vm12, %v5242_v23, %v5238_v26  ;;  %vm11367_vm12 = vcmask 786112  }
 0x61a   : > { %v9906_v43 = vpop.permute.xlu0 %4891  ;;  %v4823_v14 = vpop.permute.xlu1 %4822  ;;  %v5248_v55 = vsel %vm11359_vm1, %v5247_v53, %v5243_v7  ;;  %v11365_v53 = vld [vmem:[#allocation67_spill] sm:$0xff]  ;;  %vm11378_vm1 = vcmask 392512  }
 0x61b   : > { %v5252_v11 = vrot.slane %v4823_v14, %v11148_v15  ;;  %5098 = vperm.xlu0 %6238, %v4611_v47   ;;  %5014 = vperm.xlu1 %6237, %v4581_v59   ;;  %v4615_v59 = vmul.f32 %v9880_v27, %v11364_v41  ;;  %v4585_v14 = vmul.f32 %v9756_v44, %v11365_v53  ;;  %v11370_v53 = vld [vmem:[#allocation110_spill] sm:$0xff] }
 0x61d   : > { %v5253_v30 = vsel %vm11360_vm11, %v5252_v11, %v5248_v55  ;;  %vm11381_vm11 = vcmask 458112  }
 0x61e   : > { %v9917_v23 = vpop.permute.xlu0 %4897  ;;  %v4829_v26 = vpop.permute.xlu1 %4828  ;;  %v5258_v7 = vsel %vm11363_vm6, %v5257_v12, %v5253_v30  ;;  %v11369_v12 = vld [vmem:[#allocation136_spill] sm:$0xff]  ;;  %vm11382_vm6 = vcmask 523712  }
 0x61f   : > { %v5262_v54 = vrot.slane %v4829_v26, %v11151_v33  ;;  %5104 = vperm.xlu0 %6238, %v4613_v6   ;;  %5020 = vperm.xlu1 %6237, %v4583_v49   ;;  %v4617_v49 = vmul.f32 %v9880_v27, %v11368_v0  ;;  %v4587_v26 = vmul.f32 %v9756_v44, %v11369_v12  ;;  %v11372_v12 = vld [vmem:[#allocation164_spill] sm:$0xff] }
 0x621   : > { %v5263_v47 = vsel %vm2254_vm10, %v5262_v54, %v5258_v7 }
 0x622   : > { %v9928_v11 = vpop.permute.xlu0 %4903  ;;  %v4835_v55 = vpop.permute.xlu1 %4834  ;;  %v5268_v30 = vsel %vm11366_vm9, %v5267_v51, %v5263_v47  ;;  %v11371_v51 = vld [vmem:[#allocation137_spill] sm:$0xff]  ;;  %vm11384_vm9 = vmmov %vm11378_vm1 }
 0x623   : > { %v5272_v40 = vrot.slane %v4835_v55, %v7884_v13  ;;  %5110 = vperm.xlu0 %6238, %v4615_v59   ;;  %5026 = vperm.xlu1 %6237, %v4585_v14   ;;  %v4618_v14 = vmul.f32 %v9880_v27, %v11370_v53  ;;  %v4589_v55 = vmul.f32 %v9756_v44, %v11371_v51 }
 0x625   : > { %v5273_v6 = vsel %vm11367_vm12, %v5272_v40, %v5268_v30  ;;  %vm11385_vm12 = vcmask 589312  }
 0x626   : > { %v9939_v54 = vpop.permute.xlu0 %4909  ;;  %v4841_v7 = vpop.permute.xlu1 %4840  ;;  %v5278_v47 = vsel %vm2275_vm13, %v5277_v35, %v5273_v6  ;;  %v11373_v35 = vld [vmem:[#allocation88_spill] sm:$0xff] }
 0x627   : > { %v5282_v41 = vrot.slane %v4841_v7, %v7914_v61  ;;  %5116 = vperm.xlu0 %6238, %v4617_v49   ;;  %5032 = vperm.xlu1 %6237, %v4587_v26   ;;  %v4619_v26 = vmul.f32 %v9880_v27, %v11372_v12  ;;  %v4592_v44 = vmul.f32 %v9825_v3, %v11373_v35 }
 0x629   : > { %v5283_v59 = vsel %vm2282_vm14, %v5282_v41, %v5278_v47  ;;  %v5297_v41 = vrot.slane %v9835_v56, %v11140_v52 }
 0x62a   : > { %v9950_v40 = vpop.permute.xlu0 %4915  ;;  %v4847_v30 = vpop.permute.xlu1 %4846  ;;  %v5288_v6 = vsel %vm2289_vm15, %v5287_v22, %v5283_v59  ;;  %v5306_v59 = vrot.slane %v9843_v34, %v11141_v19  ;;  %v5316_v34 = vrot.slane %v9854_v63, %v11145_v46 }
 0x62b   : > { %v5292_v0 = vrot.slane %v4847_v30, %v11169_v28  ;;  %5119 = vperm.xlu0 %6238, %v4618_v14   ;;  %5038 = vperm.xlu1 %6237, %v4589_v55   ;;  %v11374_v14 = vld [vmem:[#allocation120_spill] sm:$0xff]  ;;  %v11375_v55 = vld [vmem:[#allocation83_spill] sm:$0xff] }
 0x62c   : > { %v4620_v51 = vmul.f32 %v9880_v27, %v11374_v14  ;;  %v4594_v22 = vmul.f32 %v9825_v3, %v11375_v55  ;;  %v5148_v14 = vrot.slane %v9768_v62, %v11141_v19  ;;  %v5153_v55 = vrot.slane %v9776_v16, %v11143_v60 }
 0x62d   : > { %v9955_v49 = vsel %vm2296_vm0, %v5292_v0, %v5288_v6 }
 0x62e   : > { %v9961_v7 = vpop.permute.xlu0 %4921  ;;  %v4853_v29 = vpop.permute.xlu1 %4852 }
 0x62f   : > { %v5301_v47 = vrot.slane %v4853_v29, %v11139_v37  ;;  %5122 = vperm.xlu0 %6238, %v4619_v26   ;;  %5044 = vperm.xlu1 %6237, %v4592_v44   ;;  %v11376_v26 = vld [vmem:[#allocation167_spill] sm:$0xff] }
 0x630   : > { %v4621_v35 = vmul.f32 %v9880_v27, %v11376_v26  ;;  %v11377_v44 = vld [vmem:[#allocation139_spill] sm:$0xff] }
 0x631   : > { %v5302_v53 = vsel %vm2198_vm2, %v5301_v47, %v5297_v41  ;;  %v4596_v29 = vmul.f32 %v9825_v3, %v11377_v44  ;;  %v5143_v41 = vrot.slane %v9760_v58, %v11139_v37  ;;  %v5326_v58 = vrot.slane %v9862_v42, %v11147_v21 }
 0x632   : > { %v9973_v30 = vpop.permute.xlu0 %4927  ;;  %v5307_v0 = vsel %vm2205_vm3, %v5306_v59, %v5302_v53  ;;  %v4859_v56 = vpop.permute.xlu1 %4858 }
 0x633   : > { %v5311_v6 = vrot.slane %v4859_v56, %v11143_v60  ;;  %5125 = vperm.xlu0 %6238, %v4620_v51   ;;  %5050 = vperm.xlu1 %6237, %v4594_v22   ;;  %v5139_v51 = vrot.slane %v9750_v8, %v11140_v52  ;;  %v5158_v22 = vrot.slane %v9784_v1, %v11145_v46  ;;  %v11379_v56 = vld [vmem:[#allocation117_spill] sm:$0xff] }
 0x634   : > { %v4622_v62 = vmul.f32 %v9880_v27, %v11379_v56  ;;  %v5163_v8 = vrot.slane %v9792_v4, %v11146_v10  ;;  %v5336_v4 = vrot.slane %v9870_v38, %v11149_v48  ;;  %v5346_v56 = vrot.slane %v9884_v39, %v11155_v24 }
 0x635   : > { %v5312_v12 = vsel %vm2212_vm4, %v5311_v6, %v5307_v0  ;;  %v11380_v6 = vld [vmem:[#allocation142_spill] sm:$0xff] }
 0x636   : > { %v9986_v47 = vpop.permute.xlu0 %4933  ;;  %v5317_v59 = vsel %vm2219_vm5, %v5316_v34, %v5312_v12  ;;  %v4865_v53 = vpop.permute.xlu1 %4864  ;;  %v4598_v34 = vmul.f32 %v9825_v3, %v11380_v6  ;;  %v5144_v12 = vsel %vm2198_vm2, %v5143_v41, %v5139_v51  ;;  %v5173_v41 = vrot.slane %v9811_v45, %v11148_v15 }
 0x637   : > { %v5321_v63 = vrot.slane %v4865_v53, %v11146_v10  ;;  %5128 = vperm.xlu0 %6238, %v4621_v35   ;;  %5056 = vperm.xlu1 %6237, %v4596_v29   ;;  %v5149_v1 = vsel %vm2205_vm3, %v5148_v14, %v5144_v12  ;;  %v5168_v35 = vrot.slane %v9803_v9, %v11147_v21  ;;  %v11383_v14 = vld [vmem:[#allocation144_spill] sm:$0xff]  ;;  %v11388_v12 = vld [vmem:[#allocation62_spill] sm:$0xff] }
 0x638   : > { %v5154_v29 = vsel %vm2212_vm4, %v5153_v55, %v5149_v1  ;;  %v5188_v6 = vrot.slane %v9829_v5, %v11155_v24 }
 0x639   : > { %v5322_v0 = vsel %vm11378_vm1, %v5321_v63, %v5317_v59  ;;  %v5159_v59 = vsel %vm2219_vm5, %v5158_v22, %v5154_v29  ;;  %v4600_v63 = vmul.f32 %v9825_v3, %v11383_v14  ;;  %vm11386_vm1 = vmmov %vm11381_vm11  ;;  %v5183_v22 = vrot.slane %v9819_v2, %v11151_v33 }
 0x63a   : > { %v10008_v16 = vpop.permute.xlu0 %4939  ;;  %v5327_v42 = vsel %vm11381_vm11, %v5326_v58, %v5322_v0  ;;  %v4871_v26 = vpop.permute.xlu1 %4870  ;;  %v5164_v9 = vsel %vm11384_vm9, %v5163_v8, %v5159_v59  ;;  %vm11387_vm11 = vmmov %vm11382_vm6  ;;  %v4608_v8 = vmul.f32 %v9880_v27, %v11388_v12 }
 0x63b   : > { %v5331_v44 = vrot.slane %v4871_v26, %v11148_v15  ;;  %5131 = vperm.xlu0 %6238, %v4622_v62   ;;  %5062 = vperm.xlu1 %6237, %v4598_v34   ;;  %v5169_v0 = vsel %vm11386_vm1, %v5168_v35, %v5164_v9  ;;  %v5178_v62 = vrot.slane %v9748_v57, %v11149_v48  ;;  %vm11390_vm9 = vmmov %vm11385_vm12  ;;  %vm11392_vm1 = vcmask 786112  }
 0x63c   : > { %v5174_v38 = vsel %vm11387_vm11, %v5173_v41, %v5169_v0  ;;  %v5198_v57 = vrot.slane %v9845_v50, %v7891_v25  ;;  %vm11394_vm11 = vmmov %vm11392_vm1  ;;  %v5208_v0 = vrot.slane %v9758_v36, %v7939_v18 }
 0x63d   : > { %v5332_v53 = vsel %vm11382_vm6, %v5331_v44, %v5327_v42  ;;  %v5193_v42 = vrot.slane %v9837_v17, %v7884_v13  ;;  %vm11389_vm6 = vcmask 720512   ;;  %v5179_v39 = vsel %vm11390_vm9, %v5178_v62, %v5174_v38  ;;  %v11395_v38 = vld [vmem:[#allocation103_spill] sm:$0xff] }
 0x63e   : > { %v10025_v51 = vpop.permute.xlu0 %4945  ;;  %v5337_v58 = vsel %vm11385_vm12, %v5336_v4, %v5332_v53  ;;  %v4877_v55 = vpop.permute.xlu1 %4876  ;;  %v5184_v35 = vsel %vm2254_vm10, %v5183_v22, %v5179_v39  ;;  %v5203_v44 = vrot.slane %v9856_v20, %v7914_v61  ;;  %v5356_v17 = vrot.slane %v9895_v31, %v7891_v25  ;;  %vm11391_vm12 = vmmov %vm11389_vm6  ;;  %v11393_v4 = vld [vmem:[#allocation74_spill] sm:$0xff] }
 0x63f   : > { %v5341_v45 = vrot.slane %v4877_v55, %v11151_v33  ;;  %5068 = vperm.xlu1 %6237, %v4600_v63   ;;  %v5189_v29 = vsel %vm11391_vm12, %v5188_v6, %v5184_v35  ;;  %v4610_v59 = vmul.f32 %v9880_v27, %v11393_v4  ;;  %v5366_v55 = vrot.slane %v9906_v43, %v7939_v18 }
 0x640   : > { %v5194_v50 = vsel %vm11394_vm11, %v5193_v42, %v5189_v29  ;;  %v4612_v22 = vmul.f32 %v9880_v27, %v11395_v38  ;;  %vm11402_vm9 = vcmask 458112   ;;  %vm11403_vm12 = vcmask 523712  }
 0x641   : > { %v5342_v34 = vsel %vm2254_vm10, %v5341_v45, %v5337_v58  ;;  %v5199_v9 = vsel %vm2275_vm13, %v5198_v57, %v5194_v50  ;;  %v5213_v58 = vrot.slane %v9864_v32, %v11169_v28  ;;  %v5376_v57 = vrot.slane %v9917_v23, %v11140_v52 }
 0x642   : > { %v10044_v26 = vpop.permute.xlu0 %4951  ;;  %v5347_v2 = vsel %vm11389_vm6, %v5346_v56, %v5342_v34  ;;  %v4883_v1 = vpop.permute.xlu1 %4882  ;;  %v5204_v31 = vsel %vm2282_vm14, %v5203_v44, %v5199_v9  ;;  %vm11396_vm6 = vcmask 1041409   ;;  %v11398_v44 = vld [vmem:[#allocation114_spill] sm:$0xff]  ;;  %v5395_v23 = vrot.slane %v9939_v54, %v11145_v46 }
 0x643   : > { %v5351_v5 = vrot.slane %v4883_v1, %v7884_v13  ;;  %5089 = vperm.xlu1 %6237, %v4608_v8   ;;  %v5209_v34 = vsel %vm2289_vm15, %v5208_v0, %v5204_v31  ;;  %v11397_v8 = vld [vmem:[#allocation140_spill] sm:$0xff]  ;;  %v11401_v0 = vld [vmem:[#allocation121_spill] sm:$0xff]  ;;  %vm11407_vm11 = vcmask 720512  }
 0x644   : > { %v5214_v43 = vsel %vm2296_vm0, %v5213_v58, %v5209_v34  ;;  %v4614_v42 = vmul.f32 %v9880_v27, %v11397_v8  ;;  %v5405_v58 = vrot.slane %v9950_v40, %v11147_v21  ;;  %v4603_v54 = vmul.f32 %v9825_v3, %v11401_v0 }
 0x645   : > { %v5352_v41 = vsel %vm11392_vm1, %v5351_v5, %v5347_v2  ;;  %v5768_v36 = vsel %vm11396_vm6, %v9955_v49, %v5214_v43  ;;  %v5385_v49 = vrot.slane %v9928_v11, %v11141_v19  ;;  %vm11405_vm1 = vcmask 589312  }
 0x646   : > { %v10061_v53 = vpop.permute.xlu0 %4957  ;;  %v5357_v14 = vsel %vm2275_vm13, %v5356_v17, %v5352_v41  ;;  %v4889_v63 = vpop.permute.xlu1 %4888  ;;  %v4616_v17 = vmul.f32 %v9880_v27, %v11398_v44  ;;  %vm11408_vm6 = vcmask 786112  }
 0x647   : > { %v5361_v20 = vrot.slane %v4889_v63, %v7914_v61  ;;  %5095 = vperm.xlu1 %6237, %v4610_v59  }
 0x649   : > { %v5362_v45 = vsel %vm2282_vm14, %v5361_v20, %v5357_v14  ;;  %v11399_v14 = vld [vmem:[#allocation146_spill] sm:$0xff] }
 0x64a   : > { %v10076_v56 = vpop.permute.xlu0 %4963  ;;  %v5367_v62 = vsel %vm2289_vm15, %v5366_v55, %v5362_v45  ;;  %v4895_v6 = vpop.permute.xlu1 %4894  ;;  %v4602_v11 = vmul.f32 %v9825_v3, %v11399_v14  ;;  %v5445_v14 = vrot.slane %v10008_v16, %v7939_v18  ;;  %v5455_v16 = vrot.slane %v10025_v51, %v11140_v52 }
 0x64b   : > { %v5371_v32 = vrot.slane %v4895_v6, %v11169_v28  ;;  %5101 = vperm.xlu1 %6237, %v4612_v22   ;;  %v5415_v6 = vrot.slane %v9961_v7, %v11149_v48 }
 0x64d   : > { %v5372_v12 = vsel %vm2296_vm0, %v5371_v32, %v5367_v62  ;;  %v11404_v32 = vld [vmem:[#allocation148_spill] sm:$0xff] }
 0x64e   : > { %v10088_v2 = vsel %vm2853_vm7, %v5372_v12, %v5768_v36  ;;  %v10090_v1 = vpop.permute.xlu0 %4969  ;;  %v4901_v39 = vpop.permute.xlu1 %4900  ;;  %vm11400_vm7 = vcmask 392512   ;;  %v4604_v40 = vmul.f32 %v9825_v3, %v11404_v32 }
 0x64f   : > { %v5380_v5 = vrot.slane %v4901_v39, %v11139_v37  ;;  %5107 = vperm.xlu1 %6237, %v4614_v42   ;;  %v5425_v42 = vrot.slane %v9973_v30, %v11155_v24 }
 0x651   : > { %v5381_v35 = vsel %vm2198_vm2, %v5380_v5, %v5376_v57  ;;  %v11406_v57 = vld [vmem:[#allocation118_spill] sm:$0xff] }
 0x652   : > { %v10100_v29 = vpop.permute.xlu0 %4975  ;;  %v5386_v41 = vsel %vm2205_vm3, %v5385_v49, %v5381_v35  ;;  %v4907_v4 = vpop.permute.xlu1 %4906  ;;  %v4605_v7 = vmul.f32 %v9825_v3, %v11406_v57 }
 0x653   : > { %v5390_v59 = vrot.slane %v4907_v4, %v11143_v60  ;;  %5113 = vperm.xlu1 %6237, %v4616_v17   ;;  %v5435_v17 = vrot.slane %v9986_v47, %v7891_v25  ;;  %v11409_v4 = vld [vmem:[#allocation151_spill] sm:$0xff] }
 0x654   : > { %v4606_v30 = vmul.f32 %v9825_v3, %v11409_v4 }
 0x655   : > { %v5391_v50 = vsel %vm2212_vm4, %v5390_v59, %v5386_v41 }
 0x656   : > { %v10109_v63 = vpop.permute.xlu0 %4981  ;;  %v5396_v9 = vsel %vm2219_vm5, %v5395_v23, %v5391_v50  ;;  %v4913_v20 = vpop.permute.xlu1 %4912 }
 0x657   : > { %v5400_v31 = vrot.slane %v4913_v20, %v11146_v10  ;;  %5074 = vperm.xlu1 %6237, %v4602_v11   ;;  %v11410_v20 = vld [vmem:[#allocation170_spill] sm:$0xff] }
 0x658   : > { %v4623_v47 = vmul.f32 %v9880_v27, %v11410_v20  ;;  %v5464_v27 = vrot.slane %v10044_v26, %v11141_v19  ;;  %v5484_v26 = vrot.slane %v10076_v56, %v11147_v21  ;;  %v5504_v56 = vrot.slane %v10100_v29, %v11155_v24 }
 0x659   : > { %v5401_v55 = vsel %vm11400_vm7, %v5400_v31, %v5396_v9 }
 0x65a   : > { %v10118_v45 = vpop.permute.xlu0 %4987  ;;  %v5406_v38 = vsel %vm11402_vm9, %v5405_v58, %v5401_v55  ;;  %v4919_v22 = vpop.permute.xlu1 %4918 }
 0x65b   : > { %v5410_v62 = vrot.slane %v4919_v22, %v11148_v15  ;;  %5077 = vperm.xlu1 %6237, %v4603_v54   ;;  %v5524_v29 = vrot.slane %v10118_v45, %v7939_v18 }
 0x65d   : > { %v5411_v34 = vsel %vm11403_vm12, %v5410_v62, %v5406_v38 }
 0x65e   : > { %v10127_v43 = vpop.permute.xlu0 %4993  ;;  %v5416_v36 = vsel %vm11405_vm1, %v5415_v6, %v5411_v34  ;;  %v4925_v12 = vpop.permute.xlu1 %4924 }
 0x65f   : > { %v5420_v8 = vrot.slane %v4925_v12, %v11151_v33  ;;  %5080 = vperm.xlu1 %6237, %v4604_v40  }
 0x661   : > { %v5421_v39 = vsel %vm2254_vm10, %v5420_v8, %v5416_v36 }
 0x662   : > { %v5426_v5 = vsel %vm11407_vm11, %v5425_v42, %v5421_v39  ;;  %v4931_v49 = vpop.permute.xlu1 %4930  ;;  %v10137_v35 = vpop.permute.xlu0 %4999 }
 0x663   : > { %v5430_v44 = vrot.slane %v4931_v49, %v7884_v13  ;;  %5083 = vperm.xlu1 %6237, %v4605_v7   ;;  %v5543_v45 = vrot.slane %v10137_v35, %v11141_v19 }
 0x665   : > { %v5431_v41 = vsel %vm11408_vm6, %v5430_v44, %v5426_v5 }
 0x666   : > { %v5436_v59 = vsel %vm2275_vm13, %v5435_v17, %v5431_v41  ;;  %v4937_v23 = vpop.permute.xlu1 %4936  ;;  %v10149_v11 = vpop.permute.xlu0 %5005 }
 0x667   : > { %v5440_v50 = vrot.slane %v4937_v23, %v7914_v61  ;;  %5086 = vperm.xlu1 %6237, %v4606_v30  }
 0x669   : > { %v5441_v9 = vsel %vm2282_vm14, %v5440_v50, %v5436_v59 }
 0x66a   : > { %v5446_v31 = vsel %vm2289_vm15, %v5445_v14, %v5441_v9  ;;  %v4943_v58 = vpop.permute.xlu1 %4942  ;;  %v10161_v38 = vpop.permute.xlu0 %5011 }
 0x66b   : > { %v5450_v3 = vrot.slane %v4943_v58, %v11169_v28  ;;  %5134 = vperm.xlu1 %6237, %v4623_v47   ;;  %v5563_v35 = vrot.slane %v10161_v38, %v11147_v21 }
 0x66d   : > { %v5451_v55 = vsel %vm2296_vm0, %v5450_v3, %v5446_v31 }
 0x66e   : > { %v5770_v0 = vsel %vm2855_vm8, %v5451_v55, %v10088_v2  ;;  %v4949_v54 = vpop.permute.xlu1 %4948  ;;  %v5474_v2 = vrot.slane %v10061_v53, %v11145_v46  ;;  %v5018_v40 = vpop.permute.xlu0 %5017  ;;  %vm11411_vm8 = vmmov %vm11400_vm7  ;;  %v5494_v53 = vrot.slane %v10090_v1, %v11149_v48  ;;  %v5514_v1 = vrot.slane %v10109_v63, %v7891_v25 }
 0x66f   : > { %v5459_v22 = vrot.slane %v4949_v54, %v11139_v37  ;;  %vm11412_vm7 = vmmov %vm11402_vm9 }
 0x670   : > { %vm11413_vm9 = vmmov %vm11403_vm12 }
 0x671   : > { %v5460_v62 = vsel %vm2198_vm2, %v5459_v22, %v5455_v16  ;;  %vm11414_vm12 = vmmov %vm11405_vm1 }
 0x672   : > { %v5465_v6 = vsel %vm2205_vm3, %v5464_v27, %v5460_v62  ;;  %v4955_v34 = vpop.permute.xlu1 %4954  ;;  %v5024_v7 = vpop.permute.xlu0 %5023  ;;  %vm11415_vm1 = vmmov %vm11407_vm11  ;;  %v5534_v62 = vrot.slane %v10127_v43, %v11140_v52 }
 0x673   : > { %v5469_v32 = vrot.slane %v4955_v34, %v11143_v60  ;;  %vm11416_vm11 = vmmov %vm11408_vm6  ;;  %vm11417_vm6 = vcmask 1044484  }
 0x675   : > { %v5470_v51 = vsel %vm2212_vm4, %v5469_v32, %v5465_v6 }
 0x676   : > { %v5475_v36 = vsel %vm2219_vm5, %v5474_v2, %v5470_v51  ;;  %v4961_v12 = vpop.permute.xlu1 %4960  ;;  %v5030_v4 = vpop.permute.xlu0 %5029 }
 0x677   : > { %v5479_v8 = vrot.slane %v4961_v12, %v11146_v10 }
 0x679   : > { %v5480_v42 = vsel %vm11411_vm8, %v5479_v8, %v5475_v36 }
 0x67a   : > { %v5485_v39 = vsel %vm11412_vm7, %v5484_v26, %v5480_v42  ;;  %v4967_v57 = vpop.permute.xlu1 %4966  ;;  %v5036_v47 = vpop.permute.xlu0 %5035 }
 0x67b   : > { %v5489_v5 = vrot.slane %v4967_v57, %v11148_v15 }
 0x67d   : > { %v5490_v49 = vsel %vm11413_vm9, %v5489_v5, %v5485_v39 }
 0x67e   : > { %v5495_v44 = vsel %vm11414_vm12, %v5494_v53, %v5490_v49  ;;  %v4973_v17 = vpop.permute.xlu1 %4972  ;;  %v10199_v16 = vpop.permute.xlu0 %5041 }
 0x67f   : > { %v5499_v41 = vrot.slane %v4973_v17, %v11151_v33 }
 0x681   : > { %v5500_v30 = vsel %vm2254_vm10, %v5499_v41, %v5495_v44 }
 0x682   : > { %v5505_v59 = vsel %vm11415_vm1, %v5504_v56, %v5500_v30  ;;  %v4979_v23 = vpop.permute.xlu1 %4978  ;;  %v10210_v51 = vpop.permute.xlu0 %5047  ;;  %v5583_v56 = vrot.slane %v5024_v7, %v11155_v24 }
 0x683   : > { %v5509_v50 = vrot.slane %v4979_v23, %v7884_v13 }
 0x685   : > { %v5510_v14 = vsel %vm11416_vm11, %v5509_v50, %v5505_v59 }
 0x686   : > { %v5515_v9 = vsel %vm2275_vm13, %v5514_v1, %v5510_v14  ;;  %v4985_v20 = vpop.permute.xlu1 %4984  ;;  %v10220_v42 = vpop.permute.xlu0 %5053 }
 0x687   : > { %v5519_v31 = vrot.slane %v4985_v20, %v7914_v61 }
 0x689   : > { %v5520_v58 = vsel %vm2282_vm14, %v5519_v31, %v5515_v9 }
 0x68a   : > { %v5525_v3 = vsel %vm2289_vm15, %v5524_v29, %v5520_v58  ;;  %v4991_v55 = vpop.permute.xlu1 %4990  ;;  %v10228_v41 = vpop.permute.xlu0 %5059  ;;  %v5603_v29 = vrot.slane %v5036_v47, %v7939_v18 }
 0x68b   : > { %v5529_v54 = vrot.slane %v4991_v55, %v11169_v28 }
 0x68d   : > { %v5530_v63 = vsel %vm2296_vm0, %v5529_v54, %v5525_v3 }
 0x68e   : > { %v5771_v22 = vsel %vm11417_vm6, %v5530_v63, %v5770_v0  ;;  %v4997_v27 = vpop.permute.xlu1 %4996  ;;  %v5553_v0 = vrot.slane %v10149_v11, %v11145_v46  ;;  %v5573_v11 = vrot.slane %v5018_v40, %v11149_v48  ;;  %v5593_v40 = vrot.slane %v5030_v4, %v7891_v25  ;;  %v10236_v1 = vpop.permute.xlu0 %5065 }
 0x68f   : > { %v5538_v6 = vrot.slane %v4997_v27, %v11139_v37  ;;  %vm11418_vm6 = vcmask 1045509  }
 0x691   : > { %v5539_v34 = vsel %vm2198_vm2, %v5538_v6, %v5534_v62 }
 0x692   : > { %v5544_v32 = vsel %vm2205_vm3, %v5543_v45, %v5539_v34  ;;  %v5003_v2 = vpop.permute.xlu1 %5002  ;;  %v10243_v3 = vpop.permute.xlu0 %5071 }
 0x693   : > { %v5548_v36 = vrot.slane %v5003_v2, %v11143_v60 }
 0x695   : > { %v5549_v12 = vsel %vm2212_vm4, %v5548_v36, %v5544_v32 }
 0x696   : > { %v5554_v43 = vsel %vm2219_vm5, %v5553_v0, %v5549_v12  ;;  %v5009_v8 = vpop.permute.xlu1 %5008  ;;  %v5093_v62 = vpop.permute.xlu0 %5092 }
 0x697   : > { %v5558_v26 = vrot.slane %v5009_v8, %v11146_v10 }
 0x699   : > { %v5559_v39 = vsel %vm11411_vm8, %v5558_v26, %v5554_v43 }
 0x69a   : > { %v5564_v57 = vsel %vm11412_vm7, %v5563_v35, %v5559_v39  ;;  %v5015_v5 = vpop.permute.xlu1 %5014  ;;  %v5099_v34 = vpop.permute.xlu0 %5098 }
 0x69b   : > { %v5568_v53 = vrot.slane %v5015_v5, %v11148_v15 }
 0x69d   : > { %v5569_v49 = vsel %vm11413_vm9, %v5568_v53, %v5564_v57 }
 0x69e   : > { %v5574_v44 = vsel %vm11414_vm12, %v5573_v11, %v5569_v49  ;;  %v5021_v17 = vpop.permute.xlu1 %5020  ;;  %v5105_v2 = vpop.permute.xlu0 %5104  ;;  %v5706_v49 = vrot.slane %v5099_v34, %v11143_v60 }
 0x69f   : > { %v5578_v38 = vrot.slane %v5021_v17, %v11151_v33  ;;  %v5613_v17 = vrot.slane %v10199_v16, %v11140_v52 }
 0x6a1   : > { %v5579_v30 = vsel %vm2254_vm10, %v5578_v38, %v5574_v44 }
 0x6a2   : > { %v5584_v59 = vsel %vm11415_vm1, %v5583_v56, %v5579_v30  ;;  %v5027_v23 = vpop.permute.xlu1 %5026  ;;  %v5111_v0 = vpop.permute.xlu0 %5110 }
 0x6a3   : > { %v5588_v50 = vrot.slane %v5027_v23, %v7884_v13 }
 0x6a5   : > { %v5589_v14 = vsel %vm11416_vm11, %v5588_v50, %v5584_v59  ;;  %v5622_v50 = vrot.slane %v10210_v51, %v11141_v19 }
 0x6a6   : > { %v5594_v9 = vsel %vm2275_vm13, %v5593_v40, %v5589_v14  ;;  %v5033_v20 = vpop.permute.xlu1 %5032  ;;  %v5117_v43 = vpop.permute.xlu0 %5116  ;;  %v5716_v40 = vrot.slane %v5105_v2, %v11146_v10  ;;  %v5652_v2 = vrot.slane %v10236_v1, %v11149_v48 }
 0x6a7   : > { %v5598_v31 = vrot.slane %v5033_v20, %v7914_v61 }
 0x6a9   : > { %v5599_v7 = vsel %vm2282_vm14, %v5598_v31, %v5594_v9 }
 0x6aa   : > { %v5039_v58 = vpop.permute.xlu1 %5038  ;;  %v5604_v4 = vsel %vm2289_vm15, %v5603_v29, %v5599_v7  ;;  %v5120_v44 = vpop.permute.xlu0 %5119  ;;  %v5632_v29 = vrot.slane %v10220_v42, %v11145_v46 }
 0x6ab   : > { %v5608_v55 = vrot.slane %v5039_v58, %v11169_v28 }
 0x6ad   : > { %v5609_v54 = vsel %vm2296_vm0, %v5608_v55, %v5604_v4 }
 0x6ae   : > { %v10249_v63 = vsel %vm11418_vm6, %v5609_v54, %v5771_v22  ;;  %v5045_v27 = vpop.permute.xlu1 %5044  ;;  %v5696_v22 = vrot.slane %v5093_v62, %v11139_v37  ;;  %v5123_v14 = vpop.permute.xlu0 %5122  ;;  %v5736_v62 = vrot.slane %v5117_v43, %v11151_v33 }
 0x6af   : > { %v5617_v57 = vrot.slane %v5045_v27, %v11139_v37  ;;  %v5642_v27 = vrot.slane %v10228_v41, %v11147_v21  ;;  %v5746_v41 = vrot.slane %v5123_v14, %v7884_v13 }
 0x6b1   : > { %v5618_v56 = vsel %vm2198_vm2, %v5617_v57, %v5613_v17 }
 0x6b2   : > { %v5051_v6 = vpop.permute.xlu1 %5050  ;;  %v5623_v9 = vsel %vm2205_vm3, %v5622_v50, %v5618_v56 }
 0x6b3   : > { %v5627_v30 = vrot.slane %v5051_v6, %v11143_v60 }
 0x6b5   : > { %v5628_v16 = vsel %vm2212_vm4, %v5627_v30, %v5623_v9 }
 0x6b6   : > { %v5057_v45 = vpop.permute.xlu1 %5056  ;;  %v5633_v51 = vsel %vm2219_vm5, %v5632_v29, %v5628_v16 }
 0x6b7   : > { %v5637_v20 = vrot.slane %v5057_v45, %v11146_v10  ;;  %v5741_v45 = vrot.slane %v5120_v44, %v11155_v24 }
 0x6ba   : > { %v5063_v32 = vpop.permute.xlu1 %5062 }
 0x6bb   : > { %v5647_v4 = vrot.slane %v5063_v32, %v11148_v15 }
 0x6be   : > { %v5069_v47 = vpop.permute.xlu1 %5068 }
 0x6c2   : > { %v5090_v36 = vpop.permute.xlu1 %5089 }
 0x6c3   : > { %v5692_v8 = vrot.slane %v5090_v36, %v11140_v52 }
 0x6c5   : > { %v5697_v39 = vsel %vm2198_vm2, %v5696_v22, %v5692_v8  ;;  %vm11419_vm2 = vmmov %vm11412_vm7 }
 0x6c6   : > { %v5096_v12 = vpop.permute.xlu1 %5095  ;;  %vm11420_vm7 = vmmov %vm11413_vm9 }
 0x6c7   : > { %v5701_v26 = vrot.slane %v5096_v12, %v11141_v19  ;;  %v5726_v19 = vrot.slane %v5111_v0, %v11148_v15  ;;  %vm11423_vm9 = vmmov %vm11419_vm2  ;;  %v5657_v15 = vrot.slane %v5069_v47, %v11151_v33  ;;  %v5662_v33 = vrot.slane %v10243_v3, %v11155_v24 }
 0x6c9   : > { %v5702_v5 = vsel %vm2205_vm3, %v5701_v26, %v5697_v39  ;;  %vm11421_vm3 = vmmov %vm11411_vm8 }
 0x6ca   : > { %v5102_v35 = vpop.permute.xlu1 %5101  ;;  %v5707_v38 = vsel %vm2212_vm4, %v5706_v49, %v5702_v5  ;;  %v5638_v55 = vsel %vm11421_vm3, %v5637_v20, %v5633_v51  ;;  %vm11422_vm4 = vmmov %vm11414_vm12 }
 0x6cb   : > { %v5711_v53 = vrot.slane %v5102_v35, %v11145_v46  ;;  %v5126_v46 = vpop.permute.xlu0 %5125  ;;  %v5643_v42 = vsel %vm11423_vm9, %v5642_v27, %v5638_v55  ;;  %vm11425_vm12 = vmmov %vm11415_vm1 }
 0x6cc   : > { %vm11426_vm1 = vmmov %vm11422_vm4  ;;  %v5751_v1 = vrot.slane %v5126_v46, %v7891_v25 }
 0x6cd   : > { %v5712_v59 = vsel %vm2219_vm5, %v5711_v53, %v5707_v38  ;;  %vm11424_vm5 = vmmov %vm11420_vm7 }
 0x6ce   : > { %v5108_v11 = vpop.permute.xlu1 %5107  ;;  %v5717_v52 = vsel %vm11411_vm8, %v5716_v40, %v5712_v59  ;;  %v5648_v34 = vsel %vm11424_vm5, %v5647_v4, %v5643_v42  ;;  %vm11427_vm6 = vmmov %vm11425_vm12 }
 0x6cf   : > { %v5721_v37 = vrot.slane %v5108_v11, %v11147_v21  ;;  %v5129_v36 = vpop.permute.xlu0 %5128  ;;  %v5653_v0 = vsel %vm11426_vm1, %v5652_v2, %v5648_v34 }
 0x6d0   : > { %v5658_v12 = vsel %vm2254_vm10, %v5657_v15, %v5653_v0  ;;  %v5756_v3 = vrot.slane %v5129_v36, %v7914_v61 }
 0x6d1   : > { %v5722_v60 = vsel %vm11419_vm2, %v5721_v37, %v5717_v52  ;;  %v5663_v35 = vsel %vm11427_vm6, %v5662_v33, %v5658_v12 }
 0x6d2   : > { %v5114_v23 = vpop.permute.xlu1 %5113  ;;  %v5727_v58 = vsel %vm11420_vm7, %v5726_v19, %v5722_v60 }
 0x6d3   : > { %v5731_v31 = vrot.slane %v5114_v23, %v11149_v48  ;;  %v5132_v57 = vpop.permute.xlu0 %5131 }
 0x6d4   : > { %v5761_v44 = vrot.slane %v5132_v57, %v7939_v18 }
 0x6d5   : > { %v5732_v10 = vsel %vm11422_vm4, %v5731_v31, %v5727_v58 }
 0x6d6   : > { %v5075_v7 = vpop.permute.xlu1 %5074  ;;  %v5737_v6 = vsel %vm2254_vm10, %v5736_v62, %v5732_v10  ;;  %vm11428_vm10 = vmmov %vm11416_vm11 }
 0x6d7   : > { %v5742_v21 = vsel %vm11425_vm12, %v5741_v45, %v5737_v6  ;;  %v5667_v43 = vrot.slane %v5075_v7, %v7884_v13 }
 0x6d8   : > { %v5747_v47 = vsel %vm11416_vm11, %v5746_v41, %v5742_v21 }
 0x6d9   : > { %v5668_v13 = vsel %vm11428_vm10, %v5667_v43, %v5663_v35  ;;  %v5752_v24 = vsel %vm2275_vm13, %v5751_v1, %v5747_v47 }
 0x6da   : > { %v5078_v54 = vpop.permute.xlu1 %5077  ;;  %v5757_v49 = vsel %vm2282_vm14, %v5756_v3, %v5752_v24 }
 0x6db   : > { %v5672_v48 = vrot.slane %v5078_v54, %v7891_v25  ;;  %v5762_v56 = vsel %vm2289_vm15, %v5761_v44, %v5757_v49 }
 0x6dd   : > { %v5673_v5 = vsel %vm2275_vm13, %v5672_v48, %v5668_v13  ;;  %vm11429_vm13 = vcmask 1046534  }
 0x6de   : > { %v5081_v32 = vpop.permute.xlu1 %5080 }
 0x6df   : > { %v5677_v26 = vrot.slane %v5081_v32, %v7914_v61 }
 0x6e1   : > { %v5678_v53 = vsel %vm2282_vm14, %v5677_v26, %v5673_v5  ;;  %vm11430_vm14 = vcmask 1047559  }
 0x6e2   : > { %v5084_v8 = vpop.permute.xlu1 %5083 }
 0x6e3   : > { %v5682_v22 = vrot.slane %v5084_v8, %v7939_v18 }
 0x6e5   : > { %v5683_v11 = vsel %vm2289_vm15, %v5682_v22, %v5678_v53 }
 0x6e6   : > { %v5087_v39 = vpop.permute.xlu1 %5086 }
 0x6e7   : > { %v5687_v25 = vrot.slane %v5087_v39, %v11169_v28 }
 0x6e9   : > { %v5688_v17 = vsel %vm2296_vm0, %v5687_v25, %v5683_v11 }
 0x6ea   : > { %v5135_v38 = vpop.permute.xlu1 %5134  ;;  %v5773_v59 = vsel %vm11429_vm13, %v5688_v17, %v10249_v63 }
 0x6eb   : > { %v5766_v61 = vrot.slane %v5135_v38, %v11169_v28 }
 0x6ed   : > { %v5767_v30 = vsel %vm2296_vm0, %v5766_v61, %v5762_v56 }
 0x6ee   : > { %v5774_v18 = vsel %vm11430_vm14, %v5767_v30, %v5773_v59 }
 0x6ef   : > { %5776 = vst [vmem:[%s193_s30] sm:$0xff] %v5774_v18 }
 0x6f0   : > { %6592 = shalt.err (!%p6589_p3)
}
 0x6f1   : > { %s6593_s13 = scalar_lea.hbm %s10328_s8, 128  ;;  %s6597_s22 = scalar_lea.hbm %s10377_s4, 256 }
 0x6f2   : > { %p6594_p4 = scmp.ne.s32.totalorder %s10328_s8, %s6593_s13  ;;  %p6598_p9 = scmp.lt.u32.totalorder %s10328_s8, %s10377_s4 }
 0x6f3   : > { %p6599_p10 = scmp.lt.u32.totalorder %s6597_s22, %s6593_s13  ;;  %p6601_p12 = scmp.lt.u32.totalorder %s6593_s13, %s10328_s8 }
 0x6f4   : > { %p6595_p7 = pnand %p6594_p4, %p6708_p5 }
 0x6f5   : > { %p6600_p11 = por %p6599_p10, %p6598_p9 }
 0x6f6   : > { %p6596_p8 = pneg %p6595_p7 }
 0x6f7   : > { %p6602_p13 = por %p6601_p12, %p6600_p11 }
 0x6f9   : > { %p6603_p0 = pnand %p6602_p13, %p6596_p8 }
 0x6fb   : > { %6606 = shalt.err (!%p6603_p0)
}
 0x6fc   : > { %6197 = dma.vmem_to_hbm [thread:$0]  (%p6708_p5), %s10330_s5, 128, %s10328_s8, %s5778_s19  }
 0x6fd PF: > { %p6203_p1 = scmp.ge.s32.totalorder %s6641_s18, 2  ;;  %s5803_s28 = sand.u32 1, %s6629_s15  }
 0x6fe   : > { %s5804_s29 = scalar_lea.sflag [#allocation3], %s5803_s28 }
 0x6ff   : > { %p6200_p2 = pnand %p6203_p1, %p6712_p6 }
 0x701   : > { %6624 = dma.done.wait (!%p6200_p2), %s5804_s29, 128  }
 0x702   : > { %6626 = vsyncadd (!%p6200_p2), %s5804_s29, 4294967168  ;;  %p14_p3 = scmp.ge.s32.totalorder %s6695_s21, 4   ;;  %s11431_s15 = smov %s6633_s16 }
 0x703   : > { %s11432_s16 = smov %s6637_s17  ;;  %s11433_s17 = smov %s6706_s24 }
 0x704   : > { %s11434_s18 = smov %s6695_s21  ;;  %16 = sbr.rel (!%p14_p3) target bundleno = 3 (0x3), region = 71 }
 0x70b   :  { %5809 = vsyncpa [#allocation3], 1 }
 0x70c   :  { %5811 = vsyncpa [#allocation3 + $0x1], 1 }

</bundles_post_ra>
